<compile_context>
chip_gen: v7x
topology: tpu7x:2x2x1
jax: 0.10.0
libtpu: 0.0.40
codegen_flags: <defaults>
</compile_context>

<pallas_src>
import numpy as np

import jax
import jax.numpy as jnp
from jax.experimental import pallas as pl
from jax.experimental.pallas import tpu as pltpu


def har_gru_kernel(x_ref, w_ih_ref, w_hh_ref, bpre_ref, bhn_ref,
                   w_lnr_ref, b_lnr_ref, out_ref,
                   gx_a_ref, gx_b_ref):
    """Whole forward pass (3 stacked GRU layers + last-step Linear) in one kernel.

    gx_a_ref / gx_b_ref: (T*Bp, 3*128) f32 ping-pong scratch holding a layer's
    precomputed input-to-hidden gates (b_ih and the r/z recurrent biases folded in).
    """
    TB, GW = gx_a_ref.shape
    _, Bp, HP = bhn_ref.shape           # (num_layers, padded batch, 128)
    T = TB // Bp

    def sigmoid(v):
        # tanh form: one EUP op + two trivial VPU ops (shorter than exp+divide).
        return 0.5 * jnp.tanh(0.5 * v) + 0.5

    # Layer 0: batched input->hidden projection for ALL timesteps (off the
    # serial recurrence path).  x and w_ih are bf16; accumulate in f32.
    gx_a_ref[...] = (
        jnp.dot(x_ref[...], w_ih_ref[0], preferred_element_type=jnp.float32)
        + bpre_ref[0])

    def run_layer(l, gx_in_ref, gx_out_ref):
        """One GRU layer, fully unrolled over T steps.

        When gx_out_ref is given, the NEXT layer's input projection for step t
        is issued right after h_t is produced, so that MXU work overlaps with
        this layer's gate math instead of being serialized between layers.
        """
        b_hn = bhn_ref[l]                                   # (Bp, HP), 1 vreg
        h = jnp.zeros((Bp, HP), jnp.float32)
        for t in range(T):
            gx_t = gx_in_ref[t * Bp:(t + 1) * Bp, :]        # (Bp, 3*HP) f32
            # w_hh re-read from VMEM each step (cheap) instead of being held
            # live in vregs across the unrolled body.
            gh = jnp.dot(h.astype(jnp.bfloat16), w_hh_ref[l],
                         preferred_element_type=jnp.float32)  # (Bp, 3*HP)
            r = sigmoid(gx_t[:, 0 * HP:1 * HP] + gh[:, 0 * HP:1 * HP])
            z = sigmoid(gx_t[:, 1 * HP:2 * HP] + gh[:, 1 * HP:2 * HP])
            n = jnp.tanh(gx_t[:, 2 * HP:3 * HP]
                         + r * (gh[:, 2 * HP:3 * HP] + b_hn))
            h = n + z * (h - n)                             # == (1-z)*n + z*h
            if gx_out_ref is not None:
                # Next layer's input gates for this step (fills idle MXU slots;
                # not on the h_{t+1} dependency chain).
                gx_out_ref[t * Bp:(t + 1) * Bp, :] = (
                    jnp.dot(h.astype(jnp.bfloat16), w_ih_ref[l + 1],
                            preferred_element_type=jnp.float32)
                    + bpre_ref[l + 1])
        return h

    run_layer(0, gx_a_ref, gx_b_ref)
    run_layer(1, gx_b_ref, gx_a_ref)
    h_last = run_layer(2, gx_a_ref, None)

    # Linear head on the last time step of the top layer -> dense (Bp,128) tile.
    out_ref[...] = (
        jnp.dot(h_last.astype(jnp.bfloat16), w_lnr_ref[...],
                preferred_element_type=jnp.float32) + b_lnr_ref[...])


def pack_params(params, *, input_size, hidden_size, num_classes, Bp=8, HP=128):
    """One-time host-side packing of PyTorch-shaped GRU+Linear params.

    Layout: each gate (r,z,n) occupies its own 128-lane block -> GW = 3*128.
    Weights are stored bf16 (f32 accumulation in-kernel); biases stay f32.
    """
    H = hidden_size
    GW = 3 * HP
    assert input_size <= HP, "input_size must be <= 128"
    assert H <= HP, "hidden_size must be <= 128"
    assert num_classes <= HP, "num_classes must be <= 128"

    def pack_w(w, rows):
        # (3H, rows) PyTorch weight -> (HP, GW): transposed, gate g at lanes g*128.
        w = np.asarray(w, np.float32)
        out = np.zeros((HP, GW), np.float32)
        for g in range(3):
            out[:rows, g * HP:g * HP + H] = w[g * H:(g + 1) * H, :].T
        return out

    def pack_bpre(b_ih, b_hh):
        # (1, GW): b_ih for all gates + b_hh folded in for the r and z gates.
        bi = np.asarray(b_ih, np.float32)
        bh = np.asarray(b_hh, np.float32)
        out = np.zeros((1, GW), np.float32)
        for g in range(3):
            v = bi[g * H:(g + 1) * H].copy()
            if g < 2:
                v = v + bh[g * H:(g + 1) * H]
            out[0, g * HP:g * HP + H] = v
        return out

    def pack_bhn(b_hh):
        # (Bp, HP): n-gate recurrent bias, pre-broadcast along sublanes.
        bh = np.asarray(b_hh, np.float32)[2 * H:3 * H]
        out = np.zeros((Bp, HP), np.float32)
        out[:, :H] = bh[None, :]
        return out

    w_ih = np.stack([pack_w(params[f"w_ih_l{l}"], input_size if l == 0 else H)
                     for l in range(3)])
    w_hh = np.stack([pack_w(params[f"w_hh_l{l}"], H) for l in range(3)])
    bpre = np.stack([pack_bpre(params[f"b_ih_l{l}"], params[f"b_hh_l{l}"])
                     for l in range(3)])
    bhn = np.stack([pack_bhn(params[f"b_hh_l{l}"]) for l in range(3)])

    w_lnr = np.zeros((HP, HP), np.float32)
    w_lnr[:H, :num_classes] = np.asarray(params["w_lnr"], np.float32).T
    b_lnr = np.zeros((Bp, HP), np.float32)
    b_lnr[:, :num_classes] = np.asarray(params["b_lnr"], np.float32)[None, :]

    return dict(
        w_ih=jnp.asarray(w_ih, jnp.bfloat16),
        w_hh=jnp.asarray(w_hh, jnp.bfloat16),
        bpre=jnp.asarray(bpre, jnp.float32),
        bhn=jnp.asarray(bhn, jnp.float32),
        w_lnr=jnp.asarray(w_lnr, jnp.bfloat16),
        b_lnr=jnp.asarray(b_lnr, jnp.float32),
    )


def make_har_gru_forward(packed, *, num_classes, Bp=8, HP=128):
    """Returns a jitted forward(x) closing over the pre-packed parameters."""
    C = num_classes
    GW = 3 * HP

    @jax.jit
    def forward(x):
        B, T, I = x.shape
        assert B <= Bp, "batch must be <= 8 (padded sublane group)"
        assert I <= HP, "input feature dim must be <= 128"

        # Time-major, pad batch->Bp and features->HP, flatten to (T*Bp, HP) bf16.
        x_tm = jnp.transpose(x, (1, 0, 2)).astype(jnp.bfloat16)       # (T,B,I)
        x_pad = jnp.zeros((T, Bp, HP), jnp.bfloat16).at[:, :B, :I].set(x_tm)
        x_flat = x_pad.reshape(T * Bp, HP)

        vmem = pl.BlockSpec(memory_space=pltpu.MemorySpace.VMEM)
        out_pad = pl.pallas_call(
            har_gru_kernel,
            out_shape=jax.ShapeDtypeStruct((Bp, HP), jnp.float32),
            in_specs=[vmem] * 7,
            out_specs=vmem,
            scratch_shapes=[pltpu.VMEM((T * Bp, GW), jnp.float32),    # gx ping
                            pltpu.VMEM((T * Bp, GW), jnp.float32)],   # gx pong
        )(x_flat, packed["w_ih"], packed["w_hh"], packed["bpre"],
          packed["bhn"], packed["w_lnr"], packed["b_lnr"])
        return out_pad[:B, :C]

    return forward


def har_gru_reference(x, params):
    """Pure-JAX f32 reference replicating nn.GRU(batch_first=True) + nn.Linear."""
    B, T, _ = x.shape
    seq = x.astype(jnp.float32)
    for l in range(3):
        w_ih, w_hh = params[f"w_ih_l{l}"], params[f"w_hh_l{l}"]
        b_ih, b_hh = params[f"b_ih_l{l}"], params[f"b_hh_l{l}"]
        H = w_hh.shape[1]
        h = jnp.zeros((B, H), jnp.float32)
        outs = []
        for t in range(T):
            gx = seq[:, t, :] @ w_ih.T + b_ih
            gh = h @ w_hh.T + b_hh
            r = jax.nn.sigmoid(gx[:, :H] + gh[:, :H])
            z = jax.nn.sigmoid(gx[:, H:2 * H] + gh[:, H:2 * H])
            n = jnp.tanh(gx[:, 2 * H:] + r * gh[:, 2 * H:])
            h = (1.0 - z) * n + z * h
            outs.append(h)
        seq = jnp.stack(outs, axis=1)
    return seq[:, -1, :] @ params["w_lnr"].T + params["b_lnr"]


def init_params(key, input_size=23, hidden_size=32, num_layers=3, num_classes=12):
    """Deterministic init mimicking PyTorch's U(-1/sqrt(H), 1/sqrt(H))."""
    k = 1.0 / jnp.sqrt(jnp.float32(hidden_size))
    params = {}
    for l in range(num_layers):
        in_sz = input_size if l == 0 else hidden_size
        key, k1, k2, k3, k4 = jax.random.split(key, 5)
        params[f"w_ih_l{l}"] = jax.random.uniform(
            k1, (3 * hidden_size, in_sz), jnp.float32, -k, k)
        params[f"w_hh_l{l}"] = jax.random.uniform(
            k2, (3 * hidden_size, hidden_size), jnp.float32, -k, k)
        params[f"b_ih_l{l}"] = jax.random.uniform(
            k3, (3 * hidden_size,), jnp.float32, -k, k)
        params[f"b_hh_l{l}"] = jax.random.uniform(
            k4, (3 * hidden_size,), jnp.float32, -k, k)
    key, k1, k2 = jax.random.split(key, 3)
    params["w_lnr"] = jax.random.uniform(
        k1, (num_classes, hidden_size), jnp.float32, -k, k)
    params["b_lnr"] = jax.random.uniform(
        k2, (num_classes,), jnp.float32, -k, k)
    return params


if __name__ == "__main__":
    B, T, I, H, C = 2, 8, 23, 32, 12
    key = jax.random.PRNGKey(0)
    key_x, key_p = jax.random.split(key)
    x = jax.random.normal(key_x, (B, T, I), jnp.float32)   # batch_first input
    params = init_params(key_p, input_size=I, hidden_size=H,
                         num_layers=3, num_classes=C)

    packed = pack_params(params, input_size=I, hidden_size=H, num_classes=C)
    forward = make_har_gru_forward(packed, num_classes=C)

    out = jax.block_until_ready(forward(x))
    ref = jax.block_until_ready(har_gru_reference(x, params))

    assert out.shape == (B, C)
    # bf16 MXU operands with f32 accumulation -> looser tolerance than pure f32.
    assert jnp.allclose(out, ref, atol=5e-2, rtol=5e-2), (out, ref)
    print("KERNEL_OK")
</pallas_src>

<mosaic_0001>
module attributes {stable_mosaic.version = 11 : i64} {
  func.func @har_gru_kernel(%arg0: memref<64x128xbf16, #tpu.memory_space<vmem>>, %arg1: memref<3x128x384xbf16, #tpu.memory_space<vmem>>, %arg2: memref<3x128x384xbf16, #tpu.memory_space<vmem>>, %arg3: memref<3x1x384xf32, #tpu.memory_space<vmem>>, %arg4: memref<3x8x128xf32, #tpu.memory_space<vmem>>, %arg5: memref<128x128xbf16, #tpu.memory_space<vmem>>, %arg6: memref<8x128xf32, #tpu.memory_space<vmem>>, %arg7: memref<8x128xf32, #tpu.memory_space<vmem>>, %arg8: memref<64x384xf32, #tpu.memory_space<vmem>>, %arg9: memref<64x384xf32, #tpu.memory_space<vmem>>) attributes {dimension_semantics = [], scalar_prefetch = 0 : i64, scratch_operands = 2 : i64, tpu.core_type = #tpu.core_type<tc>} {
    %c0 = arith.constant 0 : index
    %c0_0 = arith.constant 0 : index
    %0 = vector.load %arg0[%c0, %c0_0] : memref<64x128xbf16, #tpu.memory_space<vmem>>, vector<64x128xbf16>
    %c0_1 = arith.constant 0 : index
    %c0_2 = arith.constant 0 : index
    %c0_3 = arith.constant 0 : index
    %1 = vector.load %arg1[%c0_1, %c0_2, %c0_3] : memref<3x128x384xbf16, #tpu.memory_space<vmem>>, vector<1x128x384xbf16>
    %2 = vector.shape_cast %1 : vector<1x128x384xbf16> to vector<128x384xbf16>
    %cst = arith.constant dense<0.000000e+00> : vector<64x384xf32>
    %3 = tpu.matmul %0, %2, %cst {dimension_numbers = #tpu.dot_dimension_numbers<[1], [0], [0], [1], [0, 0, 1, 1], [], []>} : vector<64x128xbf16>, vector<128x384xbf16>, vector<64x384xf32> -> vector<64x384xf32>
    %c0_4 = arith.constant 0 : index
    %c0_5 = arith.constant 0 : index
    %c0_6 = arith.constant 0 : index
    %4 = vector.load %arg3[%c0_4, %c0_5, %c0_6] : memref<3x1x384xf32, #tpu.memory_space<vmem>>, vector<1x1x384xf32>
    %5 = vector.shape_cast %4 : vector<1x1x384xf32> to vector<1x384xf32>
    %6 = vector.broadcast %5 : vector<1x384xf32> to vector<64x384xf32>
    %7 = arith.addf %3, %6 : vector<64x384xf32>
    %c0_7 = arith.constant 0 : index
    %c0_8 = arith.constant 0 : index
    %8 = vector.load %arg8[%c0_7, %c0_8] : memref<64x384xf32, #tpu.memory_space<vmem>>, vector<64x384xf32>
    tpu.vector_store %arg8[%c0_7, %c0_8], %7 {strides = array<i32>} : memref<64x384xf32, #tpu.memory_space<vmem>>, vector<64x384xf32>,
    %c0_9 = arith.constant 0 : index
    %c0_10 = arith.constant 0 : index
    %c0_11 = arith.constant 0 : index
    %9 = vector.load %arg4[%c0_9, %c0_10, %c0_11] : memref<3x8x128xf32, #tpu.memory_space<vmem>>, vector<1x8x128xf32>
    %10 = vector.shape_cast %9 : vector<1x8x128xf32> to vector<8x128xf32>
    %cst_12 = arith.constant 0.000000e+00 : f32
    %11 = vector.broadcast %cst_12 : f32 to vector<8x128xf32>
    %c0_13 = arith.constant 0 : index
    %c0_14 = arith.constant 0 : index
    %12 = vector.load %arg8[%c0_13, %c0_14] : memref<64x384xf32, #tpu.memory_space<vmem>>, vector<8x384xf32>
    %13 = arith.truncf %11 : vector<8x128xf32> to vector<8x128xbf16>
    %c0_15 = arith.constant 0 : index
    %c0_16 = arith.constant 0 : index
    %c0_17 = arith.constant 0 : index
    %14 = vector.load %arg2[%c0_15, %c0_16, %c0_17] : memref<3x128x384xbf16, #tpu.memory_space<vmem>>, vector<1x128x384xbf16>
    %15 = vector.shape_cast %14 : vector<1x128x384xbf16> to vector<128x384xbf16>
    %cst_18 = arith.constant dense<0.000000e+00> : vector<8x384xf32>
    %16 = tpu.matmul %13, %15, %cst_18 {dimension_numbers = #tpu.dot_dimension_numbers<[1], [0], [0], [1], [0, 0, 1, 1], [], []>} : vector<8x128xbf16>, vector<128x384xbf16>, vector<8x384xf32> -> vector<8x384xf32>
    %17 = vector.extract_strided_slice %12 {offsets = [0, 0], sizes = [8, 128], strides = [1, 1]} : vector<8x384xf32> to vector<8x128xf32>
    %18 = vector.extract_strided_slice %16 {offsets = [0, 0], sizes = [8, 128], strides = [1, 1]} : vector<8x384xf32> to vector<8x128xf32>
    %19 = arith.addf %17, %18 : vector<8x128xf32>
    %cst_19 = arith.constant 5.000000e-01 : f32
    %20 = vector.broadcast %cst_19 : f32 to vector<8x128xf32>
    %21 = arith.mulf %20, %19 : vector<8x128xf32>
    %22 = math.tanh %21 : vector<8x128xf32>
    %cst_20 = arith.constant 5.000000e-01 : f32
    %23 = vector.broadcast %cst_20 : f32 to vector<8x128xf32>
    %24 = arith.mulf %23, %22 : vector<8x128xf32>
    %cst_21 = arith.constant 5.000000e-01 : f32
    %25 = vector.broadcast %cst_21 : f32 to vector<8x128xf32>
    %26 = arith.addf %24, %25 : vector<8x128xf32>
    %27 = vector.extract_strided_slice %12 {offsets = [0, 128], sizes = [8, 128], strides = [1, 1]} : vector<8x384xf32> to vector<8x128xf32>
    %28 = vector.extract_strided_slice %16 {offsets = [0, 128], sizes = [8, 128], strides = [1, 1]} : vector<8x384xf32> to vector<8x128xf32>
    %29 = arith.addf %27, %28 : vector<8x128xf32>
    %cst_22 = arith.constant 5.000000e-01 : f32
    %30 = vector.broadcast %cst_22 : f32 to vector<8x128xf32>
    %31 = arith.mulf %30, %29 : vector<8x128xf32>
    %32 = math.tanh %31 : vector<8x128xf32>
    %cst_23 = arith.constant 5.000000e-01 : f32
    %33 = vector.broadcast %cst_23 : f32 to vector<8x128xf32>
    %34 = arith.mulf %33, %32 : vector<8x128xf32>
    %cst_24 = arith.constant 5.000000e-01 : f32
    %35 = vector.broadcast %cst_24 : f32 to vector<8x128xf32>
    %36 = arith.addf %34, %35 : vector<8x128xf32>
    %37 = vector.extract_strided_slice %12 {offsets = [0, 256], sizes = [8, 128], strides = [1, 1]} : vector<8x384xf32> to vector<8x128xf32>
    %38 = vector.extract_strided_slice %16 {offsets = [0, 256], sizes = [8, 128], strides = [1, 1]} : vector<8x384xf32> to vector<8x128xf32>
    %39 = arith.addf %38, %10 : vector<8x128xf32>
    %40 = arith.mulf %26, %39 : vector<8x128xf32>
    %41 = arith.addf %37, %40 : vector<8x128xf32>
    %42 = math.tanh %41 : vector<8x128xf32>
    %43 = arith.subf %11, %42 : vector<8x128xf32>
    %44 = arith.mulf %36, %43 : vector<8x128xf32>
    %45 = arith.addf %42, %44 : vector<8x128xf32>
    %46 = arith.truncf %45 : vector<8x128xf32> to vector<8x128xbf16>
    %c1 = arith.constant 1 : index
    %c0_25 = arith.constant 0 : index
    %c0_26 = arith.constant 0 : index
    %47 = vector.load %arg1[%c1, %c0_25, %c0_26] : memref<3x128x384xbf16, #tpu.memory_space<vmem>>, vector<1x128x384xbf16>
    %48 = vector.shape_cast %47 : vector<1x128x384xbf16> to vector<128x384xbf16>
    %cst_27 = arith.constant dense<0.000000e+00> : vector<8x384xf32>
    %49 = tpu.matmul %46, %48, %cst_27 {dimension_numbers = #tpu.dot_dimension_numbers<[1], [0], [0], [1], [0, 0, 1, 1], [], []>} : vector<8x128xbf16>, vector<128x384xbf16>, vector<8x384xf32> -> vector<8x384xf32>
    %c1_28 = arith.constant 1 : index
    %c0_29 = arith.constant 0 : index
    %c0_30 = arith.constant 0 : index
    %50 = vector.load %arg3[%c1_28, %c0_29, %c0_30] : memref<3x1x384xf32, #tpu.memory_space<vmem>>, vector<1x1x384xf32>
    %51 = vector.shape_cast %50 : vector<1x1x384xf32> to vector<1x384xf32>
    %52 = vector.broadcast %51 : vector<1x384xf32> to vector<8x384xf32>
    %53 = arith.addf %49, %52 : vector<8x384xf32>
    %c0_31 = arith.constant 0 : index
    %c0_32 = arith.constant 0 : index
    %54 = vector.load %arg9[%c0_31, %c0_32] : memref<64x384xf32, #tpu.memory_space<vmem>>, vector<8x384xf32>
    tpu.vector_store %arg9[%c0_31, %c0_32], %53 {strides = array<i32>} : memref<64x384xf32, #tpu.memory_space<vmem>>, vector<8x384xf32>,
    %c8 = arith.constant 8 : index
    %c0_33 = arith.constant 0 : index
    %55 = vector.load %arg8[%c8, %c0_33] : memref<64x384xf32, #tpu.memory_space<vmem>>, vector<8x384xf32>
    %56 = arith.truncf %45 : vector<8x128xf32> to vector<8x128xbf16>
    %c0_34 = arith.constant 0 : index
    %c0_35 = arith.constant 0 : index
    %c0_36 = arith.constant 0 : index
    %57 = vector.load %arg2[%c0_34, %c0_35, %c0_36] : memref<3x128x384xbf16, #tpu.memory_space<vmem>>, vector<1x128x384xbf16>
    %58 = vector.shape_cast %57 : vector<1x128x384xbf16> to vector<128x384xbf16>
    %cst_37 = arith.constant dense<0.000000e+00> : vector<8x384xf32>
    %59 = tpu.matmul %56, %58, %cst_37 {dimension_numbers = #tpu.dot_dimension_numbers<[1], [0], [0], [1], [0, 0, 1, 1], [], []>} : vector<8x128xbf16>, vector<128x384xbf16>, vector<8x384xf32> -> vector<8x384xf32>
    %60 = vector.extract_strided_slice %55 {offsets = [0, 0], sizes = [8, 128], strides = [1, 1]} : vector<8x384xf32> to vector<8x128xf32>
    %61 = vector.extract_strided_slice %59 {offsets = [0, 0], sizes = [8, 128], strides = [1, 1]} : vector<8x384xf32> to vector<8x128xf32>
    %62 = arith.addf %60, %61 : vector<8x128xf32>
    %cst_38 = arith.constant 5.000000e-01 : f32
    %63 = vector.broadcast %cst_38 : f32 to vector<8x128xf32>
    %64 = arith.mulf %63, %62 : vector<8x128xf32>
    %65 = math.tanh %64 : vector<8x128xf32>
    %cst_39 = arith.constant 5.000000e-01 : f32
    %66 = vector.broadcast %cst_39 : f32 to vector<8x128xf32>
    %67 = arith.mulf %66, %65 : vector<8x128xf32>
    %cst_40 = arith.constant 5.000000e-01 : f32
    %68 = vector.broadcast %cst_40 : f32 to vector<8x128xf32>
    %69 = arith.addf %67, %68 : vector<8x128xf32>
    %70 = vector.extract_strided_slice %55 {offsets = [0, 128], sizes = [8, 128], strides = [1, 1]} : vector<8x384xf32> to vector<8x128xf32>
    %71 = vector.extract_strided_slice %59 {offsets = [0, 128], sizes = [8, 128], strides = [1, 1]} : vector<8x384xf32> to vector<8x128xf32>
    %72 = arith.addf %70, %71 : vector<8x128xf32>
    %cst_41 = arith.constant 5.000000e-01 : f32
    %73 = vector.broadcast %cst_41 : f32 to vector<8x128xf32>
    %74 = arith.mulf %73, %72 : vector<8x128xf32>
    %75 = math.tanh %74 : vector<8x128xf32>
    %cst_42 = arith.constant 5.000000e-01 : f32
    %76 = vector.broadcast %cst_42 : f32 to vector<8x128xf32>
    %77 = arith.mulf %76, %75 : vector<8x128xf32>
    %cst_43 = arith.constant 5.000000e-01 : f32
    %78 = vector.broadcast %cst_43 : f32 to vector<8x128xf32>
    %79 = arith.addf %77, %78 : vector<8x128xf32>
    %80 = vector.extract_strided_slice %55 {offsets = [0, 256], sizes = [8, 128], strides = [1, 1]} : vector<8x384xf32> to vector<8x128xf32>
    %81 = vector.extract_strided_slice %59 {offsets = [0, 256], sizes = [8, 128], strides = [1, 1]} : vector<8x384xf32> to vector<8x128xf32>
    %82 = arith.addf %81, %10 : vector<8x128xf32>
    %83 = arith.mulf %69, %82 : vector<8x128xf32>
    %84 = arith.addf %80, %83 : vector<8x128xf32>
    %85 = math.tanh %84 : vector<8x128xf32>
    %86 = arith.subf %45, %85 : vector<8x128xf32>
    %87 = arith.mulf %79, %86 : vector<8x128xf32>
    %88 = arith.addf %85, %87 : vector<8x128xf32>
    %89 = arith.truncf %88 : vector<8x128xf32> to vector<8x128xbf16>
    %c1_44 = arith.constant 1 : index
    %c0_45 = arith.constant 0 : index
    %c0_46 = arith.constant 0 : index
    %90 = vector.load %arg1[%c1_44, %c0_45, %c0_46] : memref<3x128x384xbf16, #tpu.memory_space<vmem>>, vector<1x128x384xbf16>
    %91 = vector.shape_cast %90 : vector<1x128x384xbf16> to vector<128x384xbf16>
    %cst_47 = arith.constant dense<0.000000e+00> : vector<8x384xf32>
    %92 = tpu.matmul %89, %91, %cst_47 {dimension_numbers = #tpu.dot_dimension_numbers<[1], [0], [0], [1], [0, 0, 1, 1], [], []>} : vector<8x128xbf16>, vector<128x384xbf16>, vector<8x384xf32> -> vector<8x384xf32>
    %c1_48 = arith.constant 1 : index
    %c0_49 = arith.constant 0 : index
    %c0_50 = arith.constant 0 : index
    %93 = vector.load %arg3[%c1_48, %c0_49, %c0_50] : memref<3x1x384xf32, #tpu.memory_space<vmem>>, vector<1x1x384xf32>
    %94 = vector.shape_cast %93 : vector<1x1x384xf32> to vector<1x384xf32>
    %95 = vector.broadcast %94 : vector<1x384xf32> to vector<8x384xf32>
    %96 = arith.addf %92, %95 : vector<8x384xf32>
    %c8_51 = arith.constant 8 : index
    %c0_52 = arith.constant 0 : index
    %97 = vector.load %arg9[%c8_51, %c0_52] : memref<64x384xf32, #tpu.memory_space<vmem>>, vector<8x384xf32>
    tpu.vector_store %arg9[%c8_51, %c0_52], %96 {strides = array<i32>} : memref<64x384xf32, #tpu.memory_space<vmem>>, vector<8x384xf32>,
    %c16 = arith.constant 16 : index
    %c0_53 = arith.constant 0 : index
    %98 = vector.load %arg8[%c16, %c0_53] : memref<64x384xf32, #tpu.memory_space<vmem>>, vector<8x384xf32>
    %99 = arith.truncf %88 : vector<8x128xf32> to vector<8x128xbf16>
    %c0_54 = arith.constant 0 : index
    %c0_55 = arith.constant 0 : index
    %c0_56 = arith.constant 0 : index
    %100 = vector.load %arg2[%c0_54, %c0_55, %c0_56] : memref<3x128x384xbf16, #tpu.memory_space<vmem>>, vector<1x128x384xbf16>
    %101 = vector.shape_cast %100 : vector<1x128x384xbf16> to vector<128x384xbf16>
    %cst_57 = arith.constant dense<0.000000e+00> : vector<8x384xf32>
    %102 = tpu.matmul %99, %101, %cst_57 {dimension_numbers = #tpu.dot_dimension_numbers<[1], [0], [0], [1], [0, 0, 1, 1], [], []>} : vector<8x128xbf16>, vector<128x384xbf16>, vector<8x384xf32> -> vector<8x384xf32>
    %103 = vector.extract_strided_slice %98 {offsets = [0, 0], sizes = [8, 128], strides = [1, 1]} : vector<8x384xf32> to vector<8x128xf32>
    %104 = vector.extract_strided_slice %102 {offsets = [0, 0], sizes = [8, 128], strides = [1, 1]} : vector<8x384xf32> to vector<8x128xf32>
    %105 = arith.addf %103, %104 : vector<8x128xf32>
    %cst_58 = arith.constant 5.000000e-01 : f32
    %106 = vector.broadcast %cst_58 : f32 to vector<8x128xf32>
    %107 = arith.mulf %106, %105 : vector<8x128xf32>
    %108 = math.tanh %107 : vector<8x128xf32>
    %cst_59 = arith.constant 5.000000e-01 : f32
    %109 = vector.broadcast %cst_59 : f32 to vector<8x128xf32>
    %110 = arith.mulf %109, %108 : vector<8x128xf32>
    %cst_60 = arith.constant 5.000000e-01 : f32
    %111 = vector.broadcast %cst_60 : f32 to vector<8x128xf32>
    %112 = arith.addf %110, %111 : vector<8x128xf32>
    %113 = vector.extract_strided_slice %98 {offsets = [0, 128], sizes = [8, 128], strides = [1, 1]} : vector<8x384xf32> to vector<8x128xf32>
    %114 = vector.extract_strided_slice %102 {offsets = [0, 128], sizes = [8, 128], strides = [1, 1]} : vector<8x384xf32> to vector<8x128xf32>
    %115 = arith.addf %113, %114 : vector<8x128xf32>
    %cst_61 = arith.constant 5.000000e-01 : f32
    %116 = vector.broadcast %cst_61 : f32 to vector<8x128xf32>
    %117 = arith.mulf %116, %115 : vector<8x128xf32>
    %118 = math.tanh %117 : vector<8x128xf32>
    %cst_62 = arith.constant 5.000000e-01 : f32
    %119 = vector.broadcast %cst_62 : f32 to vector<8x128xf32>
    %120 = arith.mulf %119, %118 : vector<8x128xf32>
    %cst_63 = arith.constant 5.000000e-01 : f32
    %121 = vector.broadcast %cst_63 : f32 to vector<8x128xf32>
    %122 = arith.addf %120, %121 : vector<8x128xf32>
    %123 = vector.extract_strided_slice %98 {offsets = [0, 256], sizes = [8, 128], strides = [1, 1]} : vector<8x384xf32> to vector<8x128xf32>
    %124 = vector.extract_strided_slice %102 {offsets = [0, 256], sizes = [8, 128], strides = [1, 1]} : vector<8x384xf32> to vector<8x128xf32>
    %125 = arith.addf %124, %10 : vector<8x128xf32>
    %126 = arith.mulf %112, %125 : vector<8x128xf32>
    %127 = arith.addf %123, %126 : vector<8x128xf32>
    %128 = math.tanh %127 : vector<8x128xf32>
    %129 = arith.subf %88, %128 : vector<8x128xf32>
    %130 = arith.mulf %122, %129 : vector<8x128xf32>
    %131 = arith.addf %128, %130 : vector<8x128xf32>
    %132 = arith.truncf %131 : vector<8x128xf32> to vector<8x128xbf16>
    %c1_64 = arith.constant 1 : index
    %c0_65 = arith.constant 0 : index
    %c0_66 = arith.constant 0 : index
    %133 = vector.load %arg1[%c1_64, %c0_65, %c0_66] : memref<3x128x384xbf16, #tpu.memory_space<vmem>>, vector<1x128x384xbf16>
    %134 = vector.shape_cast %133 : vector<1x128x384xbf16> to vector<128x384xbf16>
    %cst_67 = arith.constant dense<0.000000e+00> : vector<8x384xf32>
    %135 = tpu.matmul %132, %134, %cst_67 {dimension_numbers = #tpu.dot_dimension_numbers<[1], [0], [0], [1], [0, 0, 1, 1], [], []>} : vector<8x128xbf16>, vector<128x384xbf16>, vector<8x384xf32> -> vector<8x384xf32>
    %c1_68 = arith.constant 1 : index
    %c0_69 = arith.constant 0 : index
    %c0_70 = arith.constant 0 : index
    %136 = vector.load %arg3[%c1_68, %c0_69, %c0_70] : memref<3x1x384xf32, #tpu.memory_space<vmem>>, vector<1x1x384xf32>
    %137 = vector.shape_cast %136 : vector<1x1x384xf32> to vector<1x384xf32>
    %138 = vector.broadcast %137 : vector<1x384xf32> to vector<8x384xf32>
    %139 = arith.addf %135, %138 : vector<8x384xf32>
    %c16_71 = arith.constant 16 : index
    %c0_72 = arith.constant 0 : index
    %140 = vector.load %arg9[%c16_71, %c0_72] : memref<64x384xf32, #tpu.memory_space<vmem>>, vector<8x384xf32>
    tpu.vector_store %arg9[%c16_71, %c0_72], %139 {strides = array<i32>} : memref<64x384xf32, #tpu.memory_space<vmem>>, vector<8x384xf32>,
    %c24 = arith.constant 24 : index
    %c0_73 = arith.constant 0 : index
    %141 = vector.load %arg8[%c24, %c0_73] : memref<64x384xf32, #tpu.memory_space<vmem>>, vector<8x384xf32>
    %142 = arith.truncf %131 : vector<8x128xf32> to vector<8x128xbf16>
    %c0_74 = arith.constant 0 : index
    %c0_75 = arith.constant 0 : index
    %c0_76 = arith.constant 0 : index
    %143 = vector.load %arg2[%c0_74, %c0_75, %c0_76] : memref<3x128x384xbf16, #tpu.memory_space<vmem>>, vector<1x128x384xbf16>
    %144 = vector.shape_cast %143 : vector<1x128x384xbf16> to vector<128x384xbf16>
    %cst_77 = arith.constant dense<0.000000e+00> : vector<8x384xf32>
    %145 = tpu.matmul %142, %144, %cst_77 {dimension_numbers = #tpu.dot_dimension_numbers<[1], [0], [0], [1], [0, 0, 1, 1], [], []>} : vector<8x128xbf16>, vector<128x384xbf16>, vector<8x384xf32> -> vector<8x384xf32>
    %146 = vector.extract_strided_slice %141 {offsets = [0, 0], sizes = [8, 128], strides = [1, 1]} : vector<8x384xf32> to vector<8x128xf32>
    %147 = vector.extract_strided_slice %145 {offsets = [0, 0], sizes = [8, 128], strides = [1, 1]} : vector<8x384xf32> to vector<8x128xf32>
    %148 = arith.addf %146, %147 : vector<8x128xf32>
    %cst_78 = arith.constant 5.000000e-01 : f32
    %149 = vector.broadcast %cst_78 : f32 to vector<8x128xf32>
    %150 = arith.mulf %149, %148 : vector<8x128xf32>
    %151 = math.tanh %150 : vector<8x128xf32>
    %cst_79 = arith.constant 5.000000e-01 : f32
    %152 = vector.broadcast %cst_79 : f32 to vector<8x128xf32>
    %153 = arith.mulf %152, %151 : vector<8x128xf32>
    %cst_80 = arith.constant 5.000000e-01 : f32
    %154 = vector.broadcast %cst_80 : f32 to vector<8x128xf32>
    %155 = arith.addf %153, %154 : vector<8x128xf32>
    %156 = vector.extract_strided_slice %141 {offsets = [0, 128], sizes = [8, 128], strides = [1, 1]} : vector<8x384xf32> to vector<8x128xf32>
    %157 = vector.extract_strided_slice %145 {offsets = [0, 128], sizes = [8, 128], strides = [1, 1]} : vector<8x384xf32> to vector<8x128xf32>
    %158 = arith.addf %156, %157 : vector<8x128xf32>
    %cst_81 = arith.constant 5.000000e-01 : f32
    %159 = vector.broadcast %cst_81 : f32 to vector<8x128xf32>
    %160 = arith.mulf %159, %158 : vector<8x128xf32>
    %161 = math.tanh %160 : vector<8x128xf32>
    %cst_82 = arith.constant 5.000000e-01 : f32
    %162 = vector.broadcast %cst_82 : f32 to vector<8x128xf32>
    %163 = arith.mulf %162, %161 : vector<8x128xf32>
    %cst_83 = arith.constant 5.000000e-01 : f32
    %164 = vector.broadcast %cst_83 : f32 to vector<8x128xf32>
    %165 = arith.addf %163, %164 : vector<8x128xf32>
    %166 = vector.extract_strided_slice %141 {offsets = [0, 256], sizes = [8, 128], strides = [1, 1]} : vector<8x384xf32> to vector<8x128xf32>
    %167 = vector.extract_strided_slice %145 {offsets = [0, 256], sizes = [8, 128], strides = [1, 1]} : vector<8x384xf32> to vector<8x128xf32>
    %168 = arith.addf %167, %10 : vector<8x128xf32>
    %169 = arith.mulf %155, %168 : vector<8x128xf32>
    %170 = arith.addf %166, %169 : vector<8x128xf32>
    %171 = math.tanh %170 : vector<8x128xf32>
    %172 = arith.subf %131, %171 : vector<8x128xf32>
    %173 = arith.mulf %165, %172 : vector<8x128xf32>
    %174 = arith.addf %171, %173 : vector<8x128xf32>
    %175 = arith.truncf %174 : vector<8x128xf32> to vector<8x128xbf16>
    %c1_84 = arith.constant 1 : index
    %c0_85 = arith.constant 0 : index
    %c0_86 = arith.constant 0 : index
    %176 = vector.load %arg1[%c1_84, %c0_85, %c0_86] : memref<3x128x384xbf16, #tpu.memory_space<vmem>>, vector<1x128x384xbf16>
    %177 = vector.shape_cast %176 : vector<1x128x384xbf16> to vector<128x384xbf16>
    %cst_87 = arith.constant dense<0.000000e+00> : vector<8x384xf32>
    %178 = tpu.matmul %175, %177, %cst_87 {dimension_numbers = #tpu.dot_dimension_numbers<[1], [0], [0], [1], [0, 0, 1, 1], [], []>} : vector<8x128xbf16>, vector<128x384xbf16>, vector<8x384xf32> -> vector<8x384xf32>
    %c1_88 = arith.constant 1 : index
    %c0_89 = arith.constant 0 : index
    %c0_90 = arith.constant 0 : index
    %179 = vector.load %arg3[%c1_88, %c0_89, %c0_90] : memref<3x1x384xf32, #tpu.memory_space<vmem>>, vector<1x1x384xf32>
    %180 = vector.shape_cast %179 : vector<1x1x384xf32> to vector<1x384xf32>
    %181 = vector.broadcast %180 : vector<1x384xf32> to vector<8x384xf32>
    %182 = arith.addf %178, %181 : vector<8x384xf32>
    %c24_91 = arith.constant 24 : index
    %c0_92 = arith.constant 0 : index
    %183 = vector.load %arg9[%c24_91, %c0_92] : memref<64x384xf32, #tpu.memory_space<vmem>>, vector<8x384xf32>
    tpu.vector_store %arg9[%c24_91, %c0_92], %182 {strides = array<i32>} : memref<64x384xf32, #tpu.memory_space<vmem>>, vector<8x384xf32>,
    %c32 = arith.constant 32 : index
    %c0_93 = arith.constant 0 : index
    %184 = vector.load %arg8[%c32, %c0_93] : memref<64x384xf32, #tpu.memory_space<vmem>>, vector<8x384xf32>
    %185 = arith.truncf %174 : vector<8x128xf32> to vector<8x128xbf16>
    %c0_94 = arith.constant 0 : index
    %c0_95 = arith.constant 0 : index
    %c0_96 = arith.constant 0 : index
    %186 = vector.load %arg2[%c0_94, %c0_95, %c0_96] : memref<3x128x384xbf16, #tpu.memory_space<vmem>>, vector<1x128x384xbf16>
    %187 = vector.shape_cast %186 : vector<1x128x384xbf16> to vector<128x384xbf16>
    %cst_97 = arith.constant dense<0.000000e+00> : vector<8x384xf32>
    %188 = tpu.matmul %185, %187, %cst_97 {dimension_numbers = #tpu.dot_dimension_numbers<[1], [0], [0], [1], [0, 0, 1, 1], [], []>} : vector<8x128xbf16>, vector<128x384xbf16>, vector<8x384xf32> -> vector<8x384xf32>
    %189 = vector.extract_strided_slice %184 {offsets = [0, 0], sizes = [8, 128], strides = [1, 1]} : vector<8x384xf32> to vector<8x128xf32>
    %190 = vector.extract_strided_slice %188 {offsets = [0, 0], sizes = [8, 128], strides = [1, 1]} : vector<8x384xf32> to vector<8x128xf32>
    %191 = arith.addf %189, %190 : vector<8x128xf32>
    %cst_98 = arith.constant 5.000000e-01 : f32
    %192 = vector.broadcast %cst_98 : f32 to vector<8x128xf32>
    %193 = arith.mulf %192, %191 : vector<8x128xf32>
    %194 = math.tanh %193 : vector<8x128xf32>
    %cst_99 = arith.constant 5.000000e-01 : f32
    %195 = vector.broadcast %cst_99 : f32 to vector<8x128xf32>
    %196 = arith.mulf %195, %194 : vector<8x128xf32>
    %cst_100 = arith.constant 5.000000e-01 : f32
    %197 = vector.broadcast %cst_100 : f32 to vector<8x128xf32>
    %198 = arith.addf %196, %197 : vector<8x128xf32>
    %199 = vector.extract_strided_slice %184 {offsets = [0, 128], sizes = [8, 128], strides = [1, 1]} : vector<8x384xf32> to vector<8x128xf32>
    %200 = vector.extract_strided_slice %188 {offsets = [0, 128], sizes = [8, 128], strides = [1, 1]} : vector<8x384xf32> to vector<8x128xf32>
    %201 = arith.addf %199, %200 : vector<8x128xf32>
    %cst_101 = arith.constant 5.000000e-01 : f32
    %202 = vector.broadcast %cst_101 : f32 to vector<8x128xf32>
    %203 = arith.mulf %202, %201 : vector<8x128xf32>
    %204 = math.tanh %203 : vector<8x128xf32>
    %cst_102 = arith.constant 5.000000e-01 : f32
    %205 = vector.broadcast %cst_102 : f32 to vector<8x128xf32>
    %206 = arith.mulf %205, %204 : vector<8x128xf32>
    %cst_103 = arith.constant 5.000000e-01 : f32
    %207 = vector.broadcast %cst_103 : f32 to vector<8x128xf32>
    %208 = arith.addf %206, %207 : vector<8x128xf32>
    %209 = vector.extract_strided_slice %184 {offsets = [0, 256], sizes = [8, 128], strides = [1, 1]} : vector<8x384xf32> to vector<8x128xf32>
    %210 = vector.extract_strided_slice %188 {offsets = [0, 256], sizes = [8, 128], strides = [1, 1]} : vector<8x384xf32> to vector<8x128xf32>
    %211 = arith.addf %210, %10 : vector<8x128xf32>
    %212 = arith.mulf %198, %211 : vector<8x128xf32>
    %213 = arith.addf %209, %212 : vector<8x128xf32>
    %214 = math.tanh %213 : vector<8x128xf32>
    %215 = arith.subf %174, %214 : vector<8x128xf32>
    %216 = arith.mulf %208, %215 : vector<8x128xf32>
    %217 = arith.addf %214, %216 : vector<8x128xf32>
    %218 = arith.truncf %217 : vector<8x128xf32> to vector<8x128xbf16>
    %c1_104 = arith.constant 1 : index
    %c0_105 = arith.constant 0 : index
    %c0_106 = arith.constant 0 : index
    %219 = vector.load %arg1[%c1_104, %c0_105, %c0_106] : memref<3x128x384xbf16, #tpu.memory_space<vmem>>, vector<1x128x384xbf16>
    %220 = vector.shape_cast %219 : vector<1x128x384xbf16> to vector<128x384xbf16>
    %cst_107 = arith.constant dense<0.000000e+00> : vector<8x384xf32>
    %221 = tpu.matmul %218, %220, %cst_107 {dimension_numbers = #tpu.dot_dimension_numbers<[1], [0], [0], [1], [0, 0, 1, 1], [], []>} : vector<8x128xbf16>, vector<128x384xbf16>, vector<8x384xf32> -> vector<8x384xf32>
    %c1_108 = arith.constant 1 : index
    %c0_109 = arith.constant 0 : index
    %c0_110 = arith.constant 0 : index
    %222 = vector.load %arg3[%c1_108, %c0_109, %c0_110] : memref<3x1x384xf32, #tpu.memory_space<vmem>>, vector<1x1x384xf32>
    %223 = vector.shape_cast %222 : vector<1x1x384xf32> to vector<1x384xf32>
    %224 = vector.broadcast %223 : vector<1x384xf32> to vector<8x384xf32>
    %225 = arith.addf %221, %224 : vector<8x384xf32>
    %c32_111 = arith.constant 32 : index
    %c0_112 = arith.constant 0 : index
    %226 = vector.load %arg9[%c32_111, %c0_112] : memref<64x384xf32, #tpu.memory_space<vmem>>, vector<8x384xf32>
    tpu.vector_store %arg9[%c32_111, %c0_112], %225 {strides = array<i32>} : memref<64x384xf32, #tpu.memory_space<vmem>>, vector<8x384xf32>,
    %c40 = arith.constant 40 : index
    %c0_113 = arith.constant 0 : index
    %227 = vector.load %arg8[%c40, %c0_113] : memref<64x384xf32, #tpu.memory_space<vmem>>, vector<8x384xf32>
    %228 = arith.truncf %217 : vector<8x128xf32> to vector<8x128xbf16>
    %c0_114 = arith.constant 0 : index
    %c0_115 = arith.constant 0 : index
    %c0_116 = arith.constant 0 : index
    %229 = vector.load %arg2[%c0_114, %c0_115, %c0_116] : memref<3x128x384xbf16, #tpu.memory_space<vmem>>, vector<1x128x384xbf16>
    %230 = vector.shape_cast %229 : vector<1x128x384xbf16> to vector<128x384xbf16>
    %cst_117 = arith.constant dense<0.000000e+00> : vector<8x384xf32>
    %231 = tpu.matmul %228, %230, %cst_117 {dimension_numbers = #tpu.dot_dimension_numbers<[1], [0], [0], [1], [0, 0, 1, 1], [], []>} : vector<8x128xbf16>, vector<128x384xbf16>, vector<8x384xf32> -> vector<8x384xf32>
    %232 = vector.extract_strided_slice %227 {offsets = [0, 0], sizes = [8, 128], strides = [1, 1]} : vector<8x384xf32> to vector<8x128xf32>
    %233 = vector.extract_strided_slice %231 {offsets = [0, 0], sizes = [8, 128], strides = [1, 1]} : vector<8x384xf32> to vector<8x128xf32>
    %234 = arith.addf %232, %233 : vector<8x128xf32>
    %cst_118 = arith.constant 5.000000e-01 : f32
    %235 = vector.broadcast %cst_118 : f32 to vector<8x128xf32>
    %236 = arith.mulf %235, %234 : vector<8x128xf32>
    %237 = math.tanh %236 : vector<8x128xf32>
    %cst_119 = arith.constant 5.000000e-01 : f32
    %238 = vector.broadcast %cst_119 : f32 to vector<8x128xf32>
    %239 = arith.mulf %238, %237 : vector<8x128xf32>
    %cst_120 = arith.constant 5.000000e-01 : f32
    %240 = vector.broadcast %cst_120 : f32 to vector<8x128xf32>
    %241 = arith.addf %239, %240 : vector<8x128xf32>
    %242 = vector.extract_strided_slice %227 {offsets = [0, 128], sizes = [8, 128], strides = [1, 1]} : vector<8x384xf32> to vector<8x128xf32>
    %243 = vector.extract_strided_slice %231 {offsets = [0, 128], sizes = [8, 128], strides = [1, 1]} : vector<8x384xf32> to vector<8x128xf32>
    %244 = arith.addf %242, %243 : vector<8x128xf32>
    %cst_121 = arith.constant 5.000000e-01 : f32
    %245 = vector.broadcast %cst_121 : f32 to vector<8x128xf32>
    %246 = arith.mulf %245, %244 : vector<8x128xf32>
    %247 = math.tanh %246 : vector<8x128xf32>
    %cst_122 = arith.constant 5.000000e-01 : f32
    %248 = vector.broadcast %cst_122 : f32 to vector<8x128xf32>
    %249 = arith.mulf %248, %247 : vector<8x128xf32>
    %cst_123 = arith.constant 5.000000e-01 : f32
    %250 = vector.broadcast %cst_123 : f32 to vector<8x128xf32>
    %251 = arith.addf %249, %250 : vector<8x128xf32>
    %252 = vector.extract_strided_slice %227 {offsets = [0, 256], sizes = [8, 128], strides = [1, 1]} : vector<8x384xf32> to vector<8x128xf32>
    %253 = vector.extract_strided_slice %231 {offsets = [0, 256], sizes = [8, 128], strides = [1, 1]} : vector<8x384xf32> to vector<8x128xf32>
    %254 = arith.addf %253, %10 : vector<8x128xf32>
    %255 = arith.mulf %241, %254 : vector<8x128xf32>
    %256 = arith.addf %252, %255 : vector<8x128xf32>
    %257 = math.tanh %256 : vector<8x128xf32>
    %258 = arith.subf %217, %257 : vector<8x128xf32>
    %259 = arith.mulf %251, %258 : vector<8x128xf32>
    %260 = arith.addf %257, %259 : vector<8x128xf32>
    %261 = arith.truncf %260 : vector<8x128xf32> to vector<8x128xbf16>
    %c1_124 = arith.constant 1 : index
    %c0_125 = arith.constant 0 : index
    %c0_126 = arith.constant 0 : index
    %262 = vector.load %arg1[%c1_124, %c0_125, %c0_126] : memref<3x128x384xbf16, #tpu.memory_space<vmem>>, vector<1x128x384xbf16>
    %263 = vector.shape_cast %262 : vector<1x128x384xbf16> to vector<128x384xbf16>
    %cst_127 = arith.constant dense<0.000000e+00> : vector<8x384xf32>
    %264 = tpu.matmul %261, %263, %cst_127 {dimension_numbers = #tpu.dot_dimension_numbers<[1], [0], [0], [1], [0, 0, 1, 1], [], []>} : vector<8x128xbf16>, vector<128x384xbf16>, vector<8x384xf32> -> vector<8x384xf32>
    %c1_128 = arith.constant 1 : index
    %c0_129 = arith.constant 0 : index
    %c0_130 = arith.constant 0 : index
    %265 = vector.load %arg3[%c1_128, %c0_129, %c0_130] : memref<3x1x384xf32, #tpu.memory_space<vmem>>, vector<1x1x384xf32>
    %266 = vector.shape_cast %265 : vector<1x1x384xf32> to vector<1x384xf32>
    %267 = vector.broadcast %266 : vector<1x384xf32> to vector<8x384xf32>
    %268 = arith.addf %264, %267 : vector<8x384xf32>
    %c40_131 = arith.constant 40 : index
    %c0_132 = arith.constant 0 : index
    %269 = vector.load %arg9[%c40_131, %c0_132] : memref<64x384xf32, #tpu.memory_space<vmem>>, vector<8x384xf32>
    tpu.vector_store %arg9[%c40_131, %c0_132], %268 {strides = array<i32>} : memref<64x384xf32, #tpu.memory_space<vmem>>, vector<8x384xf32>,
    %c48 = arith.constant 48 : index
    %c0_133 = arith.constant 0 : index
    %270 = vector.load %arg8[%c48, %c0_133] : memref<64x384xf32, #tpu.memory_space<vmem>>, vector<8x384xf32>
    %271 = arith.truncf %260 : vector<8x128xf32> to vector<8x128xbf16>
    %c0_134 = arith.constant 0 : index
    %c0_135 = arith.constant 0 : index
    %c0_136 = arith.constant 0 : index
    %272 = vector.load %arg2[%c0_134, %c0_135, %c0_136] : memref<3x128x384xbf16, #tpu.memory_space<vmem>>, vector<1x128x384xbf16>
    %273 = vector.shape_cast %272 : vector<1x128x384xbf16> to vector<128x384xbf16>
    %cst_137 = arith.constant dense<0.000000e+00> : vector<8x384xf32>
    %274 = tpu.matmul %271, %273, %cst_137 {dimension_numbers = #tpu.dot_dimension_numbers<[1], [0], [0], [1], [0, 0, 1, 1], [], []>} : vector<8x128xbf16>, vector<128x384xbf16>, vector<8x384xf32> -> vector<8x384xf32>
    %275 = vector.extract_strided_slice %270 {offsets = [0, 0], sizes = [8, 128], strides = [1, 1]} : vector<8x384xf32> to vector<8x128xf32>
    %276 = vector.extract_strided_slice %274 {offsets = [0, 0], sizes = [8, 128], strides = [1, 1]} : vector<8x384xf32> to vector<8x128xf32>
    %277 = arith.addf %275, %276 : vector<8x128xf32>
    %cst_138 = arith.constant 5.000000e-01 : f32
    %278 = vector.broadcast %cst_138 : f32 to vector<8x128xf32>
    %279 = arith.mulf %278, %277 : vector<8x128xf32>
    %280 = math.tanh %279 : vector<8x128xf32>
    %cst_139 = arith.constant 5.000000e-01 : f32
    %281 = vector.broadcast %cst_139 : f32 to vector<8x128xf32>
    %282 = arith.mulf %281, %280 : vector<8x128xf32>
    %cst_140 = arith.constant 5.000000e-01 : f32
    %283 = vector.broadcast %cst_140 : f32 to vector<8x128xf32>
    %284 = arith.addf %282, %283 : vector<8x128xf32>
    %285 = vector.extract_strided_slice %270 {offsets = [0, 128], sizes = [8, 128], strides = [1, 1]} : vector<8x384xf32> to vector<8x128xf32>
    %286 = vector.extract_strided_slice %274 {offsets = [0, 128], sizes = [8, 128], strides = [1, 1]} : vector<8x384xf32> to vector<8x128xf32>
    %287 = arith.addf %285, %286 : vector<8x128xf32>
    %cst_141 = arith.constant 5.000000e-01 : f32
    %288 = vector.broadcast %cst_141 : f32 to vector<8x128xf32>
    %289 = arith.mulf %288, %287 : vector<8x128xf32>
    %290 = math.tanh %289 : vector<8x128xf32>
    %cst_142 = arith.constant 5.000000e-01 : f32
    %291 = vector.broadcast %cst_142 : f32 to vector<8x128xf32>
    %292 = arith.mulf %291, %290 : vector<8x128xf32>
    %cst_143 = arith.constant 5.000000e-01 : f32
    %293 = vector.broadcast %cst_143 : f32 to vector<8x128xf32>
    %294 = arith.addf %292, %293 : vector<8x128xf32>
    %295 = vector.extract_strided_slice %270 {offsets = [0, 256], sizes = [8, 128], strides = [1, 1]} : vector<8x384xf32> to vector<8x128xf32>
    %296 = vector.extract_strided_slice %274 {offsets = [0, 256], sizes = [8, 128], strides = [1, 1]} : vector<8x384xf32> to vector<8x128xf32>
    %297 = arith.addf %296, %10 : vector<8x128xf32>
    %298 = arith.mulf %284, %297 : vector<8x128xf32>
    %299 = arith.addf %295, %298 : vector<8x128xf32>
    %300 = math.tanh %299 : vector<8x128xf32>
    %301 = arith.subf %260, %300 : vector<8x128xf32>
    %302 = arith.mulf %294, %301 : vector<8x128xf32>
    %303 = arith.addf %300, %302 : vector<8x128xf32>
    %304 = arith.truncf %303 : vector<8x128xf32> to vector<8x128xbf16>
    %c1_144 = arith.constant 1 : index
    %c0_145 = arith.constant 0 : index
    %c0_146 = arith.constant 0 : index
    %305 = vector.load %arg1[%c1_144, %c0_145, %c0_146] : memref<3x128x384xbf16, #tpu.memory_space<vmem>>, vector<1x128x384xbf16>
    %306 = vector.shape_cast %305 : vector<1x128x384xbf16> to vector<128x384xbf16>
    %cst_147 = arith.constant dense<0.000000e+00> : vector<8x384xf32>
    %307 = tpu.matmul %304, %306, %cst_147 {dimension_numbers = #tpu.dot_dimension_numbers<[1], [0], [0], [1], [0, 0, 1, 1], [], []>} : vector<8x128xbf16>, vector<128x384xbf16>, vector<8x384xf32> -> vector<8x384xf32>
    %c1_148 = arith.constant 1 : index
    %c0_149 = arith.constant 0 : index
    %c0_150 = arith.constant 0 : index
    %308 = vector.load %arg3[%c1_148, %c0_149, %c0_150] : memref<3x1x384xf32, #tpu.memory_space<vmem>>, vector<1x1x384xf32>
    %309 = vector.shape_cast %308 : vector<1x1x384xf32> to vector<1x384xf32>
    %310 = vector.broadcast %309 : vector<1x384xf32> to vector<8x384xf32>
    %311 = arith.addf %307, %310 : vector<8x384xf32>
    %c48_151 = arith.constant 48 : index
    %c0_152 = arith.constant 0 : index
    %312 = vector.load %arg9[%c48_151, %c0_152] : memref<64x384xf32, #tpu.memory_space<vmem>>, vector<8x384xf32>
    tpu.vector_store %arg9[%c48_151, %c0_152], %311 {strides = array<i32>} : memref<64x384xf32, #tpu.memory_space<vmem>>, vector<8x384xf32>,
    %c56 = arith.constant 56 : index
    %c0_153 = arith.constant 0 : index
    %313 = vector.load %arg8[%c56, %c0_153] : memref<64x384xf32, #tpu.memory_space<vmem>>, vector<8x384xf32>
    %314 = arith.truncf %303 : vector<8x128xf32> to vector<8x128xbf16>
    %c0_154 = arith.constant 0 : index
    %c0_155 = arith.constant 0 : index
    %c0_156 = arith.constant 0 : index
    %315 = vector.load %arg2[%c0_154, %c0_155, %c0_156] : memref<3x128x384xbf16, #tpu.memory_space<vmem>>, vector<1x128x384xbf16>
    %316 = vector.shape_cast %315 : vector<1x128x384xbf16> to vector<128x384xbf16>
    %cst_157 = arith.constant dense<0.000000e+00> : vector<8x384xf32>
    %317 = tpu.matmul %314, %316, %cst_157 {dimension_numbers = #tpu.dot_dimension_numbers<[1], [0], [0], [1], [0, 0, 1, 1], [], []>} : vector<8x128xbf16>, vector<128x384xbf16>, vector<8x384xf32> -> vector<8x384xf32>
    %318 = vector.extract_strided_slice %313 {offsets = [0, 0], sizes = [8, 128], strides = [1, 1]} : vector<8x384xf32> to vector<8x128xf32>
    %319 = vector.extract_strided_slice %317 {offsets = [0, 0], sizes = [8, 128], strides = [1, 1]} : vector<8x384xf32> to vector<8x128xf32>
    %320 = arith.addf %318, %319 : vector<8x128xf32>
    %cst_158 = arith.constant 5.000000e-01 : f32
    %321 = vector.broadcast %cst_158 : f32 to vector<8x128xf32>
    %322 = arith.mulf %321, %320 : vector<8x128xf32>
    %323 = math.tanh %322 : vector<8x128xf32>
    %cst_159 = arith.constant 5.000000e-01 : f32
    %324 = vector.broadcast %cst_159 : f32 to vector<8x128xf32>
    %325 = arith.mulf %324, %323 : vector<8x128xf32>
    %cst_160 = arith.constant 5.000000e-01 : f32
    %326 = vector.broadcast %cst_160 : f32 to vector<8x128xf32>
    %327 = arith.addf %325, %326 : vector<8x128xf32>
    %328 = vector.extract_strided_slice %313 {offsets = [0, 128], sizes = [8, 128], strides = [1, 1]} : vector<8x384xf32> to vector<8x128xf32>
    %329 = vector.extract_strided_slice %317 {offsets = [0, 128], sizes = [8, 128], strides = [1, 1]} : vector<8x384xf32> to vector<8x128xf32>
    %330 = arith.addf %328, %329 : vector<8x128xf32>
    %cst_161 = arith.constant 5.000000e-01 : f32
    %331 = vector.broadcast %cst_161 : f32 to vector<8x128xf32>
    %332 = arith.mulf %331, %330 : vector<8x128xf32>
    %333 = math.tanh %332 : vector<8x128xf32>
    %cst_162 = arith.constant 5.000000e-01 : f32
    %334 = vector.broadcast %cst_162 : f32 to vector<8x128xf32>
    %335 = arith.mulf %334, %333 : vector<8x128xf32>
    %cst_163 = arith.constant 5.000000e-01 : f32
    %336 = vector.broadcast %cst_163 : f32 to vector<8x128xf32>
    %337 = arith.addf %335, %336 : vector<8x128xf32>
    %338 = vector.extract_strided_slice %313 {offsets = [0, 256], sizes = [8, 128], strides = [1, 1]} : vector<8x384xf32> to vector<8x128xf32>
    %339 = vector.extract_strided_slice %317 {offsets = [0, 256], sizes = [8, 128], strides = [1, 1]} : vector<8x384xf32> to vector<8x128xf32>
    %340 = arith.addf %339, %10 : vector<8x128xf32>
    %341 = arith.mulf %327, %340 : vector<8x128xf32>
    %342 = arith.addf %338, %341 : vector<8x128xf32>
    %343 = math.tanh %342 : vector<8x128xf32>
    %344 = arith.subf %303, %343 : vector<8x128xf32>
    %345 = arith.mulf %337, %344 : vector<8x128xf32>
    %346 = arith.addf %343, %345 : vector<8x128xf32>
    %347 = arith.truncf %346 : vector<8x128xf32> to vector<8x128xbf16>
    %c1_164 = arith.constant 1 : index
    %c0_165 = arith.constant 0 : index
    %c0_166 = arith.constant 0 : index
    %348 = vector.load %arg1[%c1_164, %c0_165, %c0_166] : memref<3x128x384xbf16, #tpu.memory_space<vmem>>, vector<1x128x384xbf16>
    %349 = vector.shape_cast %348 : vector<1x128x384xbf16> to vector<128x384xbf16>
    %cst_167 = arith.constant dense<0.000000e+00> : vector<8x384xf32>
    %350 = tpu.matmul %347, %349, %cst_167 {dimension_numbers = #tpu.dot_dimension_numbers<[1], [0], [0], [1], [0, 0, 1, 1], [], []>} : vector<8x128xbf16>, vector<128x384xbf16>, vector<8x384xf32> -> vector<8x384xf32>
    %c1_168 = arith.constant 1 : index
    %c0_169 = arith.constant 0 : index
    %c0_170 = arith.constant 0 : index
    %351 = vector.load %arg3[%c1_168, %c0_169, %c0_170] : memref<3x1x384xf32, #tpu.memory_space<vmem>>, vector<1x1x384xf32>
    %352 = vector.shape_cast %351 : vector<1x1x384xf32> to vector<1x384xf32>
    %353 = vector.broadcast %352 : vector<1x384xf32> to vector<8x384xf32>
    %354 = arith.addf %350, %353 : vector<8x384xf32>
    %c56_171 = arith.constant 56 : index
    %c0_172 = arith.constant 0 : index
    %355 = vector.load %arg9[%c56_171, %c0_172] : memref<64x384xf32, #tpu.memory_space<vmem>>, vector<8x384xf32>
    tpu.vector_store %arg9[%c56_171, %c0_172], %354 {strides = array<i32>} : memref<64x384xf32, #tpu.memory_space<vmem>>, vector<8x384xf32>,
    %c1_173 = arith.constant 1 : index
    %c0_174 = arith.constant 0 : index
    %c0_175 = arith.constant 0 : index
    %356 = vector.load %arg4[%c1_173, %c0_174, %c0_175] : memref<3x8x128xf32, #tpu.memory_space<vmem>>, vector<1x8x128xf32>
    %357 = vector.shape_cast %356 : vector<1x8x128xf32> to vector<8x128xf32>
    %cst_176 = arith.constant 0.000000e+00 : f32
    %358 = vector.broadcast %cst_176 : f32 to vector<8x128xf32>
    %c0_177 = arith.constant 0 : index
    %c0_178 = arith.constant 0 : index
    %359 = vector.load %arg9[%c0_177, %c0_178] : memref<64x384xf32, #tpu.memory_space<vmem>>, vector<8x384xf32>
    %360 = arith.truncf %358 : vector<8x128xf32> to vector<8x128xbf16>
    %c1_179 = arith.constant 1 : index
    %c0_180 = arith.constant 0 : index
    %c0_181 = arith.constant 0 : index
    %361 = vector.load %arg2[%c1_179, %c0_180, %c0_181] : memref<3x128x384xbf16, #tpu.memory_space<vmem>>, vector<1x128x384xbf16>
    %362 = vector.shape_cast %361 : vector<1x128x384xbf16> to vector<128x384xbf16>
    %cst_182 = arith.constant dense<0.000000e+00> : vector<8x384xf32>
    %363 = tpu.matmul %360, %362, %cst_182 {dimension_numbers = #tpu.dot_dimension_numbers<[1], [0], [0], [1], [0, 0, 1, 1], [], []>} : vector<8x128xbf16>, vector<128x384xbf16>, vector<8x384xf32> -> vector<8x384xf32>
    %364 = vector.extract_strided_slice %359 {offsets = [0, 0], sizes = [8, 128], strides = [1, 1]} : vector<8x384xf32> to vector<8x128xf32>
    %365 = vector.extract_strided_slice %363 {offsets = [0, 0], sizes = [8, 128], strides = [1, 1]} : vector<8x384xf32> to vector<8x128xf32>
    %366 = arith.addf %364, %365 : vector<8x128xf32>
    %cst_183 = arith.constant 5.000000e-01 : f32
    %367 = vector.broadcast %cst_183 : f32 to vector<8x128xf32>
    %368 = arith.mulf %367, %366 : vector<8x128xf32>
    %369 = math.tanh %368 : vector<8x128xf32>
    %cst_184 = arith.constant 5.000000e-01 : f32
    %370 = vector.broadcast %cst_184 : f32 to vector<8x128xf32>
    %371 = arith.mulf %370, %369 : vector<8x128xf32>
    %cst_185 = arith.constant 5.000000e-01 : f32
    %372 = vector.broadcast %cst_185 : f32 to vector<8x128xf32>
    %373 = arith.addf %371, %372 : vector<8x128xf32>
    %374 = vector.extract_strided_slice %359 {offsets = [0, 128], sizes = [8, 128], strides = [1, 1]} : vector<8x384xf32> to vector<8x128xf32>
    %375 = vector.extract_strided_slice %363 {offsets = [0, 128], sizes = [8, 128], strides = [1, 1]} : vector<8x384xf32> to vector<8x128xf32>
    %376 = arith.addf %374, %375 : vector<8x128xf32>
    %cst_186 = arith.constant 5.000000e-01 : f32
    %377 = vector.broadcast %cst_186 : f32 to vector<8x128xf32>
    %378 = arith.mulf %377, %376 : vector<8x128xf32>
    %379 = math.tanh %378 : vector<8x128xf32>
    %cst_187 = arith.constant 5.000000e-01 : f32
    %380 = vector.broadcast %cst_187 : f32 to vector<8x128xf32>
    %381 = arith.mulf %380, %379 : vector<8x128xf32>
    %cst_188 = arith.constant 5.000000e-01 : f32
    %382 = vector.broadcast %cst_188 : f32 to vector<8x128xf32>
    %383 = arith.addf %381, %382 : vector<8x128xf32>
    %384 = vector.extract_strided_slice %359 {offsets = [0, 256], sizes = [8, 128], strides = [1, 1]} : vector<8x384xf32> to vector<8x128xf32>
    %385 = vector.extract_strided_slice %363 {offsets = [0, 256], sizes = [8, 128], strides = [1, 1]} : vector<8x384xf32> to vector<8x128xf32>
    %386 = arith.addf %385, %357 : vector<8x128xf32>
    %387 = arith.mulf %373, %386 : vector<8x128xf32>
    %388 = arith.addf %384, %387 : vector<8x128xf32>
    %389 = math.tanh %388 : vector<8x128xf32>
    %390 = arith.subf %358, %389 : vector<8x128xf32>
    %391 = arith.mulf %383, %390 : vector<8x128xf32>
    %392 = arith.addf %389, %391 : vector<8x128xf32>
    %393 = arith.truncf %392 : vector<8x128xf32> to vector<8x128xbf16>
    %c2 = arith.constant 2 : index
    %c0_189 = arith.constant 0 : index
    %c0_190 = arith.constant 0 : index
    %394 = vector.load %arg1[%c2, %c0_189, %c0_190] : memref<3x128x384xbf16, #tpu.memory_space<vmem>>, vector<1x128x384xbf16>
    %395 = vector.shape_cast %394 : vector<1x128x384xbf16> to vector<128x384xbf16>
    %cst_191 = arith.constant dense<0.000000e+00> : vector<8x384xf32>
    %396 = tpu.matmul %393, %395, %cst_191 {dimension_numbers = #tpu.dot_dimension_numbers<[1], [0], [0], [1], [0, 0, 1, 1], [], []>} : vector<8x128xbf16>, vector<128x384xbf16>, vector<8x384xf32> -> vector<8x384xf32>
    %c2_192 = arith.constant 2 : index
    %c0_193 = arith.constant 0 : index
    %c0_194 = arith.constant 0 : index
    %397 = vector.load %arg3[%c2_192, %c0_193, %c0_194] : memref<3x1x384xf32, #tpu.memory_space<vmem>>, vector<1x1x384xf32>
    %398 = vector.shape_cast %397 : vector<1x1x384xf32> to vector<1x384xf32>
    %399 = vector.broadcast %398 : vector<1x384xf32> to vector<8x384xf32>
    %400 = arith.addf %396, %399 : vector<8x384xf32>
    %c0_195 = arith.constant 0 : index
    %c0_196 = arith.constant 0 : index
    %401 = vector.load %arg8[%c0_195, %c0_196] : memref<64x384xf32, #tpu.memory_space<vmem>>, vector<8x384xf32>
    tpu.vector_store %arg8[%c0_195, %c0_196], %400 {strides = array<i32>} : memref<64x384xf32, #tpu.memory_space<vmem>>, vector<8x384xf32>,
    %c8_197 = arith.constant 8 : index
    %c0_198 = arith.constant 0 : index
    %402 = vector.load %arg9[%c8_197, %c0_198] : memref<64x384xf32, #tpu.memory_space<vmem>>, vector<8x384xf32>
    %403 = arith.truncf %392 : vector<8x128xf32> to vector<8x128xbf16>
    %c1_199 = arith.constant 1 : index
    %c0_200 = arith.constant 0 : index
    %c0_201 = arith.constant 0 : index
    %404 = vector.load %arg2[%c1_199, %c0_200, %c0_201] : memref<3x128x384xbf16, #tpu.memory_space<vmem>>, vector<1x128x384xbf16>
    %405 = vector.shape_cast %404 : vector<1x128x384xbf16> to vector<128x384xbf16>
    %cst_202 = arith.constant dense<0.000000e+00> : vector<8x384xf32>
    %406 = tpu.matmul %403, %405, %cst_202 {dimension_numbers = #tpu.dot_dimension_numbers<[1], [0], [0], [1], [0, 0, 1, 1], [], []>} : vector<8x128xbf16>, vector<128x384xbf16>, vector<8x384xf32> -> vector<8x384xf32>
    %407 = vector.extract_strided_slice %402 {offsets = [0, 0], sizes = [8, 128], strides = [1, 1]} : vector<8x384xf32> to vector<8x128xf32>
    %408 = vector.extract_strided_slice %406 {offsets = [0, 0], sizes = [8, 128], strides = [1, 1]} : vector<8x384xf32> to vector<8x128xf32>
    %409 = arith.addf %407, %408 : vector<8x128xf32>
    %cst_203 = arith.constant 5.000000e-01 : f32
    %410 = vector.broadcast %cst_203 : f32 to vector<8x128xf32>
    %411 = arith.mulf %410, %409 : vector<8x128xf32>
    %412 = math.tanh %411 : vector<8x128xf32>
    %cst_204 = arith.constant 5.000000e-01 : f32
    %413 = vector.broadcast %cst_204 : f32 to vector<8x128xf32>
    %414 = arith.mulf %413, %412 : vector<8x128xf32>
    %cst_205 = arith.constant 5.000000e-01 : f32
    %415 = vector.broadcast %cst_205 : f32 to vector<8x128xf32>
    %416 = arith.addf %414, %415 : vector<8x128xf32>
    %417 = vector.extract_strided_slice %402 {offsets = [0, 128], sizes = [8, 128], strides = [1, 1]} : vector<8x384xf32> to vector<8x128xf32>
    %418 = vector.extract_strided_slice %406 {offsets = [0, 128], sizes = [8, 128], strides = [1, 1]} : vector<8x384xf32> to vector<8x128xf32>
    %419 = arith.addf %417, %418 : vector<8x128xf32>
    %cst_206 = arith.constant 5.000000e-01 : f32
    %420 = vector.broadcast %cst_206 : f32 to vector<8x128xf32>
    %421 = arith.mulf %420, %419 : vector<8x128xf32>
    %422 = math.tanh %421 : vector<8x128xf32>
    %cst_207 = arith.constant 5.000000e-01 : f32
    %423 = vector.broadcast %cst_207 : f32 to vector<8x128xf32>
    %424 = arith.mulf %423, %422 : vector<8x128xf32>
    %cst_208 = arith.constant 5.000000e-01 : f32
    %425 = vector.broadcast %cst_208 : f32 to vector<8x128xf32>
    %426 = arith.addf %424, %425 : vector<8x128xf32>
    %427 = vector.extract_strided_slice %402 {offsets = [0, 256], sizes = [8, 128], strides = [1, 1]} : vector<8x384xf32> to vector<8x128xf32>
    %428 = vector.extract_strided_slice %406 {offsets = [0, 256], sizes = [8, 128], strides = [1, 1]} : vector<8x384xf32> to vector<8x128xf32>
    %429 = arith.addf %428, %357 : vector<8x128xf32>
    %430 = arith.mulf %416, %429 : vector<8x128xf32>
    %431 = arith.addf %427, %430 : vector<8x128xf32>
    %432 = math.tanh %431 : vector<8x128xf32>
    %433 = arith.subf %392, %432 : vector<8x128xf32>
    %434 = arith.mulf %426, %433 : vector<8x128xf32>
    %435 = arith.addf %432, %434 : vector<8x128xf32>
    %436 = arith.truncf %435 : vector<8x128xf32> to vector<8x128xbf16>
    %c2_209 = arith.constant 2 : index
    %c0_210 = arith.constant 0 : index
    %c0_211 = arith.constant 0 : index
    %437 = vector.load %arg1[%c2_209, %c0_210, %c0_211] : memref<3x128x384xbf16, #tpu.memory_space<vmem>>, vector<1x128x384xbf16>
    %438 = vector.shape_cast %437 : vector<1x128x384xbf16> to vector<128x384xbf16>
    %cst_212 = arith.constant dense<0.000000e+00> : vector<8x384xf32>
    %439 = tpu.matmul %436, %438, %cst_212 {dimension_numbers = #tpu.dot_dimension_numbers<[1], [0], [0], [1], [0, 0, 1, 1], [], []>} : vector<8x128xbf16>, vector<128x384xbf16>, vector<8x384xf32> -> vector<8x384xf32>
    %c2_213 = arith.constant 2 : index
    %c0_214 = arith.constant 0 : index
    %c0_215 = arith.constant 0 : index
    %440 = vector.load %arg3[%c2_213, %c0_214, %c0_215] : memref<3x1x384xf32, #tpu.memory_space<vmem>>, vector<1x1x384xf32>
    %441 = vector.shape_cast %440 : vector<1x1x384xf32> to vector<1x384xf32>
    %442 = vector.broadcast %441 : vector<1x384xf32> to vector<8x384xf32>
    %443 = arith.addf %439, %442 : vector<8x384xf32>
    %c8_216 = arith.constant 8 : index
    %c0_217 = arith.constant 0 : index
    %444 = vector.load %arg8[%c8_216, %c0_217] : memref<64x384xf32, #tpu.memory_space<vmem>>, vector<8x384xf32>
    tpu.vector_store %arg8[%c8_216, %c0_217], %443 {strides = array<i32>} : memref<64x384xf32, #tpu.memory_space<vmem>>, vector<8x384xf32>,
    %c16_218 = arith.constant 16 : index
    %c0_219 = arith.constant 0 : index
    %445 = vector.load %arg9[%c16_218, %c0_219] : memref<64x384xf32, #tpu.memory_space<vmem>>, vector<8x384xf32>
    %446 = arith.truncf %435 : vector<8x128xf32> to vector<8x128xbf16>
    %c1_220 = arith.constant 1 : index
    %c0_221 = arith.constant 0 : index
    %c0_222 = arith.constant 0 : index
    %447 = vector.load %arg2[%c1_220, %c0_221, %c0_222] : memref<3x128x384xbf16, #tpu.memory_space<vmem>>, vector<1x128x384xbf16>
    %448 = vector.shape_cast %447 : vector<1x128x384xbf16> to vector<128x384xbf16>
    %cst_223 = arith.constant dense<0.000000e+00> : vector<8x384xf32>
    %449 = tpu.matmul %446, %448, %cst_223 {dimension_numbers = #tpu.dot_dimension_numbers<[1], [0], [0], [1], [0, 0, 1, 1], [], []>} : vector<8x128xbf16>, vector<128x384xbf16>, vector<8x384xf32> -> vector<8x384xf32>
    %450 = vector.extract_strided_slice %445 {offsets = [0, 0], sizes = [8, 128], strides = [1, 1]} : vector<8x384xf32> to vector<8x128xf32>
    %451 = vector.extract_strided_slice %449 {offsets = [0, 0], sizes = [8, 128], strides = [1, 1]} : vector<8x384xf32> to vector<8x128xf32>
    %452 = arith.addf %450, %451 : vector<8x128xf32>
    %cst_224 = arith.constant 5.000000e-01 : f32
    %453 = vector.broadcast %cst_224 : f32 to vector<8x128xf32>
    %454 = arith.mulf %453, %452 : vector<8x128xf32>
    %455 = math.tanh %454 : vector<8x128xf32>
    %cst_225 = arith.constant 5.000000e-01 : f32
    %456 = vector.broadcast %cst_225 : f32 to vector<8x128xf32>
    %457 = arith.mulf %456, %455 : vector<8x128xf32>
    %cst_226 = arith.constant 5.000000e-01 : f32
    %458 = vector.broadcast %cst_226 : f32 to vector<8x128xf32>
    %459 = arith.addf %457, %458 : vector<8x128xf32>
    %460 = vector.extract_strided_slice %445 {offsets = [0, 128], sizes = [8, 128], strides = [1, 1]} : vector<8x384xf32> to vector<8x128xf32>
    %461 = vector.extract_strided_slice %449 {offsets = [0, 128], sizes = [8, 128], strides = [1, 1]} : vector<8x384xf32> to vector<8x128xf32>
    %462 = arith.addf %460, %461 : vector<8x128xf32>
    %cst_227 = arith.constant 5.000000e-01 : f32
    %463 = vector.broadcast %cst_227 : f32 to vector<8x128xf32>
    %464 = arith.mulf %463, %462 : vector<8x128xf32>
    %465 = math.tanh %464 : vector<8x128xf32>
    %cst_228 = arith.constant 5.000000e-01 : f32
    %466 = vector.broadcast %cst_228 : f32 to vector<8x128xf32>
    %467 = arith.mulf %466, %465 : vector<8x128xf32>
    %cst_229 = arith.constant 5.000000e-01 : f32
    %468 = vector.broadcast %cst_229 : f32 to vector<8x128xf32>
    %469 = arith.addf %467, %468 : vector<8x128xf32>
    %470 = vector.extract_strided_slice %445 {offsets = [0, 256], sizes = [8, 128], strides = [1, 1]} : vector<8x384xf32> to vector<8x128xf32>
    %471 = vector.extract_strided_slice %449 {offsets = [0, 256], sizes = [8, 128], strides = [1, 1]} : vector<8x384xf32> to vector<8x128xf32>
    %472 = arith.addf %471, %357 : vector<8x128xf32>
    %473 = arith.mulf %459, %472 : vector<8x128xf32>
    %474 = arith.addf %470, %473 : vector<8x128xf32>
    %475 = math.tanh %474 : vector<8x128xf32>
    %476 = arith.subf %435, %475 : vector<8x128xf32>
    %477 = arith.mulf %469, %476 : vector<8x128xf32>
    %478 = arith.addf %475, %477 : vector<8x128xf32>
    %479 = arith.truncf %478 : vector<8x128xf32> to vector<8x128xbf16>
    %c2_230 = arith.constant 2 : index
    %c0_231 = arith.constant 0 : index
    %c0_232 = arith.constant 0 : index
    %480 = vector.load %arg1[%c2_230, %c0_231, %c0_232] : memref<3x128x384xbf16, #tpu.memory_space<vmem>>, vector<1x128x384xbf16>
    %481 = vector.shape_cast %480 : vector<1x128x384xbf16> to vector<128x384xbf16>
    %cst_233 = arith.constant dense<0.000000e+00> : vector<8x384xf32>
    %482 = tpu.matmul %479, %481, %cst_233 {dimension_numbers = #tpu.dot_dimension_numbers<[1], [0], [0], [1], [0, 0, 1, 1], [], []>} : vector<8x128xbf16>, vector<128x384xbf16>, vector<8x384xf32> -> vector<8x384xf32>
    %c2_234 = arith.constant 2 : index
    %c0_235 = arith.constant 0 : index
    %c0_236 = arith.constant 0 : index
    %483 = vector.load %arg3[%c2_234, %c0_235, %c0_236] : memref<3x1x384xf32, #tpu.memory_space<vmem>>, vector<1x1x384xf32>
    %484 = vector.shape_cast %483 : vector<1x1x384xf32> to vector<1x384xf32>
    %485 = vector.broadcast %484 : vector<1x384xf32> to vector<8x384xf32>
    %486 = arith.addf %482, %485 : vector<8x384xf32>
    %c16_237 = arith.constant 16 : index
    %c0_238 = arith.constant 0 : index
    %487 = vector.load %arg8[%c16_237, %c0_238] : memref<64x384xf32, #tpu.memory_space<vmem>>, vector<8x384xf32>
    tpu.vector_store %arg8[%c16_237, %c0_238], %486 {strides = array<i32>} : memref<64x384xf32, #tpu.memory_space<vmem>>, vector<8x384xf32>,
    %c24_239 = arith.constant 24 : index
    %c0_240 = arith.constant 0 : index
    %488 = vector.load %arg9[%c24_239, %c0_240] : memref<64x384xf32, #tpu.memory_space<vmem>>, vector<8x384xf32>
    %489 = arith.truncf %478 : vector<8x128xf32> to vector<8x128xbf16>
    %c1_241 = arith.constant 1 : index
    %c0_242 = arith.constant 0 : index
    %c0_243 = arith.constant 0 : index
    %490 = vector.load %arg2[%c1_241, %c0_242, %c0_243] : memref<3x128x384xbf16, #tpu.memory_space<vmem>>, vector<1x128x384xbf16>
    %491 = vector.shape_cast %490 : vector<1x128x384xbf16> to vector<128x384xbf16>
    %cst_244 = arith.constant dense<0.000000e+00> : vector<8x384xf32>
    %492 = tpu.matmul %489, %491, %cst_244 {dimension_numbers = #tpu.dot_dimension_numbers<[1], [0], [0], [1], [0, 0, 1, 1], [], []>} : vector<8x128xbf16>, vector<128x384xbf16>, vector<8x384xf32> -> vector<8x384xf32>
    %493 = vector.extract_strided_slice %488 {offsets = [0, 0], sizes = [8, 128], strides = [1, 1]} : vector<8x384xf32> to vector<8x128xf32>
    %494 = vector.extract_strided_slice %492 {offsets = [0, 0], sizes = [8, 128], strides = [1, 1]} : vector<8x384xf32> to vector<8x128xf32>
    %495 = arith.addf %493, %494 : vector<8x128xf32>
    %cst_245 = arith.constant 5.000000e-01 : f32
    %496 = vector.broadcast %cst_245 : f32 to vector<8x128xf32>
    %497 = arith.mulf %496, %495 : vector<8x128xf32>
    %498 = math.tanh %497 : vector<8x128xf32>
    %cst_246 = arith.constant 5.000000e-01 : f32
    %499 = vector.broadcast %cst_246 : f32 to vector<8x128xf32>
    %500 = arith.mulf %499, %498 : vector<8x128xf32>
    %cst_247 = arith.constant 5.000000e-01 : f32
    %501 = vector.broadcast %cst_247 : f32 to vector<8x128xf32>
    %502 = arith.addf %500, %501 : vector<8x128xf32>
    %503 = vector.extract_strided_slice %488 {offsets = [0, 128], sizes = [8, 128], strides = [1, 1]} : vector<8x384xf32> to vector<8x128xf32>
    %504 = vector.extract_strided_slice %492 {offsets = [0, 128], sizes = [8, 128], strides = [1, 1]} : vector<8x384xf32> to vector<8x128xf32>
    %505 = arith.addf %503, %504 : vector<8x128xf32>
    %cst_248 = arith.constant 5.000000e-01 : f32
    %506 = vector.broadcast %cst_248 : f32 to vector<8x128xf32>
    %507 = arith.mulf %506, %505 : vector<8x128xf32>
    %508 = math.tanh %507 : vector<8x128xf32>
    %cst_249 = arith.constant 5.000000e-01 : f32
    %509 = vector.broadcast %cst_249 : f32 to vector<8x128xf32>
    %510 = arith.mulf %509, %508 : vector<8x128xf32>
    %cst_250 = arith.constant 5.000000e-01 : f32
    %511 = vector.broadcast %cst_250 : f32 to vector<8x128xf32>
    %512 = arith.addf %510, %511 : vector<8x128xf32>
    %513 = vector.extract_strided_slice %488 {offsets = [0, 256], sizes = [8, 128], strides = [1, 1]} : vector<8x384xf32> to vector<8x128xf32>
    %514 = vector.extract_strided_slice %492 {offsets = [0, 256], sizes = [8, 128], strides = [1, 1]} : vector<8x384xf32> to vector<8x128xf32>
    %515 = arith.addf %514, %357 : vector<8x128xf32>
    %516 = arith.mulf %502, %515 : vector<8x128xf32>
    %517 = arith.addf %513, %516 : vector<8x128xf32>
    %518 = math.tanh %517 : vector<8x128xf32>
    %519 = arith.subf %478, %518 : vector<8x128xf32>
    %520 = arith.mulf %512, %519 : vector<8x128xf32>
    %521 = arith.addf %518, %520 : vector<8x128xf32>
    %522 = arith.truncf %521 : vector<8x128xf32> to vector<8x128xbf16>
    %c2_251 = arith.constant 2 : index
    %c0_252 = arith.constant 0 : index
    %c0_253 = arith.constant 0 : index
    %523 = vector.load %arg1[%c2_251, %c0_252, %c0_253] : memref<3x128x384xbf16, #tpu.memory_space<vmem>>, vector<1x128x384xbf16>
    %524 = vector.shape_cast %523 : vector<1x128x384xbf16> to vector<128x384xbf16>
    %cst_254 = arith.constant dense<0.000000e+00> : vector<8x384xf32>
    %525 = tpu.matmul %522, %524, %cst_254 {dimension_numbers = #tpu.dot_dimension_numbers<[1], [0], [0], [1], [0, 0, 1, 1], [], []>} : vector<8x128xbf16>, vector<128x384xbf16>, vector<8x384xf32> -> vector<8x384xf32>
    %c2_255 = arith.constant 2 : index
    %c0_256 = arith.constant 0 : index
    %c0_257 = arith.constant 0 : index
    %526 = vector.load %arg3[%c2_255, %c0_256, %c0_257] : memref<3x1x384xf32, #tpu.memory_space<vmem>>, vector<1x1x384xf32>
    %527 = vector.shape_cast %526 : vector<1x1x384xf32> to vector<1x384xf32>
    %528 = vector.broadcast %527 : vector<1x384xf32> to vector<8x384xf32>
    %529 = arith.addf %525, %528 : vector<8x384xf32>
    %c24_258 = arith.constant 24 : index
    %c0_259 = arith.constant 0 : index
    %530 = vector.load %arg8[%c24_258, %c0_259] : memref<64x384xf32, #tpu.memory_space<vmem>>, vector<8x384xf32>
    tpu.vector_store %arg8[%c24_258, %c0_259], %529 {strides = array<i32>} : memref<64x384xf32, #tpu.memory_space<vmem>>, vector<8x384xf32>,
    %c32_260 = arith.constant 32 : index
    %c0_261 = arith.constant 0 : index
    %531 = vector.load %arg9[%c32_260, %c0_261] : memref<64x384xf32, #tpu.memory_space<vmem>>, vector<8x384xf32>
    %532 = arith.truncf %521 : vector<8x128xf32> to vector<8x128xbf16>
    %c1_262 = arith.constant 1 : index
    %c0_263 = arith.constant 0 : index
    %c0_264 = arith.constant 0 : index
    %533 = vector.load %arg2[%c1_262, %c0_263, %c0_264] : memref<3x128x384xbf16, #tpu.memory_space<vmem>>, vector<1x128x384xbf16>
    %534 = vector.shape_cast %533 : vector<1x128x384xbf16> to vector<128x384xbf16>
    %cst_265 = arith.constant dense<0.000000e+00> : vector<8x384xf32>
    %535 = tpu.matmul %532, %534, %cst_265 {dimension_numbers = #tpu.dot_dimension_numbers<[1], [0], [0], [1], [0, 0, 1, 1], [], []>} : vector<8x128xbf16>, vector<128x384xbf16>, vector<8x384xf32> -> vector<8x384xf32>
    %536 = vector.extract_strided_slice %531 {offsets = [0, 0], sizes = [8, 128], strides = [1, 1]} : vector<8x384xf32> to vector<8x128xf32>
    %537 = vector.extract_strided_slice %535 {offsets = [0, 0], sizes = [8, 128], strides = [1, 1]} : vector<8x384xf32> to vector<8x128xf32>
    %538 = arith.addf %536, %537 : vector<8x128xf32>
    %cst_266 = arith.constant 5.000000e-01 : f32
    %539 = vector.broadcast %cst_266 : f32 to vector<8x128xf32>
    %540 = arith.mulf %539, %538 : vector<8x128xf32>
    %541 = math.tanh %540 : vector<8x128xf32>
    %cst_267 = arith.constant 5.000000e-01 : f32
    %542 = vector.broadcast %cst_267 : f32 to vector<8x128xf32>
    %543 = arith.mulf %542, %541 : vector<8x128xf32>
    %cst_268 = arith.constant 5.000000e-01 : f32
    %544 = vector.broadcast %cst_268 : f32 to vector<8x128xf32>
    %545 = arith.addf %543, %544 : vector<8x128xf32>
    %546 = vector.extract_strided_slice %531 {offsets = [0, 128], sizes = [8, 128], strides = [1, 1]} : vector<8x384xf32> to vector<8x128xf32>
    %547 = vector.extract_strided_slice %535 {offsets = [0, 128], sizes = [8, 128], strides = [1, 1]} : vector<8x384xf32> to vector<8x128xf32>
    %548 = arith.addf %546, %547 : vector<8x128xf32>
    %cst_269 = arith.constant 5.000000e-01 : f32
    %549 = vector.broadcast %cst_269 : f32 to vector<8x128xf32>
    %550 = arith.mulf %549, %548 : vector<8x128xf32>
    %551 = math.tanh %550 : vector<8x128xf32>
    %cst_270 = arith.constant 5.000000e-01 : f32
    %552 = vector.broadcast %cst_270 : f32 to vector<8x128xf32>
    %553 = arith.mulf %552, %551 : vector<8x128xf32>
    %cst_271 = arith.constant 5.000000e-01 : f32
    %554 = vector.broadcast %cst_271 : f32 to vector<8x128xf32>
    %555 = arith.addf %553, %554 : vector<8x128xf32>
    %556 = vector.extract_strided_slice %531 {offsets = [0, 256], sizes = [8, 128], strides = [1, 1]} : vector<8x384xf32> to vector<8x128xf32>
    %557 = vector.extract_strided_slice %535 {offsets = [0, 256], sizes = [8, 128], strides = [1, 1]} : vector<8x384xf32> to vector<8x128xf32>
    %558 = arith.addf %557, %357 : vector<8x128xf32>
    %559 = arith.mulf %545, %558 : vector<8x128xf32>
    %560 = arith.addf %556, %559 : vector<8x128xf32>
    %561 = math.tanh %560 : vector<8x128xf32>
    %562 = arith.subf %521, %561 : vector<8x128xf32>
    %563 = arith.mulf %555, %562 : vector<8x128xf32>
    %564 = arith.addf %561, %563 : vector<8x128xf32>
    %565 = arith.truncf %564 : vector<8x128xf32> to vector<8x128xbf16>
    %c2_272 = arith.constant 2 : index
    %c0_273 = arith.constant 0 : index
    %c0_274 = arith.constant 0 : index
    %566 = vector.load %arg1[%c2_272, %c0_273, %c0_274] : memref<3x128x384xbf16, #tpu.memory_space<vmem>>, vector<1x128x384xbf16>
    %567 = vector.shape_cast %566 : vector<1x128x384xbf16> to vector<128x384xbf16>
    %cst_275 = arith.constant dense<0.000000e+00> : vector<8x384xf32>
    %568 = tpu.matmul %565, %567, %cst_275 {dimension_numbers = #tpu.dot_dimension_numbers<[1], [0], [0], [1], [0, 0, 1, 1], [], []>} : vector<8x128xbf16>, vector<128x384xbf16>, vector<8x384xf32> -> vector<8x384xf32>
    %c2_276 = arith.constant 2 : index
    %c0_277 = arith.constant 0 : index
    %c0_278 = arith.constant 0 : index
    %569 = vector.load %arg3[%c2_276, %c0_277, %c0_278] : memref<3x1x384xf32, #tpu.memory_space<vmem>>, vector<1x1x384xf32>
    %570 = vector.shape_cast %569 : vector<1x1x384xf32> to vector<1x384xf32>
    %571 = vector.broadcast %570 : vector<1x384xf32> to vector<8x384xf32>
    %572 = arith.addf %568, %571 : vector<8x384xf32>
    %c32_279 = arith.constant 32 : index
    %c0_280 = arith.constant 0 : index
    %573 = vector.load %arg8[%c32_279, %c0_280] : memref<64x384xf32, #tpu.memory_space<vmem>>, vector<8x384xf32>
    tpu.vector_store %arg8[%c32_279, %c0_280], %572 {strides = array<i32>} : memref<64x384xf32, #tpu.memory_space<vmem>>, vector<8x384xf32>,
    %c40_281 = arith.constant 40 : index
    %c0_282 = arith.constant 0 : index
    %574 = vector.load %arg9[%c40_281, %c0_282] : memref<64x384xf32, #tpu.memory_space<vmem>>, vector<8x384xf32>
    %575 = arith.truncf %564 : vector<8x128xf32> to vector<8x128xbf16>
    %c1_283 = arith.constant 1 : index
    %c0_284 = arith.constant 0 : index
    %c0_285 = arith.constant 0 : index
    %576 = vector.load %arg2[%c1_283, %c0_284, %c0_285] : memref<3x128x384xbf16, #tpu.memory_space<vmem>>, vector<1x128x384xbf16>
    %577 = vector.shape_cast %576 : vector<1x128x384xbf16> to vector<128x384xbf16>
    %cst_286 = arith.constant dense<0.000000e+00> : vector<8x384xf32>
    %578 = tpu.matmul %575, %577, %cst_286 {dimension_numbers = #tpu.dot_dimension_numbers<[1], [0], [0], [1], [0, 0, 1, 1], [], []>} : vector<8x128xbf16>, vector<128x384xbf16>, vector<8x384xf32> -> vector<8x384xf32>
    %579 = vector.extract_strided_slice %574 {offsets = [0, 0], sizes = [8, 128], strides = [1, 1]} : vector<8x384xf32> to vector<8x128xf32>
    %580 = vector.extract_strided_slice %578 {offsets = [0, 0], sizes = [8, 128], strides = [1, 1]} : vector<8x384xf32> to vector<8x128xf32>
    %581 = arith.addf %579, %580 : vector<8x128xf32>
    %cst_287 = arith.constant 5.000000e-01 : f32
    %582 = vector.broadcast %cst_287 : f32 to vector<8x128xf32>
    %583 = arith.mulf %582, %581 : vector<8x128xf32>
    %584 = math.tanh %583 : vector<8x128xf32>
    %cst_288 = arith.constant 5.000000e-01 : f32
    %585 = vector.broadcast %cst_288 : f32 to vector<8x128xf32>
    %586 = arith.mulf %585, %584 : vector<8x128xf32>
    %cst_289 = arith.constant 5.000000e-01 : f32
    %587 = vector.broadcast %cst_289 : f32 to vector<8x128xf32>
    %588 = arith.addf %586, %587 : vector<8x128xf32>
    %589 = vector.extract_strided_slice %574 {offsets = [0, 128], sizes = [8, 128], strides = [1, 1]} : vector<8x384xf32> to vector<8x128xf32>
    %590 = vector.extract_strided_slice %578 {offsets = [0, 128], sizes = [8, 128], strides = [1, 1]} : vector<8x384xf32> to vector<8x128xf32>
    %591 = arith.addf %589, %590 : vector<8x128xf32>
    %cst_290 = arith.constant 5.000000e-01 : f32
    %592 = vector.broadcast %cst_290 : f32 to vector<8x128xf32>
    %593 = arith.mulf %592, %591 : vector<8x128xf32>
    %594 = math.tanh %593 : vector<8x128xf32>
    %cst_291 = arith.constant 5.000000e-01 : f32
    %595 = vector.broadcast %cst_291 : f32 to vector<8x128xf32>
    %596 = arith.mulf %595, %594 : vector<8x128xf32>
    %cst_292 = arith.constant 5.000000e-01 : f32
    %597 = vector.broadcast %cst_292 : f32 to vector<8x128xf32>
    %598 = arith.addf %596, %597 : vector<8x128xf32>
    %599 = vector.extract_strided_slice %574 {offsets = [0, 256], sizes = [8, 128], strides = [1, 1]} : vector<8x384xf32> to vector<8x128xf32>
    %600 = vector.extract_strided_slice %578 {offsets = [0, 256], sizes = [8, 128], strides = [1, 1]} : vector<8x384xf32> to vector<8x128xf32>
    %601 = arith.addf %600, %357 : vector<8x128xf32>
    %602 = arith.mulf %588, %601 : vector<8x128xf32>
    %603 = arith.addf %599, %602 : vector<8x128xf32>
    %604 = math.tanh %603 : vector<8x128xf32>
    %605 = arith.subf %564, %604 : vector<8x128xf32>
    %606 = arith.mulf %598, %605 : vector<8x128xf32>
    %607 = arith.addf %604, %606 : vector<8x128xf32>
    %608 = arith.truncf %607 : vector<8x128xf32> to vector<8x128xbf16>
    %c2_293 = arith.constant 2 : index
    %c0_294 = arith.constant 0 : index
    %c0_295 = arith.constant 0 : index
    %609 = vector.load %arg1[%c2_293, %c0_294, %c0_295] : memref<3x128x384xbf16, #tpu.memory_space<vmem>>, vector<1x128x384xbf16>
    %610 = vector.shape_cast %609 : vector<1x128x384xbf16> to vector<128x384xbf16>
    %cst_296 = arith.constant dense<0.000000e+00> : vector<8x384xf32>
    %611 = tpu.matmul %608, %610, %cst_296 {dimension_numbers = #tpu.dot_dimension_numbers<[1], [0], [0], [1], [0, 0, 1, 1], [], []>} : vector<8x128xbf16>, vector<128x384xbf16>, vector<8x384xf32> -> vector<8x384xf32>
    %c2_297 = arith.constant 2 : index
    %c0_298 = arith.constant 0 : index
    %c0_299 = arith.constant 0 : index
    %612 = vector.load %arg3[%c2_297, %c0_298, %c0_299] : memref<3x1x384xf32, #tpu.memory_space<vmem>>, vector<1x1x384xf32>
    %613 = vector.shape_cast %612 : vector<1x1x384xf32> to vector<1x384xf32>
    %614 = vector.broadcast %613 : vector<1x384xf32> to vector<8x384xf32>
    %615 = arith.addf %611, %614 : vector<8x384xf32>
    %c40_300 = arith.constant 40 : index
    %c0_301 = arith.constant 0 : index
    %616 = vector.load %arg8[%c40_300, %c0_301] : memref<64x384xf32, #tpu.memory_space<vmem>>, vector<8x384xf32>
    tpu.vector_store %arg8[%c40_300, %c0_301], %615 {strides = array<i32>} : memref<64x384xf32, #tpu.memory_space<vmem>>, vector<8x384xf32>,
    %c48_302 = arith.constant 48 : index
    %c0_303 = arith.constant 0 : index
    %617 = vector.load %arg9[%c48_302, %c0_303] : memref<64x384xf32, #tpu.memory_space<vmem>>, vector<8x384xf32>
    %618 = arith.truncf %607 : vector<8x128xf32> to vector<8x128xbf16>
    %c1_304 = arith.constant 1 : index
    %c0_305 = arith.constant 0 : index
    %c0_306 = arith.constant 0 : index
    %619 = vector.load %arg2[%c1_304, %c0_305, %c0_306] : memref<3x128x384xbf16, #tpu.memory_space<vmem>>, vector<1x128x384xbf16>
    %620 = vector.shape_cast %619 : vector<1x128x384xbf16> to vector<128x384xbf16>
    %cst_307 = arith.constant dense<0.000000e+00> : vector<8x384xf32>
    %621 = tpu.matmul %618, %620, %cst_307 {dimension_numbers = #tpu.dot_dimension_numbers<[1], [0], [0], [1], [0, 0, 1, 1], [], []>} : vector<8x128xbf16>, vector<128x384xbf16>, vector<8x384xf32> -> vector<8x384xf32>
    %622 = vector.extract_strided_slice %617 {offsets = [0, 0], sizes = [8, 128], strides = [1, 1]} : vector<8x384xf32> to vector<8x128xf32>
    %623 = vector.extract_strided_slice %621 {offsets = [0, 0], sizes = [8, 128], strides = [1, 1]} : vector<8x384xf32> to vector<8x128xf32>
    %624 = arith.addf %622, %623 : vector<8x128xf32>
    %cst_308 = arith.constant 5.000000e-01 : f32
    %625 = vector.broadcast %cst_308 : f32 to vector<8x128xf32>
    %626 = arith.mulf %625, %624 : vector<8x128xf32>
    %627 = math.tanh %626 : vector<8x128xf32>
    %cst_309 = arith.constant 5.000000e-01 : f32
    %628 = vector.broadcast %cst_309 : f32 to vector<8x128xf32>
    %629 = arith.mulf %628, %627 : vector<8x128xf32>
    %cst_310 = arith.constant 5.000000e-01 : f32
    %630 = vector.broadcast %cst_310 : f32 to vector<8x128xf32>
    %631 = arith.addf %629, %630 : vector<8x128xf32>
    %632 = vector.extract_strided_slice %617 {offsets = [0, 128], sizes = [8, 128], strides = [1, 1]} : vector<8x384xf32> to vector<8x128xf32>
    %633 = vector.extract_strided_slice %621 {offsets = [0, 128], sizes = [8, 128], strides = [1, 1]} : vector<8x384xf32> to vector<8x128xf32>
    %634 = arith.addf %632, %633 : vector<8x128xf32>
    %cst_311 = arith.constant 5.000000e-01 : f32
    %635 = vector.broadcast %cst_311 : f32 to vector<8x128xf32>
    %636 = arith.mulf %635, %634 : vector<8x128xf32>
    %637 = math.tanh %636 : vector<8x128xf32>
    %cst_312 = arith.constant 5.000000e-01 : f32
    %638 = vector.broadcast %cst_312 : f32 to vector<8x128xf32>
    %639 = arith.mulf %638, %637 : vector<8x128xf32>
    %cst_313 = arith.constant 5.000000e-01 : f32
    %640 = vector.broadcast %cst_313 : f32 to vector<8x128xf32>
    %641 = arith.addf %639, %640 : vector<8x128xf32>
    %642 = vector.extract_strided_slice %617 {offsets = [0, 256], sizes = [8, 128], strides = [1, 1]} : vector<8x384xf32> to vector<8x128xf32>
    %643 = vector.extract_strided_slice %621 {offsets = [0, 256], sizes = [8, 128], strides = [1, 1]} : vector<8x384xf32> to vector<8x128xf32>
    %644 = arith.addf %643, %357 : vector<8x128xf32>
    %645 = arith.mulf %631, %644 : vector<8x128xf32>
    %646 = arith.addf %642, %645 : vector<8x128xf32>
    %647 = math.tanh %646 : vector<8x128xf32>
    %648 = arith.subf %607, %647 : vector<8x128xf32>
    %649 = arith.mulf %641, %648 : vector<8x128xf32>
    %650 = arith.addf %647, %649 : vector<8x128xf32>
    %651 = arith.truncf %650 : vector<8x128xf32> to vector<8x128xbf16>
    %c2_314 = arith.constant 2 : index
    %c0_315 = arith.constant 0 : index
    %c0_316 = arith.constant 0 : index
    %652 = vector.load %arg1[%c2_314, %c0_315, %c0_316] : memref<3x128x384xbf16, #tpu.memory_space<vmem>>, vector<1x128x384xbf16>
    %653 = vector.shape_cast %652 : vector<1x128x384xbf16> to vector<128x384xbf16>
    %cst_317 = arith.constant dense<0.000000e+00> : vector<8x384xf32>
    %654 = tpu.matmul %651, %653, %cst_317 {dimension_numbers = #tpu.dot_dimension_numbers<[1], [0], [0], [1], [0, 0, 1, 1], [], []>} : vector<8x128xbf16>, vector<128x384xbf16>, vector<8x384xf32> -> vector<8x384xf32>
    %c2_318 = arith.constant 2 : index
    %c0_319 = arith.constant 0 : index
    %c0_320 = arith.constant 0 : index
    %655 = vector.load %arg3[%c2_318, %c0_319, %c0_320] : memref<3x1x384xf32, #tpu.memory_space<vmem>>, vector<1x1x384xf32>
    %656 = vector.shape_cast %655 : vector<1x1x384xf32> to vector<1x384xf32>
    %657 = vector.broadcast %656 : vector<1x384xf32> to vector<8x384xf32>
    %658 = arith.addf %654, %657 : vector<8x384xf32>
    %c48_321 = arith.constant 48 : index
    %c0_322 = arith.constant 0 : index
    %659 = vector.load %arg8[%c48_321, %c0_322] : memref<64x384xf32, #tpu.memory_space<vmem>>, vector<8x384xf32>
    tpu.vector_store %arg8[%c48_321, %c0_322], %658 {strides = array<i32>} : memref<64x384xf32, #tpu.memory_space<vmem>>, vector<8x384xf32>,
    %c56_323 = arith.constant 56 : index
    %c0_324 = arith.constant 0 : index
    %660 = vector.load %arg9[%c56_323, %c0_324] : memref<64x384xf32, #tpu.memory_space<vmem>>, vector<8x384xf32>
    %661 = arith.truncf %650 : vector<8x128xf32> to vector<8x128xbf16>
    %c1_325 = arith.constant 1 : index
    %c0_326 = arith.constant 0 : index
    %c0_327 = arith.constant 0 : index
    %662 = vector.load %arg2[%c1_325, %c0_326, %c0_327] : memref<3x128x384xbf16, #tpu.memory_space<vmem>>, vector<1x128x384xbf16>
    %663 = vector.shape_cast %662 : vector<1x128x384xbf16> to vector<128x384xbf16>
    %cst_328 = arith.constant dense<0.000000e+00> : vector<8x384xf32>
    %664 = tpu.matmul %661, %663, %cst_328 {dimension_numbers = #tpu.dot_dimension_numbers<[1], [0], [0], [1], [0, 0, 1, 1], [], []>} : vector<8x128xbf16>, vector<128x384xbf16>, vector<8x384xf32> -> vector<8x384xf32>
    %665 = vector.extract_strided_slice %660 {offsets = [0, 0], sizes = [8, 128], strides = [1, 1]} : vector<8x384xf32> to vector<8x128xf32>
    %666 = vector.extract_strided_slice %664 {offsets = [0, 0], sizes = [8, 128], strides = [1, 1]} : vector<8x384xf32> to vector<8x128xf32>
    %667 = arith.addf %665, %666 : vector<8x128xf32>
    %cst_329 = arith.constant 5.000000e-01 : f32
    %668 = vector.broadcast %cst_329 : f32 to vector<8x128xf32>
    %669 = arith.mulf %668, %667 : vector<8x128xf32>
    %670 = math.tanh %669 : vector<8x128xf32>
    %cst_330 = arith.constant 5.000000e-01 : f32
    %671 = vector.broadcast %cst_330 : f32 to vector<8x128xf32>
    %672 = arith.mulf %671, %670 : vector<8x128xf32>
    %cst_331 = arith.constant 5.000000e-01 : f32
    %673 = vector.broadcast %cst_331 : f32 to vector<8x128xf32>
    %674 = arith.addf %672, %673 : vector<8x128xf32>
    %675 = vector.extract_strided_slice %660 {offsets = [0, 128], sizes = [8, 128], strides = [1, 1]} : vector<8x384xf32> to vector<8x128xf32>
    %676 = vector.extract_strided_slice %664 {offsets = [0, 128], sizes = [8, 128], strides = [1, 1]} : vector<8x384xf32> to vector<8x128xf32>
    %677 = arith.addf %675, %676 : vector<8x128xf32>
    %cst_332 = arith.constant 5.000000e-01 : f32
    %678 = vector.broadcast %cst_332 : f32 to vector<8x128xf32>
    %679 = arith.mulf %678, %677 : vector<8x128xf32>
    %680 = math.tanh %679 : vector<8x128xf32>
    %cst_333 = arith.constant 5.000000e-01 : f32
    %681 = vector.broadcast %cst_333 : f32 to vector<8x128xf32>
    %682 = arith.mulf %681, %680 : vector<8x128xf32>
    %cst_334 = arith.constant 5.000000e-01 : f32
    %683 = vector.broadcast %cst_334 : f32 to vector<8x128xf32>
    %684 = arith.addf %682, %683 : vector<8x128xf32>
    %685 = vector.extract_strided_slice %660 {offsets = [0, 256], sizes = [8, 128], strides = [1, 1]} : vector<8x384xf32> to vector<8x128xf32>
    %686 = vector.extract_strided_slice %664 {offsets = [0, 256], sizes = [8, 128], strides = [1, 1]} : vector<8x384xf32> to vector<8x128xf32>
    %687 = arith.addf %686, %357 : vector<8x128xf32>
    %688 = arith.mulf %674, %687 : vector<8x128xf32>
    %689 = arith.addf %685, %688 : vector<8x128xf32>
    %690 = math.tanh %689 : vector<8x128xf32>
    %691 = arith.subf %650, %690 : vector<8x128xf32>
    %692 = arith.mulf %684, %691 : vector<8x128xf32>
    %693 = arith.addf %690, %692 : vector<8x128xf32>
    %694 = arith.truncf %693 : vector<8x128xf32> to vector<8x128xbf16>
    %c2_335 = arith.constant 2 : index
    %c0_336 = arith.constant 0 : index
    %c0_337 = arith.constant 0 : index
    %695 = vector.load %arg1[%c2_335, %c0_336, %c0_337] : memref<3x128x384xbf16, #tpu.memory_space<vmem>>, vector<1x128x384xbf16>
    %696 = vector.shape_cast %695 : vector<1x128x384xbf16> to vector<128x384xbf16>
    %cst_338 = arith.constant dense<0.000000e+00> : vector<8x384xf32>
    %697 = tpu.matmul %694, %696, %cst_338 {dimension_numbers = #tpu.dot_dimension_numbers<[1], [0], [0], [1], [0, 0, 1, 1], [], []>} : vector<8x128xbf16>, vector<128x384xbf16>, vector<8x384xf32> -> vector<8x384xf32>
    %c2_339 = arith.constant 2 : index
    %c0_340 = arith.constant 0 : index
    %c0_341 = arith.constant 0 : index
    %698 = vector.load %arg3[%c2_339, %c0_340, %c0_341] : memref<3x1x384xf32, #tpu.memory_space<vmem>>, vector<1x1x384xf32>
    %699 = vector.shape_cast %698 : vector<1x1x384xf32> to vector<1x384xf32>
    %700 = vector.broadcast %699 : vector<1x384xf32> to vector<8x384xf32>
    %701 = arith.addf %697, %700 : vector<8x384xf32>
    %c56_342 = arith.constant 56 : index
    %c0_343 = arith.constant 0 : index
    %702 = vector.load %arg8[%c56_342, %c0_343] : memref<64x384xf32, #tpu.memory_space<vmem>>, vector<8x384xf32>
    tpu.vector_store %arg8[%c56_342, %c0_343], %701 {strides = array<i32>} : memref<64x384xf32, #tpu.memory_space<vmem>>, vector<8x384xf32>,
    %c2_344 = arith.constant 2 : index
    %c0_345 = arith.constant 0 : index
    %c0_346 = arith.constant 0 : index
    %703 = vector.load %arg4[%c2_344, %c0_345, %c0_346] : memref<3x8x128xf32, #tpu.memory_space<vmem>>, vector<1x8x128xf32>
    %704 = vector.shape_cast %703 : vector<1x8x128xf32> to vector<8x128xf32>
    %cst_347 = arith.constant 0.000000e+00 : f32
    %705 = vector.broadcast %cst_347 : f32 to vector<8x128xf32>
    %c0_348 = arith.constant 0 : index
    %c0_349 = arith.constant 0 : index
    %706 = vector.load %arg8[%c0_348, %c0_349] : memref<64x384xf32, #tpu.memory_space<vmem>>, vector<8x384xf32>
    %707 = arith.truncf %705 : vector<8x128xf32> to vector<8x128xbf16>
    %c2_350 = arith.constant 2 : index
    %c0_351 = arith.constant 0 : index
    %c0_352 = arith.constant 0 : index
    %708 = vector.load %arg2[%c2_350, %c0_351, %c0_352] : memref<3x128x384xbf16, #tpu.memory_space<vmem>>, vector<1x128x384xbf16>
    %709 = vector.shape_cast %708 : vector<1x128x384xbf16> to vector<128x384xbf16>
    %cst_353 = arith.constant dense<0.000000e+00> : vector<8x384xf32>
    %710 = tpu.matmul %707, %709, %cst_353 {dimension_numbers = #tpu.dot_dimension_numbers<[1], [0], [0], [1], [0, 0, 1, 1], [], []>} : vector<8x128xbf16>, vector<128x384xbf16>, vector<8x384xf32> -> vector<8x384xf32>
    %711 = vector.extract_strided_slice %706 {offsets = [0, 0], sizes = [8, 128], strides = [1, 1]} : vector<8x384xf32> to vector<8x128xf32>
    %712 = vector.extract_strided_slice %710 {offsets = [0, 0], sizes = [8, 128], strides = [1, 1]} : vector<8x384xf32> to vector<8x128xf32>
    %713 = arith.addf %711, %712 : vector<8x128xf32>
    %cst_354 = arith.constant 5.000000e-01 : f32
    %714 = vector.broadcast %cst_354 : f32 to vector<8x128xf32>
    %715 = arith.mulf %714, %713 : vector<8x128xf32>
    %716 = math.tanh %715 : vector<8x128xf32>
    %cst_355 = arith.constant 5.000000e-01 : f32
    %717 = vector.broadcast %cst_355 : f32 to vector<8x128xf32>
    %718 = arith.mulf %717, %716 : vector<8x128xf32>
    %cst_356 = arith.constant 5.000000e-01 : f32
    %719 = vector.broadcast %cst_356 : f32 to vector<8x128xf32>
    %720 = arith.addf %718, %719 : vector<8x128xf32>
    %721 = vector.extract_strided_slice %706 {offsets = [0, 128], sizes = [8, 128], strides = [1, 1]} : vector<8x384xf32> to vector<8x128xf32>
    %722 = vector.extract_strided_slice %710 {offsets = [0, 128], sizes = [8, 128], strides = [1, 1]} : vector<8x384xf32> to vector<8x128xf32>
    %723 = arith.addf %721, %722 : vector<8x128xf32>
    %cst_357 = arith.constant 5.000000e-01 : f32
    %724 = vector.broadcast %cst_357 : f32 to vector<8x128xf32>
    %725 = arith.mulf %724, %723 : vector<8x128xf32>
    %726 = math.tanh %725 : vector<8x128xf32>
    %cst_358 = arith.constant 5.000000e-01 : f32
    %727 = vector.broadcast %cst_358 : f32 to vector<8x128xf32>
    %728 = arith.mulf %727, %726 : vector<8x128xf32>
    %cst_359 = arith.constant 5.000000e-01 : f32
    %729 = vector.broadcast %cst_359 : f32 to vector<8x128xf32>
    %730 = arith.addf %728, %729 : vector<8x128xf32>
    %731 = vector.extract_strided_slice %706 {offsets = [0, 256], sizes = [8, 128], strides = [1, 1]} : vector<8x384xf32> to vector<8x128xf32>
    %732 = vector.extract_strided_slice %710 {offsets = [0, 256], sizes = [8, 128], strides = [1, 1]} : vector<8x384xf32> to vector<8x128xf32>
    %733 = arith.addf %732, %704 : vector<8x128xf32>
    %734 = arith.mulf %720, %733 : vector<8x128xf32>
    %735 = arith.addf %731, %734 : vector<8x128xf32>
    %736 = math.tanh %735 : vector<8x128xf32>
    %737 = arith.subf %705, %736 : vector<8x128xf32>
    %738 = arith.mulf %730, %737 : vector<8x128xf32>
    %739 = arith.addf %736, %738 : vector<8x128xf32>
    %c8_360 = arith.constant 8 : index
    %c0_361 = arith.constant 0 : index
    %740 = vector.load %arg8[%c8_360, %c0_361] : memref<64x384xf32, #tpu.memory_space<vmem>>, vector<8x384xf32>
    %741 = arith.truncf %739 : vector<8x128xf32> to vector<8x128xbf16>
    %c2_362 = arith.constant 2 : index
    %c0_363 = arith.constant 0 : index
    %c0_364 = arith.constant 0 : index
    %742 = vector.load %arg2[%c2_362, %c0_363, %c0_364] : memref<3x128x384xbf16, #tpu.memory_space<vmem>>, vector<1x128x384xbf16>
    %743 = vector.shape_cast %742 : vector<1x128x384xbf16> to vector<128x384xbf16>
    %cst_365 = arith.constant dense<0.000000e+00> : vector<8x384xf32>
    %744 = tpu.matmul %741, %743, %cst_365 {dimension_numbers = #tpu.dot_dimension_numbers<[1], [0], [0], [1], [0, 0, 1, 1], [], []>} : vector<8x128xbf16>, vector<128x384xbf16>, vector<8x384xf32> -> vector<8x384xf32>
    %745 = vector.extract_strided_slice %740 {offsets = [0, 0], sizes = [8, 128], strides = [1, 1]} : vector<8x384xf32> to vector<8x128xf32>
    %746 = vector.extract_strided_slice %744 {offsets = [0, 0], sizes = [8, 128], strides = [1, 1]} : vector<8x384xf32> to vector<8x128xf32>
    %747 = arith.addf %745, %746 : vector<8x128xf32>
    %cst_366 = arith.constant 5.000000e-01 : f32
    %748 = vector.broadcast %cst_366 : f32 to vector<8x128xf32>
    %749 = arith.mulf %748, %747 : vector<8x128xf32>
    %750 = math.tanh %749 : vector<8x128xf32>
    %cst_367 = arith.constant 5.000000e-01 : f32
    %751 = vector.broadcast %cst_367 : f32 to vector<8x128xf32>
    %752 = arith.mulf %751, %750 : vector<8x128xf32>
    %cst_368 = arith.constant 5.000000e-01 : f32
    %753 = vector.broadcast %cst_368 : f32 to vector<8x128xf32>
    %754 = arith.addf %752, %753 : vector<8x128xf32>
    %755 = vector.extract_strided_slice %740 {offsets = [0, 128], sizes = [8, 128], strides = [1, 1]} : vector<8x384xf32> to vector<8x128xf32>
    %756 = vector.extract_strided_slice %744 {offsets = [0, 128], sizes = [8, 128], strides = [1, 1]} : vector<8x384xf32> to vector<8x128xf32>
    %757 = arith.addf %755, %756 : vector<8x128xf32>
    %cst_369 = arith.constant 5.000000e-01 : f32
    %758 = vector.broadcast %cst_369 : f32 to vector<8x128xf32>
    %759 = arith.mulf %758, %757 : vector<8x128xf32>
    %760 = math.tanh %759 : vector<8x128xf32>
    %cst_370 = arith.constant 5.000000e-01 : f32
    %761 = vector.broadcast %cst_370 : f32 to vector<8x128xf32>
    %762 = arith.mulf %761, %760 : vector<8x128xf32>
    %cst_371 = arith.constant 5.000000e-01 : f32
    %763 = vector.broadcast %cst_371 : f32 to vector<8x128xf32>
    %764 = arith.addf %762, %763 : vector<8x128xf32>
    %765 = vector.extract_strided_slice %740 {offsets = [0, 256], sizes = [8, 128], strides = [1, 1]} : vector<8x384xf32> to vector<8x128xf32>
    %766 = vector.extract_strided_slice %744 {offsets = [0, 256], sizes = [8, 128], strides = [1, 1]} : vector<8x384xf32> to vector<8x128xf32>
    %767 = arith.addf %766, %704 : vector<8x128xf32>
    %768 = arith.mulf %754, %767 : vector<8x128xf32>
    %769 = arith.addf %765, %768 : vector<8x128xf32>
    %770 = math.tanh %769 : vector<8x128xf32>
    %771 = arith.subf %739, %770 : vector<8x128xf32>
    %772 = arith.mulf %764, %771 : vector<8x128xf32>
    %773 = arith.addf %770, %772 : vector<8x128xf32>
    %c16_372 = arith.constant 16 : index
    %c0_373 = arith.constant 0 : index
    %774 = vector.load %arg8[%c16_372, %c0_373] : memref<64x384xf32, #tpu.memory_space<vmem>>, vector<8x384xf32>
    %775 = arith.truncf %773 : vector<8x128xf32> to vector<8x128xbf16>
    %c2_374 = arith.constant 2 : index
    %c0_375 = arith.constant 0 : index
    %c0_376 = arith.constant 0 : index
    %776 = vector.load %arg2[%c2_374, %c0_375, %c0_376] : memref<3x128x384xbf16, #tpu.memory_space<vmem>>, vector<1x128x384xbf16>
    %777 = vector.shape_cast %776 : vector<1x128x384xbf16> to vector<128x384xbf16>
    %cst_377 = arith.constant dense<0.000000e+00> : vector<8x384xf32>
    %778 = tpu.matmul %775, %777, %cst_377 {dimension_numbers = #tpu.dot_dimension_numbers<[1], [0], [0], [1], [0, 0, 1, 1], [], []>} : vector<8x128xbf16>, vector<128x384xbf16>, vector<8x384xf32> -> vector<8x384xf32>
    %779 = vector.extract_strided_slice %774 {offsets = [0, 0], sizes = [8, 128], strides = [1, 1]} : vector<8x384xf32> to vector<8x128xf32>
    %780 = vector.extract_strided_slice %778 {offsets = [0, 0], sizes = [8, 128], strides = [1, 1]} : vector<8x384xf32> to vector<8x128xf32>
    %781 = arith.addf %779, %780 : vector<8x128xf32>
    %cst_378 = arith.constant 5.000000e-01 : f32
    %782 = vector.broadcast %cst_378 : f32 to vector<8x128xf32>
    %783 = arith.mulf %782, %781 : vector<8x128xf32>
    %784 = math.tanh %783 : vector<8x128xf32>
    %cst_379 = arith.constant 5.000000e-01 : f32
    %785 = vector.broadcast %cst_379 : f32 to vector<8x128xf32>
    %786 = arith.mulf %785, %784 : vector<8x128xf32>
    %cst_380 = arith.constant 5.000000e-01 : f32
    %787 = vector.broadcast %cst_380 : f32 to vector<8x128xf32>
    %788 = arith.addf %786, %787 : vector<8x128xf32>
    %789 = vector.extract_strided_slice %774 {offsets = [0, 128], sizes = [8, 128], strides = [1, 1]} : vector<8x384xf32> to vector<8x128xf32>
    %790 = vector.extract_strided_slice %778 {offsets = [0, 128], sizes = [8, 128], strides = [1, 1]} : vector<8x384xf32> to vector<8x128xf32>
    %791 = arith.addf %789, %790 : vector<8x128xf32>
    %cst_381 = arith.constant 5.000000e-01 : f32
    %792 = vector.broadcast %cst_381 : f32 to vector<8x128xf32>
    %793 = arith.mulf %792, %791 : vector<8x128xf32>
    %794 = math.tanh %793 : vector<8x128xf32>
    %cst_382 = arith.constant 5.000000e-01 : f32
    %795 = vector.broadcast %cst_382 : f32 to vector<8x128xf32>
    %796 = arith.mulf %795, %794 : vector<8x128xf32>
    %cst_383 = arith.constant 5.000000e-01 : f32
    %797 = vector.broadcast %cst_383 : f32 to vector<8x128xf32>
    %798 = arith.addf %796, %797 : vector<8x128xf32>
    %799 = vector.extract_strided_slice %774 {offsets = [0, 256], sizes = [8, 128], strides = [1, 1]} : vector<8x384xf32> to vector<8x128xf32>
    %800 = vector.extract_strided_slice %778 {offsets = [0, 256], sizes = [8, 128], strides = [1, 1]} : vector<8x384xf32> to vector<8x128xf32>
    %801 = arith.addf %800, %704 : vector<8x128xf32>
    %802 = arith.mulf %788, %801 : vector<8x128xf32>
    %803 = arith.addf %799, %802 : vector<8x128xf32>
    %804 = math.tanh %803 : vector<8x128xf32>
    %805 = arith.subf %773, %804 : vector<8x128xf32>
    %806 = arith.mulf %798, %805 : vector<8x128xf32>
    %807 = arith.addf %804, %806 : vector<8x128xf32>
    %c24_384 = arith.constant 24 : index
    %c0_385 = arith.constant 0 : index
    %808 = vector.load %arg8[%c24_384, %c0_385] : memref<64x384xf32, #tpu.memory_space<vmem>>, vector<8x384xf32>
    %809 = arith.truncf %807 : vector<8x128xf32> to vector<8x128xbf16>
    %c2_386 = arith.constant 2 : index
    %c0_387 = arith.constant 0 : index
    %c0_388 = arith.constant 0 : index
    %810 = vector.load %arg2[%c2_386, %c0_387, %c0_388] : memref<3x128x384xbf16, #tpu.memory_space<vmem>>, vector<1x128x384xbf16>
    %811 = vector.shape_cast %810 : vector<1x128x384xbf16> to vector<128x384xbf16>
    %cst_389 = arith.constant dense<0.000000e+00> : vector<8x384xf32>
    %812 = tpu.matmul %809, %811, %cst_389 {dimension_numbers = #tpu.dot_dimension_numbers<[1], [0], [0], [1], [0, 0, 1, 1], [], []>} : vector<8x128xbf16>, vector<128x384xbf16>, vector<8x384xf32> -> vector<8x384xf32>
    %813 = vector.extract_strided_slice %808 {offsets = [0, 0], sizes = [8, 128], strides = [1, 1]} : vector<8x384xf32> to vector<8x128xf32>
    %814 = vector.extract_strided_slice %812 {offsets = [0, 0], sizes = [8, 128], strides = [1, 1]} : vector<8x384xf32> to vector<8x128xf32>
    %815 = arith.addf %813, %814 : vector<8x128xf32>
    %cst_390 = arith.constant 5.000000e-01 : f32
    %816 = vector.broadcast %cst_390 : f32 to vector<8x128xf32>
    %817 = arith.mulf %816, %815 : vector<8x128xf32>
    %818 = math.tanh %817 : vector<8x128xf32>
    %cst_391 = arith.constant 5.000000e-01 : f32
    %819 = vector.broadcast %cst_391 : f32 to vector<8x128xf32>
    %820 = arith.mulf %819, %818 : vector<8x128xf32>
    %cst_392 = arith.constant 5.000000e-01 : f32
    %821 = vector.broadcast %cst_392 : f32 to vector<8x128xf32>
    %822 = arith.addf %820, %821 : vector<8x128xf32>
    %823 = vector.extract_strided_slice %808 {offsets = [0, 128], sizes = [8, 128], strides = [1, 1]} : vector<8x384xf32> to vector<8x128xf32>
    %824 = vector.extract_strided_slice %812 {offsets = [0, 128], sizes = [8, 128], strides = [1, 1]} : vector<8x384xf32> to vector<8x128xf32>
    %825 = arith.addf %823, %824 : vector<8x128xf32>
    %cst_393 = arith.constant 5.000000e-01 : f32
    %826 = vector.broadcast %cst_393 : f32 to vector<8x128xf32>
    %827 = arith.mulf %826, %825 : vector<8x128xf32>
    %828 = math.tanh %827 : vector<8x128xf32>
    %cst_394 = arith.constant 5.000000e-01 : f32
    %829 = vector.broadcast %cst_394 : f32 to vector<8x128xf32>
    %830 = arith.mulf %829, %828 : vector<8x128xf32>
    %cst_395 = arith.constant 5.000000e-01 : f32
    %831 = vector.broadcast %cst_395 : f32 to vector<8x128xf32>
    %832 = arith.addf %830, %831 : vector<8x128xf32>
    %833 = vector.extract_strided_slice %808 {offsets = [0, 256], sizes = [8, 128], strides = [1, 1]} : vector<8x384xf32> to vector<8x128xf32>
    %834 = vector.extract_strided_slice %812 {offsets = [0, 256], sizes = [8, 128], strides = [1, 1]} : vector<8x384xf32> to vector<8x128xf32>
    %835 = arith.addf %834, %704 : vector<8x128xf32>
    %836 = arith.mulf %822, %835 : vector<8x128xf32>
    %837 = arith.addf %833, %836 : vector<8x128xf32>
    %838 = math.tanh %837 : vector<8x128xf32>
    %839 = arith.subf %807, %838 : vector<8x128xf32>
    %840 = arith.mulf %832, %839 : vector<8x128xf32>
    %841 = arith.addf %838, %840 : vector<8x128xf32>
    %c32_396 = arith.constant 32 : index
    %c0_397 = arith.constant 0 : index
    %842 = vector.load %arg8[%c32_396, %c0_397] : memref<64x384xf32, #tpu.memory_space<vmem>>, vector<8x384xf32>
    %843 = arith.truncf %841 : vector<8x128xf32> to vector<8x128xbf16>
    %c2_398 = arith.constant 2 : index
    %c0_399 = arith.constant 0 : index
    %c0_400 = arith.constant 0 : index
    %844 = vector.load %arg2[%c2_398, %c0_399, %c0_400] : memref<3x128x384xbf16, #tpu.memory_space<vmem>>, vector<1x128x384xbf16>
    %845 = vector.shape_cast %844 : vector<1x128x384xbf16> to vector<128x384xbf16>
    %cst_401 = arith.constant dense<0.000000e+00> : vector<8x384xf32>
    %846 = tpu.matmul %843, %845, %cst_401 {dimension_numbers = #tpu.dot_dimension_numbers<[1], [0], [0], [1], [0, 0, 1, 1], [], []>} : vector<8x128xbf16>, vector<128x384xbf16>, vector<8x384xf32> -> vector<8x384xf32>
    %847 = vector.extract_strided_slice %842 {offsets = [0, 0], sizes = [8, 128], strides = [1, 1]} : vector<8x384xf32> to vector<8x128xf32>
    %848 = vector.extract_strided_slice %846 {offsets = [0, 0], sizes = [8, 128], strides = [1, 1]} : vector<8x384xf32> to vector<8x128xf32>
    %849 = arith.addf %847, %848 : vector<8x128xf32>
    %cst_402 = arith.constant 5.000000e-01 : f32
    %850 = vector.broadcast %cst_402 : f32 to vector<8x128xf32>
    %851 = arith.mulf %850, %849 : vector<8x128xf32>
    %852 = math.tanh %851 : vector<8x128xf32>
    %cst_403 = arith.constant 5.000000e-01 : f32
    %853 = vector.broadcast %cst_403 : f32 to vector<8x128xf32>
    %854 = arith.mulf %853, %852 : vector<8x128xf32>
    %cst_404 = arith.constant 5.000000e-01 : f32
    %855 = vector.broadcast %cst_404 : f32 to vector<8x128xf32>
    %856 = arith.addf %854, %855 : vector<8x128xf32>
    %857 = vector.extract_strided_slice %842 {offsets = [0, 128], sizes = [8, 128], strides = [1, 1]} : vector<8x384xf32> to vector<8x128xf32>
    %858 = vector.extract_strided_slice %846 {offsets = [0, 128], sizes = [8, 128], strides = [1, 1]} : vector<8x384xf32> to vector<8x128xf32>
    %859 = arith.addf %857, %858 : vector<8x128xf32>
    %cst_405 = arith.constant 5.000000e-01 : f32
    %860 = vector.broadcast %cst_405 : f32 to vector<8x128xf32>
    %861 = arith.mulf %860, %859 : vector<8x128xf32>
    %862 = math.tanh %861 : vector<8x128xf32>
    %cst_406 = arith.constant 5.000000e-01 : f32
    %863 = vector.broadcast %cst_406 : f32 to vector<8x128xf32>
    %864 = arith.mulf %863, %862 : vector<8x128xf32>
    %cst_407 = arith.constant 5.000000e-01 : f32
    %865 = vector.broadcast %cst_407 : f32 to vector<8x128xf32>
    %866 = arith.addf %864, %865 : vector<8x128xf32>
    %867 = vector.extract_strided_slice %842 {offsets = [0, 256], sizes = [8, 128], strides = [1, 1]} : vector<8x384xf32> to vector<8x128xf32>
    %868 = vector.extract_strided_slice %846 {offsets = [0, 256], sizes = [8, 128], strides = [1, 1]} : vector<8x384xf32> to vector<8x128xf32>
    %869 = arith.addf %868, %704 : vector<8x128xf32>
    %870 = arith.mulf %856, %869 : vector<8x128xf32>
    %871 = arith.addf %867, %870 : vector<8x128xf32>
    %872 = math.tanh %871 : vector<8x128xf32>
    %873 = arith.subf %841, %872 : vector<8x128xf32>
    %874 = arith.mulf %866, %873 : vector<8x128xf32>
    %875 = arith.addf %872, %874 : vector<8x128xf32>
    %c40_408 = arith.constant 40 : index
    %c0_409 = arith.constant 0 : index
    %876 = vector.load %arg8[%c40_408, %c0_409] : memref<64x384xf32, #tpu.memory_space<vmem>>, vector<8x384xf32>
    %877 = arith.truncf %875 : vector<8x128xf32> to vector<8x128xbf16>
    %c2_410 = arith.constant 2 : index
    %c0_411 = arith.constant 0 : index
    %c0_412 = arith.constant 0 : index
    %878 = vector.load %arg2[%c2_410, %c0_411, %c0_412] : memref<3x128x384xbf16, #tpu.memory_space<vmem>>, vector<1x128x384xbf16>
    %879 = vector.shape_cast %878 : vector<1x128x384xbf16> to vector<128x384xbf16>
    %cst_413 = arith.constant dense<0.000000e+00> : vector<8x384xf32>
    %880 = tpu.matmul %877, %879, %cst_413 {dimension_numbers = #tpu.dot_dimension_numbers<[1], [0], [0], [1], [0, 0, 1, 1], [], []>} : vector<8x128xbf16>, vector<128x384xbf16>, vector<8x384xf32> -> vector<8x384xf32>
    %881 = vector.extract_strided_slice %876 {offsets = [0, 0], sizes = [8, 128], strides = [1, 1]} : vector<8x384xf32> to vector<8x128xf32>
    %882 = vector.extract_strided_slice %880 {offsets = [0, 0], sizes = [8, 128], strides = [1, 1]} : vector<8x384xf32> to vector<8x128xf32>
    %883 = arith.addf %881, %882 : vector<8x128xf32>
    %cst_414 = arith.constant 5.000000e-01 : f32
    %884 = vector.broadcast %cst_414 : f32 to vector<8x128xf32>
    %885 = arith.mulf %884, %883 : vector<8x128xf32>
    %886 = math.tanh %885 : vector<8x128xf32>
    %cst_415 = arith.constant 5.000000e-01 : f32
    %887 = vector.broadcast %cst_415 : f32 to vector<8x128xf32>
    %888 = arith.mulf %887, %886 : vector<8x128xf32>
    %cst_416 = arith.constant 5.000000e-01 : f32
    %889 = vector.broadcast %cst_416 : f32 to vector<8x128xf32>
    %890 = arith.addf %888, %889 : vector<8x128xf32>
    %891 = vector.extract_strided_slice %876 {offsets = [0, 128], sizes = [8, 128], strides = [1, 1]} : vector<8x384xf32> to vector<8x128xf32>
    %892 = vector.extract_strided_slice %880 {offsets = [0, 128], sizes = [8, 128], strides = [1, 1]} : vector<8x384xf32> to vector<8x128xf32>
    %893 = arith.addf %891, %892 : vector<8x128xf32>
    %cst_417 = arith.constant 5.000000e-01 : f32
    %894 = vector.broadcast %cst_417 : f32 to vector<8x128xf32>
    %895 = arith.mulf %894, %893 : vector<8x128xf32>
    %896 = math.tanh %895 : vector<8x128xf32>
    %cst_418 = arith.constant 5.000000e-01 : f32
    %897 = vector.broadcast %cst_418 : f32 to vector<8x128xf32>
    %898 = arith.mulf %897, %896 : vector<8x128xf32>
    %cst_419 = arith.constant 5.000000e-01 : f32
    %899 = vector.broadcast %cst_419 : f32 to vector<8x128xf32>
    %900 = arith.addf %898, %899 : vector<8x128xf32>
    %901 = vector.extract_strided_slice %876 {offsets = [0, 256], sizes = [8, 128], strides = [1, 1]} : vector<8x384xf32> to vector<8x128xf32>
    %902 = vector.extract_strided_slice %880 {offsets = [0, 256], sizes = [8, 128], strides = [1, 1]} : vector<8x384xf32> to vector<8x128xf32>
    %903 = arith.addf %902, %704 : vector<8x128xf32>
    %904 = arith.mulf %890, %903 : vector<8x128xf32>
    %905 = arith.addf %901, %904 : vector<8x128xf32>
    %906 = math.tanh %905 : vector<8x128xf32>
    %907 = arith.subf %875, %906 : vector<8x128xf32>
    %908 = arith.mulf %900, %907 : vector<8x128xf32>
    %909 = arith.addf %906, %908 : vector<8x128xf32>
    %c48_420 = arith.constant 48 : index
    %c0_421 = arith.constant 0 : index
    %910 = vector.load %arg8[%c48_420, %c0_421] : memref<64x384xf32, #tpu.memory_space<vmem>>, vector<8x384xf32>
    %911 = arith.truncf %909 : vector<8x128xf32> to vector<8x128xbf16>
    %c2_422 = arith.constant 2 : index
    %c0_423 = arith.constant 0 : index
    %c0_424 = arith.constant 0 : index
    %912 = vector.load %arg2[%c2_422, %c0_423, %c0_424] : memref<3x128x384xbf16, #tpu.memory_space<vmem>>, vector<1x128x384xbf16>
    %913 = vector.shape_cast %912 : vector<1x128x384xbf16> to vector<128x384xbf16>
    %cst_425 = arith.constant dense<0.000000e+00> : vector<8x384xf32>
    %914 = tpu.matmul %911, %913, %cst_425 {dimension_numbers = #tpu.dot_dimension_numbers<[1], [0], [0], [1], [0, 0, 1, 1], [], []>} : vector<8x128xbf16>, vector<128x384xbf16>, vector<8x384xf32> -> vector<8x384xf32>
    %915 = vector.extract_strided_slice %910 {offsets = [0, 0], sizes = [8, 128], strides = [1, 1]} : vector<8x384xf32> to vector<8x128xf32>
    %916 = vector.extract_strided_slice %914 {offsets = [0, 0], sizes = [8, 128], strides = [1, 1]} : vector<8x384xf32> to vector<8x128xf32>
    %917 = arith.addf %915, %916 : vector<8x128xf32>
    %cst_426 = arith.constant 5.000000e-01 : f32
    %918 = vector.broadcast %cst_426 : f32 to vector<8x128xf32>
    %919 = arith.mulf %918, %917 : vector<8x128xf32>
    %920 = math.tanh %919 : vector<8x128xf32>
    %cst_427 = arith.constant 5.000000e-01 : f32
    %921 = vector.broadcast %cst_427 : f32 to vector<8x128xf32>
    %922 = arith.mulf %921, %920 : vector<8x128xf32>
    %cst_428 = arith.constant 5.000000e-01 : f32
    %923 = vector.broadcast %cst_428 : f32 to vector<8x128xf32>
    %924 = arith.addf %922, %923 : vector<8x128xf32>
    %925 = vector.extract_strided_slice %910 {offsets = [0, 128], sizes = [8, 128], strides = [1, 1]} : vector<8x384xf32> to vector<8x128xf32>
    %926 = vector.extract_strided_slice %914 {offsets = [0, 128], sizes = [8, 128], strides = [1, 1]} : vector<8x384xf32> to vector<8x128xf32>
    %927 = arith.addf %925, %926 : vector<8x128xf32>
    %cst_429 = arith.constant 5.000000e-01 : f32
    %928 = vector.broadcast %cst_429 : f32 to vector<8x128xf32>
    %929 = arith.mulf %928, %927 : vector<8x128xf32>
    %930 = math.tanh %929 : vector<8x128xf32>
    %cst_430 = arith.constant 5.000000e-01 : f32
    %931 = vector.broadcast %cst_430 : f32 to vector<8x128xf32>
    %932 = arith.mulf %931, %930 : vector<8x128xf32>
    %cst_431 = arith.constant 5.000000e-01 : f32
    %933 = vector.broadcast %cst_431 : f32 to vector<8x128xf32>
    %934 = arith.addf %932, %933 : vector<8x128xf32>
    %935 = vector.extract_strided_slice %910 {offsets = [0, 256], sizes = [8, 128], strides = [1, 1]} : vector<8x384xf32> to vector<8x128xf32>
    %936 = vector.extract_strided_slice %914 {offsets = [0, 256], sizes = [8, 128], strides = [1, 1]} : vector<8x384xf32> to vector<8x128xf32>
    %937 = arith.addf %936, %704 : vector<8x128xf32>
    %938 = arith.mulf %924, %937 : vector<8x128xf32>
    %939 = arith.addf %935, %938 : vector<8x128xf32>
    %940 = math.tanh %939 : vector<8x128xf32>
    %941 = arith.subf %909, %940 : vector<8x128xf32>
    %942 = arith.mulf %934, %941 : vector<8x128xf32>
    %943 = arith.addf %940, %942 : vector<8x128xf32>
    %c56_432 = arith.constant 56 : index
    %c0_433 = arith.constant 0 : index
    %944 = vector.load %arg8[%c56_432, %c0_433] : memref<64x384xf32, #tpu.memory_space<vmem>>, vector<8x384xf32>
    %945 = arith.truncf %943 : vector<8x128xf32> to vector<8x128xbf16>
    %c2_434 = arith.constant 2 : index
    %c0_435 = arith.constant 0 : index
    %c0_436 = arith.constant 0 : index
    %946 = vector.load %arg2[%c2_434, %c0_435, %c0_436] : memref<3x128x384xbf16, #tpu.memory_space<vmem>>, vector<1x128x384xbf16>
    %947 = vector.shape_cast %946 : vector<1x128x384xbf16> to vector<128x384xbf16>
    %cst_437 = arith.constant dense<0.000000e+00> : vector<8x384xf32>
    %948 = tpu.matmul %945, %947, %cst_437 {dimension_numbers = #tpu.dot_dimension_numbers<[1], [0], [0], [1], [0, 0, 1, 1], [], []>} : vector<8x128xbf16>, vector<128x384xbf16>, vector<8x384xf32> -> vector<8x384xf32>
    %949 = vector.extract_strided_slice %944 {offsets = [0, 0], sizes = [8, 128], strides = [1, 1]} : vector<8x384xf32> to vector<8x128xf32>
    %950 = vector.extract_strided_slice %948 {offsets = [0, 0], sizes = [8, 128], strides = [1, 1]} : vector<8x384xf32> to vector<8x128xf32>
    %951 = arith.addf %949, %950 : vector<8x128xf32>
    %cst_438 = arith.constant 5.000000e-01 : f32
    %952 = vector.broadcast %cst_438 : f32 to vector<8x128xf32>
    %953 = arith.mulf %952, %951 : vector<8x128xf32>
    %954 = math.tanh %953 : vector<8x128xf32>
    %cst_439 = arith.constant 5.000000e-01 : f32
    %955 = vector.broadcast %cst_439 : f32 to vector<8x128xf32>
    %956 = arith.mulf %955, %954 : vector<8x128xf32>
    %cst_440 = arith.constant 5.000000e-01 : f32
    %957 = vector.broadcast %cst_440 : f32 to vector<8x128xf32>
    %958 = arith.addf %956, %957 : vector<8x128xf32>
    %959 = vector.extract_strided_slice %944 {offsets = [0, 128], sizes = [8, 128], strides = [1, 1]} : vector<8x384xf32> to vector<8x128xf32>
    %960 = vector.extract_strided_slice %948 {offsets = [0, 128], sizes = [8, 128], strides = [1, 1]} : vector<8x384xf32> to vector<8x128xf32>
    %961 = arith.addf %959, %960 : vector<8x128xf32>
    %cst_441 = arith.constant 5.000000e-01 : f32
    %962 = vector.broadcast %cst_441 : f32 to vector<8x128xf32>
    %963 = arith.mulf %962, %961 : vector<8x128xf32>
    %964 = math.tanh %963 : vector<8x128xf32>
    %cst_442 = arith.constant 5.000000e-01 : f32
    %965 = vector.broadcast %cst_442 : f32 to vector<8x128xf32>
    %966 = arith.mulf %965, %964 : vector<8x128xf32>
    %cst_443 = arith.constant 5.000000e-01 : f32
    %967 = vector.broadcast %cst_443 : f32 to vector<8x128xf32>
    %968 = arith.addf %966, %967 : vector<8x128xf32>
    %969 = vector.extract_strided_slice %944 {offsets = [0, 256], sizes = [8, 128], strides = [1, 1]} : vector<8x384xf32> to vector<8x128xf32>
    %970 = vector.extract_strided_slice %948 {offsets = [0, 256], sizes = [8, 128], strides = [1, 1]} : vector<8x384xf32> to vector<8x128xf32>
    %971 = arith.addf %970, %704 : vector<8x128xf32>
    %972 = arith.mulf %958, %971 : vector<8x128xf32>
    %973 = arith.addf %969, %972 : vector<8x128xf32>
    %974 = math.tanh %973 : vector<8x128xf32>
    %975 = arith.subf %943, %974 : vector<8x128xf32>
    %976 = arith.mulf %968, %975 : vector<8x128xf32>
    %977 = arith.addf %974, %976 : vector<8x128xf32>
    %978 = arith.truncf %977 : vector<8x128xf32> to vector<8x128xbf16>
    %c0_444 = arith.constant 0 : index
    %c0_445 = arith.constant 0 : index
    %979 = vector.load %arg5[%c0_444, %c0_445] : memref<128x128xbf16, #tpu.memory_space<vmem>>, vector<128x128xbf16>
    %cst_446 = arith.constant dense<0.000000e+00> : vector<8x128xf32>
    %980 = tpu.matmul %978, %979, %cst_446 {dimension_numbers = #tpu.dot_dimension_numbers<[1], [0], [0], [1], [0, 0, 1, 1], [], []>} : vector<8x128xbf16>, vector<128x128xbf16>, vector<8x128xf32> -> vector<8x128xf32>
    %c0_447 = arith.constant 0 : index
    %c0_448 = arith.constant 0 : index
    %981 = vector.load %arg6[%c0_447, %c0_448] : memref<8x128xf32, #tpu.memory_space<vmem>>, vector<8x128xf32>
    %982 = arith.addf %980, %981 : vector<8x128xf32>
    %c0_449 = arith.constant 0 : index
    %c0_450 = arith.constant 0 : index
    %983 = vector.load %arg7[%c0_449, %c0_450] : memref<8x128xf32, #tpu.memory_space<vmem>>, vector<8x128xf32>
    tpu.vector_store %arg7[%c0_449, %c0_450], %982 {strides = array<i32>} : memref<8x128xf32, #tpu.memory_space<vmem>>, vector<8x128xf32>,
    return
  }
}

</mosaic_0001>

<bundles_post_ra>
// kernel: forward.1
= control target key start
LH: loop header
LB: loop body
LE: loop exit
PB: predicated region body
PF: predicated region fallthrough
CT: control target
= control target key end

     0   :  { %v17214_v1 = vmov 0   ;;  %v17222_v34 = vmov 0.0   ;;  %vm13633_vm0 = vmmov 0   ;;  %s17206_s1 = inlined_call_operand.vmem [shape: bf16[3,128,384], index: 1, kind: input, shape index: {}]   ;;  %s17207_s0 = inlined_call_operand.vmem [shape: bf16[64,128], index: 0, kind: input, shape index: {}]   ;;  %s17208_s2 = inlined_call_operand.vmem [shape: bf16[3,128,384], index: 2, kind: input, shape index: {}]   ;;  %s17209_s3 = inlined_call_operand.vmem [shape: f32[3,1,384], index: 3, kind: input, shape index: {}]   ;;  %s17210_s4 = inlined_call_operand.vmem [shape: f32[3,8,128], index: 4, kind: input, shape index: {}]   ;;  %s17211_s5 = inlined_call_operand.vmem [shape: bf16[128,128], index: 5, kind: input, shape index: {}]   ;;  %s17212_s6 = inlined_call_operand.vmem [shape: f32[8,128], index: 6, kind: input, shape index: {}]   ;;  %s17213_s7 = inlined_call_operand.vmem [shape: f32[8,128], index: 7, kind: output, shape index: {}]  }
   0x1   :  { %v12833_v0 = vld [vmem:[%s17206_s1 + $0x4] ss:$12 sps:$4 sm:$0xff]   ;;  %268 = vmatprep.mubr.bf16.mxu0 %v17214_v1  ;;  %v12835_v2 = vld [vmem:[%s17206_s1] ss:$12 sps:$4 sm:$0xff]   ;;  %v12836_v3 = vld [vmem:[%s17206_s1 + $0x1c] ss:$12 sps:$4 sm:$0xff]  }
   0x2   :  { %236 = vmatprep.subr.bf16.mxu0 %v12833_v0  ;;  %v12838_v4 = vld [vmem:[%s17206_s1 + $0x18] ss:$12 sps:$4 sm:$0xff]   ;;  %v12839_v5 = vld [vmem:[%s17206_s1 + $0x34] ss:$12 sps:$4 sm:$0xff]   ;;  %v12841_v7 = vld [vmem:[%s17206_s1 + $0x30] ss:$12 sps:$4 sm:$0xff]  }
   0x3   :  { %237 = vmatpush1.bf16.msra.mxu0 %v12835_v2  ;;  %v12845_v6 = vld [vmem:[%s17206_s1 + $0x8] ss:$12 sps:$4 sm:$0xff]   ;;  %v12842_v8 = vld [vmem:[%s17206_s1 + $0x4c] ss:$12 sps:$4 sm:$0xff]   ;;  %v12846_v12 = vld [vmem:[%s17206_s1 + $0x64] ss:$12 sps:$4 sm:$0xff]  }
   0x4   :  { %238 = vmatprep.subr.bf16.mxu0 %v12836_v3  ;;  %11890 = vmatprep.subr.bf16.mxu1 %v12845_v6  ;;  %v12849_v9 = vld [vmem:[%s17206_s1 + $0x20] ss:$12 sps:$4 sm:$0xff]   ;;  %v12853_v10 = vld [vmem:[%s17206_s1 + $0x38] ss:$12 sps:$4 sm:$0xff]   ;;  %v12844_v11 = vld [vmem:[%s17206_s1 + $0x48] ss:$12 sps:$4 sm:$0xff]  }
   0x5   :  { %11891 = vmatpush3.bf16.msra.mxu1 %v12845_v6  ;;  %v12848_v13 = vld [vmem:[%s17206_s1 + $0x60] ss:$12 sps:$4 sm:$0xff]   ;;  %v12857_v14 = vld [vmem:[%s17206_s1 + $0x50] ss:$12 sps:$4 sm:$0xff]   ;;  %v12861_v17 = vld [vmem:[%s17206_s1 + $0x68] ss:$12 sps:$4 sm:$0xff]  }
   0x6   :  { %11892 = vmatprep.subr.bf16.mxu1 %v12849_v9  ;;  %v12850_v15 = vld [vmem:[%s17206_s1 + $0x7c] ss:$12 sps:$4 sm:$0xff]   ;;  %v12862_v16 = vld [vmem:[%s17207_s0] sm:$0xff]   ;;  %v12858_v22 = vld [vmem:[%s17206_s1 + $0xac] ss:$12 sps:$4 sm:$0xff]  }
   0x7   :  { %239 = vmatpush1.bf16.msra.mxu0 %v12838_v4  ;;  %11906 = vmatprep.mubr.bf16.mxu1 %v12862_v16  ;;  %v12852_v18 = vld [vmem:[%s17206_s1 + $0x78] ss:$12 sps:$4 sm:$0xff]   ;;  %v12854_v19 = vld [vmem:[%s17206_s1 + $0x94] ss:$12 sps:$4 sm:$0xff]   ;;  %v12856_v21 = vld [vmem:[%s17206_s1 + $0x90] ss:$12 sps:$4 sm:$0xff]  }
   0x8   :  { %240 = vmatprep.subr.bf16.mxu0 %v12839_v5  ;;  %v12866_v20 = vld [vmem:[%s17206_s1 + $0x80] ss:$12 sps:$4 sm:$0xff]   ;;  %v12870_v23 = vld [vmem:[%s17206_s1 + $0x98] ss:$12 sps:$4 sm:$0xff]   ;;  %v12860_v24 = vld [vmem:[%s17206_s1 + $0xa8] ss:$12 sps:$4 sm:$0xff]  }
   0x9   :  { %11893 = vmatpush3.bf16.msra.mxu1 %v12849_v9  ;;  %v12865_v25 = vld [vmem:[%s17208_s2 + $0x4] ss:$12 sps:$4 sm:$0xff]   ;;  %v12863_v27 = vld [vmem:[%s17208_s2] ss:$12 sps:$4 sm:$0xff]   ;;  %v12869_v28 = vld [vmem:[%s17208_s2 + $0x1c] ss:$12 sps:$4 sm:$0xff]  }
   0xa   :  { %11894 = vmatprep.subr.bf16.mxu1 %v12853_v10  ;;  %v12875_v26 = vld [vmem:[%s17206_s1 + $0xb0] ss:$12 sps:$4 sm:$0xff]   ;;  %v12867_v29 = vld [vmem:[%s17208_s2 + $0x18] ss:$12 sps:$4 sm:$0xff]   ;;  %v12871_v30 = vld [vmem:[%s17207_s0 + $0x8] sm:$0xff]  }
   0xb   :  { %241 = vmatpush1.bf16.msra.mxu0 %v12841_v7  ;;  %v12874_v31 = vld [vmem:[%s17208_s2 + $0x34] ss:$12 sps:$4 sm:$0xff]   ;;  %v12872_v33 = vld [vmem:[%s17208_s2 + $0x30] ss:$12 sps:$4 sm:$0xff]   ;;  %v12878_v36 = vld [vmem:[%s17208_s2 + $0x4c] ss:$12 sps:$4 sm:$0xff]  }
   0xc   :  { %242 = vmatprep.subr.bf16.mxu0 %v12842_v8  ;;  %v12883_v32 = vld [vmem:[%s17208_s2 + $0x8] ss:$12 sps:$4 sm:$0xff]   ;;  %v12887_v38 = vld [vmem:[%s17208_s2 + $0x20] ss:$12 sps:$4 sm:$0xff]   ;;  %v12882_v39 = vld [vmem:[%s17208_s2 + $0x64] ss:$12 sps:$4 sm:$0xff]  }
   0xd   :  { %11895 = vmatpush3.bf16.msra.mxu1 %v12853_v10  ;;  %v12879_v35 = vld [vmem:[%s17207_s0 + $0x10] sm:$0xff]   ;;  %v12892_v40 = vld [vmem:[%s17208_s2 + $0x38] ss:$12 sps:$4 sm:$0xff]   ;;  %v12880_v42 = vld [vmem:[%s17208_s2 + $0x60] ss:$12 sps:$4 sm:$0xff]  }
   0xe   :  { %11896 = vmatprep.subr.bf16.mxu1 %v12857_v14  ;;  %v12876_v37 = vld [vmem:[%s17208_s2 + $0x48] ss:$12 sps:$4 sm:$0xff]   ;;  %v12888_v41 = vld [vmem:[%s17207_s0 + $0x18] sm:$0xff]   ;;  %v12898_v50 = vld [vmem:[%s17208_s2 + $0x80] ss:$12 sps:$4 sm:$0xff]  }
   0xf   :  { %243 = vmatpush1.bf16.msra.mxu0 %v12844_v11  ;;  %v12886_v43 = vld [vmem:[%s17208_s2 + $0x7c] ss:$12 sps:$4 sm:$0xff]   ;;  %v12884_v45 = vld [vmem:[%s17208_s2 + $0x78] ss:$12 sps:$4 sm:$0xff]   ;;  %v12891_v46 = vld [vmem:[%s17208_s2 + $0x94] ss:$12 sps:$4 sm:$0xff]  }
  0x10   :  { %244 = vmatprep.subr.bf16.mxu0 %v12846_v12  ;;  %v12896_v44 = vld [vmem:[%s17208_s2 + $0x50] ss:$12 sps:$4 sm:$0xff]   ;;  %v12897_v47 = vld [vmem:[%s17208_s2 + $0x68] ss:$12 sps:$4 sm:$0xff]   ;;  %v12895_v49 = vld [vmem:[%s17208_s2 + $0xac] ss:$12 sps:$4 sm:$0xff]  }
  0x11   :  { %11897 = vmatpush3.bf16.msra.mxu1 %v12857_v14  ;;  %v12889_v48 = vld [vmem:[%s17208_s2 + $0x90] ss:$12 sps:$4 sm:$0xff]   ;;  %v12893_v51 = vld [vmem:[%s17208_s2 + $0xa8] ss:$12 sps:$4 sm:$0xff]   ;;  %v12899_v52 = vld [vmem:[%s17208_s2 + $0x98] ss:$12 sps:$4 sm:$0xff]  }
  0x12   :  { %11898 = vmatprep.subr.bf16.mxu1 %v12861_v17  ;;  %v12900_v53 = vld [vmem:[%s17208_s2 + $0xb0] ss:$12 sps:$4 sm:$0xff]   ;;  %v12901_v55 = vld [vmem:[%s17206_s1 + $0xc0] ss:$12 sps:$4 sm:$0xff]   ;;  %v12904_v56 = vld [vmem:[%s17206_s1 + $0xc8] ss:$12 sps:$4 sm:$0xff]  }
  0x13   :  { %245 = vmatpush1.bf16.msra.mxu0 %v12848_v13  ;;  %v12903_v54 = vld [vmem:[%s17206_s1 + $0xc4] ss:$12 sps:$4 sm:$0xff]   ;;  %v12907_v57 = vld [vmem:[%s17206_s1 + $0xdc] ss:$12 sps:$4 sm:$0xff]   ;;  %v12908_v59 = vld [vmem:[%s17206_s1 + $0xe0] ss:$12 sps:$4 sm:$0xff]  }
  0x14   :  { %246 = vmatprep.subr.bf16.mxu0 %v12850_v15  ;;  %v12905_v58 = vld [vmem:[%s17206_s1 + $0xd8] ss:$12 sps:$4 sm:$0xff]   ;;  %v12911_v60 = vld [vmem:[%s17206_s1 + $0xf4] ss:$12 sps:$4 sm:$0xff]   ;;  %v12909_v61 = vld [vmem:[%s17206_s1 + $0xf0] ss:$12 sps:$4 sm:$0xff]  }
  0x15   :  { %11899 = vmatpush3.bf16.msra.mxu1 %v12861_v17  ;;  %v12912_v62 = vld [vmem:[%s17206_s1 + $0xf8] ss:$12 sps:$4 sm:$0xff]   ;;  %v13889_v0 = vld [vmem:[%s17206_s1 + $0x108] ss:$12 sps:$4 sm:$0xff]   ;;  %v12916_v2 = vld [vmem:[%s17206_s1 + $0x110] ss:$12 sps:$4 sm:$0xff]  }
  0x16   :  { %11900 = vmatprep.subr.bf16.mxu1 %v12866_v20  ;;  %v13883_v63 = vld [vmem:[%s17206_s1 + $0x10c] ss:$12 sps:$4 sm:$0xff]   ;;  %v13904_v4 = vld [vmem:[%s17206_s1 + $0x124] ss:$12 sps:$4 sm:$0xff]   ;;  %v12920_v5 = vld [vmem:[%s17206_s1 + $0x128] ss:$12 sps:$4 sm:$0xff]  }
  0x17   :  { %247 = vmatpush1.bf16.msra.mxu0 %v12852_v18  ;;  %v13899_v3 = vld [vmem:[%s17206_s1 + $0x120] ss:$12 sps:$4 sm:$0xff]   ;;  %v13913_v6 = vld [vmem:[%s17206_s1 + $0x13c] ss:$12 sps:$4 sm:$0xff]   ;;  %v13920_v7 = vld [vmem:[%s17206_s1 + $0x138] ss:$12 sps:$4 sm:$0xff]  }
  0x18   :  { %248 = vmatprep.subr.bf16.mxu0 %v12854_v19  ;;  %v12924_v8 = vld [vmem:[%s17206_s1 + $0x140] ss:$12 sps:$4 sm:$0xff]   ;;  %v13935_v10 = vld [vmem:[%s17206_s1 + $0x150] ss:$12 sps:$4 sm:$0xff]   ;;  %v12928_v11 = vld [vmem:[%s17206_s1 + $0x158] ss:$12 sps:$4 sm:$0xff]  }
  0x19   :  { %11901 = vmatpush3.bf16.msra.mxu1 %v12866_v20  ;;  %v13928_v9 = vld [vmem:[%s17206_s1 + $0x154] ss:$12 sps:$4 sm:$0xff]   ;;  %v13943_v12 = vld [vmem:[%s17206_s1 + $0x16c] ss:$12 sps:$4 sm:$0xff]   ;;  %v12932_v14 = vld [vmem:[%s17206_s1 + $0x170] ss:$12 sps:$4 sm:$0xff]  }
  0x1a   :  { %11902 = vmatprep.subr.bf16.mxu1 %v12870_v23  ;;  %v13951_v13 = vld [vmem:[%s17206_s1 + $0x168] ss:$12 sps:$4 sm:$0xff]   ;;  %v13597_v15 = vld [vmem:[%s17208_s2 + $0x4] ss:$12 sps:$4 sm:$0xff]  }
  0x1b   :  { %249 = vmatpush1.bf16.msra.mxu0 %v12856_v21  ;;  %v67_v21 = vld [vmem:[%s17209_s3] sm:$0x7] }
  0x1c   :  { %250 = vmatprep.subr.bf16.mxu0 %v12858_v22 }
  0x1d   :  { %11903 = vmatpush3.bf16.msra.mxu1 %v12870_v23 }
  0x1e   :  { %11904 = vmatprep.subr.bf16.mxu1 %v12875_v26 }
  0x1f   :  { %251 = vmatpush1.bf16.msra.mxu0 %v12860_v24 }
  0x20   :  { %562 = vmatprep.subr.bf16.mxu0 %v12865_v25 }
  0x21   :  { %11905 = vmatpush3.bf16.msra.mxu1 %v12875_v26 }
  0x22   :  { %269 = vmatmul.mubr.bf16.vlgmr.msra.gmra.mrb[0].mxu0 %v12862_v16  ;;  %11914 = vmatprep.subr.bf16.mxu1 %v17222_v34  ;;  %v69_v16 = vlaneseq }
  0x23   :  { %563 = vmatpush1.bf16.msra.mxu0 %v12863_v27  ;;  %278 = vmatprep.mubr.bf16.mxu0 %v17214_v1 }
  0x24   :  { %564 = vmatprep.subr.bf16.mxu0 %v12869_v28  ;;  %11907 = vmatmul.mubr.bf16.vlgmr.msra.gmra.mrb[0].mxu1 %v12871_v30  ;;  %v70_v17 = vshrl.u32 %v69_v16, 7 }
  0x25   :  { %11915 = vmatpush3.bf16.msra.mxu1 %v12883_v32  ;;  %11910 = vmatprep.mubr.bf16.mxu1 %v12879_v35 }
  0x26   :  { %11916 = vmatprep.subr.bf16.mxu1 %v17222_v34  ;;  %v13964_v18 = vsub.s32 0, %v70_v17  ;;  %v13966_v19 = vsub.s32 1, %v70_v17  ;;  %v13968_v20 = vsub.s32 2, %v70_v17 }
  0x27   :  { %565 = vmatpush1.bf16.msra.mxu0 %v12867_v29 }
  0x28   :  { %566 = vmatprep.subr.bf16.mxu0 %v12874_v31  ;;  %17224 = vst [vmem:[#allocation4_spill] sm:$0xff] %v13964_v18  ;;  %17225 = vst [vmem:[#allocation5_spill] sm:$0xff] %v13966_v19  ;;  %v72_v23 = vrot.slane %v67_v21, %v13964_v18  ;;  %v76_v25 = vrot.slane %v67_v21, %v13966_v19  ;;  %v13978_v29 = vrot.slane %v67_v21, %v13968_v20 }
  0x29   :  { %11917 = vmatpush3.bf16.msra.mxu1 %v12887_v38  ;;  %17226 = vst [vmem:[#allocation6_spill] sm:$0xff] %v13968_v20 }
  0x2a   :  { %279 = vmatmul.mubr.bf16.gmra.mrb[4].mxu0 %v12871_v30  ;;  %11918 = vmatprep.subr.bf16.mxu1 %v17222_v34 }
  0x2b   :  { %567 = vmatpush1.bf16.msra.mxu0 %v12872_v33  ;;  %288 = vmatprep.mubr.bf16.mxu0 %v17214_v1 }
  0x2c   :  { %568 = vmatprep.subr.bf16.mxu0 %v12878_v36  ;;  %11911 = vmatmul.mubr.bf16.gmra.mrb[4].mxu1 %v12888_v41 }
  0x2d   :  { %11919 = vmatpush3.bf16.msra.mxu1 %v12892_v40  ;;  %11930 = vmatprep.mubr.msk.bf16.mxu1 %vm13633_vm0, %v17222_v34 }
  0x2e   :  { %11920 = vmatprep.subr.bf16.mxu1 %v17222_v34 }
  0x2f   :  { %569 = vmatpush1.bf16.msra.mxu0 %v12876_v37 }
  0x30   :  { %570 = vmatprep.subr.bf16.mxu0 %v12882_v39 }
  0x31   :  { %11921 = vmatpush3.bf16.msra.mxu1 %v12896_v44 }
  0x32   :  { %289 = vmatmul.mubr.bf16.gmra.mrb[8].mxu0 %v12879_v35  ;;  %11922 = vmatprep.subr.bf16.mxu1 %v17222_v34 }
  0x33   :  { %571 = vmatpush1.bf16.msra.mxu0 %v12880_v42  ;;  %298 = vmatprep.mubr.bf16.mxu0 %v17214_v1 }
  0x34   :  { %572 = vmatprep.subr.bf16.mxu0 %v12886_v43 }
  0x35   :  { %11923 = vmatpush3.bf16.msra.mxu1 %v12897_v47 }
  0x36   :  { %11924 = vmatprep.subr.bf16.mxu1 %v17222_v34 }
  0x37   :  { %573 = vmatpush1.bf16.msra.mxu0 %v12884_v45 }
  0x38   :  { %574 = vmatprep.subr.bf16.mxu0 %v12891_v46 }
  0x39   :  { %11925 = vmatpush3.bf16.msra.mxu1 %v12898_v50 }
  0x3a   :  { %299 = vmatmul.mubr.bf16.gmra.mrb[12].mxu0 %v12888_v41  ;;  %11926 = vmatprep.subr.bf16.mxu1 %v17222_v34 }
  0x3b   :  { %575 = vmatpush1.bf16.msra.mxu0 %v12889_v48  ;;  %594 = vmatprep.mubr.bf16.mxu0 %v17214_v1 }
  0x3c   :  { %576 = vmatprep.subr.bf16.mxu0 %v12895_v49 }
  0x3d   :  { %11927 = vmatpush3.bf16.msra.mxu1 %v12899_v52 }
  0x3e   :  { %11928 = vmatprep.subr.bf16.mxu1 %v17222_v34 }
  0x3f   :  { %577 = vmatpush1.bf16.msra.mxu0 %v12893_v51 }
  0x40   :  { %840 = vmatprep.subr.bf16.mxu0 %v12903_v54 }
  0x41   :  { %11929 = vmatpush3.bf16.msra.mxu1 %v12900_v53 }
  0x42   :  { %595 = vmatmul.mubr.bf16.vlgmr.msra.gmra.mrb[16].mxu0 %v17214_v1  ;;  %11934 = vmatprep.subr.bf16.mxu1 %v17222_v34 }
  0x43   :  { %872 = vmatprep.mubr.bf16.mxu0 %v17214_v1  ;;  %841 = vmatpush1.bf16.msra.mxu0 %v12901_v55 }
  0x44   :  { %11931 = vmatmul.mubr.bf16.vlgmr.msra.gmra.mrb[8].mxu1 %v17214_v1  ;;  %842 = vmatprep.subr.bf16.mxu0 %v12907_v57 }
  0x45   :  { %11950 = vmatprep.mubr.msk.bf16.mxu1 %vm13633_vm0, %v17222_v34  ;;  %11935 = vmatpush3.bf16.msra.mxu1 %v12904_v56 }
  0x46   :  { %11936 = vmatprep.subr.bf16.mxu1 %v17222_v34 }
  0x47   :  { %843 = vmatpush1.bf16.msra.mxu0 %v12905_v58 }
  0x48   :  { %844 = vmatprep.subr.bf16.mxu0 %v12911_v60 }
  0x49   :  { %11937 = vmatpush3.bf16.msra.mxu1 %v12908_v59 }
  0x4a   :  { %11938 = vmatprep.subr.bf16.mxu1 %v17222_v34 }
  0x4b   :  { %845 = vmatpush1.bf16.msra.mxu0 %v12909_v61 }
  0x4c   :  { %846 = vmatprep.subr.bf16.mxu0 %v13883_v63 }
  0x4d   :  { %11939 = vmatpush3.bf16.msra.mxu1 %v12912_v62 }
  0x4e   :  { %11940 = vmatprep.subr.bf16.mxu1 %v17222_v34 }
  0x4f   :  { %847 = vmatpush1.bf16.msra.mxu0 %v13889_v0 }
  0x50   :  { %848 = vmatprep.subr.bf16.mxu0 %v13904_v4 }
  0x51   :  { %11941 = vmatpush3.bf16.msra.mxu1 %v12916_v2 }
  0x52   :  { %11942 = vmatprep.subr.bf16.mxu1 %v17222_v34 }
  0x53   :  { %849 = vmatpush1.bf16.msra.mxu0 %v13899_v3 }
  0x54   :  { %850 = vmatprep.subr.bf16.mxu0 %v13913_v6 }
  0x55   :  { %11943 = vmatpush3.bf16.msra.mxu1 %v12920_v5 }
  0x56   :  { %11944 = vmatprep.subr.bf16.mxu1 %v17222_v34 }
  0x57   :  { %851 = vmatpush1.bf16.msra.mxu0 %v13920_v7 }
  0x58   :  { %852 = vmatprep.subr.bf16.mxu0 %v13928_v9 }
  0x59   :  { %11945 = vmatpush3.bf16.msra.mxu1 %v12924_v8 }
  0x5a   :  { %11946 = vmatprep.subr.bf16.mxu1 %v17222_v34 }
  0x5b   :  { %853 = vmatpush1.bf16.msra.mxu0 %v13935_v10 }
  0x5c   :  { %854 = vmatprep.subr.bf16.mxu0 %v13943_v12 }
  0x5d   :  { %11947 = vmatpush3.bf16.msra.mxu1 %v12928_v11 }
  0x5e   :  { %11948 = vmatprep.subr.bf16.mxu1 %v17222_v34 }
  0x5f   :  { %855 = vmatpush1.bf16.msra.mxu0 %v13951_v13 }
  0x60   :  { %1087 = vmatprep.subr.bf16.mxu0 %v13597_v15 }
  0x61   :  { %11949 = vmatpush3.bf16.msra.mxu1 %v12932_v14 }
  0x62   :  { %11954 = vmatprep.subr.bf16.mxu1 %v17222_v34 }
  0xf5   :  { %v270_v22 = vpop.f32.mrb[0].mxu0 }
  0xf6   :  { %v272_v24 = vpop.f32.mrb[1].mxu0  ;;  %v271_v21 = vadd.f32 %v270_v22, %v72_v23 }
  0xf7   :  { %v274_v26 = vpop.f32.mrb[2].mxu0  ;;  %v11908_v31 = vpop.f32.mrb[0].mxu1 }
  0xf8   :  { %v13975_v27 = vadd.f32 %v274_v26, %v72_v23  ;;  %v276_v28 = vpop.f32.mrb[3].mxu0  ;;  %v13983_v32 = vadd.f32 %v11908_v31, %v13978_v29  ;;  %v343_v33 = vpop.f32.mrb[1].mxu1  ;;  %v273_v26 = vadd.f32 %v272_v24, %v76_v25 }
  0xf9   :  { %v13980_v30 = vadd.f32 %v276_v28, %v76_v25  ;;  %v11909_v36 = vpop.f32.mrb[2].mxu1 }
  0xfa   :  { %v13988_v39 = vadd.f32 %v11909_v36, %v13978_v29  ;;  %v346_v40 = vpop.f32.mrb[3].mxu1 }
  0xfb   :  { %v13993_v43 = vadd.f32 %v346_v40, %v13978_v29 }
  0xfd   :  { %v280_v35 = vpop.f32.mrb[4].mxu0 }
  0xfe   :  { %v13985_v37 = vadd.f32 %v280_v35, %v72_v23  ;;  %v282_v38 = vpop.f32.mrb[5].mxu0 }
  0xff   :  { %v13990_v41 = vadd.f32 %v282_v38, %v76_v25  ;;  %v284_v42 = vpop.f32.mrb[6].mxu0  ;;  %v11912_v47 = vpop.f32.mrb[4].mxu1 }
 0x100   :  { %v13995_v44 = vadd.f32 %v284_v42, %v72_v23  ;;  %v286_v45 = vpop.f32.mrb[7].mxu0  ;;  %v14000_v48 = vadd.f32 %v11912_v47, %v13978_v29  ;;  %v359_v49 = vpop.f32.mrb[5].mxu1 }
 0x101   :  { %v13997_v46 = vadd.f32 %v286_v45, %v76_v25  ;;  %v14003_v51 = vadd.f32 %v359_v49, %v13978_v29  ;;  %v11913_v52 = vpop.f32.mrb[6].mxu1 }
 0x102   :  { %v14008_v55 = vadd.f32 %v11913_v52, %v13978_v29  ;;  %v362_v56 = vpop.f32.mrb[7].mxu1  ;;  %v14030_v52 = vld [vmem:[%s17210_s4] sm:$0xff] }
 0x103   :  { %v14013_v59 = vadd.f32 %v362_v56, %v13978_v29  ;;  %v344_v56 = vadd.f32 %v343_v33, %v13978_v29  ;;  %v13598_v29 = vld [vmem:[%s17208_s2] ss:$12 sps:$4 sm:$0xff]  }
 0x104   :  { %17227 = vst [vmem:[#allocation7_spill] sm:$0xff] %v14008_v55  ;;  %v12934_v33 = vld [vmem:[%s17208_s2 + $0x20] ss:$12 sps:$4 sm:$0xff]  }
 0x105   :  { %v290_v50 = vpop.f32.mrb[8].mxu0 }
 0x106   :  { %v14005_v53 = vadd.f32 %v290_v50, %v72_v23  ;;  %v292_v54 = vpop.f32.mrb[9].mxu0 }
 0x107   :  { %v14010_v57 = vadd.f32 %v292_v54, %v76_v25  ;;  %v294_v58 = vpop.f32.mrb[10].mxu0 }
 0x108   :  { %v14015_v60 = vadd.f32 %v294_v58, %v72_v23  ;;  %v296_v61 = vpop.f32.mrb[11].mxu0 }
 0x109   :  { %v14017_v62 = vadd.f32 %v296_v61, %v76_v25 }
 0x10d   :  { %v300_v2 = vpop.f32.mrb[12].mxu0 }
 0x10e   :  { %v14019_v5 = vadd.f32 %v300_v2, %v72_v23  ;;  %v302_v8 = vpop.f32.mrb[13].mxu0 }
 0x10f   :  { %v14021_v11 = vadd.f32 %v302_v8, %v76_v25  ;;  %v304_v14 = vpop.f32.mrb[14].mxu0 }
 0x110   :  { %v14023_v15 = vadd.f32 %v304_v14, %v72_v23  ;;  %v306_v16 = vpop.f32.mrb[15].mxu0 }
 0x111   :  { %v14025_v17 = vadd.f32 %v306_v16, %v76_v25 }
 0x115   :  { %v596_v28 = vpop.f32.mrb[16].mxu0 }
 0x116   :  { %v643_v31 = vadd.f32 %v596_v28, %v271_v21  ;;  %v598_v35 = vpop.f32.mrb[17].mxu0 }
 0x117   :  { %v648_v36 = vadd.f32 %v598_v35, %v273_v26  ;;  %v600_v38 = vpop.f32.mrb[18].mxu0  ;;  %v637_v45 = vpop.f32.mrb[8].mxu1 }
 0x118   :  { %v644_v40 = vmul.f32 0.5, %v643_v31  ;;  %v601_v42 = vpop.f32.mrb[19].mxu0  ;;  %v11932_v47 = vpop.f32.mrb[9].mxu1  ;;  %v653_v24 = vadd.f32 %v637_v45, %v14030_v52  ;;  %v12933_v31 = vld [vmem:[%s17208_s2 + $0x8] ss:$12 sps:$4 sm:$0xff]  }
 0x119   :  { %v640_v49 = vpop.f32.mrb[10].mxu1  ;;  %v649_v54 = vmul.f32 0.5, %v648_v36  ;;  %v13599_v36 = vld [vmem:[%s17208_s2 + $0x1c] ss:$12 sps:$4 sm:$0xff]   ;;  %v13600_v38 = vld [vmem:[%s17208_s2 + $0x18] ss:$12 sps:$4 sm:$0xff]  }
 0x11a   :  { %13453 = vtanh.f32 %v644_v40  ;;  %v11933_v50 = vpop.f32.mrb[11].mxu1  ;;  %v12935_v40 = vld [vmem:[%s17208_s2 + $0x38] ss:$12 sps:$4 sm:$0xff]   ;;  %v13601_v42 = vld [vmem:[%s17208_s2 + $0x34] ss:$12 sps:$4 sm:$0xff]  }
 0x11b   :  { %13455 = vtanh.f32 %v649_v54  ;;  %v13602_v45 = vld [vmem:[%s17208_s2 + $0x30] ss:$12 sps:$4 sm:$0xff]   ;;  %v13603_v49 = vld [vmem:[%s17208_s2 + $0x4c] ss:$12 sps:$4 sm:$0xff]   ;;  %v13604_v50 = vld [vmem:[%s17208_s2 + $0x48] ss:$12 sps:$4 sm:$0xff]  }
 0x11c   :  { %v12936_v47 = vld [vmem:[%s17208_s2 + $0x50] ss:$12 sps:$4 sm:$0xff]   ;;  %v12937_v54 = vld [vmem:[%s17208_s2 + $0x68] ss:$12 sps:$4 sm:$0xff]  }
 0x124   :  { %v13454_v22 = vpop.eup %13453 }
 0x125   :  { %v646_v23 = vmul.f32 0.5, %v13454_v22  ;;  %v13456_v2 = vpop.eup %13455  ;;  %v13605_v22 = vld [vmem:[%s17208_s2 + $0x64] ss:$12 sps:$4 sm:$0xff]  }
 0x126   :  { %v651_v8 = vmul.f32 0.5, %v13456_v2  ;;  %v14110_v2 = vld [vmem:[%s17208_s2 + $0x90] ss:$12 sps:$4 sm:$0xff]  }
 0x127   :  { %v647_v25 = vadd.f32 0.5, %v646_v23  ;;  %v13606_v23 = vld [vmem:[%s17208_s2 + $0x60] ss:$12 sps:$4 sm:$0xff]  }
 0x128   :  { %v652_v16 = vadd.f32 0.5, %v651_v8  ;;  %v12940_v8 = vld [vmem:[%s17208_s2 + $0xb0] ss:$12 sps:$4 sm:$0xff]  }
 0x129   :  { %v654_v58 = vmul.f32 %v653_v24, %v647_v25  ;;  %v12938_v24 = vld [vmem:[%s17208_s2 + $0x80] ss:$12 sps:$4 sm:$0xff]   ;;  %v13607_v25 = vld [vmem:[%s17208_s2 + $0x7c] ss:$12 sps:$4 sm:$0xff]  }
 0x12b   :  { %v655_v61 = vadd.f32 %v654_v58, %v344_v56  ;;  %v13608_v56 = vld [vmem:[%s17208_s2 + $0x78] ss:$12 sps:$4 sm:$0xff]  }
 0x12c   :  { %v12939_v58 = vld [vmem:[%s17208_s2 + $0x98] ss:$12 sps:$4 sm:$0xff]  }
 0x12d   :  { %13457 = vtanh.f32 %v655_v61  ;;  %v14103_v61 = vld [vmem:[%s17208_s2 + $0x94] ss:$12 sps:$4 sm:$0xff]  }
 0x137   :  { %v13458_v14 = vpop.eup %13457 }
 0x138   :  { %v657_v21 = vsub.f32 0.0, %v13458_v14 }
 0x13a   :  { %v658_v26 = vmul.f32 %v657_v21, %v652_v16  ;;  %v14126_v16 = vld [vmem:[%s17208_s2 + $0xa8] ss:$12 sps:$4 sm:$0xff]   ;;  %v14132_v21 = vld [vmem:[%s17206_s1 + $0xc4] ss:$12 sps:$4 sm:$0xff]  }
 0x13c   :  { %v14034_v28 = vadd.f32 %v13458_v14, %v658_v26  ;;  %v14119_v14 = vld [vmem:[%s17208_s2 + $0xac] ss:$12 sps:$4 sm:$0xff]  }
 0x13d   :  { %v14139_v26 = vld [vmem:[%s17206_s1 + $0xc0] ss:$12 sps:$4 sm:$0xff]  }
 0x13e   :  { %v660_v35 = vpack.c.bf16 %v14034_v28, %v14034_v28 }
 0x140   :  { %873 = vmatmul.mubr.bf16.vlgmr.msra.gmra.mrb[20].mxu0 %v660_v35  ;;  %11951 = vmatmul.mubr.bf16.vlgmr.msra.gmra.mrb[12].mxu1 %v660_v35 }
 0x141   :  { %1088 = vmatpush1.bf16.msra.mxu0 %v13598_v29  ;;  %11955 = vmatpush3.bf16.msra.mxu1 %v12933_v31  ;;  %v14146_v31 = vld [vmem:[%s17206_s1 + $0xdc] ss:$12 sps:$4 sm:$0xff]   ;;  %v14160_v29 = vld [vmem:[%s17206_s1 + $0xf4] ss:$12 sps:$4 sm:$0xff]  }
 0x142   :  { %1089 = vmatprep.subr.bf16.mxu0 %v13599_v36  ;;  %11956 = vmatprep.subr.bf16.mxu1 %v17222_v34 }
 0x143   :  { %1119 = vmatprep.mubr.bf16.mxu0 %v17214_v1  ;;  %11970 = vmatprep.mubr.msk.bf16.mxu1 %vm13633_vm0, %v17222_v34 }
 0x145   :  { %1090 = vmatpush1.bf16.msra.mxu0 %v13600_v38  ;;  %11957 = vmatpush3.bf16.msra.mxu1 %v12934_v33  ;;  %v14166_v33 = vld [vmem:[%s17206_s1 + $0xf0] ss:$12 sps:$4 sm:$0xff]  }
 0x146   :  { %1091 = vmatprep.subr.bf16.mxu0 %v13601_v42  ;;  %11958 = vmatprep.subr.bf16.mxu1 %v17222_v34 }
 0x149   :  { %1092 = vmatpush1.bf16.msra.mxu0 %v13602_v45  ;;  %11959 = vmatpush3.bf16.msra.mxu1 %v12935_v40 }
 0x14a   :  { %1093 = vmatprep.subr.bf16.mxu0 %v13603_v49  ;;  %11960 = vmatprep.subr.bf16.mxu1 %v17222_v34 }
 0x14d   :  { %1094 = vmatpush1.bf16.msra.mxu0 %v13604_v50  ;;  %11961 = vmatpush3.bf16.msra.mxu1 %v12936_v47 }
 0x14e   :  { %1095 = vmatprep.subr.bf16.mxu0 %v13605_v22  ;;  %11962 = vmatprep.subr.bf16.mxu1 %v17222_v34 }
 0x151   :  { %1096 = vmatpush1.bf16.msra.mxu0 %v13606_v23  ;;  %11963 = vmatpush3.bf16.msra.mxu1 %v12937_v54 }
 0x152   :  { %1097 = vmatprep.subr.bf16.mxu0 %v13607_v25  ;;  %11964 = vmatprep.subr.bf16.mxu1 %v17222_v34 }
 0x155   :  { %1098 = vmatpush1.bf16.msra.mxu0 %v13608_v56  ;;  %11965 = vmatpush3.bf16.msra.mxu1 %v12938_v24 }
 0x156   :  { %1099 = vmatprep.subr.bf16.mxu0 %v14103_v61  ;;  %11966 = vmatprep.subr.bf16.mxu1 %v17222_v34 }
 0x159   :  { %1100 = vmatpush1.bf16.msra.mxu0 %v14110_v2  ;;  %11967 = vmatpush3.bf16.msra.mxu1 %v12939_v58 }
 0x15a   :  { %1101 = vmatprep.subr.bf16.mxu0 %v14119_v14  ;;  %11968 = vmatprep.subr.bf16.mxu1 %v17222_v34 }
 0x15d   :  { %1102 = vmatpush1.bf16.msra.mxu0 %v14126_v16  ;;  %11969 = vmatpush3.bf16.msra.mxu1 %v12940_v8 }
 0x15e   :  { %1363 = vmatprep.subr.bf16.mxu0 %v14132_v21  ;;  %11974 = vmatprep.subr.bf16.mxu1 %v17222_v34 }
 0x160   :  { %1120 = vmatmul.mubr.bf16.vlgmr.msra.gmra.mrb[24].mxu0 %v660_v35  ;;  %11971 = vmatmul.mubr.bf16.vlgmr.msra.gmra.mrb[16].mxu1 %v660_v35  ;;  %v14154_v35 = vld [vmem:[%s17206_s1 + $0xd8] ss:$12 sps:$4 sm:$0xff]  }
 0x161   :  { %1364 = vmatpush1.bf16.msra.mxu0 %v14139_v26  ;;  %1395 = vmatprep.mubr.bf16.mxu0 %v17214_v1 }
 0x162   :  { %1365 = vmatprep.subr.bf16.mxu0 %v14146_v31  ;;  %11990 = vmatprep.mubr.msk.bf16.mxu1 %vm13633_vm0, %v17222_v34 }
 0x165   :  { %1366 = vmatpush1.bf16.msra.mxu0 %v14154_v35 }
 0x166   :  { %1367 = vmatprep.subr.bf16.mxu0 %v14160_v29 }
 0x169   :  { %1368 = vmatpush1.bf16.msra.mxu0 %v14166_v33 }
 0x16a   :  { %1369 = vmatprep.subr.bf16.mxu0 %v13883_v63  ;;  %v12941_v63 = vld [vmem:[%s17206_s1 + $0xc8] ss:$12 sps:$4 sm:$0xff]  }
 0x16b   :  { %11975 = vmatpush3.bf16.msra.mxu1 %v12941_v63 }
 0x16c   :  { %11976 = vmatprep.subr.bf16.mxu1 %v17222_v34 }
 0x16d   :  { %1370 = vmatpush1.bf16.msra.mxu0 %v13889_v0  ;;  %v12942_v0 = vld [vmem:[%s17206_s1 + $0xe0] ss:$12 sps:$4 sm:$0xff]  }
 0x16e   :  { %1371 = vmatprep.subr.bf16.mxu0 %v13904_v4  ;;  %v12944_v4 = vld [vmem:[%s17206_s1 + $0x110] ss:$12 sps:$4 sm:$0xff]  }
 0x16f   :  { %11977 = vmatpush3.bf16.msra.mxu1 %v12942_v0 }
 0x170   :  { %11978 = vmatprep.subr.bf16.mxu1 %v17222_v34 }
 0x171   :  { %1372 = vmatpush1.bf16.msra.mxu0 %v13899_v3  ;;  %v12943_v3 = vld [vmem:[%s17206_s1 + $0xf8] ss:$12 sps:$4 sm:$0xff]  }
 0x172   :  { %1373 = vmatprep.subr.bf16.mxu0 %v13913_v6  ;;  %v12945_v6 = vld [vmem:[%s17206_s1 + $0x128] ss:$12 sps:$4 sm:$0xff]  }
 0x173   :  { %11979 = vmatpush3.bf16.msra.mxu1 %v12943_v3 }
 0x174   :  { %11980 = vmatprep.subr.bf16.mxu1 %v17222_v34 }
 0x175   :  { %1374 = vmatpush1.bf16.msra.mxu0 %v13920_v7  ;;  %v12946_v7 = vld [vmem:[%s17206_s1 + $0x140] ss:$12 sps:$4 sm:$0xff]  }
 0x176   :  { %1375 = vmatprep.subr.bf16.mxu0 %v13928_v9  ;;  %v12947_v9 = vld [vmem:[%s17206_s1 + $0x158] ss:$12 sps:$4 sm:$0xff]  }
 0x177   :  { %11981 = vmatpush3.bf16.msra.mxu1 %v12944_v4 }
 0x178   :  { %11982 = vmatprep.subr.bf16.mxu1 %v17222_v34 }
 0x179   :  { %1376 = vmatpush1.bf16.msra.mxu0 %v13935_v10  ;;  %v12948_v10 = vld [vmem:[%s17206_s1 + $0x170] ss:$12 sps:$4 sm:$0xff]  }
 0x17a   :  { %1377 = vmatprep.subr.bf16.mxu0 %v13943_v12  ;;  %v14213_v12 = vld [vmem:[%s17208_s2 + $0x4] ss:$12 sps:$4 sm:$0xff]  }
 0x17b   :  { %11983 = vmatpush3.bf16.msra.mxu1 %v12945_v6 }
 0x17c   :  { %11984 = vmatprep.subr.bf16.mxu1 %v17222_v34 }
 0x17d   :  { %1378 = vmatpush1.bf16.msra.mxu0 %v13951_v13 }
 0x17e   :  { %1610 = vmatprep.subr.bf16.mxu0 %v14213_v12 }
 0x17f   :  { %11985 = vmatpush3.bf16.msra.mxu1 %v12946_v7 }
 0x180   :  { %11986 = vmatprep.subr.bf16.mxu1 %v17222_v34 }
 0x183   :  { %11987 = vmatpush3.bf16.msra.mxu1 %v12947_v9 }
 0x184   :  { %11988 = vmatprep.subr.bf16.mxu1 %v17222_v34 }
 0x187   :  { %11989 = vmatpush3.bf16.msra.mxu1 %v12948_v10 }
 0x188   :  { %11994 = vmatprep.subr.bf16.mxu1 %v17222_v34 }
 0x213   :  { %v14217_v13 = vpop.f32.mrb[12].mxu1 }
 0x214   :  { %17228 = vst [vmem:[#allocation8_spill] sm:$0xff] %v14217_v13  ;;  %v11952_v36 = vpop.f32.mrb[13].mxu1 }
 0x215   :  { %v918_v38 = vpop.f32.mrb[14].mxu1 }
 0x216   :  { %v11953_v40 = vpop.f32.mrb[15].mxu1 }
 0x217   :  { %v14229_v40 = vld [vmem:[%s17208_s2] ss:$12 sps:$4 sm:$0xff]  }
 0x233   :  { %v1121_v42 = vpop.f32.mrb[24].mxu0  ;;  %v1162_v45 = vpop.f32.mrb[16].mxu1 }
 0x234   :  { %v1168_v47 = vadd.f32 %v1121_v42, %v13975_v27  ;;  %v1123_v49 = vpop.f32.mrb[25].mxu0  ;;  %v11972_v50 = vpop.f32.mrb[17].mxu1  ;;  %v1178_v3 = vadd.f32 %v1162_v45, %v14030_v52  ;;  %v12952_v42 = vld [vmem:[%s17208_s2 + $0x8] ss:$12 sps:$4 sm:$0xff]  }
 0x235   :  { %v1173_v54 = vadd.f32 %v1123_v49, %v13980_v30  ;;  %v1125_v22 = vpop.f32.mrb[26].mxu0  ;;  %v1165_v23 = vpop.f32.mrb[18].mxu1  ;;  %v14239_v45 = vld [vmem:[%s17208_s2 + $0x1c] ss:$12 sps:$4 sm:$0xff]   ;;  %v14255_v49 = vld [vmem:[%s17208_s2 + $0x34] ss:$12 sps:$4 sm:$0xff]  }
 0x236   :  { %v1169_v24 = vmul.f32 0.5, %v1168_v47  ;;  %v1126_v25 = vpop.f32.mrb[27].mxu0  ;;  %v11973_v56 = vpop.f32.mrb[19].mxu1  ;;  %v12956_v47 = vld [vmem:[%s17208_s2 + $0x20] ss:$12 sps:$4 sm:$0xff]  }
 0x237   :  { %v1174_v58 = vmul.f32 0.5, %v1173_v54  ;;  %v14264_v50 = vld [vmem:[%s17208_s2 + $0x30] ss:$12 sps:$4 sm:$0xff]   ;;  %v12960_v54 = vld [vmem:[%s17208_s2 + $0x38] ss:$12 sps:$4 sm:$0xff]  }
 0x238   :  { %13459 = vtanh.f32 %v1169_v24  ;;  %v14274_v22 = vld [vmem:[%s17208_s2 + $0x4c] ss:$12 sps:$4 sm:$0xff]   ;;  %v14280_v23 = vld [vmem:[%s17208_s2 + $0x48] ss:$12 sps:$4 sm:$0xff]   ;;  %v12964_v24 = vld [vmem:[%s17208_s2 + $0x50] ss:$12 sps:$4 sm:$0xff]  }
 0x239   :  { %13461 = vtanh.f32 %v1174_v58  ;;  %v14290_v25 = vld [vmem:[%s17208_s2 + $0x64] ss:$12 sps:$4 sm:$0xff]   ;;  %v14296_v56 = vld [vmem:[%s17208_s2 + $0x60] ss:$12 sps:$4 sm:$0xff]   ;;  %v12968_v58 = vld [vmem:[%s17208_s2 + $0x68] ss:$12 sps:$4 sm:$0xff]  }
 0x242   :  { %v13460_v8 = vpop.eup %13459 }
 0x243   :  { %v1171_v63 = vmul.f32 0.5, %v13460_v8  ;;  %v13462_v6 = vpop.eup %13461  ;;  %v14306_v8 = vld [vmem:[%s17208_s2 + $0x7c] ss:$12 sps:$4 sm:$0xff]  }
 0x244   :  { %v1176_v7 = vmul.f32 0.5, %v13462_v6  ;;  %v12976_v6 = vld [vmem:[%s17206_s1 + $0xe0] ss:$12 sps:$4 sm:$0xff]  }
 0x245   :  { %v1172_v0 = vadd.f32 0.5, %v1171_v63  ;;  %v14312_v63 = vld [vmem:[%s17208_s2 + $0x78] ss:$12 sps:$4 sm:$0xff]  }
 0x246   :  { %v1177_v9 = vadd.f32 0.5, %v1176_v7  ;;  %v12977_v7 = vld [vmem:[%s17206_s1 + $0xf8] ss:$12 sps:$4 sm:$0xff]  }
 0x247   :  { %v1179_v4 = vmul.f32 %v1178_v3, %v1172_v0  ;;  %v12972_v0 = vld [vmem:[%s17208_s2 + $0x80] ss:$12 sps:$4 sm:$0xff]   ;;  %v12973_v3 = vld [vmem:[%s17208_s2 + $0x98] ss:$12 sps:$4 sm:$0xff]  }
 0x249   :  { %v1180_v27 = vadd.f32 %v1179_v4, %v13993_v43  ;;  %v12974_v4 = vld [vmem:[%s17208_s2 + $0xb0] ss:$12 sps:$4 sm:$0xff]  }
 0x24b   :  { %13463 = vtanh.f32 %v1180_v27  ;;  %v12975_v27 = vld [vmem:[%s17206_s1 + $0xc8] ss:$12 sps:$4 sm:$0xff]  }
 0x255   :  { %v13464_v30 = vpop.eup %13463 }
 0x256   :  { %v1182_v10 = vsub.f32 %v14034_v28, %v13464_v30  ;;  %v14245_v28 = vld [vmem:[%s17208_s2 + $0x18] ss:$12 sps:$4 sm:$0xff]  }
 0x258   :  { %v1183_v36 = vmul.f32 %v1182_v10, %v1177_v9  ;;  %v12979_v9 = vld [vmem:[%s17206_s1 + $0x128] ss:$12 sps:$4 sm:$0xff]   ;;  %v12980_v10 = vld [vmem:[%s17206_s1 + $0x140] ss:$12 sps:$4 sm:$0xff]  }
 0x25a   :  { %v14224_v38 = vadd.f32 %v13464_v30, %v1183_v36  ;;  %v12978_v30 = vld [vmem:[%s17206_s1 + $0x110] ss:$12 sps:$4 sm:$0xff]   ;;  %v12981_v36 = vld [vmem:[%s17206_s1 + $0x158] ss:$12 sps:$4 sm:$0xff]  }
 0x25c   :  { %v1185_v43 = vpack.c.bf16 %v14224_v38, %v14224_v38 }
 0x25e   :  { %1396 = vmatmul.mubr.bf16.vlgmr.msra.gmra.mrb[28].mxu0 %v1185_v43  ;;  %11991 = vmatmul.mubr.bf16.vlgmr.msra.gmra.mrb[20].mxu1 %v1185_v43 }
 0x25f   :  { %1611 = vmatpush1.bf16.msra.mxu0 %v14229_v40  ;;  %11995 = vmatpush3.bf16.msra.mxu1 %v12952_v42  ;;  %v12982_v42 = vld [vmem:[%s17206_s1 + $0x170] ss:$12 sps:$4 sm:$0xff]  }
 0x260   :  { %1612 = vmatprep.subr.bf16.mxu0 %v14239_v45  ;;  %11996 = vmatprep.subr.bf16.mxu1 %v17222_v34 }
 0x261   :  { %1642 = vmatprep.mubr.bf16.mxu0 %v17214_v1  ;;  %12010 = vmatprep.mubr.msk.bf16.mxu1 %vm13633_vm0, %v17222_v34 }
 0x263   :  { %1613 = vmatpush1.bf16.msra.mxu0 %v14245_v28  ;;  %11997 = vmatpush3.bf16.msra.mxu1 %v12956_v47 }
 0x264   :  { %1614 = vmatprep.subr.bf16.mxu0 %v14255_v49  ;;  %11998 = vmatprep.subr.bf16.mxu1 %v17222_v34 }
 0x267   :  { %1615 = vmatpush1.bf16.msra.mxu0 %v14264_v50  ;;  %11999 = vmatpush3.bf16.msra.mxu1 %v12960_v54 }
 0x268   :  { %1616 = vmatprep.subr.bf16.mxu0 %v14274_v22  ;;  %12000 = vmatprep.subr.bf16.mxu1 %v17222_v34 }
 0x26b   :  { %1617 = vmatpush1.bf16.msra.mxu0 %v14280_v23  ;;  %12001 = vmatpush3.bf16.msra.mxu1 %v12964_v24 }
 0x26c   :  { %1618 = vmatprep.subr.bf16.mxu0 %v14290_v25  ;;  %12002 = vmatprep.subr.bf16.mxu1 %v17222_v34 }
 0x26f   :  { %1619 = vmatpush1.bf16.msra.mxu0 %v14296_v56  ;;  %12003 = vmatpush3.bf16.msra.mxu1 %v12968_v58 }
 0x270   :  { %1620 = vmatprep.subr.bf16.mxu0 %v14306_v8  ;;  %12004 = vmatprep.subr.bf16.mxu1 %v17222_v34 }
 0x273   :  { %1621 = vmatpush1.bf16.msra.mxu0 %v14312_v63  ;;  %12005 = vmatpush3.bf16.msra.mxu1 %v12972_v0 }
 0x274   :  { %1622 = vmatprep.subr.bf16.mxu0 %v14103_v61  ;;  %12006 = vmatprep.subr.bf16.mxu1 %v17222_v34  ;;  %v13619_v61 = vld [vmem:[%s17206_s1 + $0x10c] ss:$12 sps:$4 sm:$0xff]  }
 0x277   :  { %1623 = vmatpush1.bf16.msra.mxu0 %v14110_v2  ;;  %12007 = vmatpush3.bf16.msra.mxu1 %v12973_v3  ;;  %v13620_v2 = vld [vmem:[%s17206_s1 + $0x108] ss:$12 sps:$4 sm:$0xff]  }
 0x278   :  { %1624 = vmatprep.subr.bf16.mxu0 %v14119_v14  ;;  %12008 = vmatprep.subr.bf16.mxu1 %v17222_v34  ;;  %v13621_v14 = vld [vmem:[%s17206_s1 + $0x124] ss:$12 sps:$4 sm:$0xff]  }
 0x27b   :  { %1625 = vmatpush1.bf16.msra.mxu0 %v14126_v16  ;;  %12009 = vmatpush3.bf16.msra.mxu1 %v12974_v4  ;;  %v13622_v16 = vld [vmem:[%s17206_s1 + $0x120] ss:$12 sps:$4 sm:$0xff]  }
 0x27c   :  { %1886 = vmatprep.subr.bf16.mxu0 %v14132_v21  ;;  %12014 = vmatprep.subr.bf16.mxu1 %v17222_v34  ;;  %v13623_v21 = vld [vmem:[%s17206_s1 + $0x13c] ss:$12 sps:$4 sm:$0xff]  }
 0x27e   :  { %1643 = vmatmul.mubr.bf16.vlgmr.msra.gmra.mrb[32].mxu0 %v1185_v43  ;;  %12011 = vmatmul.mubr.bf16.vlgmr.msra.gmra.mrb[24].mxu1 %v1185_v43 }
 0x27f   :  { %1887 = vmatpush1.bf16.msra.mxu0 %v14139_v26  ;;  %1918 = vmatprep.mubr.bf16.mxu0 %v17214_v1  ;;  %v13624_v26 = vld [vmem:[%s17206_s1 + $0x138] ss:$12 sps:$4 sm:$0xff]  }
 0x280   :  { %1888 = vmatprep.subr.bf16.mxu0 %v14146_v31  ;;  %12030 = vmatprep.mubr.msk.bf16.mxu1 %vm13633_vm0, %v17222_v34  ;;  %v13625_v31 = vld [vmem:[%s17206_s1 + $0x154] ss:$12 sps:$4 sm:$0xff]  }
 0x281   :  { %12015 = vmatpush3.bf16.msra.mxu1 %v12975_v27 }
 0x282   :  { %12016 = vmatprep.subr.bf16.mxu1 %v17222_v34 }
 0x283   :  { %1889 = vmatpush1.bf16.msra.mxu0 %v14154_v35  ;;  %v13626_v35 = vld [vmem:[%s17206_s1 + $0x150] ss:$12 sps:$4 sm:$0xff]  }
 0x284   :  { %1890 = vmatprep.subr.bf16.mxu0 %v14160_v29  ;;  %v13627_v29 = vld [vmem:[%s17206_s1 + $0x16c] ss:$12 sps:$4 sm:$0xff]  }
 0x285   :  { %12017 = vmatpush3.bf16.msra.mxu1 %v12976_v6 }
 0x286   :  { %12018 = vmatprep.subr.bf16.mxu1 %v17222_v34 }
 0x287   :  { %1891 = vmatpush1.bf16.msra.mxu0 %v14166_v33  ;;  %v13628_v33 = vld [vmem:[%s17206_s1 + $0x168] ss:$12 sps:$4 sm:$0xff]  }
 0x288   :  { %1892 = vmatprep.subr.bf16.mxu0 %v13619_v61 }
 0x289   :  { %12019 = vmatpush3.bf16.msra.mxu1 %v12977_v7 }
 0x28a   :  { %12020 = vmatprep.subr.bf16.mxu1 %v17222_v34 }
 0x28b   :  { %1893 = vmatpush1.bf16.msra.mxu0 %v13620_v2 }
 0x28c   :  { %1894 = vmatprep.subr.bf16.mxu0 %v13621_v14 }
 0x28d   :  { %12021 = vmatpush3.bf16.msra.mxu1 %v12978_v30 }
 0x28e   :  { %12022 = vmatprep.subr.bf16.mxu1 %v17222_v34 }
 0x28f   :  { %1895 = vmatpush1.bf16.msra.mxu0 %v13622_v16 }
 0x290   :  { %1896 = vmatprep.subr.bf16.mxu0 %v13623_v21 }
 0x291   :  { %12023 = vmatpush3.bf16.msra.mxu1 %v12979_v9 }
 0x292   :  { %12024 = vmatprep.subr.bf16.mxu1 %v17222_v34 }
 0x293   :  { %1897 = vmatpush1.bf16.msra.mxu0 %v13624_v26 }
 0x294   :  { %1898 = vmatprep.subr.bf16.mxu0 %v13625_v31 }
 0x295   :  { %12025 = vmatpush3.bf16.msra.mxu1 %v12980_v10 }
 0x296   :  { %12026 = vmatprep.subr.bf16.mxu1 %v17222_v34 }
 0x297   :  { %1899 = vmatpush1.bf16.msra.mxu0 %v13626_v35 }
 0x298   :  { %1900 = vmatprep.subr.bf16.mxu0 %v13627_v29 }
 0x299   :  { %12027 = vmatpush3.bf16.msra.mxu1 %v12981_v36 }
 0x29a   :  { %12028 = vmatprep.subr.bf16.mxu1 %v17222_v34 }
 0x29b   :  { %1901 = vmatpush1.bf16.msra.mxu0 %v13628_v33 }
 0x29c   :  { %2133 = vmatprep.subr.bf16.mxu0 %v14213_v12 }
 0x29d   :  { %12029 = vmatpush3.bf16.msra.mxu1 %v12982_v42 }
 0x29e   :  { %12034 = vmatprep.subr.bf16.mxu1 %v17222_v34 }
 0x331   :  { %v14405_v43 = vpop.f32.mrb[20].mxu1 }
 0x332   :  { %17229 = vst [vmem:[#allocation9_spill] sm:$0xff] %v14405_v43  ;;  %v11992_v47 = vpop.f32.mrb[21].mxu1 }
 0x333   :  { %v1441_v54 = vpop.f32.mrb[22].mxu1 }
 0x334   :  { %v11993_v24 = vpop.f32.mrb[23].mxu1  ;;  %v12983_v54 = vld [vmem:[%s17208_s2 + $0x8] ss:$12 sps:$4 sm:$0xff]  }
 0x351   :  { %v1644_v58 = vpop.f32.mrb[32].mxu0  ;;  %v1685_v0 = vpop.f32.mrb[24].mxu1 }
 0x352   :  { %v1691_v3 = vadd.f32 %v1644_v58, %v13985_v37  ;;  %v1646_v4 = vpop.f32.mrb[33].mxu0  ;;  %v12012_v61 = vpop.f32.mrb[25].mxu1  ;;  %v1701_v6 = vadd.f32 %v1685_v0, %v14030_v52  ;;  %v12986_v58 = vld [vmem:[%s17208_s2 + $0x50] ss:$12 sps:$4 sm:$0xff]   ;;  %v12987_v0 = vld [vmem:[%s17208_s2 + $0x68] ss:$12 sps:$4 sm:$0xff]  }
 0x353   :  { %v1696_v2 = vadd.f32 %v1646_v4, %v13990_v41  ;;  %v1648_v14 = vpop.f32.mrb[34].mxu0  ;;  %v1688_v16 = vpop.f32.mrb[26].mxu1  ;;  %v14455_v4 = vld [vmem:[%s17208_s2 + $0x94] ss:$12 sps:$4 sm:$0xff]   ;;  %v14461_v61 = vld [vmem:[%s17208_s2 + $0x90] ss:$12 sps:$4 sm:$0xff]  }
 0x354   :  { %v1692_v21 = vmul.f32 0.5, %v1691_v3  ;;  %v1649_v26 = vpop.f32.mrb[35].mxu0  ;;  %v12013_v31 = vpop.f32.mrb[27].mxu1  ;;  %v12988_v3 = vld [vmem:[%s17208_s2 + $0x80] ss:$12 sps:$4 sm:$0xff]  }
 0x355   :  { %v1697_v35 = vmul.f32 0.5, %v1696_v2  ;;  %v12992_v2 = vld [vmem:[%s17208_s2 + $0x98] ss:$12 sps:$4 sm:$0xff]   ;;  %v14477_v16 = vld [vmem:[%s17208_s2 + $0xa8] ss:$12 sps:$4 sm:$0xff]  }
 0x356   :  { %13465 = vtanh.f32 %v1692_v21  ;;  %v14471_v14 = vld [vmem:[%s17208_s2 + $0xac] ss:$12 sps:$4 sm:$0xff]   ;;  %v12996_v21 = vld [vmem:[%s17208_s2 + $0xb0] ss:$12 sps:$4 sm:$0xff]  }
 0x357   :  { %13467 = vtanh.f32 %v1697_v35  ;;  %v14492_v26 = vld [vmem:[%s17206_s1 + $0xc4] ss:$12 sps:$4 sm:$0xff]   ;;  %v14497_v31 = vld [vmem:[%s17206_s1 + $0xc0] ss:$12 sps:$4 sm:$0xff]   ;;  %v13000_v35 = vld [vmem:[%s17206_s1 + $0xc8] ss:$12 sps:$4 sm:$0xff]  }
 0x360   :  { %v13466_v29 = vpop.eup %13465 }
 0x361   :  { %v1694_v33 = vmul.f32 0.5, %v13466_v29  ;;  %v13468_v30 = vpop.eup %13467  ;;  %v14507_v29 = vld [vmem:[%s17206_s1 + $0xdc] ss:$12 sps:$4 sm:$0xff]  }
 0x362   :  { %v1699_v9 = vmul.f32 0.5, %v13468_v30  ;;  %v14539_v30 = vld [vmem:[%s17206_s1 + $0x10c] ss:$12 sps:$4 sm:$0xff]  }
 0x363   :  { %v1695_v27 = vadd.f32 0.5, %v1694_v33  ;;  %v14513_v33 = vld [vmem:[%s17206_s1 + $0xd8] ss:$12 sps:$4 sm:$0xff]  }
 0x364   :  { %v1700_v10 = vadd.f32 0.5, %v1699_v9  ;;  %v14545_v9 = vld [vmem:[%s17206_s1 + $0x108] ss:$12 sps:$4 sm:$0xff]  }
 0x365   :  { %v1702_v7 = vmul.f32 %v1701_v6, %v1695_v27  ;;  %v13004_v27 = vld [vmem:[%s17206_s1 + $0xe0] ss:$12 sps:$4 sm:$0xff]  }
 0x366   :  { %v14523_v6 = vld [vmem:[%s17206_s1 + $0xf4] ss:$12 sps:$4 sm:$0xff]  }
 0x367   :  { %v1703_v37 = vadd.f32 %v1702_v7, %v13983_v32  ;;  %v12984_v32 = vld [vmem:[%s17208_s2 + $0x20] ss:$12 sps:$4 sm:$0xff]   ;;  %v14529_v7 = vld [vmem:[%s17206_s1 + $0xf0] ss:$12 sps:$4 sm:$0xff]  }
 0x369   :  { %13469 = vtanh.f32 %v1703_v37  ;;  %v13008_v37 = vld [vmem:[%s17206_s1 + $0xf8] ss:$12 sps:$4 sm:$0xff]  }
 0x373   :  { %v13470_v41 = vpop.eup %13469 }
 0x374   :  { %v1705_v36 = vsub.f32 %v14224_v38, %v13470_v41  ;;  %v12985_v38 = vld [vmem:[%s17208_s2 + $0x38] ss:$12 sps:$4 sm:$0xff]  }
 0x376   :  { %v1706_v42 = vmul.f32 %v1705_v36, %v1700_v10  ;;  %v14555_v10 = vld [vmem:[%s17206_s1 + $0x124] ss:$12 sps:$4 sm:$0xff]   ;;  %v14561_v36 = vld [vmem:[%s17206_s1 + $0x120] ss:$12 sps:$4 sm:$0xff]  }
 0x378   :  { %v14412_v47 = vadd.f32 %v13470_v41, %v1706_v42  ;;  %v13012_v41 = vld [vmem:[%s17206_s1 + $0x110] ss:$12 sps:$4 sm:$0xff]   ;;  %v13016_v42 = vld [vmem:[%s17206_s1 + $0x128] ss:$12 sps:$4 sm:$0xff]  }
 0x37a   :  { %v1708_v24 = vpack.c.bf16 %v14412_v47, %v14412_v47 }
 0x37c   :  { %1919 = vmatmul.mubr.bf16.vlgmr.msra.gmra.mrb[36].mxu0 %v1708_v24  ;;  %12031 = vmatmul.mubr.bf16.vlgmr.msra.gmra.mrb[28].mxu1 %v1708_v24 }
 0x37d   :  { %2134 = vmatpush1.bf16.msra.mxu0 %v14229_v40  ;;  %12035 = vmatpush3.bf16.msra.mxu1 %v12983_v54  ;;  %v14571_v54 = vld [vmem:[%s17206_s1 + $0x13c] ss:$12 sps:$4 sm:$0xff]  }
 0x37e   :  { %2135 = vmatprep.subr.bf16.mxu0 %v14239_v45  ;;  %12036 = vmatprep.subr.bf16.mxu1 %v17222_v34 }
 0x37f   :  { %2165 = vmatprep.mubr.bf16.mxu0 %v17214_v1  ;;  %12050 = vmatprep.mubr.msk.bf16.mxu1 %vm13633_vm0, %v17222_v34 }
 0x381   :  { %2136 = vmatpush1.bf16.msra.mxu0 %v14245_v28  ;;  %12037 = vmatpush3.bf16.msra.mxu1 %v12984_v32  ;;  %v13020_v32 = vld [vmem:[%s17206_s1 + $0x140] ss:$12 sps:$4 sm:$0xff]  }
 0x382   :  { %2137 = vmatprep.subr.bf16.mxu0 %v14255_v49  ;;  %12038 = vmatprep.subr.bf16.mxu1 %v17222_v34 }
 0x385   :  { %2138 = vmatpush1.bf16.msra.mxu0 %v14264_v50  ;;  %12039 = vmatpush3.bf16.msra.mxu1 %v12985_v38  ;;  %v14587_v38 = vld [vmem:[%s17206_s1 + $0x154] ss:$12 sps:$4 sm:$0xff]  }
 0x386   :  { %2139 = vmatprep.subr.bf16.mxu0 %v14274_v22  ;;  %12040 = vmatprep.subr.bf16.mxu1 %v17222_v34 }
 0x389   :  { %2140 = vmatpush1.bf16.msra.mxu0 %v14280_v23  ;;  %12041 = vmatpush3.bf16.msra.mxu1 %v12986_v58  ;;  %v14593_v58 = vld [vmem:[%s17206_s1 + $0x150] ss:$12 sps:$4 sm:$0xff]  }
 0x38a   :  { %2141 = vmatprep.subr.bf16.mxu0 %v14290_v25  ;;  %12042 = vmatprep.subr.bf16.mxu1 %v17222_v34 }
 0x38d   :  { %2142 = vmatpush1.bf16.msra.mxu0 %v14296_v56  ;;  %12043 = vmatpush3.bf16.msra.mxu1 %v12987_v0  ;;  %v13024_v0 = vld [vmem:[%s17206_s1 + $0x158] ss:$12 sps:$4 sm:$0xff]  }
 0x38e   :  { %2143 = vmatprep.subr.bf16.mxu0 %v14306_v8  ;;  %12044 = vmatprep.subr.bf16.mxu1 %v17222_v34 }
 0x391   :  { %2144 = vmatpush1.bf16.msra.mxu0 %v14312_v63  ;;  %12045 = vmatpush3.bf16.msra.mxu1 %v12988_v3  ;;  %v14603_v3 = vld [vmem:[%s17206_s1 + $0x16c] ss:$12 sps:$4 sm:$0xff]  }
 0x392   :  { %2145 = vmatprep.subr.bf16.mxu0 %v14455_v4  ;;  %12046 = vmatprep.subr.bf16.mxu1 %v17222_v34 }
 0x395   :  { %2146 = vmatpush1.bf16.msra.mxu0 %v14461_v61  ;;  %12047 = vmatpush3.bf16.msra.mxu1 %v12992_v2  ;;  %v14609_v2 = vld [vmem:[%s17206_s1 + $0x168] ss:$12 sps:$4 sm:$0xff]  }
 0x396   :  { %2147 = vmatprep.subr.bf16.mxu0 %v14471_v14  ;;  %12048 = vmatprep.subr.bf16.mxu1 %v17222_v34 }
 0x399   :  { %2148 = vmatpush1.bf16.msra.mxu0 %v14477_v16  ;;  %12049 = vmatpush3.bf16.msra.mxu1 %v12996_v21  ;;  %v13028_v21 = vld [vmem:[%s17206_s1 + $0x170] ss:$12 sps:$4 sm:$0xff]  }
 0x39a   :  { %12054 = vmatprep.subr.bf16.mxu1 %v17222_v34  ;;  %2409 = vmatprep.subr.bf16.mxu0 %v14492_v26 }
 0x39c   :  { %2166 = vmatmul.mubr.bf16.vlgmr.msra.gmra.mrb[40].mxu0 %v1708_v24  ;;  %12051 = vmatmul.mubr.bf16.vlgmr.msra.gmra.mrb[32].mxu1 %v1708_v24  ;;  %v14577_v24 = vld [vmem:[%s17206_s1 + $0x138] ss:$12 sps:$4 sm:$0xff]  }
 0x39d   :  { %2441 = vmatprep.mubr.bf16.mxu0 %v17214_v1  ;;  %12070 = vmatprep.mubr.msk.bf16.mxu1 %vm13633_vm0, %v17222_v34 }
 0x39e   :  { %2410 = vmatpush1.bf16.msra.mxu0 %v14497_v31  ;;  %12055 = vmatpush3.bf16.msra.mxu1 %v13000_v35 }
 0x39f   :  { %12056 = vmatprep.subr.bf16.mxu1 %v17222_v34  ;;  %2411 = vmatprep.subr.bf16.mxu0 %v14507_v29 }
 0x3a2   :  { %2412 = vmatpush1.bf16.msra.mxu0 %v14513_v33  ;;  %12057 = vmatpush3.bf16.msra.mxu1 %v13004_v27 }
 0x3a3   :  { %12058 = vmatprep.subr.bf16.mxu1 %v17222_v34  ;;  %2413 = vmatprep.subr.bf16.mxu0 %v14523_v6 }
 0x3a6   :  { %2414 = vmatpush1.bf16.msra.mxu0 %v14529_v7  ;;  %12059 = vmatpush3.bf16.msra.mxu1 %v13008_v37 }
 0x3a7   :  { %12060 = vmatprep.subr.bf16.mxu1 %v17222_v34  ;;  %2415 = vmatprep.subr.bf16.mxu0 %v14539_v30 }
 0x3aa   :  { %2416 = vmatpush1.bf16.msra.mxu0 %v14545_v9  ;;  %12061 = vmatpush3.bf16.msra.mxu1 %v13012_v41 }
 0x3ab   :  { %12062 = vmatprep.subr.bf16.mxu1 %v17222_v34  ;;  %2417 = vmatprep.subr.bf16.mxu0 %v14555_v10 }
 0x3ae   :  { %2418 = vmatpush1.bf16.msra.mxu0 %v14561_v36  ;;  %12063 = vmatpush3.bf16.msra.mxu1 %v13016_v42 }
 0x3af   :  { %12064 = vmatprep.subr.bf16.mxu1 %v17222_v34  ;;  %2419 = vmatprep.subr.bf16.mxu0 %v14571_v54 }
 0x3b2   :  { %2420 = vmatpush1.bf16.msra.mxu0 %v14577_v24  ;;  %12065 = vmatpush3.bf16.msra.mxu1 %v13020_v32 }
 0x3b3   :  { %12066 = vmatprep.subr.bf16.mxu1 %v17222_v34  ;;  %2421 = vmatprep.subr.bf16.mxu0 %v14587_v38 }
 0x3b6   :  { %2422 = vmatpush1.bf16.msra.mxu0 %v14593_v58  ;;  %12067 = vmatpush3.bf16.msra.mxu1 %v13024_v0 }
 0x3b7   :  { %12068 = vmatprep.subr.bf16.mxu1 %v17222_v34  ;;  %2423 = vmatprep.subr.bf16.mxu0 %v14603_v3 }
 0x3ba   :  { %2424 = vmatpush1.bf16.msra.mxu0 %v14609_v2  ;;  %12069 = vmatpush3.bf16.msra.mxu1 %v13028_v21 }
 0x3bb   :  { %2656 = vmatprep.subr.bf16.mxu0 %v14213_v12  ;;  %12074 = vmatprep.subr.bf16.mxu1 %v17222_v34 }
 0x44f   :  { %v14618_v35 = vpop.f32.mrb[28].mxu1 }
 0x450   :  { %17230 = vst [vmem:[#allocation10_spill] sm:$0xff] %v14618_v35  ;;  %v12032_v27 = vpop.f32.mrb[29].mxu1 }
 0x451   :  { %v1964_v37 = vpop.f32.mrb[30].mxu1 }
 0x452   :  { %v12033_v41 = vpop.f32.mrb[31].mxu1 }
 0x46f   :  { %v2167_v42 = vpop.f32.mrb[40].mxu0  ;;  %v2208_v32 = vpop.f32.mrb[32].mxu1 }
 0x470   :  { %v2214_v0 = vadd.f32 %v2167_v42, %v13995_v44  ;;  %v2169_v1 = vpop.f32.mrb[41].mxu0  ;;  %v12052_v43 = vpop.f32.mrb[33].mxu1  ;;  %v2224_v37 = vadd.f32 %v2208_v32, %v14030_v52  ;;  %v17231_v52 = vmov 0.0   ;;  %v13044_v32 = vld [vmem:[%s17206_s1 + $0x170] ss:$12 sps:$4 sm:$0xff]  }
 0x471   :  { %v2219_v13 = vadd.f32 %v2169_v1, %v13997_v46  ;;  %v2171_v20 = vpop.f32.mrb[42].mxu0  ;;  %v2211_v19 = vpop.f32.mrb[34].mxu1 }
 0x472   :  { %v2215_v21 = vmul.f32 0.5, %v2214_v0  ;;  %v2172_v18 = vpop.f32.mrb[43].mxu0  ;;  %v12053_v12 = vpop.f32.mrb[35].mxu1  ;;  %v14732_v0 = vld [vmem:[%s17208_s2 + $0x4] ss:$12 sps:$4 sm:$0xff]  }
 0x473   :  { %v2220_v34 = vmul.f32 0.5, %v2219_v13  ;;  %v17232_v13 = vmov 0  }
 0x474   :  { %13471 = vtanh.f32 %v2215_v21 }
 0x475   :  { %13473 = vtanh.f32 %v2220_v34 }
 0x47e   :  { %v13472_v55 = vpop.eup %13471 }
 0x47f   :  { %v2217_v35 = vmul.f32 0.5, %v13472_v55  ;;  %v13474_v43 = vpop.eup %13473  ;;  %v13029_v55 = vld [vmem:[%s17208_s2 + $0x8] ss:$12 sps:$4 sm:$0xff]  }
 0x480   :  { %v2222_v42 = vmul.f32 0.5, %v13474_v43 }
 0x481   :  { %v2218_v27 = vadd.f32 0.5, %v2217_v35  ;;  %v13043_v35 = vld [vmem:[%s17206_s1 + $0x158] ss:$12 sps:$4 sm:$0xff]  }
 0x482   :  { %v2223_v20 = vadd.f32 0.5, %v2222_v42 }
 0x483   :  { %v2225_v41 = vmul.f32 %v2224_v37, %v2218_v27 }
 0x485   :  { %v2226_v44 = vadd.f32 %v2225_v41, %v13988_v39  ;;  %v13030_v39 = vld [vmem:[%s17208_s2 + $0x20] ss:$12 sps:$4 sm:$0xff]  }
 0x487   :  { %13475 = vtanh.f32 %v2226_v44 }
 0x491   :  { %v13476_v1 = vpop.eup %13475 }
 0x492   :  { %v2228_v19 = vsub.f32 %v14412_v47, %v13476_v1  ;;  %v13042_v47 = vld [vmem:[%s17206_s1 + $0x140] ss:$12 sps:$4 sm:$0xff]  }
 0x494   :  { %v2229_v18 = vmul.f32 %v2228_v19, %v2223_v20 }
 0x496   :  { %v14625_v46 = vadd.f32 %v13476_v1, %v2229_v18 }
 0x498   :  { %v2231_v34 = vpack.c.bf16 %v14625_v46, %v14625_v46 }
 0x49a   :  { %2442 = vmatmul.mubr.bf16.vlgmr.msra.gmra.mrb[44].mxu0 %v2231_v34  ;;  %12071 = vmatmul.mubr.bf16.vlgmr.msra.gmra.mrb[36].mxu1 %v2231_v34 }
 0x49b   :  { %2657 = vmatpush1.bf16.msra.mxu0 %v14229_v40  ;;  %12075 = vmatpush3.bf16.msra.mxu1 %v13029_v55  ;;  %v13031_v40 = vld [vmem:[%s17208_s2 + $0x38] ss:$12 sps:$4 sm:$0xff]  }
 0x49c   :  { %2658 = vmatprep.subr.bf16.mxu0 %v14239_v45  ;;  %12076 = vmatprep.subr.bf16.mxu1 %v17231_v52  ;;  %v13032_v45 = vld [vmem:[%s17208_s2 + $0x50] ss:$12 sps:$4 sm:$0xff]  }
 0x49d   :  { %2688 = vmatprep.mubr.bf16.mxu0 %v17232_v13  ;;  %12090 = vmatprep.mubr.msk.bf16.mxu1 %vm13633_vm0, %v17231_v52 }
 0x49f   :  { %2659 = vmatpush1.bf16.msra.mxu0 %v14245_v28  ;;  %12077 = vmatpush3.bf16.msra.mxu1 %v13030_v39  ;;  %v13033_v28 = vld [vmem:[%s17208_s2 + $0x68] ss:$12 sps:$4 sm:$0xff]  }
 0x4a0   :  { %2660 = vmatprep.subr.bf16.mxu0 %v14255_v49  ;;  %12078 = vmatprep.subr.bf16.mxu1 %v17231_v52  ;;  %v13034_v49 = vld [vmem:[%s17208_s2 + $0x80] ss:$12 sps:$4 sm:$0xff]  }
 0x4a3   :  { %2661 = vmatpush1.bf16.msra.mxu0 %v14264_v50  ;;  %12079 = vmatpush3.bf16.msra.mxu1 %v13031_v40  ;;  %v13035_v50 = vld [vmem:[%s17208_s2 + $0x98] ss:$12 sps:$4 sm:$0xff]  }
 0x4a4   :  { %2662 = vmatprep.subr.bf16.mxu0 %v14274_v22  ;;  %12080 = vmatprep.subr.bf16.mxu1 %v17231_v52  ;;  %v13036_v22 = vld [vmem:[%s17208_s2 + $0xb0] ss:$12 sps:$4 sm:$0xff]  }
 0x4a7   :  { %2663 = vmatpush1.bf16.msra.mxu0 %v14280_v23  ;;  %12081 = vmatpush3.bf16.msra.mxu1 %v13032_v45  ;;  %v13037_v23 = vld [vmem:[%s17206_s1 + $0xc8] ss:$12 sps:$4 sm:$0xff]  }
 0x4a8   :  { %2664 = vmatprep.subr.bf16.mxu0 %v14290_v25  ;;  %12082 = vmatprep.subr.bf16.mxu1 %v17231_v52  ;;  %v13038_v25 = vld [vmem:[%s17206_s1 + $0xe0] ss:$12 sps:$4 sm:$0xff]  }
 0x4ab   :  { %2665 = vmatpush1.bf16.msra.mxu0 %v14296_v56  ;;  %12083 = vmatpush3.bf16.msra.mxu1 %v13033_v28  ;;  %v13039_v56 = vld [vmem:[%s17206_s1 + $0xf8] ss:$12 sps:$4 sm:$0xff]  }
 0x4ac   :  { %2666 = vmatprep.subr.bf16.mxu0 %v14306_v8  ;;  %12084 = vmatprep.subr.bf16.mxu1 %v17231_v52  ;;  %v13040_v8 = vld [vmem:[%s17206_s1 + $0x110] ss:$12 sps:$4 sm:$0xff]  }
 0x4af   :  { %2667 = vmatpush1.bf16.msra.mxu0 %v14312_v63  ;;  %12085 = vmatpush3.bf16.msra.mxu1 %v13034_v49  ;;  %v13041_v63 = vld [vmem:[%s17206_s1 + $0x128] ss:$12 sps:$4 sm:$0xff]  }
 0x4b0   :  { %2668 = vmatprep.subr.bf16.mxu0 %v14455_v4  ;;  %12086 = vmatprep.subr.bf16.mxu1 %v17231_v52 }
 0x4b3   :  { %2669 = vmatpush1.bf16.msra.mxu0 %v14461_v61  ;;  %12087 = vmatpush3.bf16.msra.mxu1 %v13035_v50  ;;  %v14743_v50 = vld [vmem:[%s17210_s4] sm:$0xff] }
 0x4b4   :  { %2670 = vmatprep.subr.bf16.mxu0 %v14471_v14  ;;  %12088 = vmatprep.subr.bf16.mxu1 %v17231_v52 }
 0x4b7   :  { %2671 = vmatpush1.bf16.msra.mxu0 %v14477_v16  ;;  %12089 = vmatpush3.bf16.msra.mxu1 %v13036_v22 }
 0x4b8   :  { %2932 = vmatprep.subr.bf16.mxu0 %v14492_v26  ;;  %12094 = vmatprep.subr.bf16.mxu1 %v17231_v52 }
 0x4ba   :  { %2689 = vmatmul.mubr.bf16.vlgmr.msra.gmra.mrb[48].mxu0 %v2231_v34  ;;  %12091 = vmatmul.mubr.bf16.vlgmr.msra.gmra.mrb[40].mxu1 %v2231_v34 }
 0x4bb   :  { %2933 = vmatpush1.bf16.msra.mxu0 %v14497_v31  ;;  %2964 = vmatprep.mubr.bf16.mxu0 %v17232_v13 }
 0x4bc   :  { %2934 = vmatprep.subr.bf16.mxu0 %v14507_v29  ;;  %12110 = vmatprep.mubr.msk.bf16.mxu1 %vm13633_vm0, %v17231_v52 }
 0x4bd   :  { %12095 = vmatpush3.bf16.msra.mxu1 %v13037_v23 }
 0x4be   :  { %12096 = vmatprep.subr.bf16.mxu1 %v17231_v52 }
 0x4bf   :  { %2935 = vmatpush1.bf16.msra.mxu0 %v14513_v33 }
 0x4c0   :  { %2936 = vmatprep.subr.bf16.mxu0 %v14523_v6 }
 0x4c1   :  { %12097 = vmatpush3.bf16.msra.mxu1 %v13038_v25 }
 0x4c2   :  { %12098 = vmatprep.subr.bf16.mxu1 %v17231_v52 }
 0x4c3   :  { %2937 = vmatpush1.bf16.msra.mxu0 %v14529_v7 }
 0x4c4   :  { %2938 = vmatprep.subr.bf16.mxu0 %v14539_v30 }
 0x4c5   :  { %12099 = vmatpush3.bf16.msra.mxu1 %v13039_v56 }
 0x4c6   :  { %12100 = vmatprep.subr.bf16.mxu1 %v17231_v52 }
 0x4c7   :  { %2939 = vmatpush1.bf16.msra.mxu0 %v14545_v9 }
 0x4c8   :  { %2940 = vmatprep.subr.bf16.mxu0 %v14555_v10 }
 0x4c9   :  { %12101 = vmatpush3.bf16.msra.mxu1 %v13040_v8 }
 0x4ca   :  { %12102 = vmatprep.subr.bf16.mxu1 %v17231_v52 }
 0x4cb   :  { %2941 = vmatpush1.bf16.msra.mxu0 %v14561_v36 }
 0x4cc   :  { %2942 = vmatprep.subr.bf16.mxu0 %v14571_v54 }
 0x4cd   :  { %12103 = vmatpush3.bf16.msra.mxu1 %v13041_v63 }
 0x4ce   :  { %12104 = vmatprep.subr.bf16.mxu1 %v17231_v52 }
 0x4cf   :  { %2943 = vmatpush1.bf16.msra.mxu0 %v14577_v24 }
 0x4d0   :  { %2944 = vmatprep.subr.bf16.mxu0 %v14587_v38 }
 0x4d1   :  { %12105 = vmatpush3.bf16.msra.mxu1 %v13042_v47 }
 0x4d2   :  { %12106 = vmatprep.subr.bf16.mxu1 %v17231_v52 }
 0x4d3   :  { %2945 = vmatpush1.bf16.msra.mxu0 %v14593_v58 }
 0x4d4   :  { %2946 = vmatprep.subr.bf16.mxu0 %v14603_v3 }
 0x4d5   :  { %12107 = vmatpush3.bf16.msra.mxu1 %v13043_v35 }
 0x4d6   :  { %12108 = vmatprep.subr.bf16.mxu1 %v17231_v52 }
 0x4d7   :  { %2947 = vmatpush1.bf16.msra.mxu0 %v14609_v2 }
 0x4d8   :  { %3179 = vmatprep.subr.bf16.mxu0 %v14732_v0 }
 0x4d9   :  { %12109 = vmatpush3.bf16.msra.mxu1 %v13044_v32  ;;  %v14753_v32 = vld [vmem:[%s17208_s2] ss:$12 sps:$4 sm:$0xff]  }
 0x4da   :  { %12114 = vmatprep.subr.bf16.mxu1 %v17231_v52 }
 0x56d   :  { %v14736_v21 = vpop.f32.mrb[36].mxu1 }
 0x56e   :  { %v12072_v12 = vpop.f32.mrb[37].mxu1 }
 0x56f   :  { %v2487_v27 = vpop.f32.mrb[38].mxu1  ;;  %v13048_v12 = vld [vmem:[%s17208_s2 + $0x8] ss:$12 sps:$4 sm:$0xff]  }
 0x570   :  { %v12073_v37 = vpop.f32.mrb[39].mxu1  ;;  %v14763_v27 = vld [vmem:[%s17208_s2 + $0x1c] ss:$12 sps:$4 sm:$0xff]  }
 0x571   :  { %v13052_v37 = vld [vmem:[%s17208_s2 + $0x20] ss:$12 sps:$4 sm:$0xff]  }
 0x58d   :  { %v2690_v41 = vpop.f32.mrb[48].mxu0  ;;  %v2731_v44 = vpop.f32.mrb[40].mxu1 }
 0x58e   :  { %v2737_v43 = vadd.f32 %v2690_v41, %v14005_v53  ;;  %v2692_v42 = vpop.f32.mrb[49].mxu0  ;;  %v12092_v1 = vpop.f32.mrb[41].mxu1  ;;  %v2747_v53 = vadd.f32 %v14743_v50, %v2731_v44  ;;  %v14779_v41 = vld [vmem:[%s17208_s2 + $0x34] ss:$12 sps:$4 sm:$0xff]   ;;  %v14788_v44 = vld [vmem:[%s17208_s2 + $0x30] ss:$12 sps:$4 sm:$0xff]  }
 0x58f   :  { %v2742_v20 = vadd.f32 %v2692_v42, %v14010_v57  ;;  %v2694_v19 = vpop.f32.mrb[50].mxu0  ;;  %v2734_v18 = vpop.f32.mrb[42].mxu1  ;;  %v14798_v42 = vld [vmem:[%s17208_s2 + $0x4c] ss:$12 sps:$4 sm:$0xff]   ;;  %v14804_v1 = vld [vmem:[%s17208_s2 + $0x48] ss:$12 sps:$4 sm:$0xff]  }
 0x590   :  { %v2738_v55 = vmul.f32 0.5, %v2737_v43  ;;  %v2695_v34 = vpop.f32.mrb[51].mxu0  ;;  %v12093_v39 = vpop.f32.mrb[43].mxu1  ;;  %v13056_v43 = vld [vmem:[%s17208_s2 + $0x38] ss:$12 sps:$4 sm:$0xff]  }
 0x591   :  { %v2743_v40 = vmul.f32 0.5, %v2742_v20  ;;  %v13060_v20 = vld [vmem:[%s17208_s2 + $0x50] ss:$12 sps:$4 sm:$0xff]   ;;  %v14820_v18 = vld [vmem:[%s17208_s2 + $0x60] ss:$12 sps:$4 sm:$0xff]  }
 0x592   :  { %13477 = vtanh.f32 %v2738_v55  ;;  %v14814_v19 = vld [vmem:[%s17208_s2 + $0x64] ss:$12 sps:$4 sm:$0xff]   ;;  %v13064_v55 = vld [vmem:[%s17208_s2 + $0x68] ss:$12 sps:$4 sm:$0xff]  }
 0x593   :  { %13479 = vtanh.f32 %v2743_v40  ;;  %v14830_v34 = vld [vmem:[%s17208_s2 + $0x7c] ss:$12 sps:$4 sm:$0xff]   ;;  %v14836_v39 = vld [vmem:[%s17208_s2 + $0x78] ss:$12 sps:$4 sm:$0xff]   ;;  %v13068_v40 = vld [vmem:[%s17208_s2 + $0x80] ss:$12 sps:$4 sm:$0xff]  }
 0x59c   :  { %v13478_v45 = vpop.eup %13477 }
 0x59d   :  { %v2740_v28 = vmul.f32 0.5, %v13478_v45  ;;  %v13480_v23 = vpop.eup %13479  ;;  %v13069_v45 = vld [vmem:[%s17208_s2 + $0x98] ss:$12 sps:$4 sm:$0xff]  }
 0x59e   :  { %v2745_v25 = vmul.f32 0.5, %v13480_v23 }
 0x59f   :  { %v2741_v49 = vadd.f32 0.5, %v2740_v28  ;;  %v13070_v28 = vld [vmem:[%s17208_s2 + $0xb0] ss:$12 sps:$4 sm:$0xff]  }
 0x5a0   :  { %v2746_v8 = vadd.f32 0.5, %v2745_v25 }
 0x5a1   :  { %v2748_v22 = vmul.f32 %v2747_v53, %v2741_v49 }
 0x5a3   :  { %v2749_v57 = vadd.f32 %v2748_v22, %v14003_v51 }
 0x5a5   :  { %13481 = vtanh.f32 %v2749_v57 }
 0x5af   :  { %v13482_v56 = vpop.eup %13481 }
 0x5b0   :  { %v2751_v63 = vsub.f32 %v14625_v46, %v13482_v56  ;;  %v14769_v46 = vld [vmem:[%s17208_s2 + $0x18] ss:$12 sps:$4 sm:$0xff]  }
 0x5b2   :  { %v2752_v47 = vmul.f32 %v2751_v63, %v2746_v8 }
 0x5b4   :  { %v14748_v35 = vadd.f32 %v13482_v56, %v2752_v47 }
 0x5b6   :  { %v2754_v51 = vpack.c.bf16 %v14748_v35, %v14748_v35 }
 0x5b8   :  { %2965 = vmatmul.mubr.bf16.vlgmr.msra.gmra.mrb[52].mxu0 %v2754_v51  ;;  %12111 = vmatmul.mubr.bf16.vlgmr.msra.gmra.mrb[44].mxu1 %v2754_v51 }
 0x5b9   :  { %3180 = vmatpush1.bf16.msra.mxu0 %v14753_v32  ;;  %12115 = vmatpush3.bf16.msra.mxu1 %v13048_v12 }
 0x5ba   :  { %3181 = vmatprep.subr.bf16.mxu0 %v14763_v27  ;;  %12116 = vmatprep.subr.bf16.mxu1 %v17231_v52 }
 0x5bb   :  { %3211 = vmatprep.mubr.bf16.mxu0 %v17232_v13  ;;  %12130 = vmatprep.mubr.msk.bf16.mxu1 %vm13633_vm0, %v17231_v52 }
 0x5bd   :  { %3182 = vmatpush1.bf16.msra.mxu0 %v14769_v46  ;;  %12117 = vmatpush3.bf16.msra.mxu1 %v13052_v37 }
 0x5be   :  { %3183 = vmatprep.subr.bf16.mxu0 %v14779_v41  ;;  %12118 = vmatprep.subr.bf16.mxu1 %v17231_v52 }
 0x5c1   :  { %3184 = vmatpush1.bf16.msra.mxu0 %v14788_v44  ;;  %12119 = vmatpush3.bf16.msra.mxu1 %v13056_v43 }
 0x5c2   :  { %3185 = vmatprep.subr.bf16.mxu0 %v14798_v42  ;;  %12120 = vmatprep.subr.bf16.mxu1 %v17231_v52 }
 0x5c5   :  { %3186 = vmatpush1.bf16.msra.mxu0 %v14804_v1  ;;  %12121 = vmatpush3.bf16.msra.mxu1 %v13060_v20 }
 0x5c6   :  { %3187 = vmatprep.subr.bf16.mxu0 %v14814_v19  ;;  %12122 = vmatprep.subr.bf16.mxu1 %v17231_v52 }
 0x5c9   :  { %3188 = vmatpush1.bf16.msra.mxu0 %v14820_v18  ;;  %12123 = vmatpush3.bf16.msra.mxu1 %v13064_v55  ;;  %v13079_v55 = vld [vmem:[%s17208_s2 + $0x8] ss:$12 sps:$4 sm:$0xff]  }
 0x5ca   :  { %3189 = vmatprep.subr.bf16.mxu0 %v14830_v34  ;;  %12124 = vmatprep.subr.bf16.mxu1 %v17231_v52 }
 0x5cd   :  { %3190 = vmatpush1.bf16.msra.mxu0 %v14836_v39  ;;  %12125 = vmatpush3.bf16.msra.mxu1 %v13068_v40 }
 0x5ce   :  { %3191 = vmatprep.subr.bf16.mxu0 %v14455_v4  ;;  %12126 = vmatprep.subr.bf16.mxu1 %v17231_v52  ;;  %v13071_v4 = vld [vmem:[%s17206_s1 + $0xc8] ss:$12 sps:$4 sm:$0xff]  }
 0x5d1   :  { %3192 = vmatpush1.bf16.msra.mxu0 %v14461_v61  ;;  %12127 = vmatpush3.bf16.msra.mxu1 %v13069_v45  ;;  %v13072_v61 = vld [vmem:[%s17206_s1 + $0xe0] ss:$12 sps:$4 sm:$0xff]   ;;  %v13082_v45 = vld [vmem:[%s17208_s2 + $0x50] ss:$12 sps:$4 sm:$0xff]  }
 0x5d2   :  { %3193 = vmatprep.subr.bf16.mxu0 %v14471_v14  ;;  %12128 = vmatprep.subr.bf16.mxu1 %v17231_v52  ;;  %v13073_v14 = vld [vmem:[%s17206_s1 + $0xf8] ss:$12 sps:$4 sm:$0xff]  }
 0x5d5   :  { %3194 = vmatpush1.bf16.msra.mxu0 %v14477_v16  ;;  %12129 = vmatpush3.bf16.msra.mxu1 %v13070_v28  ;;  %v13074_v16 = vld [vmem:[%s17206_s1 + $0x110] ss:$12 sps:$4 sm:$0xff]   ;;  %v13083_v28 = vld [vmem:[%s17208_s2 + $0x68] ss:$12 sps:$4 sm:$0xff]  }
 0x5d6   :  { %3455 = vmatprep.subr.bf16.mxu0 %v14492_v26  ;;  %12134 = vmatprep.subr.bf16.mxu1 %v17231_v52  ;;  %v13075_v26 = vld [vmem:[%s17206_s1 + $0x128] ss:$12 sps:$4 sm:$0xff]  }
 0x5d8   :  { %3212 = vmatmul.mubr.bf16.vlgmr.msra.gmra.mrb[56].mxu0 %v2754_v51  ;;  %12131 = vmatmul.mubr.bf16.vlgmr.msra.gmra.mrb[48].mxu1 %v2754_v51 }
 0x5d9   :  { %3456 = vmatpush1.bf16.msra.mxu0 %v14497_v31  ;;  %3487 = vmatprep.mubr.bf16.mxu0 %v17232_v13  ;;  %v13076_v31 = vld [vmem:[%s17206_s1 + $0x140] ss:$12 sps:$4 sm:$0xff]  }
 0x5da   :  { %3457 = vmatprep.subr.bf16.mxu0 %v14507_v29  ;;  %12150 = vmatprep.mubr.msk.bf16.mxu1 %vm13633_vm0, %v17231_v52  ;;  %v13077_v29 = vld [vmem:[%s17206_s1 + $0x158] ss:$12 sps:$4 sm:$0xff]  }
 0x5db   :  { %12135 = vmatpush3.bf16.msra.mxu1 %v13071_v4  ;;  %v13084_v4 = vld [vmem:[%s17208_s2 + $0x80] ss:$12 sps:$4 sm:$0xff]  }
 0x5dc   :  { %12136 = vmatprep.subr.bf16.mxu1 %v17231_v52 }
 0x5dd   :  { %3458 = vmatpush1.bf16.msra.mxu0 %v14513_v33  ;;  %v13078_v33 = vld [vmem:[%s17206_s1 + $0x170] ss:$12 sps:$4 sm:$0xff]  }
 0x5de   :  { %3459 = vmatprep.subr.bf16.mxu0 %v14523_v6 }
 0x5df   :  { %12137 = vmatpush3.bf16.msra.mxu1 %v13072_v61  ;;  %v14959_v61 = vld [vmem:[%s17208_s2 + $0x94] ss:$12 sps:$4 sm:$0xff]  }
 0x5e0   :  { %12138 = vmatprep.subr.bf16.mxu1 %v17231_v52 }
 0x5e1   :  { %3460 = vmatpush1.bf16.msra.mxu0 %v14529_v7 }
 0x5e2   :  { %3461 = vmatprep.subr.bf16.mxu0 %v14539_v30 }
 0x5e3   :  { %12139 = vmatpush3.bf16.msra.mxu1 %v13073_v14  ;;  %v14965_v14 = vld [vmem:[%s17208_s2 + $0x90] ss:$12 sps:$4 sm:$0xff]  }
 0x5e4   :  { %12140 = vmatprep.subr.bf16.mxu1 %v17231_v52 }
 0x5e5   :  { %3462 = vmatpush1.bf16.msra.mxu0 %v14545_v9 }
 0x5e6   :  { %3463 = vmatprep.subr.bf16.mxu0 %v14555_v10 }
 0x5e7   :  { %12141 = vmatpush3.bf16.msra.mxu1 %v13074_v16  ;;  %v13088_v16 = vld [vmem:[%s17208_s2 + $0x98] ss:$12 sps:$4 sm:$0xff]  }
 0x5e8   :  { %12142 = vmatprep.subr.bf16.mxu1 %v17231_v52 }
 0x5e9   :  { %3464 = vmatpush1.bf16.msra.mxu0 %v14561_v36 }
 0x5ea   :  { %3465 = vmatprep.subr.bf16.mxu0 %v14571_v54 }
 0x5eb   :  { %12143 = vmatpush3.bf16.msra.mxu1 %v13075_v26  ;;  %v14975_v26 = vld [vmem:[%s17208_s2 + $0xac] ss:$12 sps:$4 sm:$0xff]  }
 0x5ec   :  { %12144 = vmatprep.subr.bf16.mxu1 %v17231_v52 }
 0x5ed   :  { %3466 = vmatpush1.bf16.msra.mxu0 %v14577_v24 }
 0x5ee   :  { %3467 = vmatprep.subr.bf16.mxu0 %v14587_v38 }
 0x5ef   :  { %12145 = vmatpush3.bf16.msra.mxu1 %v13076_v31  ;;  %v14981_v31 = vld [vmem:[%s17208_s2 + $0xa8] ss:$12 sps:$4 sm:$0xff]  }
 0x5f0   :  { %12146 = vmatprep.subr.bf16.mxu1 %v17231_v52 }
 0x5f1   :  { %3468 = vmatpush1.bf16.msra.mxu0 %v14593_v58 }
 0x5f2   :  { %3469 = vmatprep.subr.bf16.mxu0 %v14603_v3 }
 0x5f3   :  { %12147 = vmatpush3.bf16.msra.mxu1 %v13077_v29  ;;  %v13092_v29 = vld [vmem:[%s17208_s2 + $0xb0] ss:$12 sps:$4 sm:$0xff]  }
 0x5f4   :  { %12148 = vmatprep.subr.bf16.mxu1 %v17231_v52 }
 0x5f5   :  { %3470 = vmatpush1.bf16.msra.mxu0 %v14609_v2 }
 0x5f6   :  { %3702 = vmatprep.subr.bf16.mxu0 %v14732_v0 }
 0x5f7   :  { %12149 = vmatpush3.bf16.msra.mxu1 %v13078_v33  ;;  %v14996_v33 = vld [vmem:[%s17206_s1 + $0xc4] ss:$12 sps:$4 sm:$0xff]  }
 0x5f8   :  { %12154 = vmatprep.subr.bf16.mxu1 %v17231_v52 }
 0x68b   :  { %v14909_v6 = vpop.f32.mrb[44].mxu1 }
 0x68c   :  { %v12112_v7 = vpop.f32.mrb[45].mxu1 }
 0x68d   :  { %v3010_v30 = vpop.f32.mrb[46].mxu1  ;;  %v15001_v7 = vld [vmem:[%s17206_s1 + $0xc0] ss:$12 sps:$4 sm:$0xff]  }
 0x68e   :  { %v12113_v9 = vpop.f32.mrb[47].mxu1  ;;  %v13096_v30 = vld [vmem:[%s17206_s1 + $0xc8] ss:$12 sps:$4 sm:$0xff]  }
 0x68f   :  { %v15011_v9 = vld [vmem:[%s17206_s1 + $0xdc] ss:$12 sps:$4 sm:$0xff]  }
 0x6ab   :  { %v3213_v10 = vpop.f32.mrb[56].mxu0  ;;  %v3254_v36 = vpop.f32.mrb[48].mxu1 }
 0x6ac   :  { %v3260_v54 = vadd.f32 %v3213_v10, %v14015_v60  ;;  %v3215_v24 = vpop.f32.mrb[57].mxu0  ;;  %v12132_v38 = vpop.f32.mrb[49].mxu1  ;;  %v3270_v8 = vadd.f32 %v14743_v50, %v3254_v36  ;;  %v15017_v10 = vld [vmem:[%s17206_s1 + $0xd8] ss:$12 sps:$4 sm:$0xff]   ;;  %v13100_v36 = vld [vmem:[%s17206_s1 + $0xe0] ss:$12 sps:$4 sm:$0xff]  }
 0x6ad   :  { %v3265_v58 = vadd.f32 %v3215_v24, %v14017_v62  ;;  %v3217_v3 = vpop.f32.mrb[58].mxu0  ;;  %v3257_v2 = vpop.f32.mrb[50].mxu1  ;;  %v15033_v24 = vld [vmem:[%s17206_s1 + $0xf0] ss:$12 sps:$4 sm:$0xff]   ;;  %v13104_v38 = vld [vmem:[%s17206_s1 + $0xf8] ss:$12 sps:$4 sm:$0xff]  }
 0x6ae   :  { %v3261_v49 = vmul.f32 0.5, %v3260_v54  ;;  %v3218_v53 = vpop.f32.mrb[59].mxu0  ;;  %v12133_v22 = vpop.f32.mrb[51].mxu1  ;;  %v15027_v54 = vld [vmem:[%s17206_s1 + $0xf4] ss:$12 sps:$4 sm:$0xff]  }
 0x6af   :  { %v3266_v57 = vmul.f32 0.5, %v3265_v58  ;;  %v15043_v58 = vld [vmem:[%s17206_s1 + $0x10c] ss:$12 sps:$4 sm:$0xff]   ;;  %v15049_v3 = vld [vmem:[%s17206_s1 + $0x108] ss:$12 sps:$4 sm:$0xff]  }
 0x6b0   :  { %13483 = vtanh.f32 %v3261_v49  ;;  %v13108_v2 = vld [vmem:[%s17206_s1 + $0x110] ss:$12 sps:$4 sm:$0xff]   ;;  %v15065_v53 = vld [vmem:[%s17206_s1 + $0x120] ss:$12 sps:$4 sm:$0xff]   ;;  %v13112_v22 = vld [vmem:[%s17206_s1 + $0x128] ss:$12 sps:$4 sm:$0xff]  }
 0x6b1   :  { %13485 = vtanh.f32 %v3266_v57  ;;  %v15059_v49 = vld [vmem:[%s17206_s1 + $0x124] ss:$12 sps:$4 sm:$0xff]   ;;  %v15075_v57 = vld [vmem:[%s17206_s1 + $0x13c] ss:$12 sps:$4 sm:$0xff]  }
 0x6ba   :  { %v13484_v23 = vpop.eup %13483 }
 0x6bb   :  { %v3263_v25 = vmul.f32 0.5, %v13484_v23  ;;  %v13486_v47 = vpop.eup %13485  ;;  %v15081_v23 = vld [vmem:[%s17206_s1 + $0x138] ss:$12 sps:$4 sm:$0xff]  }
 0x6bc   :  { %v3268_v12 = vmul.f32 0.5, %v13486_v47  ;;  %v15113_v47 = vld [vmem:[%s17206_s1 + $0x168] ss:$12 sps:$4 sm:$0xff]  }
 0x6bd   :  { %v3264_v56 = vadd.f32 0.5, %v3263_v25  ;;  %v13116_v25 = vld [vmem:[%s17206_s1 + $0x140] ss:$12 sps:$4 sm:$0xff]  }
 0x6be   :  { %v3269_v51 = vadd.f32 0.5, %v3268_v12  ;;  %v13124_v12 = vld [vmem:[%s17206_s1 + $0x170] ss:$12 sps:$4 sm:$0xff]  }
 0x6bf   :  { %v3271_v63 = vmul.f32 %v3270_v8, %v3264_v56  ;;  %v15091_v56 = vld [vmem:[%s17206_s1 + $0x154] ss:$12 sps:$4 sm:$0xff]   ;;  %v15097_v8 = vld [vmem:[%s17206_s1 + $0x150] ss:$12 sps:$4 sm:$0xff]  }
 0x6c1   :  { %v3272_v60 = vadd.f32 %v3271_v63, %v14013_v59  ;;  %v13080_v59 = vld [vmem:[%s17208_s2 + $0x20] ss:$12 sps:$4 sm:$0xff]   ;;  %v13120_v63 = vld [vmem:[%s17206_s1 + $0x158] ss:$12 sps:$4 sm:$0xff]  }
 0x6c3   :  { %13487 = vtanh.f32 %v3272_v60  ;;  %v15107_v60 = vld [vmem:[%s17206_s1 + $0x16c] ss:$12 sps:$4 sm:$0xff]  }
 0x6cd   :  { %v13488_v62 = vpop.eup %13487 }
 0x6ce   :  { %v3274_v37 = vsub.f32 %v14748_v35, %v13488_v62  ;;  %v13081_v35 = vld [vmem:[%s17208_s2 + $0x38] ss:$12 sps:$4 sm:$0xff]  }
 0x6d0   :  { %v3275_v43 = vmul.f32 %v3274_v37, %v3269_v51 }
 0x6d2   :  { %v14916_v20 = vadd.f32 %v13488_v62, %v3275_v43 }
 0x6d4   :  { %v3277_v40 = vpack.c.bf16 %v14916_v20, %v14916_v20 }
 0x6d6   :  { %3488 = vmatmul.mubr.bf16.vlgmr.msra.gmra.mrb[60].mxu0 %v3277_v40  ;;  %12151 = vmatmul.mubr.bf16.vlgmr.msra.gmra.mrb[52].mxu1 %v3277_v40 }
 0x6d7   :  { %3703 = vmatpush1.bf16.msra.mxu0 %v14753_v32  ;;  %12155 = vmatpush3.bf16.msra.mxu1 %v13079_v55 }
 0x6d8   :  { %3704 = vmatprep.subr.bf16.mxu0 %v14763_v27  ;;  %12156 = vmatprep.subr.bf16.mxu1 %v17231_v52 }
 0x6d9   :  { %3734 = vmatprep.mubr.bf16.mxu0 %v17232_v13  ;;  %12170 = vmatprep.mubr.msk.bf16.mxu1 %vm13633_vm0, %v17231_v52 }
 0x6db   :  { %3705 = vmatpush1.bf16.msra.mxu0 %v14769_v46  ;;  %12157 = vmatpush3.bf16.msra.mxu1 %v13080_v59 }
 0x6dc   :  { %3706 = vmatprep.subr.bf16.mxu0 %v14779_v41  ;;  %12158 = vmatprep.subr.bf16.mxu1 %v17231_v52 }
 0x6df   :  { %3707 = vmatpush1.bf16.msra.mxu0 %v14788_v44  ;;  %12159 = vmatpush3.bf16.msra.mxu1 %v13081_v35 }
 0x6e0   :  { %3708 = vmatprep.subr.bf16.mxu0 %v14798_v42  ;;  %12160 = vmatprep.subr.bf16.mxu1 %v17231_v52 }
 0x6e3   :  { %3709 = vmatpush1.bf16.msra.mxu0 %v14804_v1  ;;  %12161 = vmatpush3.bf16.msra.mxu1 %v13082_v45 }
 0x6e4   :  { %3710 = vmatprep.subr.bf16.mxu0 %v14814_v19  ;;  %12162 = vmatprep.subr.bf16.mxu1 %v17231_v52 }
 0x6e7   :  { %3711 = vmatpush1.bf16.msra.mxu0 %v14820_v18  ;;  %12163 = vmatpush3.bf16.msra.mxu1 %v13083_v28 }
 0x6e8   :  { %3712 = vmatprep.subr.bf16.mxu0 %v14830_v34  ;;  %12164 = vmatprep.subr.bf16.mxu1 %v17231_v52 }
 0x6eb   :  { %3713 = vmatpush1.bf16.msra.mxu0 %v14836_v39  ;;  %12165 = vmatpush3.bf16.msra.mxu1 %v13084_v4 }
 0x6ec   :  { %3714 = vmatprep.subr.bf16.mxu0 %v14959_v61  ;;  %12166 = vmatprep.subr.bf16.mxu1 %v17231_v52 }
 0x6ef   :  { %3715 = vmatpush1.bf16.msra.mxu0 %v14965_v14  ;;  %12167 = vmatpush3.bf16.msra.mxu1 %v13088_v16 }
 0x6f0   :  { %3716 = vmatprep.subr.bf16.mxu0 %v14975_v26  ;;  %12168 = vmatprep.subr.bf16.mxu1 %v17231_v52 }
 0x6f3   :  { %3717 = vmatpush1.bf16.msra.mxu0 %v14981_v31  ;;  %12169 = vmatpush3.bf16.msra.mxu1 %v13092_v29 }
 0x6f4   :  { %12174 = vmatprep.subr.bf16.mxu1 %v17231_v52  ;;  %3978 = vmatprep.subr.bf16.mxu0 %v14996_v33 }
 0x6f6   :  { %3735 = vmatmul.mubr.bf16.vlgmr.msra.gmra.mrb[64].mxu0 %v3277_v40  ;;  %12171 = vmatmul.mubr.bf16.vlgmr.msra.gmra.mrb[56].mxu1 %v3277_v40 }
 0x6f7   :  { %4010 = vmatprep.mubr.bf16.mxu0 %v17232_v13  ;;  %12190 = vmatprep.mubr.msk.bf16.mxu1 %vm13633_vm0, %v17231_v52 }
 0x6f8   :  { %3979 = vmatpush1.bf16.msra.mxu0 %v15001_v7  ;;  %12175 = vmatpush3.bf16.msra.mxu1 %v13096_v30 }
 0x6f9   :  { %12176 = vmatprep.subr.bf16.mxu1 %v17231_v52  ;;  %3980 = vmatprep.subr.bf16.mxu0 %v15011_v9 }
 0x6fc   :  { %3981 = vmatpush1.bf16.msra.mxu0 %v15017_v10  ;;  %12177 = vmatpush3.bf16.msra.mxu1 %v13100_v36 }
 0x6fd   :  { %12178 = vmatprep.subr.bf16.mxu1 %v17231_v52  ;;  %3982 = vmatprep.subr.bf16.mxu0 %v15027_v54 }
 0x700   :  { %3983 = vmatpush1.bf16.msra.mxu0 %v15033_v24  ;;  %12179 = vmatpush3.bf16.msra.mxu1 %v13104_v38 }
 0x701   :  { %12180 = vmatprep.subr.bf16.mxu1 %v17231_v52  ;;  %3984 = vmatprep.subr.bf16.mxu0 %v15043_v58 }
 0x704   :  { %3985 = vmatpush1.bf16.msra.mxu0 %v15049_v3  ;;  %12181 = vmatpush3.bf16.msra.mxu1 %v13108_v2 }
 0x705   :  { %12182 = vmatprep.subr.bf16.mxu1 %v17231_v52  ;;  %3986 = vmatprep.subr.bf16.mxu0 %v15059_v49 }
 0x708   :  { %3987 = vmatpush1.bf16.msra.mxu0 %v15065_v53  ;;  %12183 = vmatpush3.bf16.msra.mxu1 %v13112_v22 }
 0x709   :  { %12184 = vmatprep.subr.bf16.mxu1 %v17231_v52  ;;  %3988 = vmatprep.subr.bf16.mxu0 %v15075_v57 }
 0x70c   :  { %3989 = vmatpush1.bf16.msra.mxu0 %v15081_v23  ;;  %12185 = vmatpush3.bf16.msra.mxu1 %v13116_v25 }
 0x70d   :  { %12186 = vmatprep.subr.bf16.mxu1 %v17231_v52  ;;  %3990 = vmatprep.subr.bf16.mxu0 %v15091_v56 }
 0x710   :  { %3991 = vmatpush1.bf16.msra.mxu0 %v15097_v8  ;;  %12187 = vmatpush3.bf16.msra.mxu1 %v13120_v63 }
 0x711   :  { %12188 = vmatprep.subr.bf16.mxu1 %v17231_v52  ;;  %3992 = vmatprep.subr.bf16.mxu0 %v15107_v60 }
 0x714   :  { %3993 = vmatpush1.bf16.msra.mxu0 %v15113_v47  ;;  %12189 = vmatpush3.bf16.msra.mxu1 %v13124_v12 }
 0x715   :  { %4225 = vmatprep.subr.bf16.mxu0 %v14732_v0  ;;  %12194 = vmatprep.subr.bf16.mxu1 %v17231_v52 }
 0x7a9   :  { %v15122_v62 = vpop.f32.mrb[52].mxu1 }
 0x7aa   :  { %v12152_v51 = vpop.f32.mrb[53].mxu1 }
 0x7ab   :  { %v3533_v37 = vpop.f32.mrb[54].mxu1 }
 0x7ac   :  { %v12153_v43 = vpop.f32.mrb[55].mxu1 }
 0x7c9   :  { %v3736_v55 = vpop.f32.mrb[64].mxu0  ;;  %v3777_v40 = vpop.f32.mrb[56].mxu1 }
 0x7ca   :  { %v3783_v59 = vadd.f32 %v3736_v55, %v14019_v5  ;;  %v3738_v35 = vpop.f32.mrb[65].mxu0  ;;  %v12172_v45 = vpop.f32.mrb[57].mxu1  ;;  %v3793_v25 = vadd.f32 %v14743_v50, %v3777_v40 }
 0x7cb   :  { %v3788_v28 = vadd.f32 %v3738_v35, %v14021_v11  ;;  %v3740_v4 = vpop.f32.mrb[66].mxu0  ;;  %v3780_v16 = vpop.f32.mrb[58].mxu1  ;;  %v13125_v35 = vld [vmem:[%s17208_s2 + $0x8] ss:$12 sps:$4 sm:$0xff]  }
 0x7cc   :  { %v3784_v29 = vmul.f32 0.5, %v3783_v59  ;;  %v3741_v30 = vpop.f32.mrb[67].mxu0  ;;  %v12173_v0 = vpop.f32.mrb[59].mxu1 }
 0x7cd   :  { %v3789_v36 = vmul.f32 0.5, %v3788_v28 }
 0x7ce   :  { %13489 = vtanh.f32 %v3784_v29  ;;  %v17233_v29 = vld [vmem:[#allocation7_spill] sm:$0xff] }
 0x7cf   :  { %13491 = vtanh.f32 %v3789_v36 }
 0x7d8   :  { %v13490_v38 = vpop.eup %13489 }
 0x7d9   :  { %v3786_v2 = vmul.f32 0.5, %v13490_v38  ;;  %v13492_v12 = vpop.eup %13491 }
 0x7da   :  { %v3791_v51 = vmul.f32 0.5, %v13492_v12  ;;  %v15264_v12 = vld [vmem:[%s17208_s2 + $0xd8] ss:$12 sps:$4 sm:$0xff]  }
 0x7db   :  { %v3787_v22 = vadd.f32 0.5, %v3786_v2 }
 0x7dc   :  { %v3792_v37 = vadd.f32 0.5, %v3791_v51  ;;  %v13160_v51 = vld [vmem:[%s17208_s2 + $0xe0] ss:$12 sps:$4 sm:$0xff]  }
 0x7dd   :  { %v3794_v63 = vmul.f32 %v3793_v25, %v3787_v22  ;;  %v15250_v25 = vld [vmem:[%s17208_s2 + $0xc0] ss:$12 sps:$4 sm:$0xff]  }
 0x7df   :  { %v3795_v5 = vadd.f32 %v3794_v63, %v14000_v48  ;;  %v13126_v48 = vld [vmem:[%s17208_s2 + $0x20] ss:$12 sps:$4 sm:$0xff]  }
 0x7e1   :  { %13493 = vtanh.f32 %v3795_v5  ;;  %v15258_v5 = vld [vmem:[%s17208_s2 + $0xdc] ss:$12 sps:$4 sm:$0xff]  }
 0x7eb   :  { %v13494_v11 = vpop.eup %13493 }
 0x7ec   :  { %v3797_v43 = vsub.f32 %v14916_v20, %v13494_v11  ;;  %v13138_v20 = vld [vmem:[%s17206_s1 + $0x140] ss:$12 sps:$4 sm:$0xff]  }
 0x7ee   :  { %v3798_v55 = vmul.f32 %v3797_v43, %v3792_v37  ;;  %v15283_v37 = vld [vmem:[%s17208_s2 + $0xf0] ss:$12 sps:$4 sm:$0xff]   ;;  %v13164_v43 = vld [vmem:[%s17208_s2 + $0xf8] ss:$12 sps:$4 sm:$0xff]  }
 0x7f0   :  { %v15129_v59 = vadd.f32 %v13494_v11, %v3798_v55  ;;  %v15273_v11 = vld [vmem:[%s17208_s2 + $0xf4] ss:$12 sps:$4 sm:$0xff]   ;;  %v15292_v55 = vld [vmem:[%s17208_s2 + $0x10c] ss:$12 sps:$4 sm:$0xff]  }
 0x7f2   :  { %v3800_v40 = vpack.c.bf16 %v15129_v59, %v15129_v59 }
 0x7f4   :  { %4011 = vmatmul.mubr.bf16.vlgmr.msra.gmra.mrb[68].mxu0 %v3800_v40  ;;  %12191 = vmatmul.mubr.bf16.vlgmr.msra.gmra.mrb[60].mxu1 %v3800_v40 }
 0x7f5   :  { %4226 = vmatpush1.bf16.msra.mxu0 %v14753_v32  ;;  %12195 = vmatpush3.bf16.msra.mxu1 %v13125_v35  ;;  %v13127_v32 = vld [vmem:[%s17208_s2 + $0x38] ss:$12 sps:$4 sm:$0xff]   ;;  %v13168_v35 = vld [vmem:[%s17208_s2 + $0x110] ss:$12 sps:$4 sm:$0xff]  }
 0x7f6   :  { %4227 = vmatprep.subr.bf16.mxu0 %v14763_v27  ;;  %12196 = vmatprep.subr.bf16.mxu1 %v17231_v52  ;;  %v13128_v27 = vld [vmem:[%s17208_s2 + $0x50] ss:$12 sps:$4 sm:$0xff]  }
 0x7f7   :  { %4257 = vmatprep.mubr.bf16.mxu0 %v17232_v13  ;;  %12210 = vmatprep.mubr.msk.bf16.mxu1 %vm13633_vm0, %v17231_v52 }
 0x7f9   :  { %4228 = vmatpush1.bf16.msra.mxu0 %v14769_v46  ;;  %12197 = vmatpush3.bf16.msra.mxu1 %v13126_v48  ;;  %v13129_v46 = vld [vmem:[%s17208_s2 + $0x68] ss:$12 sps:$4 sm:$0xff]   ;;  %v15315_v48 = vld [vmem:[%s17208_s2 + $0x120] ss:$12 sps:$4 sm:$0xff]  }
 0x7fa   :  { %4229 = vmatprep.subr.bf16.mxu0 %v14779_v41  ;;  %12198 = vmatprep.subr.bf16.mxu1 %v17231_v52  ;;  %v13130_v41 = vld [vmem:[%s17208_s2 + $0x80] ss:$12 sps:$4 sm:$0xff]  }
 0x7fd   :  { %4230 = vmatpush1.bf16.msra.mxu0 %v14788_v44  ;;  %12199 = vmatpush3.bf16.msra.mxu1 %v13127_v32  ;;  %v13131_v44 = vld [vmem:[%s17208_s2 + $0x98] ss:$12 sps:$4 sm:$0xff]   ;;  %v13169_v32 = vld [vmem:[%s17208_s2 + $0x128] ss:$12 sps:$4 sm:$0xff]  }
 0x7fe   :  { %4231 = vmatprep.subr.bf16.mxu0 %v14798_v42  ;;  %12200 = vmatprep.subr.bf16.mxu1 %v17231_v52  ;;  %v13132_v42 = vld [vmem:[%s17208_s2 + $0xb0] ss:$12 sps:$4 sm:$0xff]  }
 0x801   :  { %4232 = vmatpush1.bf16.msra.mxu0 %v14804_v1  ;;  %12201 = vmatpush3.bf16.msra.mxu1 %v13128_v27  ;;  %v13133_v1 = vld [vmem:[%s17206_s1 + $0xc8] ss:$12 sps:$4 sm:$0xff]  }
 0x802   :  { %4233 = vmatprep.subr.bf16.mxu0 %v14814_v19  ;;  %12202 = vmatprep.subr.bf16.mxu1 %v17231_v52  ;;  %v13134_v19 = vld [vmem:[%s17206_s1 + $0xe0] ss:$12 sps:$4 sm:$0xff]   ;;  %v15324_v27 = vld [vmem:[%s17208_s2 + $0x13c] ss:$12 sps:$4 sm:$0xff]  }
 0x805   :  { %4234 = vmatpush1.bf16.msra.mxu0 %v14820_v18  ;;  %12203 = vmatpush3.bf16.msra.mxu1 %v13129_v46  ;;  %v13135_v18 = vld [vmem:[%s17206_s1 + $0xf8] ss:$12 sps:$4 sm:$0xff]  }
 0x806   :  { %4235 = vmatprep.subr.bf16.mxu0 %v14830_v34  ;;  %12204 = vmatprep.subr.bf16.mxu1 %v17231_v52  ;;  %v13136_v34 = vld [vmem:[%s17206_s1 + $0x110] ss:$12 sps:$4 sm:$0xff]   ;;  %v15331_v46 = vld [vmem:[%s17208_s2 + $0x138] ss:$12 sps:$4 sm:$0xff]  }
 0x809   :  { %4236 = vmatpush1.bf16.msra.mxu0 %v14836_v39  ;;  %12205 = vmatpush3.bf16.msra.mxu1 %v13130_v41  ;;  %v13137_v39 = vld [vmem:[%s17206_s1 + $0x128] ss:$12 sps:$4 sm:$0xff]   ;;  %v13170_v41 = vld [vmem:[%s17208_s2 + $0x140] ss:$12 sps:$4 sm:$0xff]  }
 0x80a   :  { %4237 = vmatprep.subr.bf16.mxu0 %v14959_v61  ;;  %12206 = vmatprep.subr.bf16.mxu1 %v17231_v52  ;;  %v13139_v61 = vld [vmem:[%s17206_s1 + $0x158] ss:$12 sps:$4 sm:$0xff]  }
 0x80d   :  { %4238 = vmatpush1.bf16.msra.mxu0 %v14965_v14  ;;  %12207 = vmatpush3.bf16.msra.mxu1 %v13131_v44  ;;  %v13140_v14 = vld [vmem:[%s17206_s1 + $0x170] ss:$12 sps:$4 sm:$0xff]   ;;  %v15340_v44 = vld [vmem:[%s17208_s2 + $0x154] ss:$12 sps:$4 sm:$0xff]  }
 0x80e   :  { %4239 = vmatprep.subr.bf16.mxu0 %v14975_v26  ;;  %12208 = vmatprep.subr.bf16.mxu1 %v17231_v52  ;;  %v15236_v26 = vld [vmem:[%s17208_s2 + $0xc4] ss:$12 sps:$4 sm:$0xff]  }
 0x811   :  { %4240 = vmatpush1.bf16.msra.mxu0 %v14981_v31  ;;  %12209 = vmatpush3.bf16.msra.mxu1 %v13132_v42  ;;  %v15347_v42 = vld [vmem:[%s17208_s2 + $0x150] ss:$12 sps:$4 sm:$0xff]  }
 0x812   :  { %4501 = vmatprep.subr.bf16.mxu0 %v14996_v33  ;;  %12214 = vmatprep.subr.bf16.mxu1 %v17231_v52 }
 0x814   :  { %4258 = vmatmul.mubr.bf16.vlgmr.msra.gmra.mrb[72].mxu0 %v3800_v40  ;;  %12211 = vmatmul.mubr.bf16.vlgmr.msra.gmra.mrb[64].mxu1 %v3800_v40  ;;  %v15308_v40 = vld [vmem:[%s17208_s2 + $0x124] ss:$12 sps:$4 sm:$0xff]  }
 0x815   :  { %4502 = vmatpush1.bf16.msra.mxu0 %v15001_v7  ;;  %4533 = vmatprep.mubr.bf16.mxu0 %v17232_v13 }
 0x816   :  { %4503 = vmatprep.subr.bf16.mxu0 %v15011_v9  ;;  %12230 = vmatprep.mubr.msk.bf16.mxu1 %vm13633_vm0, %v17231_v52 }
 0x817   :  { %12215 = vmatpush3.bf16.msra.mxu1 %v13133_v1  ;;  %v13171_v1 = vld [vmem:[%s17208_s2 + $0x158] ss:$12 sps:$4 sm:$0xff]  }
 0x818   :  { %12216 = vmatprep.subr.bf16.mxu1 %v17231_v52 }
 0x819   :  { %4504 = vmatpush1.bf16.msra.mxu0 %v15017_v10 }
 0x81a   :  { %4505 = vmatprep.subr.bf16.mxu0 %v15027_v54 }
 0x81b   :  { %12217 = vmatpush3.bf16.msra.mxu1 %v13134_v19  ;;  %v15356_v19 = vld [vmem:[%s17208_s2 + $0x16c] ss:$12 sps:$4 sm:$0xff]  }
 0x81c   :  { %12218 = vmatprep.subr.bf16.mxu1 %v17231_v52 }
 0x81d   :  { %4506 = vmatpush1.bf16.msra.mxu0 %v15033_v24 }
 0x81e   :  { %4507 = vmatprep.subr.bf16.mxu0 %v15043_v58 }
 0x81f   :  { %12219 = vmatpush3.bf16.msra.mxu1 %v13135_v18  ;;  %v15363_v18 = vld [vmem:[%s17208_s2 + $0x168] ss:$12 sps:$4 sm:$0xff]  }
 0x820   :  { %12220 = vmatprep.subr.bf16.mxu1 %v17231_v52 }
 0x821   :  { %4508 = vmatpush1.bf16.msra.mxu0 %v15049_v3 }
 0x822   :  { %4509 = vmatprep.subr.bf16.mxu0 %v15059_v49 }
 0x823   :  { %12221 = vmatpush3.bf16.msra.mxu1 %v13136_v34  ;;  %v13172_v34 = vld [vmem:[%s17208_s2 + $0x170] ss:$12 sps:$4 sm:$0xff]  }
 0x824   :  { %12222 = vmatprep.subr.bf16.mxu1 %v17231_v52 }
 0x825   :  { %4510 = vmatpush1.bf16.msra.mxu0 %v15065_v53 }
 0x826   :  { %4511 = vmatprep.subr.bf16.mxu0 %v15075_v57 }
 0x827   :  { %12223 = vmatpush3.bf16.msra.mxu1 %v13137_v39  ;;  %v15380_v39 = vld [vmem:[%s17206_s1 + $0x184] ss:$12 sps:$4 sm:$0xff]  }
 0x828   :  { %12224 = vmatprep.subr.bf16.mxu1 %v17231_v52 }
 0x829   :  { %4512 = vmatpush1.bf16.msra.mxu0 %v15081_v23 }
 0x82a   :  { %4513 = vmatprep.subr.bf16.mxu0 %v15091_v56 }
 0x82b   :  { %12225 = vmatpush3.bf16.msra.mxu1 %v13138_v20  ;;  %v15385_v20 = vld [vmem:[%s17206_s1 + $0x180] ss:$12 sps:$4 sm:$0xff]  }
 0x82c   :  { %12226 = vmatprep.subr.bf16.mxu1 %v17231_v52 }
 0x82d   :  { %4514 = vmatpush1.bf16.msra.mxu0 %v15097_v8 }
 0x82e   :  { %4515 = vmatprep.subr.bf16.mxu0 %v15107_v60 }
 0x82f   :  { %12227 = vmatpush3.bf16.msra.mxu1 %v13139_v61  ;;  %v13176_v61 = vld [vmem:[%s17206_s1 + $0x188] ss:$12 sps:$4 sm:$0xff]  }
 0x830   :  { %12228 = vmatprep.subr.bf16.mxu1 %v17231_v52 }
 0x831   :  { %4516 = vmatpush1.bf16.msra.mxu0 %v15113_v47 }
 0x832   :  { %4751 = vmatprep.subr.bf16.mxu0 %v15236_v26 }
 0x833   :  { %12229 = vmatpush3.bf16.msra.mxu1 %v13140_v14  ;;  %v15395_v14 = vld [vmem:[%s17206_s1 + $0x19c] ss:$12 sps:$4 sm:$0xff]  }
 0x834   :  { %12234 = vmatprep.subr.bf16.mxu1 %v17231_v52 }
 0x8c7   :  { %v15240_v31 = vpop.f32.mrb[60].mxu1 }
 0x8c8   :  { %v12192_v33 = vpop.f32.mrb[61].mxu1 }
 0x8c9   :  { %v4056_v7 = vpop.f32.mrb[62].mxu1  ;;  %v15401_v33 = vld [vmem:[%s17206_s1 + $0x198] ss:$12 sps:$4 sm:$0xff]  }
 0x8ca   :  { %v12193_v9 = vpop.f32.mrb[63].mxu1  ;;  %v13180_v7 = vld [vmem:[%s17206_s1 + $0x1a0] ss:$12 sps:$4 sm:$0xff]  }
 0x8cb   :  { %v15411_v9 = vld [vmem:[%s17206_s1 + $0x1b4] ss:$12 sps:$4 sm:$0xff]  }
 0x8e7   :  { %v4259_v10 = vpop.f32.mrb[72].mxu0  ;;  %v4300_v54 = vpop.f32.mrb[64].mxu1 }
 0x8e8   :  { %v4306_v24 = vadd.f32 %v4259_v10, %v14023_v15  ;;  %v4261_v58 = vpop.f32.mrb[73].mxu0  ;;  %v12212_v3 = vpop.f32.mrb[65].mxu1  ;;  %v4316_v4 = vadd.f32 %v14743_v50, %v4300_v54  ;;  %v13156_v50 = vld [vmem:[%s17208_s2 + $0xc8] ss:$12 sps:$4 sm:$0xff]   ;;  %v15417_v10 = vld [vmem:[%s17206_s1 + $0x1b0] ss:$12 sps:$4 sm:$0xff]  }
 0x8e9   :  { %v4311_v49 = vadd.f32 %v4261_v58, %v14025_v17  ;;  %v4263_v53 = vpop.f32.mrb[74].mxu0  ;;  %v4303_v57 = vpop.f32.mrb[66].mxu1  ;;  %v13184_v54 = vld [vmem:[%s17206_s1 + $0x1b8] ss:$12 sps:$4 sm:$0xff]   ;;  %v15433_v58 = vld [vmem:[%s17206_s1 + $0x1c8] ss:$12 sps:$4 sm:$0xff]  }
 0x8ea   :  { %v4307_v23 = vmul.f32 0.5, %v4306_v24  ;;  %v4264_v56 = vpop.f32.mrb[75].mxu0  ;;  %v12213_v8 = vpop.f32.mrb[67].mxu1  ;;  %v15427_v24 = vld [vmem:[%s17206_s1 + $0x1cc] ss:$12 sps:$4 sm:$0xff]  }
 0x8eb   :  { %v4312_v60 = vmul.f32 0.5, %v4311_v49  ;;  %v13188_v3 = vld [vmem:[%s17206_s1 + $0x1d0] ss:$12 sps:$4 sm:$0xff]   ;;  %v15443_v49 = vld [vmem:[%s17206_s1 + $0x1e0] ss:$12 sps:$4 sm:$0xff]  }
 0x8ec   :  { %13495 = vtanh.f32 %v4307_v23  ;;  %v15448_v53 = vld [vmem:[%s17206_s1 + $0x1e4] ss:$12 sps:$4 sm:$0xff]   ;;  %v13192_v57 = vld [vmem:[%s17206_s1 + $0x1e8] ss:$12 sps:$4 sm:$0xff]   ;;  %v13196_v8 = vld [vmem:[%s17206_s1 + $0x200] ss:$12 sps:$4 sm:$0xff]  }
 0x8ed   :  { %13497 = vtanh.f32 %v4312_v60  ;;  %v15457_v23 = vld [vmem:[%s17206_s1 + $0x1fc] ss:$12 sps:$4 sm:$0xff]   ;;  %v15464_v56 = vld [vmem:[%s17206_s1 + $0x1f8] ss:$12 sps:$4 sm:$0xff]   ;;  %v15474_v60 = vld [vmem:[%s17206_s1 + $0x214] ss:$12 sps:$4 sm:$0xff]  }
 0x8f6   :  { %v13496_v47 = vpop.eup %13495 }
 0x8f7   :  { %v4309_v45 = vmul.f32 0.5, %v13496_v47  ;;  %v13498_v30 = vpop.eup %13497  ;;  %v15480_v47 = vld [vmem:[%s17206_s1 + $0x210] ss:$12 sps:$4 sm:$0xff]  }
 0x8f8   :  { %v4314_v0 = vmul.f32 0.5, %v13498_v30 }
 0x8f9   :  { %v4310_v28 = vadd.f32 0.5, %v4309_v45  ;;  %v13200_v45 = vld [vmem:[%s17206_s1 + $0x218] ss:$12 sps:$4 sm:$0xff]  }
 0x8fa   :  { %v4315_v36 = vadd.f32 0.5, %v4314_v0 }
 0x8fb   :  { %v4317_v16 = vmul.f32 %v4316_v4, %v4310_v28  ;;  %v15490_v28 = vld [vmem:[%s17206_s1 + $0x22c] ss:$12 sps:$4 sm:$0xff]   ;;  %v15496_v4 = vld [vmem:[%s17206_s1 + $0x228] ss:$12 sps:$4 sm:$0xff]  }
 0x8fd   :  { %v4318_v15 = vadd.f32 %v4317_v16, %v17233_v29  ;;  %v13204_v16 = vld [vmem:[%s17206_s1 + $0x230] ss:$12 sps:$4 sm:$0xff]  }
 0x8ff   :  { %13499 = vtanh.f32 %v4318_v15 }
 0x909   :  { %v13500_v17 = vpop.eup %13499 }
 0x90a   :  { %v4320_v38 = vsub.f32 %v15129_v59, %v13500_v17  ;;  %v15299_v59 = vld [vmem:[%s17208_s2 + $0x108] ss:$12 sps:$4 sm:$0xff]  }
 0x90c   :  { %v4321_v2 = vmul.f32 %v4320_v38, %v4315_v36  ;;  %v17234_v36 = vld [vmem:[#allocation4_spill] sm:$0xff] }
 0x90e   :  { %v4322_v22 = vadd.f32 %v13500_v17, %v4321_v2  ;;  %v9947_v17 = vld [vmem:[%s17209_s3 + $0x3] sm:$0x7] }
 0x90f   :  { %v700_v38 = vrot.slane %v9947_v17, %v17234_v36 }
 0x910   :  { %v4323_v63 = vpack.c.bf16 %v4322_v22, %v4322_v22 }
 0x912   :  { %4534 = vmatmul.mubr.bf16.vlgmr.msra.gmra.mrb[76].mxu0 %v4323_v63  ;;  %12231 = vmatmul.mubr.bf16.vlgmr.msra.gmra.mrb[68].mxu1 %v4323_v63 }
 0x913   :  { %4752 = vmatpush1.bf16.msra.mxu0 %v15250_v25  ;;  %12235 = vmatpush3.bf16.msra.mxu1 %v13156_v50 }
 0x914   :  { %4753 = vmatprep.subr.bf16.mxu0 %v15258_v5  ;;  %12236 = vmatprep.subr.bf16.mxu1 %v17231_v52 }
 0x915   :  { %4783 = vmatprep.mubr.bf16.mxu0 %v17232_v13  ;;  %12250 = vmatprep.mubr.msk.bf16.mxu1 %vm13633_vm0, %v17231_v52 }
 0x917   :  { %4754 = vmatpush1.bf16.msra.mxu0 %v15264_v12  ;;  %12237 = vmatpush3.bf16.msra.mxu1 %v13160_v51 }
 0x918   :  { %4755 = vmatprep.subr.bf16.mxu0 %v15273_v11  ;;  %12238 = vmatprep.subr.bf16.mxu1 %v17231_v52 }
 0x91b   :  { %4756 = vmatpush1.bf16.msra.mxu0 %v15283_v37  ;;  %12239 = vmatpush3.bf16.msra.mxu1 %v13164_v43 }
 0x91c   :  { %4757 = vmatprep.subr.bf16.mxu0 %v15292_v55  ;;  %12240 = vmatprep.subr.bf16.mxu1 %v17231_v52 }
 0x91f   :  { %4758 = vmatpush1.bf16.msra.mxu0 %v15299_v59  ;;  %12241 = vmatpush3.bf16.msra.mxu1 %v13168_v35 }
 0x920   :  { %4759 = vmatprep.subr.bf16.mxu0 %v15308_v40  ;;  %12242 = vmatprep.subr.bf16.mxu1 %v17231_v52 }
 0x923   :  { %4760 = vmatpush1.bf16.msra.mxu0 %v15315_v48  ;;  %12243 = vmatpush3.bf16.msra.mxu1 %v13169_v32 }
 0x924   :  { %4761 = vmatprep.subr.bf16.mxu0 %v15324_v27  ;;  %12244 = vmatprep.subr.bf16.mxu1 %v17231_v52 }
 0x927   :  { %4762 = vmatpush1.bf16.msra.mxu0 %v15331_v46  ;;  %12245 = vmatpush3.bf16.msra.mxu1 %v13170_v41 }
 0x928   :  { %4763 = vmatprep.subr.bf16.mxu0 %v15340_v44  ;;  %12246 = vmatprep.subr.bf16.mxu1 %v17231_v52 }
 0x92b   :  { %4764 = vmatpush1.bf16.msra.mxu0 %v15347_v42  ;;  %12247 = vmatpush3.bf16.msra.mxu1 %v13171_v1 }
 0x92c   :  { %4765 = vmatprep.subr.bf16.mxu0 %v15356_v19  ;;  %12248 = vmatprep.subr.bf16.mxu1 %v17231_v52 }
 0x92f   :  { %4766 = vmatpush1.bf16.msra.mxu0 %v15363_v18  ;;  %12249 = vmatpush3.bf16.msra.mxu1 %v13172_v34  ;;  %v17235_v34 = vld [vmem:[#allocation5_spill] sm:$0xff] }
 0x930   :  { %12254 = vmatprep.subr.bf16.mxu1 %v17231_v52  ;;  %5029 = vmatprep.subr.bf16.mxu0 %v15380_v39 }
 0x932   :  { %4784 = vmatmul.mubr.bf16.vlgmr.msra.gmra.mrb[20].mxu0 %v17232_v13  ;;  %12251 = vmatmul.mubr.bf16.vlgmr.msra.gmra.mrb[72].mxu1 %v17232_v13 }
 0x933   :  { %5061 = vmatprep.mubr.bf16.mxu0 %v17232_v13  ;;  %12270 = vmatprep.mubr.msk.bf16.mxu1 %vm13633_vm0, %v17231_v52 }
 0x934   :  { %5030 = vmatpush1.bf16.msra.mxu0 %v15385_v20  ;;  %12255 = vmatpush3.bf16.msra.mxu1 %v13176_v61  ;;  %v704_v61 = vrot.slane %v9947_v17, %v17235_v34 }
 0x935   :  { %12256 = vmatprep.subr.bf16.mxu1 %v17231_v52  ;;  %5031 = vmatprep.subr.bf16.mxu0 %v15395_v14 }
 0x938   :  { %5032 = vmatpush1.bf16.msra.mxu0 %v15401_v33  ;;  %12257 = vmatpush3.bf16.msra.mxu1 %v13180_v7 }
 0x939   :  { %12258 = vmatprep.subr.bf16.mxu1 %v17231_v52  ;;  %5033 = vmatprep.subr.bf16.mxu0 %v15411_v9 }
 0x93c   :  { %5034 = vmatpush1.bf16.msra.mxu0 %v15417_v10  ;;  %12259 = vmatpush3.bf16.msra.mxu1 %v13184_v54  ;;  %v15516_v54 = vld [vmem:[%s17210_s4 + $0x8] sm:$0xff] }
 0x93d   :  { %12260 = vmatprep.subr.bf16.mxu1 %v17231_v52  ;;  %5035 = vmatprep.subr.bf16.mxu0 %v15427_v24 }
 0x940   :  { %5036 = vmatpush1.bf16.msra.mxu0 %v15433_v58  ;;  %12261 = vmatpush3.bf16.msra.mxu1 %v13188_v3 }
 0x941   :  { %12262 = vmatprep.subr.bf16.mxu1 %v17231_v52  ;;  %5037 = vmatprep.subr.bf16.mxu0 %v15448_v53 }
 0x944   :  { %5038 = vmatpush1.bf16.msra.mxu0 %v15443_v49  ;;  %12263 = vmatpush3.bf16.msra.mxu1 %v13192_v57 }
 0x945   :  { %5039 = vmatprep.subr.bf16.mxu0 %v15457_v23  ;;  %12264 = vmatprep.subr.bf16.mxu1 %v17231_v52 }
 0x948   :  { %5040 = vmatpush1.bf16.msra.mxu0 %v15464_v56  ;;  %12265 = vmatpush3.bf16.msra.mxu1 %v13196_v8  ;;  %v17236_v8 = vld [vmem:[#allocation6_spill] sm:$0xff] }
 0x949   :  { %5041 = vmatprep.subr.bf16.mxu0 %v15474_v60  ;;  %12266 = vmatprep.subr.bf16.mxu1 %v17231_v52 }
 0x94c   :  { %5042 = vmatpush1.bf16.msra.mxu0 %v15480_v47  ;;  %12267 = vmatpush3.bf16.msra.mxu1 %v13200_v45  ;;  %v708_v45 = vrot.slane %v9947_v17, %v17236_v8  ;;  %v13205_v17 = vld [vmem:[%s17208_s2 + $0xc8] ss:$12 sps:$4 sm:$0xff]  }
 0x94d   :  { %5043 = vmatprep.subr.bf16.mxu0 %v15490_v28  ;;  %12268 = vmatprep.subr.bf16.mxu1 %v17231_v52 }
 0x950   :  { %5044 = vmatpush1.bf16.msra.mxu0 %v15496_v4  ;;  %12269 = vmatpush3.bf16.msra.mxu1 %v13204_v16 }
 0x951   :  { %5276 = vmatprep.subr.bf16.mxu0 %v15236_v26  ;;  %12274 = vmatprep.subr.bf16.mxu1 %v17231_v52 }
 0x9e5   :  { %v15506_v29 = vpop.f32.mrb[68].mxu1 }
 0x9e6   :  { %v12232_v15 = vpop.f32.mrb[69].mxu1 }
 0x9e7   :  { %v4579_v30 = vpop.f32.mrb[70].mxu1 }
 0x9e8   :  { %v12233_v0 = vpop.f32.mrb[71].mxu1 }
 0x9e9   :  { %v17237_v0 = vld [vmem:[#allocation8_spill] sm:$0xff] }
 0xa05   :  { %v4785_v2 = vpop.f32.mrb[20].mxu0  ;;  %v4826_v22 = vpop.f32.mrb[72].mxu1 }
 0xa06   :  { %v12734_v50 = vadd.f32 %v4785_v2, %v700_v38  ;;  %v4787_v63 = vpop.f32.mrb[21].mxu0  ;;  %v12252_v51 = vpop.f32.mrb[73].mxu1  ;;  %v4842_v15 = vadd.f32 %v15516_v54, %v4826_v22  ;;  %v916_v38 = vadd.f32 %v17237_v0, %v708_v45  ;;  %v13210_v45 = vld [vmem:[%s17208_s2 + $0x140] ss:$12 sps:$4 sm:$0xff]  }
 0xa07   :  { %v4789_v43 = vpop.f32.mrb[22].mxu0  ;;  %v4829_v35 = vpop.f32.mrb[74].mxu1  ;;  %v12735_v7 = vadd.f32 %v4787_v63, %v704_v61  ;;  %v13206_v61 = vld [vmem:[%s17208_s2 + $0xe0] ss:$12 sps:$4 sm:$0xff]  }
 0xa08   :  { %v4833_v32 = vmul.f32 0.5, %v12734_v50  ;;  %v4790_v41 = vpop.f32.mrb[23].mxu0  ;;  %v12253_v1 = vpop.f32.mrb[75].mxu1  ;;  %v13214_v0 = vld [vmem:[%s17206_s1 + $0x1a0] ss:$12 sps:$4 sm:$0xff]  }
 0xa09   :  { %v4838_v3 = vmul.f32 0.5, %v12735_v7  ;;  %v13207_v7 = vld [vmem:[%s17208_s2 + $0xf8] ss:$12 sps:$4 sm:$0xff]  }
 0xa0a   :  { %13501 = vtanh.f32 %v4833_v32 }
 0xa0b   :  { %13503 = vtanh.f32 %v4838_v3  ;;  %v13208_v3 = vld [vmem:[%s17208_s2 + $0x110] ss:$12 sps:$4 sm:$0xff]  }
 0xa14   :  { %v13502_v57 = vpop.eup %13501 }
 0xa15   :  { %v4835_v16 = vmul.f32 0.5, %v13502_v57  ;;  %v13504_v63 = vpop.eup %13503  ;;  %v13209_v57 = vld [vmem:[%s17208_s2 + $0x128] ss:$12 sps:$4 sm:$0xff]  }
 0xa16   :  { %v4840_v51 = vmul.f32 0.5, %v13504_v63  ;;  %v13219_v63 = vld [vmem:[%s17206_s1 + $0x218] ss:$12 sps:$4 sm:$0xff]  }
 0xa17   :  { %v4836_v30 = vadd.f32 0.5, %v4835_v16  ;;  %v13211_v16 = vld [vmem:[%s17208_s2 + $0x158] ss:$12 sps:$4 sm:$0xff]  }
 0xa18   :  { %v4841_v35 = vadd.f32 0.5, %v4840_v51  ;;  %v13220_v51 = vld [vmem:[%s17206_s1 + $0x230] ss:$12 sps:$4 sm:$0xff]  }
 0xa19   :  { %v4843_v2 = vmul.f32 %v4842_v15, %v4836_v30  ;;  %v13212_v15 = vld [vmem:[%s17208_s2 + $0x170] ss:$12 sps:$4 sm:$0xff]   ;;  %v13213_v30 = vld [vmem:[%s17206_s1 + $0x188] ss:$12 sps:$4 sm:$0xff]  }
 0xa1b   :  { %v4844_v50 = vadd.f32 %v4843_v2, %v916_v38  ;;  %v13215_v38 = vld [vmem:[%s17206_s1 + $0x1b8] ss:$12 sps:$4 sm:$0xff]   ;;  %v13217_v2 = vld [vmem:[%s17206_s1 + $0x1e8] ss:$12 sps:$4 sm:$0xff]  }
 0xa1d   :  { %13505 = vtanh.f32 %v4844_v50  ;;  %v13218_v50 = vld [vmem:[%s17206_s1 + $0x200] ss:$12 sps:$4 sm:$0xff]  }
 0xa27   :  { %v13506_v43 = vpop.eup %13505 }
 0xa28   :  { %v4846_v32 = vsub.f32 0.0, %v13506_v43 }
 0xa2a   :  { %v4847_v41 = vmul.f32 %v4846_v32, %v4841_v35 }
 0xa2c   :  { %v15521_v1 = vadd.f32 %v13506_v43, %v4847_v41 }
 0xa2e   :  { %v4849_v22 = vpack.c.bf16 %v15521_v1, %v15521_v1 }
 0xa30   :  { %5062 = vmatmul.mubr.bf16.vlgmr.msra.gmra.mrb[80].mxu0 %v4849_v22  ;;  %12271 = vmatmul.mubr.bf16.vlgmr.msra.gmra.mrb[76].mxu1 %v4849_v22 }
 0xa31   :  { %5277 = vmatpush1.bf16.msra.mxu0 %v15250_v25  ;;  %12275 = vmatpush3.bf16.msra.mxu1 %v13205_v17  ;;  %v10028_v17 = vld [vmem:[%s17209_s3 + $0x3] sm:$0x7] }
 0xa32   :  { %5278 = vmatprep.subr.bf16.mxu0 %v15258_v5  ;;  %12276 = vmatprep.subr.bf16.mxu1 %v17231_v52 }
 0xa33   :  { %5308 = vmatprep.mubr.bf16.mxu0 %v17232_v13  ;;  %12290 = vmatprep.mubr.msk.bf16.mxu1 %vm13633_vm0, %v17231_v52 }
 0xa35   :  { %5279 = vmatpush1.bf16.msra.mxu0 %v15264_v12  ;;  %12277 = vmatpush3.bf16.msra.mxu1 %v13206_v61 }
 0xa36   :  { %5280 = vmatprep.subr.bf16.mxu0 %v15273_v11  ;;  %12278 = vmatprep.subr.bf16.mxu1 %v17231_v52 }
 0xa39   :  { %5281 = vmatpush1.bf16.msra.mxu0 %v15283_v37  ;;  %12279 = vmatpush3.bf16.msra.mxu1 %v13207_v7 }
 0xa3a   :  { %5282 = vmatprep.subr.bf16.mxu0 %v15292_v55  ;;  %12280 = vmatprep.subr.bf16.mxu1 %v17231_v52 }
 0xa3d   :  { %5283 = vmatpush1.bf16.msra.mxu0 %v15299_v59  ;;  %12281 = vmatpush3.bf16.msra.mxu1 %v13208_v3 }
 0xa3e   :  { %5284 = vmatprep.subr.bf16.mxu0 %v15308_v40  ;;  %12282 = vmatprep.subr.bf16.mxu1 %v17231_v52 }
 0xa41   :  { %5285 = vmatpush1.bf16.msra.mxu0 %v15315_v48  ;;  %12283 = vmatpush3.bf16.msra.mxu1 %v13209_v57 }
 0xa42   :  { %5286 = vmatprep.subr.bf16.mxu0 %v15324_v27  ;;  %12284 = vmatprep.subr.bf16.mxu1 %v17231_v52 }
 0xa45   :  { %5287 = vmatpush1.bf16.msra.mxu0 %v15331_v46  ;;  %12285 = vmatpush3.bf16.msra.mxu1 %v13210_v45 }
 0xa46   :  { %5288 = vmatprep.subr.bf16.mxu0 %v15340_v44  ;;  %12286 = vmatprep.subr.bf16.mxu1 %v17231_v52 }
 0xa49   :  { %5289 = vmatpush1.bf16.msra.mxu0 %v15347_v42  ;;  %12287 = vmatpush3.bf16.msra.mxu1 %v13211_v16 }
 0xa4a   :  { %5290 = vmatprep.subr.bf16.mxu0 %v15356_v19  ;;  %12288 = vmatprep.subr.bf16.mxu1 %v17231_v52 }
 0xa4d   :  { %5291 = vmatpush1.bf16.msra.mxu0 %v15363_v18  ;;  %12289 = vmatpush3.bf16.msra.mxu1 %v13212_v15 }
 0xa4e   :  { %5552 = vmatprep.subr.bf16.mxu0 %v15380_v39  ;;  %12294 = vmatprep.subr.bf16.mxu1 %v17231_v52 }
 0xa50   :  { %5309 = vmatmul.mubr.bf16.vlgmr.msra.gmra.mrb[28].mxu0 %v4849_v22  ;;  %12291 = vmatmul.mubr.bf16.vlgmr.msra.gmra.mrb[80].mxu1 %v4849_v22  ;;  %v1223_v22 = vrot.slane %v10028_v17, %v17234_v36 }
 0xa51   :  { %5553 = vmatpush1.bf16.msra.mxu0 %v15385_v20  ;;  %5584 = vmatprep.mubr.bf16.mxu0 %v17232_v13 }
 0xa52   :  { %5554 = vmatprep.subr.bf16.mxu0 %v15395_v14  ;;  %12310 = vmatprep.mubr.msk.bf16.mxu1 %vm13633_vm0, %v17231_v52 }
 0xa53   :  { %12295 = vmatpush3.bf16.msra.mxu1 %v13213_v30 }
 0xa54   :  { %12296 = vmatprep.subr.bf16.mxu1 %v17231_v52 }
 0xa55   :  { %5555 = vmatpush1.bf16.msra.mxu0 %v15401_v33 }
 0xa56   :  { %5556 = vmatprep.subr.bf16.mxu0 %v15411_v9 }
 0xa57   :  { %12297 = vmatpush3.bf16.msra.mxu1 %v13214_v0 }
 0xa58   :  { %12298 = vmatprep.subr.bf16.mxu1 %v17231_v52 }
 0xa59   :  { %5557 = vmatpush1.bf16.msra.mxu0 %v15417_v10 }
 0xa5a   :  { %5558 = vmatprep.subr.bf16.mxu0 %v15427_v24 }
 0xa5b   :  { %12299 = vmatpush3.bf16.msra.mxu1 %v13215_v38 }
 0xa5c   :  { %12300 = vmatprep.subr.bf16.mxu1 %v17231_v52 }
 0xa5d   :  { %5559 = vmatpush1.bf16.msra.mxu0 %v15433_v58 }
 0xa5e   :  { %5560 = vmatprep.subr.bf16.mxu0 %v15448_v53 }
 0xa61   :  { %5561 = vmatpush1.bf16.msra.mxu0 %v15443_v49 }
 0xa62   :  { %5562 = vmatprep.subr.bf16.mxu0 %v15457_v23 }
 0xa65   :  { %5563 = vmatpush1.bf16.msra.mxu0 %v15464_v56 }
 0xa66   :  { %5564 = vmatprep.subr.bf16.mxu0 %v15474_v60 }
 0xa69   :  { %5565 = vmatpush1.bf16.msra.mxu0 %v15480_v47 }
 0xa6a   :  { %5566 = vmatprep.subr.bf16.mxu0 %v15490_v28 }
 0xa6d   :  { %5567 = vmatpush1.bf16.msra.mxu0 %v15496_v4 }
 0xa6e   :  { %5799 = vmatprep.subr.bf16.mxu0 %v15236_v26  ;;  %v13216_v26 = vld [vmem:[%s17206_s1 + $0x1d0] ss:$12 sps:$4 sm:$0xff]  }
 0xa6f   :  { %12301 = vmatpush3.bf16.msra.mxu1 %v13216_v26  ;;  %v1227_v26 = vrot.slane %v10028_v17, %v17235_v34 }
 0xa70   :  { %12302 = vmatprep.subr.bf16.mxu1 %v17231_v52 }
 0xa73   :  { %12303 = vmatpush3.bf16.msra.mxu1 %v13217_v2 }
 0xa74   :  { %12304 = vmatprep.subr.bf16.mxu1 %v17231_v52 }
 0xa77   :  { %12305 = vmatpush3.bf16.msra.mxu1 %v13218_v50 }
 0xa78   :  { %12306 = vmatprep.subr.bf16.mxu1 %v17231_v52 }
 0xa7b   :  { %12307 = vmatpush3.bf16.msra.mxu1 %v13219_v63 }
 0xa7c   :  { %12308 = vmatprep.subr.bf16.mxu1 %v17231_v52 }
 0xa7f   :  { %12309 = vmatpush3.bf16.msra.mxu1 %v13220_v51  ;;  %v1231_v51 = vrot.slane %v10028_v17, %v17236_v8  ;;  %v13221_v17 = vld [vmem:[%s17208_s2 + $0xc8] ss:$12 sps:$4 sm:$0xff]  }
 0xa80   :  { %12314 = vmatprep.subr.bf16.mxu1 %v17231_v52 }
 0xb03   :  { %v15627_v43 = vpop.f32.mrb[76].mxu1 }
 0xb04   :  { %17238 = vst [vmem:[#allocation7_spill] sm:$0xff] %v15627_v43  ;;  %v12272_v35 = vpop.f32.mrb[77].mxu1 }
 0xb05   :  { %v5107_v32 = vpop.f32.mrb[78].mxu1 }
 0xb06   :  { %v12273_v41 = vpop.f32.mrb[79].mxu1 }
 0xb23   :  { %v5310_v61 = vpop.f32.mrb[28].mxu0  ;;  %v5351_v7 = vpop.f32.mrb[80].mxu1 }
 0xb24   :  { %v12736_v3 = vadd.f32 %v5310_v61, %v1223_v22  ;;  %v5312_v57 = vpop.f32.mrb[29].mxu0  ;;  %v12292_v45 = vpop.f32.mrb[81].mxu1  ;;  %v5367_v41 = vadd.f32 %v15516_v54, %v5351_v7  ;;  %v17239_v22 = vld [vmem:[#allocation9_spill] sm:$0xff] }
 0xb25   :  { %v5314_v16 = vpop.f32.mrb[30].mxu0  ;;  %v5354_v15 = vpop.f32.mrb[82].mxu1  ;;  %v12737_v2 = vadd.f32 %v5312_v57, %v1227_v26  ;;  %v1439_v61 = vadd.f32 %v17239_v22, %v1231_v51 }
 0xb26   :  { %v5358_v30 = vmul.f32 0.5, %v12736_v3  ;;  %v5315_v0 = vpop.f32.mrb[31].mxu0  ;;  %v12293_v38 = vpop.f32.mrb[83].mxu1 }
 0xb27   :  { %v5363_v50 = vmul.f32 0.5, %v12737_v2  ;;  %v13222_v2 = vld [vmem:[%s17208_s2 + $0xe0] ss:$12 sps:$4 sm:$0xff]  }
 0xb28   :  { %13507 = vtanh.f32 %v5358_v30 }
 0xb29   :  { %13509 = vtanh.f32 %v5363_v50 }
 0xb32   :  { %v13508_v63 = vpop.eup %13507 }
 0xb33   :  { %v5360_v35 = vmul.f32 0.5, %v13508_v63  ;;  %v13510_v3 = vpop.eup %13509 }
 0xb34   :  { %v5365_v15 = vmul.f32 0.5, %v13510_v3 }
 0xb35   :  { %v5361_v32 = vadd.f32 0.5, %v5360_v35 }
 0xb36   :  { %v5366_v0 = vadd.f32 0.5, %v5365_v15 }
 0xb37   :  { %v5368_v45 = vmul.f32 %v5367_v41, %v5361_v32 }
 0xb39   :  { %v5369_v16 = vadd.f32 %v5368_v45, %v1439_v61  ;;  %v17241_v61 = vld [vmem:[#allocation10_spill] sm:$0xff] }
 0xb3b   :  { %13511 = vtanh.f32 %v5369_v16 }
 0xb45   :  { %v13512_v30 = vpop.eup %13511 }
 0xb46   :  { %v5371_v57 = vsub.f32 %v15521_v1, %v13512_v30 }
 0xb48   :  { %v5372_v38 = vmul.f32 %v5371_v57, %v5366_v0 }
 0xb4a   :  { %v15638_v26 = vadd.f32 %v13512_v30, %v5372_v38 }
 0xb4c   :  { %v5374_v7 = vpack.c.bf16 %v15638_v26, %v15638_v26 }
 0xb4e   :  { %5585 = vmatmul.mubr.bf16.vlgmr.msra.gmra.mrb[84].mxu0 %v5374_v7  ;;  %12311 = vmatmul.mubr.bf16.vlgmr.msra.gmra.mrb[84].mxu1 %v5374_v7 }
 0xb4f   :  { %5800 = vmatpush1.bf16.msra.mxu0 %v15250_v25  ;;  %12315 = vmatpush3.bf16.msra.mxu1 %v13221_v17  ;;  %v13223_v25 = vld [vmem:[%s17208_s2 + $0xf8] ss:$12 sps:$4 sm:$0xff]  }
 0xb50   :  { %5801 = vmatprep.subr.bf16.mxu0 %v15258_v5  ;;  %12316 = vmatprep.subr.bf16.mxu1 %v17231_v52  ;;  %v13224_v5 = vld [vmem:[%s17208_s2 + $0x110] ss:$12 sps:$4 sm:$0xff]  }
 0xb51   :  { %5831 = vmatprep.mubr.bf16.mxu0 %v17232_v13  ;;  %12330 = vmatprep.mubr.msk.bf16.mxu1 %vm13633_vm0, %v17231_v52 }
 0xb53   :  { %5802 = vmatpush1.bf16.msra.mxu0 %v15264_v12  ;;  %12317 = vmatpush3.bf16.msra.mxu1 %v13222_v2  ;;  %v13225_v12 = vld [vmem:[%s17208_s2 + $0x128] ss:$12 sps:$4 sm:$0xff]   ;;  %v15765_v2 = vld [vmem:[%s17208_s2 + $0xc0] ss:$12 sps:$4 sm:$0xff]  }
 0xb54   :  { %5803 = vmatprep.subr.bf16.mxu0 %v15273_v11  ;;  %12318 = vmatprep.subr.bf16.mxu1 %v17231_v52  ;;  %v13226_v11 = vld [vmem:[%s17208_s2 + $0x140] ss:$12 sps:$4 sm:$0xff]  }
 0xb57   :  { %5804 = vmatpush1.bf16.msra.mxu0 %v15283_v37  ;;  %12319 = vmatpush3.bf16.msra.mxu1 %v13223_v25  ;;  %v13227_v37 = vld [vmem:[%s17208_s2 + $0x158] ss:$12 sps:$4 sm:$0xff]   ;;  %v13240_v25 = vld [vmem:[%s17208_s2 + $0xc8] ss:$12 sps:$4 sm:$0xff]  }
 0xb58   :  { %5805 = vmatprep.subr.bf16.mxu0 %v15292_v55  ;;  %12320 = vmatprep.subr.bf16.mxu1 %v17231_v52  ;;  %v13228_v55 = vld [vmem:[%s17208_s2 + $0x170] ss:$12 sps:$4 sm:$0xff]  }
 0xb5b   :  { %5806 = vmatpush1.bf16.msra.mxu0 %v15299_v59  ;;  %12321 = vmatpush3.bf16.msra.mxu1 %v13224_v5  ;;  %v13229_v59 = vld [vmem:[%s17206_s1 + $0x188] ss:$12 sps:$4 sm:$0xff]  }
 0xb5c   :  { %5807 = vmatprep.subr.bf16.mxu0 %v15308_v40  ;;  %12322 = vmatprep.subr.bf16.mxu1 %v17231_v52  ;;  %v13230_v40 = vld [vmem:[%s17206_s1 + $0x1a0] ss:$12 sps:$4 sm:$0xff]  }
 0xb5f   :  { %5808 = vmatpush1.bf16.msra.mxu0 %v15315_v48  ;;  %12323 = vmatpush3.bf16.msra.mxu1 %v13225_v12  ;;  %v13231_v48 = vld [vmem:[%s17206_s1 + $0x1b8] ss:$12 sps:$4 sm:$0xff]   ;;  %v15775_v12 = vld [vmem:[%s17208_s2 + $0xdc] ss:$12 sps:$4 sm:$0xff]  }
 0xb60   :  { %5809 = vmatprep.subr.bf16.mxu0 %v15324_v27  ;;  %12324 = vmatprep.subr.bf16.mxu1 %v17231_v52  ;;  %v13232_v27 = vld [vmem:[%s17206_s1 + $0x1d0] ss:$12 sps:$4 sm:$0xff]  }
 0xb63   :  { %5810 = vmatpush1.bf16.msra.mxu0 %v15331_v46  ;;  %12325 = vmatpush3.bf16.msra.mxu1 %v13226_v11  ;;  %v13233_v46 = vld [vmem:[%s17206_s1 + $0x1e8] ss:$12 sps:$4 sm:$0xff]   ;;  %v13244_v11 = vld [vmem:[%s17208_s2 + $0xe0] ss:$12 sps:$4 sm:$0xff]  }
 0xb64   :  { %5811 = vmatprep.subr.bf16.mxu0 %v15340_v44  ;;  %12326 = vmatprep.subr.bf16.mxu1 %v17231_v52  ;;  %v13234_v44 = vld [vmem:[%s17206_s1 + $0x200] ss:$12 sps:$4 sm:$0xff]  }
 0xb67   :  { %5812 = vmatpush1.bf16.msra.mxu0 %v15347_v42  ;;  %12327 = vmatpush3.bf16.msra.mxu1 %v13227_v37  ;;  %v13235_v42 = vld [vmem:[%s17206_s1 + $0x218] ss:$12 sps:$4 sm:$0xff]   ;;  %v15791_v37 = vld [vmem:[%s17208_s2 + $0xf4] ss:$12 sps:$4 sm:$0xff]  }
 0xb68   :  { %5813 = vmatprep.subr.bf16.mxu0 %v15356_v19  ;;  %12328 = vmatprep.subr.bf16.mxu1 %v17231_v52  ;;  %v13236_v19 = vld [vmem:[%s17206_s1 + $0x230] ss:$12 sps:$4 sm:$0xff]  }
 0xb6b   :  { %5814 = vmatpush1.bf16.msra.mxu0 %v15363_v18  ;;  %12329 = vmatpush3.bf16.msra.mxu1 %v13228_v55  ;;  %v15745_v18 = vld [vmem:[%s17208_s2 + $0xc4] ss:$12 sps:$4 sm:$0xff]  }
 0xb6c   :  { %6075 = vmatprep.subr.bf16.mxu0 %v15380_v39  ;;  %12334 = vmatprep.subr.bf16.mxu1 %v17231_v52  ;;  %v15800_v55 = vld [vmem:[%s17208_s2 + $0xf0] ss:$12 sps:$4 sm:$0xff]  }
 0xb6e   :  { %5832 = vmatmul.mubr.bf16.vlgmr.msra.gmra.mrb[36].mxu0 %v5374_v7  ;;  %12331 = vmatmul.mubr.bf16.vlgmr.msra.gmra.mrb[88].mxu1 %v5374_v7 }
 0xb6f   :  { %6076 = vmatpush1.bf16.msra.mxu0 %v15385_v20  ;;  %6107 = vmatprep.mubr.bf16.mxu0 %v17232_v13 }
 0xb70   :  { %6077 = vmatprep.subr.bf16.mxu0 %v15395_v14  ;;  %12350 = vmatprep.mubr.msk.bf16.mxu1 %vm13633_vm0, %v17231_v52 }
 0xb71   :  { %12335 = vmatpush3.bf16.msra.mxu1 %v13229_v59  ;;  %v13248_v59 = vld [vmem:[%s17208_s2 + $0xf8] ss:$12 sps:$4 sm:$0xff]  }
 0xb72   :  { %12336 = vmatprep.subr.bf16.mxu1 %v17231_v52 }
 0xb73   :  { %6078 = vmatpush1.bf16.msra.mxu0 %v15401_v33 }
 0xb74   :  { %6079 = vmatprep.subr.bf16.mxu0 %v15411_v9  ;;  %v10109_v9 = vld [vmem:[%s17209_s3 + $0x3] sm:$0x7] }
 0xb75   :  { %12337 = vmatpush3.bf16.msra.mxu1 %v13230_v40  ;;  %v1750_v1 = vrot.slane %v10109_v9, %v17235_v34  ;;  %v1754_v35 = vrot.slane %v10109_v9, %v17236_v8  ;;  %v15810_v40 = vld [vmem:[%s17208_s2 + $0x10c] ss:$12 sps:$4 sm:$0xff]  }
 0xb76   :  { %12338 = vmatprep.subr.bf16.mxu1 %v17231_v52 }
 0xb77   :  { %6080 = vmatpush1.bf16.msra.mxu0 %v15417_v10  ;;  %v1746_v10 = vrot.slane %v10109_v9, %v17234_v36  ;;  %v1962_v45 = vadd.f32 %v17241_v61, %v1754_v35  ;;  %v15864_v9 = vld [vmem:[%s17208_s2 + $0x150] ss:$12 sps:$4 sm:$0xff]  }
 0xb78   :  { %6081 = vmatprep.subr.bf16.mxu0 %v15427_v24  ;;  %v13284_v35 = vld [vmem:[%s17206_s1 + $0x1d0] ss:$12 sps:$4 sm:$0xff]  }
 0xb79   :  { %12339 = vmatpush3.bf16.msra.mxu1 %v13231_v48  ;;  %v15816_v48 = vld [vmem:[%s17208_s2 + $0x108] ss:$12 sps:$4 sm:$0xff]  }
 0xb7a   :  { %12340 = vmatprep.subr.bf16.mxu1 %v17231_v52  ;;  %v15974_v61 = vld [vmem:[%s17206_s1 + $0x1fc] ss:$12 sps:$4 sm:$0xff]  }
 0xb7b   :  { %6082 = vmatpush1.bf16.msra.mxu0 %v15433_v58 }
 0xb7c   :  { %6083 = vmatprep.subr.bf16.mxu0 %v15448_v53 }
 0xb7d   :  { %12341 = vmatpush3.bf16.msra.mxu1 %v13232_v27  ;;  %v13252_v27 = vld [vmem:[%s17208_s2 + $0x110] ss:$12 sps:$4 sm:$0xff]  }
 0xb7e   :  { %12342 = vmatprep.subr.bf16.mxu1 %v17231_v52 }
 0xb7f   :  { %6084 = vmatpush1.bf16.msra.mxu0 %v15443_v49 }
 0xb80   :  { %6085 = vmatprep.subr.bf16.mxu0 %v15457_v23 }
 0xb81   :  { %12343 = vmatpush3.bf16.msra.mxu1 %v13233_v46  ;;  %v15826_v46 = vld [vmem:[%s17208_s2 + $0x124] ss:$12 sps:$4 sm:$0xff]  }
 0xb82   :  { %12344 = vmatprep.subr.bf16.mxu1 %v17231_v52 }
 0xb83   :  { %6086 = vmatpush1.bf16.msra.mxu0 %v15464_v56 }
 0xb84   :  { %6087 = vmatprep.subr.bf16.mxu0 %v15474_v60 }
 0xb85   :  { %12345 = vmatpush3.bf16.msra.mxu1 %v13234_v44  ;;  %v15832_v44 = vld [vmem:[%s17208_s2 + $0x120] ss:$12 sps:$4 sm:$0xff]  }
 0xb86   :  { %12346 = vmatprep.subr.bf16.mxu1 %v17231_v52 }
 0xb87   :  { %6088 = vmatpush1.bf16.msra.mxu0 %v15480_v47 }
 0xb88   :  { %6089 = vmatprep.subr.bf16.mxu0 %v15490_v28 }
 0xb89   :  { %12347 = vmatpush3.bf16.msra.mxu1 %v13235_v42  ;;  %v13256_v42 = vld [vmem:[%s17208_s2 + $0x128] ss:$12 sps:$4 sm:$0xff]  }
 0xb8a   :  { %12348 = vmatprep.subr.bf16.mxu1 %v17231_v52 }
 0xb8b   :  { %6090 = vmatpush1.bf16.msra.mxu0 %v15496_v4 }
 0xb8c   :  { %6322 = vmatprep.subr.bf16.mxu0 %v15745_v18 }
 0xb8d   :  { %12349 = vmatpush3.bf16.msra.mxu1 %v13236_v19  ;;  %v15842_v19 = vld [vmem:[%s17208_s2 + $0x13c] ss:$12 sps:$4 sm:$0xff]  }
 0xb8e   :  { %12354 = vmatprep.subr.bf16.mxu1 %v17231_v52 }
 0xc21   :  { %v15749_v39 = vpop.f32.mrb[84].mxu1 }
 0xc22   :  { %17240 = vst [vmem:[#allocation4_spill] sm:$0xff] %v15749_v39  ;;  %v12312_v20 = vpop.f32.mrb[85].mxu1 }
 0xc23   :  { %v5630_v14 = vpop.f32.mrb[86].mxu1  ;;  %v15848_v20 = vld [vmem:[%s17208_s2 + $0x138] ss:$12 sps:$4 sm:$0xff]  }
 0xc24   :  { %v12313_v33 = vpop.f32.mrb[87].mxu1  ;;  %v13260_v14 = vld [vmem:[%s17208_s2 + $0x140] ss:$12 sps:$4 sm:$0xff]  }
 0xc25   :  { %v15858_v33 = vld [vmem:[%s17208_s2 + $0x154] ss:$12 sps:$4 sm:$0xff]  }
 0xc41   :  { %v5833_v24 = vpop.f32.mrb[36].mxu0  ;;  %v5874_v58 = vpop.f32.mrb[88].mxu1 }
 0xc42   :  { %v12738_v49 = vadd.f32 %v5833_v24, %v1746_v10  ;;  %v5835_v53 = vpop.f32.mrb[37].mxu0  ;;  %v12332_v23 = vpop.f32.mrb[89].mxu1  ;;  %v5890_v22 = vadd.f32 %v15516_v54, %v5874_v58  ;;  %v13264_v10 = vld [vmem:[%s17208_s2 + $0x158] ss:$12 sps:$4 sm:$0xff]   ;;  %v15880_v58 = vld [vmem:[%s17208_s2 + $0x168] ss:$12 sps:$4 sm:$0xff]  }
 0xc43   :  { %v5837_v56 = vpop.f32.mrb[38].mxu0  ;;  %v5877_v60 = vpop.f32.mrb[90].mxu1  ;;  %v12739_v50 = vadd.f32 %v5835_v53, %v1750_v1  ;;  %v15874_v24 = vld [vmem:[%s17208_s2 + $0x16c] ss:$12 sps:$4 sm:$0xff]   ;;  %v15895_v53 = vld [vmem:[%s17206_s1 + $0x184] ss:$12 sps:$4 sm:$0xff]  }
 0xc44   :  { %v5881_v47 = vmul.f32 0.5, %v12738_v49  ;;  %v5838_v28 = vpop.f32.mrb[39].mxu0  ;;  %v12333_v4 = vpop.f32.mrb[91].mxu1  ;;  %v13268_v49 = vld [vmem:[%s17208_s2 + $0x170] ss:$12 sps:$4 sm:$0xff]  }
 0xc45   :  { %v5886_v63 = vmul.f32 0.5, %v12739_v50  ;;  %v15900_v23 = vld [vmem:[%s17206_s1 + $0x180] ss:$12 sps:$4 sm:$0xff]   ;;  %v13272_v56 = vld [vmem:[%s17206_s1 + $0x188] ss:$12 sps:$4 sm:$0xff]  }
 0xc46   :  { %13513 = vtanh.f32 %v5881_v47  ;;  %v15910_v60 = vld [vmem:[%s17206_s1 + $0x19c] ss:$12 sps:$4 sm:$0xff]   ;;  %v15916_v47 = vld [vmem:[%s17206_s1 + $0x198] ss:$12 sps:$4 sm:$0xff]   ;;  %v13276_v28 = vld [vmem:[%s17206_s1 + $0x1a0] ss:$12 sps:$4 sm:$0xff]  }
 0xc47   :  { %13515 = vtanh.f32 %v5886_v63  ;;  %v15926_v4 = vld [vmem:[%s17206_s1 + $0x1b4] ss:$12 sps:$4 sm:$0xff]   ;;  %v15932_v1 = vld [vmem:[%s17206_s1 + $0x1b0] ss:$12 sps:$4 sm:$0xff]   ;;  %v13280_v50 = vld [vmem:[%s17206_s1 + $0x1b8] ss:$12 sps:$4 sm:$0xff]  }
 0xc48   :  { %v15942_v63 = vld [vmem:[%s17206_s1 + $0x1cc] ss:$12 sps:$4 sm:$0xff]  }
 0xc50   :  { %v13514_v51 = vpop.eup %13513 }
 0xc51   :  { %v5883_v32 = vmul.f32 0.5, %v13514_v51  ;;  %v13516_v15 = vpop.eup %13515  ;;  %v15948_v51 = vld [vmem:[%s17206_s1 + $0x1c8] ss:$12 sps:$4 sm:$0xff]  }
 0xc52   :  { %v5888_v30 = vmul.f32 0.5, %v13516_v15  ;;  %v15996_v15 = vld [vmem:[%s17206_s1 + $0x210] ss:$12 sps:$4 sm:$0xff]  }
 0xc53   :  { %v5884_v41 = vadd.f32 0.5, %v5883_v32  ;;  %v15958_v32 = vld [vmem:[%s17206_s1 + $0x1e4] ss:$12 sps:$4 sm:$0xff]  }
 0xc54   :  { %v5889_v57 = vadd.f32 0.5, %v5888_v30  ;;  %v13296_v30 = vld [vmem:[%s17206_s1 + $0x218] ss:$12 sps:$4 sm:$0xff]  }
 0xc55   :  { %v5891_v16 = vmul.f32 %v5890_v22, %v5884_v41  ;;  %v15964_v41 = vld [vmem:[%s17206_s1 + $0x1e0] ss:$12 sps:$4 sm:$0xff]   ;;  %v13288_v22 = vld [vmem:[%s17206_s1 + $0x1e8] ss:$12 sps:$4 sm:$0xff]  }
 0xc57   :  { %v5892_v3 = vadd.f32 %v5891_v16, %v1962_v45  ;;  %v15980_v45 = vld [vmem:[%s17206_s1 + $0x1f8] ss:$12 sps:$4 sm:$0xff]   ;;  %v13292_v16 = vld [vmem:[%s17206_s1 + $0x200] ss:$12 sps:$4 sm:$0xff]  }
 0xc59   :  { %13517 = vtanh.f32 %v5892_v3  ;;  %v15990_v3 = vld [vmem:[%s17206_s1 + $0x214] ss:$12 sps:$4 sm:$0xff]  }
 0xc63   :  { %v13518_v0 = vpop.eup %13517 }
 0xc64   :  { %v5894_v38 = vsub.f32 %v15638_v26, %v13518_v0  ;;  %v15781_v26 = vld [vmem:[%s17208_s2 + $0xd8] ss:$12 sps:$4 sm:$0xff]  }
 0xc66   :  { %v5895_v17 = vmul.f32 %v5894_v38, %v5889_v57  ;;  %v16012_v57 = vld [vmem:[%s17206_s1 + $0x228] ss:$12 sps:$4 sm:$0xff]   ;;  %v13300_v38 = vld [vmem:[%s17206_s1 + $0x230] ss:$12 sps:$4 sm:$0xff]  }
 0xc68   :  { %v15760_v7 = vadd.f32 %v13518_v0, %v5895_v17  ;;  %v16006_v0 = vld [vmem:[%s17206_s1 + $0x22c] ss:$12 sps:$4 sm:$0xff]  }
 0xc6a   :  { %v5897_v5 = vpack.c.bf16 %v15760_v7, %v15760_v7 }
 0xc6c   :  { %6108 = vmatmul.mubr.bf16.vlgmr.msra.gmra.mrb[88].mxu0 %v5897_v5  ;;  %12351 = vmatmul.mubr.bf16.vlgmr.msra.gmra.mrb[92].mxu1 %v5897_v5 }
 0xc6d   :  { %6323 = vmatpush1.bf16.msra.mxu0 %v15765_v2  ;;  %12355 = vmatpush3.bf16.msra.mxu1 %v13240_v25 }
 0xc6e   :  { %6324 = vmatprep.subr.bf16.mxu0 %v15775_v12  ;;  %12356 = vmatprep.subr.bf16.mxu1 %v17231_v52 }
 0xc6f   :  { %6354 = vmatprep.mubr.bf16.mxu0 %v17232_v13  ;;  %12370 = vmatprep.mubr.msk.bf16.mxu1 %vm13633_vm0, %v17231_v52 }
 0xc71   :  { %6325 = vmatpush1.bf16.msra.mxu0 %v15781_v26  ;;  %12357 = vmatpush3.bf16.msra.mxu1 %v13244_v11 }
 0xc72   :  { %6326 = vmatprep.subr.bf16.mxu0 %v15791_v37  ;;  %12358 = vmatprep.subr.bf16.mxu1 %v17231_v52 }
 0xc75   :  { %6327 = vmatpush1.bf16.msra.mxu0 %v15800_v55  ;;  %12359 = vmatpush3.bf16.msra.mxu1 %v13248_v59  ;;  %v10190_v59 = vld [vmem:[%s17209_s3 + $0x3] sm:$0x7] }
 0xc76   :  { %6328 = vmatprep.subr.bf16.mxu0 %v15810_v40  ;;  %12360 = vmatprep.subr.bf16.mxu1 %v17231_v52 }
 0xc79   :  { %6329 = vmatpush1.bf16.msra.mxu0 %v15816_v48  ;;  %12361 = vmatpush3.bf16.msra.mxu1 %v13252_v27  ;;  %v2269_v27 = vrot.slane %v10190_v59, %v17234_v36 }
 0xc7a   :  { %6330 = vmatprep.subr.bf16.mxu0 %v15826_v46  ;;  %12362 = vmatprep.subr.bf16.mxu1 %v17231_v52 }
 0xc7d   :  { %6331 = vmatpush1.bf16.msra.mxu0 %v15832_v44  ;;  %12363 = vmatpush3.bf16.msra.mxu1 %v13256_v42 }
 0xc7e   :  { %6332 = vmatprep.subr.bf16.mxu0 %v15842_v19  ;;  %12364 = vmatprep.subr.bf16.mxu1 %v17231_v52 }
 0xc81   :  { %6333 = vmatpush1.bf16.msra.mxu0 %v15848_v20  ;;  %12365 = vmatpush3.bf16.msra.mxu1 %v13260_v14 }
 0xc82   :  { %6334 = vmatprep.subr.bf16.mxu0 %v15858_v33  ;;  %12366 = vmatprep.subr.bf16.mxu1 %v17231_v52 }
 0xc85   :  { %6335 = vmatpush1.bf16.msra.mxu0 %v15864_v9  ;;  %12367 = vmatpush3.bf16.msra.mxu1 %v13264_v10 }
 0xc86   :  { %6336 = vmatprep.subr.bf16.mxu0 %v15874_v24  ;;  %12368 = vmatprep.subr.bf16.mxu1 %v17231_v52 }
 0xc89   :  { %6337 = vmatpush1.bf16.msra.mxu0 %v15880_v58  ;;  %12369 = vmatpush3.bf16.msra.mxu1 %v13268_v49 }
 0xc8a   :  { %12374 = vmatprep.subr.bf16.mxu1 %v17231_v52  ;;  %6598 = vmatprep.subr.bf16.mxu0 %v15895_v53 }
 0xc8c   :  { %6355 = vmatmul.mubr.bf16.vlgmr.msra.gmra.mrb[44].mxu0 %v5897_v5  ;;  %12371 = vmatmul.mubr.bf16.vlgmr.msra.gmra.mrb[96].mxu1 %v5897_v5 }
 0xc8d   :  { %6630 = vmatprep.mubr.bf16.mxu0 %v17232_v13  ;;  %12390 = vmatprep.mubr.msk.bf16.mxu1 %vm13633_vm0, %v17231_v52 }
 0xc8e   :  { %6599 = vmatpush1.bf16.msra.mxu0 %v15900_v23  ;;  %12375 = vmatpush3.bf16.msra.mxu1 %v13272_v56 }
 0xc8f   :  { %12376 = vmatprep.subr.bf16.mxu1 %v17231_v52  ;;  %6600 = vmatprep.subr.bf16.mxu0 %v15910_v60 }
 0xc92   :  { %6601 = vmatpush1.bf16.msra.mxu0 %v15916_v47  ;;  %12377 = vmatpush3.bf16.msra.mxu1 %v13276_v28 }
 0xc93   :  { %12378 = vmatprep.subr.bf16.mxu1 %v17231_v52  ;;  %6602 = vmatprep.subr.bf16.mxu0 %v15926_v4 }
 0xc96   :  { %6603 = vmatpush1.bf16.msra.mxu0 %v15932_v1  ;;  %12379 = vmatpush3.bf16.msra.mxu1 %v13280_v50 }
 0xc97   :  { %12380 = vmatprep.subr.bf16.mxu1 %v17231_v52  ;;  %6604 = vmatprep.subr.bf16.mxu0 %v15942_v63 }
 0xc9a   :  { %6605 = vmatpush1.bf16.msra.mxu0 %v15948_v51  ;;  %12381 = vmatpush3.bf16.msra.mxu1 %v13284_v35 }
 0xc9b   :  { %12382 = vmatprep.subr.bf16.mxu1 %v17231_v52  ;;  %6606 = vmatprep.subr.bf16.mxu0 %v15958_v32 }
 0xc9e   :  { %6607 = vmatpush1.bf16.msra.mxu0 %v15964_v41  ;;  %12383 = vmatpush3.bf16.msra.mxu1 %v13288_v22 }
 0xc9f   :  { %12384 = vmatprep.subr.bf16.mxu1 %v17231_v52  ;;  %6608 = vmatprep.subr.bf16.mxu0 %v15974_v61 }
 0xca2   :  { %6609 = vmatpush1.bf16.msra.mxu0 %v15980_v45  ;;  %12385 = vmatpush3.bf16.msra.mxu1 %v13292_v16 }
 0xca3   :  { %12386 = vmatprep.subr.bf16.mxu1 %v17231_v52  ;;  %6610 = vmatprep.subr.bf16.mxu0 %v15990_v3 }
 0xca6   :  { %6611 = vmatpush1.bf16.msra.mxu0 %v15996_v15  ;;  %12387 = vmatpush3.bf16.msra.mxu1 %v13296_v30  ;;  %v2273_v30 = vrot.slane %v10190_v59, %v17235_v34 }
 0xca7   :  { %12388 = vmatprep.subr.bf16.mxu1 %v17231_v52  ;;  %6612 = vmatprep.subr.bf16.mxu0 %v16006_v0 }
 0xcaa   :  { %6613 = vmatpush1.bf16.msra.mxu0 %v16012_v57  ;;  %12389 = vmatpush3.bf16.msra.mxu1 %v13300_v38 }
 0xcab   :  { %6845 = vmatprep.subr.bf16.mxu0 %v15745_v18  ;;  %12394 = vmatprep.subr.bf16.mxu1 %v17231_v52 }
 0xd3f   :  { %v16021_v17 = vpop.f32.mrb[92].mxu1 }
 0xd40   :  { %17242 = vst [vmem:[#allocation5_spill] sm:$0xff] %v16021_v17  ;;  %v12352_v25 = vpop.f32.mrb[93].mxu1 }
 0xd41   :  { %v6153_v5 = vpop.f32.mrb[94].mxu1 }
 0xd42   :  { %v12353_v11 = vpop.f32.mrb[95].mxu1 }
 0xd43   :  { %v2277_v11 = vrot.slane %v10190_v59, %v17236_v8  ;;  %v13306_v59 = vld [vmem:[%s17208_s2 + $0x140] ss:$12 sps:$4 sm:$0xff]  }
 0xd5f   :  { %v6356_v42 = vpop.f32.mrb[44].mxu0  ;;  %v6397_v14 = vpop.f32.mrb[96].mxu1 }
 0xd60   :  { %v12740_v10 = vadd.f32 %v6356_v42, %v2269_v27  ;;  %v6358_v49 = vpop.f32.mrb[45].mxu0  ;;  %v12372_v56 = vpop.f32.mrb[97].mxu1  ;;  %v6413_v43 = vadd.f32 %v15516_v54, %v6397_v14  ;;  %v2485_v27 = vadd.f32 %v14736_v21, %v2277_v11  ;;  %v13302_v21 = vld [vmem:[%s17208_s2 + $0xe0] ss:$12 sps:$4 sm:$0xff]   ;;  %v13307_v14 = vld [vmem:[%s17208_s2 + $0x158] ss:$12 sps:$4 sm:$0xff]  }
 0xd61   :  { %v6360_v28 = vpop.f32.mrb[46].mxu0  ;;  %v6400_v50 = vpop.f32.mrb[98].mxu1  ;;  %v12741_v38 = vadd.f32 %v6358_v49, %v2273_v30  ;;  %v13308_v30 = vld [vmem:[%s17208_s2 + $0x170] ss:$12 sps:$4 sm:$0xff]   ;;  %v13313_v11 = vld [vmem:[%s17206_s1 + $0x1e8] ss:$12 sps:$4 sm:$0xff]  }
 0xd62   :  { %v6404_v35 = vmul.f32 0.5, %v12740_v10  ;;  %v6361_v22 = vpop.f32.mrb[47].mxu0  ;;  %v12373_v16 = vpop.f32.mrb[99].mxu1 }
 0xd63   :  { %v6409_v25 = vmul.f32 0.5, %v12741_v38  ;;  %v13309_v38 = vld [vmem:[%s17206_s1 + $0x188] ss:$12 sps:$4 sm:$0xff]  }
 0xd64   :  { %13519 = vtanh.f32 %v6404_v35 }
 0xd65   :  { %13521 = vtanh.f32 %v6409_v25  ;;  %v13310_v25 = vld [vmem:[%s17206_s1 + $0x1a0] ss:$12 sps:$4 sm:$0xff]  }
 0xd6e   :  { %v13520_v5 = vpop.eup %13519 }
 0xd6f   :  { %v6406_v17 = vmul.f32 0.5, %v13520_v5  ;;  %v13522_v10 = vpop.eup %13521  ;;  %v13311_v5 = vld [vmem:[%s17206_s1 + $0x1b8] ss:$12 sps:$4 sm:$0xff]  }
 0xd70   :  { %v6411_v28 = vmul.f32 0.5, %v13522_v10 }
 0xd71   :  { %v6407_v39 = vadd.f32 0.5, %v6406_v17  ;;  %v13301_v17 = vld [vmem:[%s17208_s2 + $0xc8] ss:$12 sps:$4 sm:$0xff]  }
 0xd72   :  { %v6412_v35 = vadd.f32 0.5, %v6411_v28 }
 0xd73   :  { %v6414_v42 = vmul.f32 %v6413_v43, %v6407_v39  ;;  %v13303_v43 = vld [vmem:[%s17208_s2 + $0xf8] ss:$12 sps:$4 sm:$0xff]   ;;  %v13304_v39 = vld [vmem:[%s17208_s2 + $0x110] ss:$12 sps:$4 sm:$0xff]  }
 0xd75   :  { %v6415_v56 = vadd.f32 %v6414_v42, %v2485_v27  ;;  %v13314_v27 = vld [vmem:[%s17206_s1 + $0x200] ss:$12 sps:$4 sm:$0xff]   ;;  %v13315_v42 = vld [vmem:[%s17206_s1 + $0x218] ss:$12 sps:$4 sm:$0xff]  }
 0xd77   :  { %13523 = vtanh.f32 %v6415_v56  ;;  %v13316_v56 = vld [vmem:[%s17206_s1 + $0x230] ss:$12 sps:$4 sm:$0xff]  }
 0xd81   :  { %v13524_v50 = vpop.eup %13523 }
 0xd82   :  { %v6417_v49 = vsub.f32 %v15760_v7, %v13524_v50  ;;  %v13305_v7 = vld [vmem:[%s17208_s2 + $0x128] ss:$12 sps:$4 sm:$0xff]  }
 0xd84   :  { %v6418_v22 = vmul.f32 %v6417_v49, %v6412_v35  ;;  %v10271_v49 = vld [vmem:[%s17209_s3 + $0x3] sm:$0x7] }
 0xd86   :  { %v16032_v16 = vadd.f32 %v13524_v50, %v6418_v22  ;;  %v2792_v22 = vrot.slane %v10271_v49, %v17234_v36 }
 0xd88   :  { %v6420_v54 = vpack.c.bf16 %v16032_v16, %v16032_v16 }
 0xd8a   :  { %6631 = vmatmul.mubr.bf16.vlgmr.msra.gmra.mrb[92].mxu0 %v6420_v54  ;;  %12391 = vmatmul.mubr.bf16.vlgmr.msra.gmra.mrb[100].mxu1 %v6420_v54 }
 0xd8b   :  { %6846 = vmatpush1.bf16.msra.mxu0 %v15765_v2  ;;  %12395 = vmatpush3.bf16.msra.mxu1 %v13301_v17 }
 0xd8c   :  { %6847 = vmatprep.subr.bf16.mxu0 %v15775_v12  ;;  %12396 = vmatprep.subr.bf16.mxu1 %v17231_v52 }
 0xd8d   :  { %6877 = vmatprep.mubr.bf16.mxu0 %v17232_v13  ;;  %12410 = vmatprep.mubr.msk.bf16.mxu1 %vm13633_vm0, %v17231_v52 }
 0xd8f   :  { %6848 = vmatpush1.bf16.msra.mxu0 %v15781_v26  ;;  %12397 = vmatpush3.bf16.msra.mxu1 %v13302_v21 }
 0xd90   :  { %6849 = vmatprep.subr.bf16.mxu0 %v15791_v37  ;;  %12398 = vmatprep.subr.bf16.mxu1 %v17231_v52 }
 0xd93   :  { %6850 = vmatpush1.bf16.msra.mxu0 %v15800_v55  ;;  %12399 = vmatpush3.bf16.msra.mxu1 %v13303_v43 }
 0xd94   :  { %6851 = vmatprep.subr.bf16.mxu0 %v15810_v40  ;;  %12400 = vmatprep.subr.bf16.mxu1 %v17231_v52 }
 0xd97   :  { %6852 = vmatpush1.bf16.msra.mxu0 %v15816_v48  ;;  %12401 = vmatpush3.bf16.msra.mxu1 %v13304_v39 }
 0xd98   :  { %6853 = vmatprep.subr.bf16.mxu0 %v15826_v46  ;;  %12402 = vmatprep.subr.bf16.mxu1 %v17231_v52 }
 0xd9b   :  { %6854 = vmatpush1.bf16.msra.mxu0 %v15832_v44  ;;  %12403 = vmatpush3.bf16.msra.mxu1 %v13305_v7 }
 0xd9c   :  { %6855 = vmatprep.subr.bf16.mxu0 %v15842_v19  ;;  %12404 = vmatprep.subr.bf16.mxu1 %v17231_v52 }
 0xd9f   :  { %6856 = vmatpush1.bf16.msra.mxu0 %v15848_v20  ;;  %12405 = vmatpush3.bf16.msra.mxu1 %v13306_v59 }
 0xda0   :  { %6857 = vmatprep.subr.bf16.mxu0 %v15858_v33  ;;  %12406 = vmatprep.subr.bf16.mxu1 %v17231_v52 }
 0xda3   :  { %6858 = vmatpush1.bf16.msra.mxu0 %v15864_v9  ;;  %12407 = vmatpush3.bf16.msra.mxu1 %v13307_v14 }
 0xda4   :  { %6859 = vmatprep.subr.bf16.mxu0 %v15874_v24  ;;  %12408 = vmatprep.subr.bf16.mxu1 %v17231_v52 }
 0xda7   :  { %6860 = vmatpush1.bf16.msra.mxu0 %v15880_v58  ;;  %12409 = vmatpush3.bf16.msra.mxu1 %v13308_v30 }
 0xda8   :  { %7121 = vmatprep.subr.bf16.mxu0 %v15895_v53  ;;  %12414 = vmatprep.subr.bf16.mxu1 %v17231_v52 }
 0xdaa   :  { %6878 = vmatmul.mubr.bf16.vlgmr.msra.gmra.mrb[52].mxu0 %v6420_v54  ;;  %12411 = vmatmul.mubr.bf16.vlgmr.msra.gmra.mrb[104].mxu1 %v6420_v54 }
 0xdab   :  { %7122 = vmatpush1.bf16.msra.mxu0 %v15900_v23  ;;  %7153 = vmatprep.mubr.bf16.mxu0 %v17232_v13 }
 0xdac   :  { %7123 = vmatprep.subr.bf16.mxu0 %v15910_v60  ;;  %12430 = vmatprep.mubr.msk.bf16.mxu1 %vm13633_vm0, %v17231_v52 }
 0xdad   :  { %12415 = vmatpush3.bf16.msra.mxu1 %v13309_v38 }
 0xdae   :  { %12416 = vmatprep.subr.bf16.mxu1 %v17231_v52 }
 0xdaf   :  { %7124 = vmatpush1.bf16.msra.mxu0 %v15916_v47 }
 0xdb0   :  { %7125 = vmatprep.subr.bf16.mxu0 %v15926_v4 }
 0xdb1   :  { %12417 = vmatpush3.bf16.msra.mxu1 %v13310_v25  ;;  %v2796_v25 = vrot.slane %v10271_v49, %v17235_v34 }
 0xdb2   :  { %12418 = vmatprep.subr.bf16.mxu1 %v17231_v52 }
 0xdb3   :  { %7126 = vmatpush1.bf16.msra.mxu0 %v15932_v1 }
 0xdb4   :  { %7127 = vmatprep.subr.bf16.mxu0 %v15942_v63 }
 0xdb5   :  { %12419 = vmatpush3.bf16.msra.mxu1 %v13311_v5 }
 0xdb6   :  { %12420 = vmatprep.subr.bf16.mxu1 %v17231_v52 }
 0xdb7   :  { %7128 = vmatpush1.bf16.msra.mxu0 %v15948_v51 }
 0xdb8   :  { %7129 = vmatprep.subr.bf16.mxu0 %v15958_v32 }
 0xdbb   :  { %7130 = vmatpush1.bf16.msra.mxu0 %v15964_v41 }
 0xdbc   :  { %7131 = vmatprep.subr.bf16.mxu0 %v15974_v61 }
 0xdbf   :  { %7132 = vmatpush1.bf16.msra.mxu0 %v15980_v45 }
 0xdc0   :  { %7133 = vmatprep.subr.bf16.mxu0 %v15990_v3 }
 0xdc3   :  { %7134 = vmatpush1.bf16.msra.mxu0 %v15996_v15 }
 0xdc4   :  { %7135 = vmatprep.subr.bf16.mxu0 %v16006_v0 }
 0xdc7   :  { %7136 = vmatpush1.bf16.msra.mxu0 %v16012_v57 }
 0xdc8   :  { %7368 = vmatprep.subr.bf16.mxu0 %v15745_v18  ;;  %v13312_v18 = vld [vmem:[%s17206_s1 + $0x1d0] ss:$12 sps:$4 sm:$0xff]  }
 0xdc9   :  { %12421 = vmatpush3.bf16.msra.mxu1 %v13312_v18 }
 0xdca   :  { %12422 = vmatprep.subr.bf16.mxu1 %v17231_v52 }
 0xdcd   :  { %12423 = vmatpush3.bf16.msra.mxu1 %v13313_v11 }
 0xdce   :  { %12424 = vmatprep.subr.bf16.mxu1 %v17231_v52 }
 0xdd1   :  { %12425 = vmatpush3.bf16.msra.mxu1 %v13314_v27  ;;  %v2800_v27 = vrot.slane %v10271_v49, %v17236_v8 }
 0xdd2   :  { %12426 = vmatprep.subr.bf16.mxu1 %v17231_v52 }
 0xdd5   :  { %12427 = vmatpush3.bf16.msra.mxu1 %v13315_v42 }
 0xdd6   :  { %12428 = vmatprep.subr.bf16.mxu1 %v17231_v52 }
 0xdd9   :  { %12429 = vmatpush3.bf16.msra.mxu1 %v13316_v56 }
 0xdda   :  { %12434 = vmatprep.subr.bf16.mxu1 %v17231_v52 }
 0xe5d   :  { %v16138_v10 = vpop.f32.mrb[100].mxu1 }
 0xe5e   :  { %v12392_v28 = vpop.f32.mrb[101].mxu1 }
 0xe5f   :  { %v6676_v50 = vpop.f32.mrb[102].mxu1  ;;  %v16149_v28 = vld [vmem:[%s17210_s4 + $0x8] sm:$0xff] }
 0xe60   :  { %v12393_v35 = vpop.f32.mrb[103].mxu1 }
 0xe61   :  { %v3008_v35 = vadd.f32 %v14909_v6, %v2800_v27  ;;  %v13318_v6 = vld [vmem:[%s17208_s2 + $0xe0] ss:$12 sps:$4 sm:$0xff]  }
 0xe7d   :  { %v6879_v17 = vpop.f32.mrb[52].mxu0  ;;  %v6920_v54 = vpop.f32.mrb[104].mxu1 }
 0xe7e   :  { %v12742_v21 = vadd.f32 %v6879_v17, %v2792_v22  ;;  %v6881_v43 = vpop.f32.mrb[53].mxu0  ;;  %v12412_v39 = vpop.f32.mrb[105].mxu1  ;;  %v6936_v50 = vadd.f32 %v16149_v28, %v6920_v54 }
 0xe7f   :  { %v6883_v7 = vpop.f32.mrb[54].mxu0  ;;  %v6923_v59 = vpop.f32.mrb[106].mxu1  ;;  %v12743_v5 = vadd.f32 %v6881_v43, %v2796_v25 }
 0xe80   :  { %v6927_v14 = vmul.f32 0.5, %v12742_v21  ;;  %v6884_v30 = vpop.f32.mrb[55].mxu0  ;;  %v12413_v38 = vpop.f32.mrb[107].mxu1 }
 0xe81   :  { %v6932_v18 = vmul.f32 0.5, %v12743_v5  ;;  %v13317_v30 = vld [vmem:[%s17208_s2 + $0xc8] ss:$12 sps:$4 sm:$0xff]  }
 0xe82   :  { %13525 = vtanh.f32 %v6927_v14 }
 0xe83   :  { %13527 = vtanh.f32 %v6932_v18 }
 0xe8c   :  { %v13526_v11 = vpop.eup %13525 }
 0xe8d   :  { %v6929_v42 = vmul.f32 0.5, %v13526_v11  ;;  %v13528_v21 = vpop.eup %13527 }
 0xe8e   :  { %v6934_v43 = vmul.f32 0.5, %v13528_v21 }
 0xe8f   :  { %v6930_v56 = vadd.f32 0.5, %v6929_v42 }
 0xe90   :  { %v6935_v7 = vadd.f32 0.5, %v6934_v43 }
 0xe91   :  { %v6937_v22 = vmul.f32 %v6936_v50, %v6930_v56 }
 0xe93   :  { %v6938_v17 = vadd.f32 %v6937_v22, %v3008_v35 }
 0xe95   :  { %13529 = vtanh.f32 %v6938_v17 }
 0xe9f   :  { %v13530_v39 = vpop.eup %13529 }
 0xea0   :  { %v6940_v49 = vsub.f32 %v16032_v16, %v13530_v39 }
 0xea2   :  { %v6941_v59 = vmul.f32 %v6940_v49, %v6935_v7 }
 0xea4   :  { %v16154_v14 = vadd.f32 %v13530_v39, %v6941_v59  ;;  %v16281_v59 = vld [vmem:[%s17208_s2 + $0xc0] ss:$12 sps:$4 sm:$0xff]  }
 0xea6   :  { %v6943_v54 = vpack.c.bf16 %v16154_v14, %v16154_v14 }
 0xea8   :  { %7154 = vmatmul.mubr.bf16.vlgmr.msra.gmra.mrb[96].mxu0 %v6943_v54  ;;  %12431 = vmatmul.mubr.bf16.vlgmr.msra.gmra.mrb[108].mxu1 %v6943_v54 }
 0xea9   :  { %7369 = vmatpush1.bf16.msra.mxu0 %v15765_v2  ;;  %12435 = vmatpush3.bf16.msra.mxu1 %v13317_v30  ;;  %v13319_v2 = vld [vmem:[%s17208_s2 + $0xf8] ss:$12 sps:$4 sm:$0xff]  }
 0xeaa   :  { %7370 = vmatprep.subr.bf16.mxu0 %v15775_v12  ;;  %12436 = vmatprep.subr.bf16.mxu1 %v17231_v52  ;;  %v13320_v12 = vld [vmem:[%s17208_s2 + $0x110] ss:$12 sps:$4 sm:$0xff]  }
 0xeab   :  { %7400 = vmatprep.mubr.bf16.mxu0 %v17232_v13  ;;  %12450 = vmatprep.mubr.msk.bf16.mxu1 %vm13633_vm0, %v17231_v52 }
 0xead   :  { %7371 = vmatpush1.bf16.msra.mxu0 %v15781_v26  ;;  %12437 = vmatpush3.bf16.msra.mxu1 %v13318_v6  ;;  %v13321_v26 = vld [vmem:[%s17208_s2 + $0x128] ss:$12 sps:$4 sm:$0xff]   ;;  %v13340_v6 = vld [vmem:[%s17208_s2 + $0xe0] ss:$12 sps:$4 sm:$0xff]  }
 0xeae   :  { %7372 = vmatprep.subr.bf16.mxu0 %v15791_v37  ;;  %12438 = vmatprep.subr.bf16.mxu1 %v17231_v52  ;;  %v13322_v37 = vld [vmem:[%s17208_s2 + $0x140] ss:$12 sps:$4 sm:$0xff]  }
 0xeb1   :  { %7373 = vmatpush1.bf16.msra.mxu0 %v15800_v55  ;;  %12439 = vmatpush3.bf16.msra.mxu1 %v13319_v2  ;;  %v13323_v55 = vld [vmem:[%s17208_s2 + $0x158] ss:$12 sps:$4 sm:$0xff]   ;;  %v16307_v2 = vld [vmem:[%s17208_s2 + $0xf4] ss:$12 sps:$4 sm:$0xff]  }
 0xeb2   :  { %7374 = vmatprep.subr.bf16.mxu0 %v15810_v40  ;;  %12440 = vmatprep.subr.bf16.mxu1 %v17231_v52  ;;  %v13324_v40 = vld [vmem:[%s17208_s2 + $0x170] ss:$12 sps:$4 sm:$0xff]  }
 0xeb5   :  { %7375 = vmatpush1.bf16.msra.mxu0 %v15816_v48  ;;  %12441 = vmatpush3.bf16.msra.mxu1 %v13320_v12  ;;  %v13325_v48 = vld [vmem:[%s17206_s1 + $0x188] ss:$12 sps:$4 sm:$0xff]   ;;  %v16316_v12 = vld [vmem:[%s17208_s2 + $0xf0] ss:$12 sps:$4 sm:$0xff]  }
 0xeb6   :  { %7376 = vmatprep.subr.bf16.mxu0 %v15826_v46  ;;  %12442 = vmatprep.subr.bf16.mxu1 %v17231_v52  ;;  %v13326_v46 = vld [vmem:[%s17206_s1 + $0x1a0] ss:$12 sps:$4 sm:$0xff]  }
 0xeb9   :  { %7377 = vmatpush1.bf16.msra.mxu0 %v15832_v44  ;;  %12443 = vmatpush3.bf16.msra.mxu1 %v13321_v26  ;;  %v13327_v44 = vld [vmem:[%s17206_s1 + $0x1b8] ss:$12 sps:$4 sm:$0xff]  }
 0xeba   :  { %7378 = vmatprep.subr.bf16.mxu0 %v15842_v19  ;;  %12444 = vmatprep.subr.bf16.mxu1 %v17231_v52  ;;  %v13328_v19 = vld [vmem:[%s17206_s1 + $0x1d0] ss:$12 sps:$4 sm:$0xff]   ;;  %v13344_v26 = vld [vmem:[%s17208_s2 + $0xf8] ss:$12 sps:$4 sm:$0xff]  }
 0xebd   :  { %7379 = vmatpush1.bf16.msra.mxu0 %v15848_v20  ;;  %12445 = vmatpush3.bf16.msra.mxu1 %v13322_v37  ;;  %v13329_v20 = vld [vmem:[%s17206_s1 + $0x1e8] ss:$12 sps:$4 sm:$0xff]   ;;  %v16326_v37 = vld [vmem:[%s17208_s2 + $0x10c] ss:$12 sps:$4 sm:$0xff]  }
 0xebe   :  { %7380 = vmatprep.subr.bf16.mxu0 %v15858_v33  ;;  %12446 = vmatprep.subr.bf16.mxu1 %v17231_v52  ;;  %v13330_v33 = vld [vmem:[%s17206_s1 + $0x200] ss:$12 sps:$4 sm:$0xff]  }
 0xec1   :  { %7381 = vmatpush1.bf16.msra.mxu0 %v15864_v9  ;;  %12447 = vmatpush3.bf16.msra.mxu1 %v13323_v55  ;;  %v13331_v9 = vld [vmem:[%s17206_s1 + $0x218] ss:$12 sps:$4 sm:$0xff]   ;;  %v16332_v55 = vld [vmem:[%s17208_s2 + $0x108] ss:$12 sps:$4 sm:$0xff]  }
 0xec2   :  { %7382 = vmatprep.subr.bf16.mxu0 %v15874_v24  ;;  %12448 = vmatprep.subr.bf16.mxu1 %v17231_v52  ;;  %v13332_v24 = vld [vmem:[%s17206_s1 + $0x230] ss:$12 sps:$4 sm:$0xff]  }
 0xec5   :  { %7383 = vmatpush1.bf16.msra.mxu0 %v15880_v58  ;;  %12449 = vmatpush3.bf16.msra.mxu1 %v13324_v40  ;;  %v16261_v58 = vld [vmem:[%s17208_s2 + $0xc4] ss:$12 sps:$4 sm:$0xff]  }
 0xec6   :  { %7644 = vmatprep.subr.bf16.mxu0 %v15895_v53  ;;  %12454 = vmatprep.subr.bf16.mxu1 %v17231_v52  ;;  %v13348_v40 = vld [vmem:[%s17208_s2 + $0x110] ss:$12 sps:$4 sm:$0xff]  }
 0xec8   :  { %7401 = vmatmul.mubr.bf16.vlgmr.msra.gmra.mrb[60].mxu0 %v6943_v54  ;;  %12451 = vmatmul.mubr.bf16.vlgmr.msra.gmra.mrb[112].mxu1 %v6943_v54  ;;  %v16291_v54 = vld [vmem:[%s17208_s2 + $0xdc] ss:$12 sps:$4 sm:$0xff]  }
 0xec9   :  { %7645 = vmatpush1.bf16.msra.mxu0 %v15900_v23  ;;  %7676 = vmatprep.mubr.bf16.mxu0 %v17232_v13 }
 0xeca   :  { %7646 = vmatprep.subr.bf16.mxu0 %v15910_v60  ;;  %12470 = vmatprep.mubr.msk.bf16.mxu1 %vm13633_vm0, %v17231_v52 }
 0xecb   :  { %12455 = vmatpush3.bf16.msra.mxu1 %v13325_v48  ;;  %v16342_v48 = vld [vmem:[%s17208_s2 + $0x124] ss:$12 sps:$4 sm:$0xff]  }
 0xecc   :  { %12456 = vmatprep.subr.bf16.mxu1 %v17231_v52 }
 0xecd   :  { %7647 = vmatpush1.bf16.msra.mxu0 %v15916_v47 }
 0xece   :  { %7648 = vmatprep.subr.bf16.mxu0 %v15926_v4  ;;  %v10352_v4 = vld [vmem:[%s17209_s3 + $0x3] sm:$0x7] }
 0xecf   :  { %12457 = vmatpush3.bf16.msra.mxu1 %v13326_v46  ;;  %v3319_v16 = vrot.slane %v10352_v4, %v17235_v34  ;;  %v3323_v18 = vrot.slane %v10352_v4, %v17236_v8  ;;  %v16348_v46 = vld [vmem:[%s17208_s2 + $0x120] ss:$12 sps:$4 sm:$0xff]  }
 0xed0   :  { %12458 = vmatprep.subr.bf16.mxu1 %v17231_v52 }
 0xed1   :  { %7649 = vmatpush1.bf16.msra.mxu0 %v15932_v1  ;;  %v3315_v1 = vrot.slane %v10352_v4, %v17234_v36  ;;  %v3531_v56 = vadd.f32 %v15122_v62, %v3323_v18  ;;  %v13336_v62 = vld [vmem:[%s17208_s2 + $0xc8] ss:$12 sps:$4 sm:$0xff]   ;;  %v13364_v4 = vld [vmem:[%s17208_s2 + $0x170] ss:$12 sps:$4 sm:$0xff]  }
 0xed2   :  { %7650 = vmatprep.subr.bf16.mxu0 %v15942_v63  ;;  %v16490_v18 = vld [vmem:[%s17206_s1 + $0x1fc] ss:$12 sps:$4 sm:$0xff]  }
 0xed3   :  { %12459 = vmatpush3.bf16.msra.mxu1 %v13327_v44  ;;  %v13352_v44 = vld [vmem:[%s17208_s2 + $0x128] ss:$12 sps:$4 sm:$0xff]  }
 0xed4   :  { %12460 = vmatprep.subr.bf16.mxu1 %v17231_v52 }
 0xed5   :  { %7651 = vmatpush1.bf16.msra.mxu0 %v15948_v51 }
 0xed6   :  { %7652 = vmatprep.subr.bf16.mxu0 %v15958_v32 }
 0xed7   :  { %12461 = vmatpush3.bf16.msra.mxu1 %v13328_v19  ;;  %v16358_v19 = vld [vmem:[%s17208_s2 + $0x13c] ss:$12 sps:$4 sm:$0xff]  }
 0xed8   :  { %12462 = vmatprep.subr.bf16.mxu1 %v17231_v52 }
 0xed9   :  { %7653 = vmatpush1.bf16.msra.mxu0 %v15964_v41 }
 0xeda   :  { %7654 = vmatprep.subr.bf16.mxu0 %v15974_v61 }
 0xedb   :  { %12463 = vmatpush3.bf16.msra.mxu1 %v13329_v20  ;;  %v16364_v20 = vld [vmem:[%s17208_s2 + $0x138] ss:$12 sps:$4 sm:$0xff]  }
 0xedc   :  { %12464 = vmatprep.subr.bf16.mxu1 %v17231_v52 }
 0xedd   :  { %7655 = vmatpush1.bf16.msra.mxu0 %v15980_v45 }
 0xede   :  { %7656 = vmatprep.subr.bf16.mxu0 %v15990_v3 }
 0xedf   :  { %12465 = vmatpush3.bf16.msra.mxu1 %v13330_v33  ;;  %v13356_v33 = vld [vmem:[%s17208_s2 + $0x140] ss:$12 sps:$4 sm:$0xff]  }
 0xee0   :  { %12466 = vmatprep.subr.bf16.mxu1 %v17231_v52 }
 0xee1   :  { %7657 = vmatpush1.bf16.msra.mxu0 %v15996_v15 }
 0xee2   :  { %7658 = vmatprep.subr.bf16.mxu0 %v16006_v0 }
 0xee3   :  { %12467 = vmatpush3.bf16.msra.mxu1 %v13331_v9  ;;  %v16374_v9 = vld [vmem:[%s17208_s2 + $0x154] ss:$12 sps:$4 sm:$0xff]  }
 0xee4   :  { %12468 = vmatprep.subr.bf16.mxu1 %v17231_v52 }
 0xee5   :  { %7659 = vmatpush1.bf16.msra.mxu0 %v16012_v57 }
 0xee6   :  { %7891 = vmatprep.subr.bf16.mxu0 %v16261_v58 }
 0xee7   :  { %12469 = vmatpush3.bf16.msra.mxu1 %v13332_v24  ;;  %v16380_v24 = vld [vmem:[%s17208_s2 + $0x150] ss:$12 sps:$4 sm:$0xff]  }
 0xee8   :  { %12474 = vmatprep.subr.bf16.mxu1 %v17231_v52 }
 0xf7b   :  { %v16265_v53 = vpop.f32.mrb[108].mxu1 }
 0xf7c   :  { %v12432_v23 = vpop.f32.mrb[109].mxu1 }
 0xf7d   :  { %v7199_v60 = vpop.f32.mrb[110].mxu1  ;;  %v13360_v23 = vld [vmem:[%s17208_s2 + $0x158] ss:$12 sps:$4 sm:$0xff]  }
 0xf7e   :  { %v12433_v47 = vpop.f32.mrb[111].mxu1  ;;  %v16390_v60 = vld [vmem:[%s17208_s2 + $0x16c] ss:$12 sps:$4 sm:$0xff]  }
 0xf7f   :  { %v16396_v47 = vld [vmem:[%s17208_s2 + $0x168] ss:$12 sps:$4 sm:$0xff]  }
 0xf9b   :  { %v7402_v63 = vpop.f32.mrb[60].mxu0  ;;  %v7443_v51 = vpop.f32.mrb[112].mxu1 }
 0xf9c   :  { %v12744_v32 = vadd.f32 %v7402_v63, %v3315_v1  ;;  %v7404_v41 = vpop.f32.mrb[61].mxu0  ;;  %v12452_v61 = vpop.f32.mrb[113].mxu1  ;;  %v7459_v42 = vadd.f32 %v16149_v28, %v7443_v51  ;;  %v16411_v1 = vld [vmem:[%s17206_s1 + $0x184] ss:$12 sps:$4 sm:$0xff]   ;;  %v16416_v63 = vld [vmem:[%s17206_s1 + $0x180] ss:$12 sps:$4 sm:$0xff]  }
 0xf9d   :  { %v7406_v45 = vpop.f32.mrb[62].mxu0  ;;  %v7446_v3 = vpop.f32.mrb[114].mxu1  ;;  %v12745_v38 = vadd.f32 %v7404_v41, %v3319_v16  ;;  %v13368_v51 = vld [vmem:[%s17206_s1 + $0x188] ss:$12 sps:$4 sm:$0xff]   ;;  %v16432_v41 = vld [vmem:[%s17206_s1 + $0x198] ss:$12 sps:$4 sm:$0xff]  }
 0xf9e   :  { %v7450_v15 = vmul.f32 0.5, %v12744_v32  ;;  %v7407_v0 = vpop.f32.mrb[63].mxu0  ;;  %v12453_v57 = vpop.f32.mrb[115].mxu1  ;;  %v16426_v32 = vld [vmem:[%s17206_s1 + $0x19c] ss:$12 sps:$4 sm:$0xff]  }
 0xf9f   :  { %v7455_v25 = vmul.f32 0.5, %v12745_v38  ;;  %v13372_v61 = vld [vmem:[%s17206_s1 + $0x1a0] ss:$12 sps:$4 sm:$0xff]   ;;  %v16448_v3 = vld [vmem:[%s17206_s1 + $0x1b0] ss:$12 sps:$4 sm:$0xff]  }
 0xfa0   :  { %13531 = vtanh.f32 %v7450_v15  ;;  %v16442_v45 = vld [vmem:[%s17206_s1 + $0x1b4] ss:$12 sps:$4 sm:$0xff]   ;;  %v13376_v15 = vld [vmem:[%s17206_s1 + $0x1b8] ss:$12 sps:$4 sm:$0xff]   ;;  %v13380_v16 = vld [vmem:[%s17206_s1 + $0x1d0] ss:$12 sps:$4 sm:$0xff]  }
 0xfa1   :  { %13533 = vtanh.f32 %v7455_v25  ;;  %v16458_v0 = vld [vmem:[%s17206_s1 + $0x1cc] ss:$12 sps:$4 sm:$0xff]   ;;  %v16464_v57 = vld [vmem:[%s17206_s1 + $0x1c8] ss:$12 sps:$4 sm:$0xff]   ;;  %v16474_v38 = vld [vmem:[%s17206_s1 + $0x1e4] ss:$12 sps:$4 sm:$0xff]  }
 0xfa2   :  { %v16480_v25 = vld [vmem:[%s17206_s1 + $0x1e0] ss:$12 sps:$4 sm:$0xff]  }
 0xfaa   :  { %v13532_v5 = vpop.eup %13531 }
 0xfab   :  { %v7452_v11 = vmul.f32 0.5, %v13532_v5  ;;  %v13534_v22 = vpop.eup %13533  ;;  %v13384_v5 = vld [vmem:[%s17206_s1 + $0x1e8] ss:$12 sps:$4 sm:$0xff]  }
 0xfac   :  { %v7457_v17 = vmul.f32 0.5, %v13534_v22  ;;  %v16528_v22 = vld [vmem:[%s17206_s1 + $0x228] ss:$12 sps:$4 sm:$0xff]  }
 0xfad   :  { %v7453_v27 = vadd.f32 0.5, %v7452_v11  ;;  %v16496_v11 = vld [vmem:[%s17206_s1 + $0x1f8] ss:$12 sps:$4 sm:$0xff]  }
 0xfae   :  { %v7458_v43 = vadd.f32 0.5, %v7457_v17  ;;  %v13396_v17 = vld [vmem:[%s17206_s1 + $0x230] ss:$12 sps:$4 sm:$0xff]  }
 0xfaf   :  { %v7460_v50 = vmul.f32 %v7459_v42, %v7453_v27  ;;  %v13388_v27 = vld [vmem:[%s17206_s1 + $0x200] ss:$12 sps:$4 sm:$0xff]  }
 0xfb0   :  { %v16506_v42 = vld [vmem:[%s17206_s1 + $0x214] ss:$12 sps:$4 sm:$0xff]  }
 0xfb1   :  { %v7461_v35 = vadd.f32 %v7460_v50, %v3531_v56  ;;  %v16512_v56 = vld [vmem:[%s17206_s1 + $0x210] ss:$12 sps:$4 sm:$0xff]   ;;  %v13392_v50 = vld [vmem:[%s17206_s1 + $0x218] ss:$12 sps:$4 sm:$0xff]  }
 0xfb3   :  { %13535 = vtanh.f32 %v7461_v35  ;;  %v16522_v35 = vld [vmem:[%s17206_s1 + $0x22c] ss:$12 sps:$4 sm:$0xff]  }
 0xfbd   :  { %v13536_v21 = vpop.eup %13535 }
 0xfbe   :  { %v7463_v39 = vsub.f32 %v16154_v14, %v13536_v21  ;;  %v16297_v14 = vld [vmem:[%s17208_s2 + $0xd8] ss:$12 sps:$4 sm:$0xff]  }
 0xfc0   :  { %v7464_v7 = vmul.f32 %v7463_v39, %v7458_v43 }
 0xfc2   :  { %v16276_v49 = vadd.f32 %v13536_v21, %v7464_v7 }
 0xfc4   :  { %v7466_v30 = vpack.c.bf16 %v16276_v49, %v16276_v49 }
 0xfc6   :  { %7677 = vmatmul.mubr.bf16.vlgmr.msra.gmra.mrb[100].mxu0 %v7466_v30  ;;  %12471 = vmatmul.mubr.bf16.vlgmr.msra.gmra.mrb[116].mxu1 %v7466_v30 }
 0xfc7   :  { %7892 = vmatpush1.bf16.msra.mxu0 %v16281_v59  ;;  %12475 = vmatpush3.bf16.msra.mxu1 %v13336_v62  ;;  %v10433_v62 = vld [vmem:[%s17209_s3 + $0x3] sm:$0x7] }
 0xfc8   :  { %7893 = vmatprep.subr.bf16.mxu0 %v16291_v54  ;;  %12476 = vmatprep.subr.bf16.mxu1 %v17231_v52 }
 0xfc9   :  { %7923 = vmatprep.mubr.bf16.mxu0 %v17232_v13  ;;  %12490 = vmatprep.mubr.msk.bf16.mxu1 %vm13633_vm0, %v17231_v52 }
 0xfcb   :  { %7894 = vmatpush1.bf16.msra.mxu0 %v16297_v14  ;;  %12477 = vmatpush3.bf16.msra.mxu1 %v13340_v6 }
 0xfcc   :  { %7895 = vmatprep.subr.bf16.mxu0 %v16307_v2  ;;  %12478 = vmatprep.subr.bf16.mxu1 %v17231_v52 }
 0xfcf   :  { %7896 = vmatpush1.bf16.msra.mxu0 %v16316_v12  ;;  %12479 = vmatpush3.bf16.msra.mxu1 %v13344_v26 }
 0xfd0   :  { %7897 = vmatprep.subr.bf16.mxu0 %v16326_v37  ;;  %12480 = vmatprep.subr.bf16.mxu1 %v17231_v52 }
 0xfd3   :  { %7898 = vmatpush1.bf16.msra.mxu0 %v16332_v55  ;;  %12481 = vmatpush3.bf16.msra.mxu1 %v13348_v40 }
 0xfd4   :  { %7899 = vmatprep.subr.bf16.mxu0 %v16342_v48  ;;  %12482 = vmatprep.subr.bf16.mxu1 %v17231_v52 }
 0xfd7   :  { %7900 = vmatpush1.bf16.msra.mxu0 %v16348_v46  ;;  %12483 = vmatpush3.bf16.msra.mxu1 %v13352_v44 }
 0xfd8   :  { %7901 = vmatprep.subr.bf16.mxu0 %v16358_v19  ;;  %12484 = vmatprep.subr.bf16.mxu1 %v17231_v52 }
 0xfdb   :  { %7902 = vmatpush1.bf16.msra.mxu0 %v16364_v20  ;;  %12485 = vmatpush3.bf16.msra.mxu1 %v13356_v33 }
 0xfdc   :  { %7903 = vmatprep.subr.bf16.mxu0 %v16374_v9  ;;  %12486 = vmatprep.subr.bf16.mxu1 %v17231_v52 }
 0xfdf   :  { %7904 = vmatpush1.bf16.msra.mxu0 %v16380_v24  ;;  %12487 = vmatpush3.bf16.msra.mxu1 %v13360_v23 }
 0xfe0   :  { %7905 = vmatprep.subr.bf16.mxu0 %v16390_v60  ;;  %12488 = vmatprep.subr.bf16.mxu1 %v17231_v52 }
 0xfe3   :  { %7906 = vmatpush1.bf16.msra.mxu0 %v16396_v47  ;;  %12489 = vmatpush3.bf16.msra.mxu1 %v13364_v4 }
 0xfe4   :  { %12494 = vmatprep.subr.bf16.mxu1 %v17231_v52  ;;  %8167 = vmatprep.subr.bf16.mxu0 %v16411_v1 }
 0xfe6   :  { %7924 = vmatmul.mubr.bf16.vlgmr.msra.gmra.mrb[68].mxu0 %v7466_v30  ;;  %12491 = vmatmul.mubr.bf16.vlgmr.msra.gmra.mrb[120].mxu1 %v7466_v30  ;;  %v3838_v30 = vrot.slane %v10433_v62, %v17234_v36 }
 0xfe7   :  { %8199 = vmatprep.mubr.bf16.mxu0 %v17232_v13  ;;  %12510 = vmatprep.mubr.msk.bf16.mxu1 %vm13633_vm0, %v17231_v52 }
 0xfe8   :  { %8168 = vmatpush1.bf16.msra.mxu0 %v16416_v63  ;;  %12495 = vmatpush3.bf16.msra.mxu1 %v13368_v51 }
 0xfe9   :  { %12496 = vmatprep.subr.bf16.mxu1 %v17231_v52  ;;  %8169 = vmatprep.subr.bf16.mxu0 %v16426_v32 }
 0xfec   :  { %8170 = vmatpush1.bf16.msra.mxu0 %v16432_v41  ;;  %12497 = vmatpush3.bf16.msra.mxu1 %v13372_v61 }
 0xfed   :  { %12498 = vmatprep.subr.bf16.mxu1 %v17231_v52  ;;  %8171 = vmatprep.subr.bf16.mxu0 %v16442_v45 }
 0xff0   :  { %8172 = vmatpush1.bf16.msra.mxu0 %v16448_v3  ;;  %12499 = vmatpush3.bf16.msra.mxu1 %v13376_v15  ;;  %v3842_v15 = vrot.slane %v10433_v62, %v17235_v34 }
 0xff1   :  { %12500 = vmatprep.subr.bf16.mxu1 %v17231_v52  ;;  %8173 = vmatprep.subr.bf16.mxu0 %v16458_v0 }
 0xff4   :  { %8174 = vmatpush1.bf16.msra.mxu0 %v16464_v57  ;;  %12501 = vmatpush3.bf16.msra.mxu1 %v13380_v16 }
 0xff5   :  { %12502 = vmatprep.subr.bf16.mxu1 %v17231_v52  ;;  %8175 = vmatprep.subr.bf16.mxu0 %v16474_v38 }
 0xff8   :  { %8176 = vmatpush1.bf16.msra.mxu0 %v16480_v25  ;;  %12503 = vmatpush3.bf16.msra.mxu1 %v13384_v5 }
 0xff9   :  { %12504 = vmatprep.subr.bf16.mxu1 %v17231_v52  ;;  %8177 = vmatprep.subr.bf16.mxu0 %v16490_v18 }
 0xffc   :  { %8178 = vmatpush1.bf16.msra.mxu0 %v16496_v11  ;;  %12505 = vmatpush3.bf16.msra.mxu1 %v13388_v27 }
 0xffd   :  { %12506 = vmatprep.subr.bf16.mxu1 %v17231_v52  ;;  %8179 = vmatprep.subr.bf16.mxu0 %v16506_v42 }
0x1000   :  { %8180 = vmatpush1.bf16.msra.mxu0 %v16512_v56  ;;  %12507 = vmatpush3.bf16.msra.mxu1 %v13392_v50  ;;  %v3846_v50 = vrot.slane %v10433_v62, %v17236_v8  ;;  %v13397_v62 = vld [vmem:[%s17208_s2 + $0xc8] ss:$12 sps:$4 sm:$0xff]  }
0x1001   :  { %12508 = vmatprep.subr.bf16.mxu1 %v17231_v52  ;;  %8181 = vmatprep.subr.bf16.mxu0 %v16522_v35 }
0x1004   :  { %8182 = vmatpush1.bf16.msra.mxu0 %v16528_v22  ;;  %12509 = vmatpush3.bf16.msra.mxu1 %v13396_v17 }
0x1005   :  { %8414 = vmatprep.subr.bf16.mxu0 %v16261_v58  ;;  %12514 = vmatprep.subr.bf16.mxu1 %v17231_v52 }
0x1099   :  { %v16537_v21 = vpop.f32.mrb[116].mxu1 }
0x109a   :  { %v12472_v43 = vpop.f32.mrb[117].mxu1 }
0x109b   :  { %v7722_v39 = vpop.f32.mrb[118].mxu1 }
0x109c   :  { %v12473_v7 = vpop.f32.mrb[119].mxu1 }
0x109d   :  { %v4054_v7 = vadd.f32 %v15240_v31, %v3846_v50  ;;  %v13398_v31 = vld [vmem:[%s17208_s2 + $0xe0] ss:$12 sps:$4 sm:$0xff]  }
0x10b9   :  { %v7925_v6 = vpop.f32.mrb[68].mxu0  ;;  %v7966_v26 = vpop.f32.mrb[120].mxu1 }
0x10ba   :  { %v12746_v40 = vadd.f32 %v7925_v6, %v3838_v30  ;;  %v7927_v44 = vpop.f32.mrb[69].mxu0  ;;  %v12492_v33 = vpop.f32.mrb[121].mxu1  ;;  %v7982_v39 = vadd.f32 %v16149_v28, %v7966_v26 }
0x10bb   :  { %v7929_v23 = vpop.f32.mrb[70].mxu0  ;;  %v7969_v58 = vpop.f32.mrb[122].mxu1  ;;  %v12747_v16 = vadd.f32 %v7927_v44, %v3842_v15 }
0x10bc   :  { %v7973_v4 = vmul.f32 0.5, %v12746_v40  ;;  %v7930_v51 = vpop.f32.mrb[71].mxu0  ;;  %v12493_v61 = vpop.f32.mrb[123].mxu1 }
0x10bd   :  { %v7978_v5 = vmul.f32 0.5, %v12747_v16 }
0x10be   :  { %13537 = vtanh.f32 %v7973_v4 }
0x10bf   :  { %13539 = vtanh.f32 %v7978_v5 }
0x10c8   :  { %v13538_v27 = vpop.eup %13537 }
0x10c9   :  { %v7975_v17 = vmul.f32 0.5, %v13538_v27  ;;  %v13540_v40 = vpop.eup %13539 }
0x10ca   :  { %v7980_v33 = vmul.f32 0.5, %v13540_v40 }
0x10cb   :  { %v7976_v43 = vadd.f32 0.5, %v7975_v17 }
0x10cc   :  { %v7981_v58 = vadd.f32 0.5, %v7980_v33 }
0x10cd   :  { %v7983_v30 = vmul.f32 %v7982_v39, %v7976_v43 }
0x10cf   :  { %v7984_v6 = vadd.f32 %v7983_v30, %v4054_v7 }
0x10d1   :  { %13541 = vtanh.f32 %v7984_v6 }
0x10db   :  { %v13542_v23 = vpop.eup %13541 }
0x10dc   :  { %v7986_v44 = vsub.f32 %v16276_v49, %v13542_v23  ;;  %v13399_v49 = vld [vmem:[%s17208_s2 + $0xf8] ss:$12 sps:$4 sm:$0xff]  }
0x10de   :  { %v7987_v4 = vmul.f32 %v7986_v44, %v7981_v58 }
0x10e0   :  { %v16548_v51 = vadd.f32 %v13542_v23, %v7987_v4  ;;  %v16673_v4 = vld [vmem:[%s17208_s2 + $0x180] ss:$12 sps:$4 sm:$0xff]  }
0x10e2   :  { %v7989_v26 = vpack.c.bf16 %v16548_v51, %v16548_v51 }
0x10e4   :  { %8200 = vmatmul.mubr.bf16.vlgmr.msra.gmra.mrb[104].mxu0 %v7989_v26  ;;  %12511 = vmatmul.mubr.bf16.vlgmr.msra.gmra.mrb[124].mxu1 %v7989_v26 }
0x10e5   :  { %8415 = vmatpush1.bf16.msra.mxu0 %v16281_v59  ;;  %12515 = vmatpush3.bf16.msra.mxu1 %v13397_v62  ;;  %v13400_v59 = vld [vmem:[%s17208_s2 + $0x110] ss:$12 sps:$4 sm:$0xff]  }
0x10e6   :  { %8416 = vmatprep.subr.bf16.mxu0 %v16291_v54  ;;  %12516 = vmatprep.subr.bf16.mxu1 %v17231_v52  ;;  %v13401_v54 = vld [vmem:[%s17208_s2 + $0x128] ss:$12 sps:$4 sm:$0xff]  }
0x10e7   :  { %8446 = vmatprep.mubr.bf16.mxu0 %v17232_v13  ;;  %12530 = vmatprep.mubr.msk.bf16.mxu1 %vm13633_vm0, %v17231_v52  ;;  %v16683_v62 = vld [vmem:[%s17208_s2 + $0x19c] ss:$12 sps:$4 sm:$0xff]  }
0x10e9   :  { %8417 = vmatpush1.bf16.msra.mxu0 %v16297_v14  ;;  %12517 = vmatpush3.bf16.msra.mxu1 %v13398_v31  ;;  %v13402_v14 = vld [vmem:[%s17208_s2 + $0x140] ss:$12 sps:$4 sm:$0xff]  }
0x10ea   :  { %8418 = vmatprep.subr.bf16.mxu0 %v16307_v2  ;;  %12518 = vmatprep.subr.bf16.mxu1 %v17231_v52  ;;  %v13403_v2 = vld [vmem:[%s17208_s2 + $0x158] ss:$12 sps:$4 sm:$0xff]   ;;  %v16701_v31 = vld [vmem:[%s17208_s2 + $0x1b4] ss:$12 sps:$4 sm:$0xff]  }
0x10ed   :  { %8419 = vmatpush1.bf16.msra.mxu0 %v16316_v12  ;;  %12519 = vmatpush3.bf16.msra.mxu1 %v13399_v49  ;;  %v13404_v12 = vld [vmem:[%s17208_s2 + $0x170] ss:$12 sps:$4 sm:$0xff]  }
0x10ee   :  { %8420 = vmatprep.subr.bf16.mxu0 %v16326_v37  ;;  %12520 = vmatprep.subr.bf16.mxu1 %v17231_v52  ;;  %v13405_v37 = vld [vmem:[%s17206_s1 + $0x188] ss:$12 sps:$4 sm:$0xff]   ;;  %v16711_v49 = vld [vmem:[%s17208_s2 + $0x1b0] ss:$12 sps:$4 sm:$0xff]  }
0x10f1   :  { %8421 = vmatpush1.bf16.msra.mxu0 %v16332_v55  ;;  %12521 = vmatpush3.bf16.msra.mxu1 %v13400_v59  ;;  %v13406_v55 = vld [vmem:[%s17206_s1 + $0x1a0] ss:$12 sps:$4 sm:$0xff]   ;;  %v16717_v59 = vld [vmem:[%s17208_s2 + $0x1b8] ss:$12 sps:$4 sm:$0xff]  }
0x10f2   :  { %8422 = vmatprep.subr.bf16.mxu0 %v16342_v48  ;;  %12522 = vmatprep.subr.bf16.mxu1 %v17231_v52  ;;  %v13407_v48 = vld [vmem:[%s17206_s1 + $0x1b8] ss:$12 sps:$4 sm:$0xff]  }
0x10f5   :  { %8423 = vmatpush1.bf16.msra.mxu0 %v16348_v46  ;;  %12523 = vmatpush3.bf16.msra.mxu1 %v13401_v54  ;;  %v13408_v46 = vld [vmem:[%s17206_s1 + $0x1d0] ss:$12 sps:$4 sm:$0xff]   ;;  %v16723_v54 = vld [vmem:[%s17208_s2 + $0x1cc] ss:$12 sps:$4 sm:$0xff]  }
0x10f6   :  { %8424 = vmatprep.subr.bf16.mxu0 %v16358_v19  ;;  %12524 = vmatprep.subr.bf16.mxu1 %v17231_v52  ;;  %v13409_v19 = vld [vmem:[%s17206_s1 + $0x1e8] ss:$12 sps:$4 sm:$0xff]  }
0x10f9   :  { %8425 = vmatpush1.bf16.msra.mxu0 %v16364_v20  ;;  %12525 = vmatpush3.bf16.msra.mxu1 %v13402_v14  ;;  %v13410_v20 = vld [vmem:[%s17206_s1 + $0x200] ss:$12 sps:$4 sm:$0xff]   ;;  %v16730_v14 = vld [vmem:[%s17208_s2 + $0x1c8] ss:$12 sps:$4 sm:$0xff]  }
0x10fa   :  { %8426 = vmatprep.subr.bf16.mxu0 %v16374_v9  ;;  %12526 = vmatprep.subr.bf16.mxu1 %v17231_v52  ;;  %v13411_v9 = vld [vmem:[%s17206_s1 + $0x218] ss:$12 sps:$4 sm:$0xff]  }
0x10fd   :  { %8427 = vmatpush1.bf16.msra.mxu0 %v16380_v24  ;;  %12527 = vmatpush3.bf16.msra.mxu1 %v13403_v2  ;;  %v13412_v24 = vld [vmem:[%s17206_s1 + $0x230] ss:$12 sps:$4 sm:$0xff]  }
0x10fe   :  { %8428 = vmatprep.subr.bf16.mxu0 %v16390_v60  ;;  %12528 = vmatprep.subr.bf16.mxu1 %v17231_v52  ;;  %v16655_v60 = vld [vmem:[%s17208_s2 + $0x184] ss:$12 sps:$4 sm:$0xff]  }
0x10ff   :  { %v16736_v2 = vld [vmem:[%s17208_s2 + $0x1d0] ss:$12 sps:$4 sm:$0xff]  }
0x1101   :  { %8429 = vmatpush1.bf16.msra.mxu0 %v16396_v47  ;;  %12529 = vmatpush3.bf16.msra.mxu1 %v13404_v12  ;;  %v16742_v12 = vld [vmem:[%s17208_s2 + $0x1e4] ss:$12 sps:$4 sm:$0xff]  }
0x1102   :  { %8690 = vmatprep.subr.bf16.mxu0 %v16411_v1  ;;  %12534 = vmatprep.subr.bf16.mxu1 %v17231_v52 }
0x1104   :  { %8447 = vmatmul.mubr.bf16.vlgmr.msra.gmra.mrb[76].mxu0 %v7989_v26  ;;  %12531 = vmatmul.mubr.bf16.vlgmr.msra.gmra.mrb[128].mxu1 %v7989_v26  ;;  %v16695_v26 = vld [vmem:[%s17208_s2 + $0x1a0] ss:$12 sps:$4 sm:$0xff]  }
0x1105   :  { %8691 = vmatpush1.bf16.msra.mxu0 %v16416_v63  ;;  %8722 = vmatprep.mubr.bf16.mxu0 %v17232_v13 }
0x1106   :  { %8692 = vmatprep.subr.bf16.mxu0 %v16426_v32  ;;  %12550 = vmatprep.mubr.msk.bf16.mxu1 %vm13633_vm0, %v17231_v52 }
0x1107   :  { %12535 = vmatpush3.bf16.msra.mxu1 %v13405_v37  ;;  %v16749_v37 = vld [vmem:[%s17208_s2 + $0x1e0] ss:$12 sps:$4 sm:$0xff]  }
0x1108   :  { %12536 = vmatprep.subr.bf16.mxu1 %v17231_v52 }
0x1109   :  { %8693 = vmatpush1.bf16.msra.mxu0 %v16432_v41  ;;  %v10514_v41 = vld [vmem:[%s17209_s3 + $0x3] sm:$0x7] }
0x110a   :  { %8694 = vmatprep.subr.bf16.mxu0 %v16442_v45  ;;  %v4361_v45 = vrot.slane %v10514_v41, %v17234_v36  ;;  %v4369_v5 = vrot.slane %v10514_v41, %v17236_v8 }
0x110b   :  { %12537 = vmatpush3.bf16.msra.mxu1 %v13406_v55  ;;  %v16755_v55 = vld [vmem:[%s17208_s2 + $0x1e8] ss:$12 sps:$4 sm:$0xff]  }
0x110c   :  { %12538 = vmatprep.subr.bf16.mxu1 %v17231_v52  ;;  %v4577_v43 = vadd.f32 %v15506_v29, %v4369_v5  ;;  %v16678_v29 = vld [vmem:[%s17208_s2 + $0x188] ss:$12 sps:$4 sm:$0xff]  }
0x110d   :  { %8695 = vmatpush1.bf16.msra.mxu0 %v16448_v3 }
0x110e   :  { %8696 = vmatprep.subr.bf16.mxu0 %v16458_v0 }
0x110f   :  { %12539 = vmatpush3.bf16.msra.mxu1 %v13407_v48  ;;  %v16761_v48 = vld [vmem:[%s17208_s2 + $0x1fc] ss:$12 sps:$4 sm:$0xff]  }
0x1110   :  { %12540 = vmatprep.subr.bf16.mxu1 %v17231_v52 }
0x1111   :  { %8697 = vmatpush1.bf16.msra.mxu0 %v16464_v57 }
0x1112   :  { %8698 = vmatprep.subr.bf16.mxu0 %v16474_v38 }
0x1113   :  { %12541 = vmatpush3.bf16.msra.mxu1 %v13408_v46  ;;  %v16768_v46 = vld [vmem:[%s17208_s2 + $0x1f8] ss:$12 sps:$4 sm:$0xff]  }
0x1114   :  { %12542 = vmatprep.subr.bf16.mxu1 %v17231_v52 }
0x1115   :  { %8699 = vmatpush1.bf16.msra.mxu0 %v16480_v25 }
0x1116   :  { %8700 = vmatprep.subr.bf16.mxu0 %v16490_v18 }
0x1117   :  { %12543 = vmatpush3.bf16.msra.mxu1 %v13409_v19  ;;  %v16774_v19 = vld [vmem:[%s17208_s2 + $0x200] ss:$12 sps:$4 sm:$0xff]  }
0x1118   :  { %12544 = vmatprep.subr.bf16.mxu1 %v17231_v52 }
0x1119   :  { %8701 = vmatpush1.bf16.msra.mxu0 %v16496_v11 }
0x111a   :  { %8702 = vmatprep.subr.bf16.mxu0 %v16506_v42 }
0x111b   :  { %12545 = vmatpush3.bf16.msra.mxu1 %v13410_v20  ;;  %v16780_v20 = vld [vmem:[%s17208_s2 + $0x214] ss:$12 sps:$4 sm:$0xff]  }
0x111c   :  { %12546 = vmatprep.subr.bf16.mxu1 %v17231_v52 }
0x111d   :  { %8703 = vmatpush1.bf16.msra.mxu0 %v16512_v56 }
0x111e   :  { %8704 = vmatprep.subr.bf16.mxu0 %v16522_v35 }
0x111f   :  { %12547 = vmatpush3.bf16.msra.mxu1 %v13411_v9  ;;  %v16787_v9 = vld [vmem:[%s17208_s2 + $0x210] ss:$12 sps:$4 sm:$0xff]  }
0x1120   :  { %12548 = vmatprep.subr.bf16.mxu1 %v17231_v52 }
0x1121   :  { %8705 = vmatpush1.bf16.msra.mxu0 %v16528_v22  ;;  %v4365_v22 = vrot.slane %v10514_v41, %v17235_v34 }
0x1122   :  { %8940 = vmatprep.subr.bf16.mxu0 %v16655_v60 }
0x1123   :  { %12549 = vmatpush3.bf16.msra.mxu1 %v13412_v24  ;;  %v16793_v24 = vld [vmem:[%s17208_s2 + $0x218] ss:$12 sps:$4 sm:$0xff]  }
0x1124   :  { %12554 = vmatprep.subr.bf16.mxu1 %v17231_v52 }
0x11b7   :  { %v16659_v47 = vpop.f32.mrb[124].mxu1 }
0x11b8   :  { %v12512_v1 = vpop.f32.mrb[125].mxu1 }
0x11b9   :  { %v8245_v63 = vpop.f32.mrb[126].mxu1  ;;  %v16799_v1 = vld [vmem:[%s17208_s2 + $0x22c] ss:$12 sps:$4 sm:$0xff]  }
0x11ba   :  { %v12513_v32 = vpop.f32.mrb[127].mxu1  ;;  %v16806_v63 = vld [vmem:[%s17208_s2 + $0x228] ss:$12 sps:$4 sm:$0xff]  }
0x11bb   :  { %v16812_v32 = vld [vmem:[%s17208_s2 + $0x230] ss:$12 sps:$4 sm:$0xff]  }
0x11d7   :  { %v8448_v3 = vpop.f32.mrb[76].mxu0  ;;  %v8489_v0 = vpop.f32.mrb[128].mxu1 }
0x11d8   :  { %v12748_v57 = vadd.f32 %v8448_v3, %v4361_v45  ;;  %v8450_v38 = vpop.f32.mrb[77].mxu0  ;;  %v12532_v25 = vpop.f32.mrb[129].mxu1  ;;  %v8505_v17 = vadd.f32 %v16149_v28, %v8489_v0 }
0x11d9   :  { %v8452_v18 = vpop.f32.mrb[78].mxu0  ;;  %v8492_v11 = vpop.f32.mrb[130].mxu1  ;;  %v12749_v61 = vadd.f32 %v8450_v38, %v4365_v22 }
0x11da   :  { %v8496_v42 = vmul.f32 0.5, %v12748_v57  ;;  %v8453_v56 = vpop.f32.mrb[79].mxu0  ;;  %v12533_v35 = vpop.f32.mrb[131].mxu1  ;;  %v10628_v57 = vld [vmem:[%s17209_s3 + $0x6] sm:$0x7] }
0x11db   :  { %v8501_v15 = vmul.f32 0.5, %v12749_v61  ;;  %v4889_v38 = vrot.slane %v10628_v57, %v17234_v36  ;;  %v4893_v5 = vrot.slane %v10628_v57, %v17235_v34 }
0x11dc   :  { %13543 = vtanh.f32 %v8496_v42 }
0x11dd   :  { %13545 = vtanh.f32 %v8501_v15 }
0x11e6   :  { %v13544_v16 = vpop.eup %13543 }
0x11e7   :  { %v8498_v27 = vmul.f32 0.5, %v13544_v16  ;;  %v13546_v30 = vpop.eup %13545 }
0x11e8   :  { %v8503_v6 = vmul.f32 0.5, %v13546_v30 }
0x11e9   :  { %v8499_v50 = vadd.f32 0.5, %v8498_v27 }
0x11ea   :  { %v8504_v33 = vadd.f32 0.5, %v8503_v6 }
0x11eb   :  { %v8506_v39 = vmul.f32 %v8505_v17, %v8499_v50  ;;  %v16867_v50 = vld [vmem:[%s17210_s4 + $0x10] sm:$0xff] }
0x11ed   :  { %v8507_v7 = vadd.f32 %v8506_v39, %v4577_v43  ;;  %v4897_v39 = vrot.slane %v10628_v57, %v17236_v8 }
0x11ef   :  { %13547 = vtanh.f32 %v8507_v7 }
0x11f9   :  { %v13548_v40 = vpop.eup %13547 }
0x11fa   :  { %v8509_v23 = vsub.f32 %v16548_v51, %v13548_v40  ;;  %v16689_v51 = vld [vmem:[%s17208_s2 + $0x198] ss:$12 sps:$4 sm:$0xff]  }
0x11fc   :  { %v8510_v58 = vmul.f32 %v8509_v23, %v8504_v33 }
0x11fe   :  { %v8511_v44 = vadd.f32 %v13548_v40, %v8510_v58  ;;  %v17243_v40 = vld [vmem:[#allocation7_spill] sm:$0xff] }
0x11ff   :  { %v5105_v33 = vadd.f32 %v17243_v40, %v4897_v39 }
0x1200   :  { %v8512_v28 = vpack.c.bf16 %v8511_v44, %v8511_v44 }
0x1202   :  { %8723 = vmatmul.mubr.bf16.vlgmr.msra.gmra.mrb[108].mxu0 %v8512_v28  ;;  %12551 = vmatmul.mubr.bf16.vlgmr.msra.gmra.mrb[132].mxu1 %v8512_v28 }
0x1203   :  { %8941 = vmatpush1.bf16.msra.mxu0 %v16673_v4  ;;  %12555 = vmatpush3.bf16.msra.mxu1 %v16678_v29 }
0x1204   :  { %8942 = vmatprep.subr.bf16.mxu0 %v16683_v62  ;;  %12556 = vmatprep.subr.bf16.mxu1 %v17231_v52 }
0x1205   :  { %8972 = vmatprep.mubr.bf16.mxu0 %v17232_v13  ;;  %12570 = vmatprep.mubr.msk.bf16.mxu1 %vm13633_vm0, %v17231_v52 }
0x1207   :  { %8943 = vmatpush1.bf16.msra.mxu0 %v16689_v51  ;;  %12557 = vmatpush3.bf16.msra.mxu1 %v16695_v26 }
0x1208   :  { %8944 = vmatprep.subr.bf16.mxu0 %v16701_v31  ;;  %12558 = vmatprep.subr.bf16.mxu1 %v17231_v52 }
0x120b   :  { %8945 = vmatpush1.bf16.msra.mxu0 %v16711_v49  ;;  %12559 = vmatpush3.bf16.msra.mxu1 %v16717_v59 }
0x120c   :  { %8946 = vmatprep.subr.bf16.mxu0 %v16723_v54  ;;  %12560 = vmatprep.subr.bf16.mxu1 %v17231_v52 }
0x120f   :  { %8947 = vmatpush1.bf16.msra.mxu0 %v16730_v14  ;;  %12561 = vmatpush3.bf16.msra.mxu1 %v16736_v2 }
0x1210   :  { %8948 = vmatprep.subr.bf16.mxu0 %v16742_v12  ;;  %12562 = vmatprep.subr.bf16.mxu1 %v17231_v52 }
0x1213   :  { %8949 = vmatpush1.bf16.msra.mxu0 %v16749_v37  ;;  %12563 = vmatpush3.bf16.msra.mxu1 %v16755_v55 }
0x1214   :  { %8950 = vmatprep.subr.bf16.mxu0 %v16761_v48  ;;  %12564 = vmatprep.subr.bf16.mxu1 %v17231_v52 }
0x1217   :  { %8951 = vmatpush1.bf16.msra.mxu0 %v16768_v46  ;;  %12565 = vmatpush3.bf16.msra.mxu1 %v16774_v19 }
0x1218   :  { %8952 = vmatprep.subr.bf16.mxu0 %v16780_v20  ;;  %12566 = vmatprep.subr.bf16.mxu1 %v17231_v52 }
0x121b   :  { %8953 = vmatpush1.bf16.msra.mxu0 %v16787_v9  ;;  %12567 = vmatpush3.bf16.msra.mxu1 %v16793_v24 }
0x121c   :  { %8954 = vmatprep.subr.bf16.mxu0 %v16799_v1  ;;  %12568 = vmatprep.subr.bf16.mxu1 %v17231_v52 }
0x121f   :  { %8955 = vmatpush1.bf16.msra.mxu0 %v16806_v63  ;;  %12569 = vmatpush3.bf16.msra.mxu1 %v16812_v32 }
0x1220   :  { %9042 = vmatprep.subr.bf16.mxu0 %v16655_v60  ;;  %12574 = vmatprep.subr.bf16.mxu1 %v17231_v52 }
0x1222   :  { %8973 = vmatmul.mubr.bf16.vlgmr.msra.gmra.mrb[80].mxu0 %v17232_v13  ;;  %12571 = vmatmul.mubr.bf16.vlgmr.msra.gmra.mrb[136].mxu1 %v17232_v13 }
0x1223   :  { %9043 = vmatpush1.bf16.msra.mxu0 %v16673_v4  ;;  %12575 = vmatpush3.bf16.msra.mxu1 %v16678_v29 }
0x1224   :  { %9044 = vmatprep.subr.bf16.mxu0 %v16683_v62  ;;  %12576 = vmatprep.subr.bf16.mxu1 %v17231_v52 }
0x1225   :  { %9074 = vmatprep.mubr.bf16.mxu0 %v17232_v13  ;;  %12590 = vmatprep.mubr.msk.bf16.mxu1 %vm13633_vm0, %v17231_v52 }
0x1227   :  { %9045 = vmatpush1.bf16.msra.mxu0 %v16689_v51  ;;  %12577 = vmatpush3.bf16.msra.mxu1 %v16695_v26 }
0x1228   :  { %9046 = vmatprep.subr.bf16.mxu0 %v16701_v31  ;;  %12578 = vmatprep.subr.bf16.mxu1 %v17231_v52 }
0x122b   :  { %9047 = vmatpush1.bf16.msra.mxu0 %v16711_v49  ;;  %12579 = vmatpush3.bf16.msra.mxu1 %v16717_v59 }
0x122c   :  { %9048 = vmatprep.subr.bf16.mxu0 %v16723_v54  ;;  %12580 = vmatprep.subr.bf16.mxu1 %v17231_v52 }
0x122f   :  { %9049 = vmatpush1.bf16.msra.mxu0 %v16730_v14  ;;  %12581 = vmatpush3.bf16.msra.mxu1 %v16736_v2 }
0x1230   :  { %9050 = vmatprep.subr.bf16.mxu0 %v16742_v12  ;;  %12582 = vmatprep.subr.bf16.mxu1 %v17231_v52 }
0x1233   :  { %9051 = vmatpush1.bf16.msra.mxu0 %v16749_v37  ;;  %12583 = vmatpush3.bf16.msra.mxu1 %v16755_v55 }
0x1234   :  { %9052 = vmatprep.subr.bf16.mxu0 %v16761_v48  ;;  %12584 = vmatprep.subr.bf16.mxu1 %v17231_v52 }
0x1237   :  { %9053 = vmatpush1.bf16.msra.mxu0 %v16768_v46  ;;  %12585 = vmatpush3.bf16.msra.mxu1 %v16774_v19 }
0x1238   :  { %9054 = vmatprep.subr.bf16.mxu0 %v16780_v20  ;;  %12586 = vmatprep.subr.bf16.mxu1 %v17231_v52 }
0x123b   :  { %9055 = vmatpush1.bf16.msra.mxu0 %v16787_v9  ;;  %12587 = vmatpush3.bf16.msra.mxu1 %v16793_v24 }
0x123c   :  { %9056 = vmatprep.subr.bf16.mxu0 %v16799_v1  ;;  %12588 = vmatprep.subr.bf16.mxu1 %v17231_v52 }
0x123f   :  { %9057 = vmatpush1.bf16.msra.mxu0 %v16806_v63  ;;  %12589 = vmatpush3.bf16.msra.mxu1 %v16812_v32 }
0x1240   :  { %9144 = vmatprep.subr.bf16.mxu0 %v16655_v60  ;;  %12594 = vmatprep.subr.bf16.mxu1 %v17231_v52 }
0x12d5   :  { %v16857_v41 = vpop.f32.mrb[132].mxu1 }
0x12d6   :  { %v12552_v45 = vpop.f32.mrb[133].mxu1 }
0x12d7   :  { %v8768_v3 = vpop.f32.mrb[134].mxu1 }
0x12d8   :  { %v12553_v0 = vpop.f32.mrb[135].mxu1 }
0x12f5   :  { %v8974_v25 = vpop.f32.mrb[80].mxu0  ;;  %v9015_v18 = vpop.f32.mrb[136].mxu1 }
0x12f6   :  { %v12750_v11 = vadd.f32 %v8974_v25, %v4889_v38  ;;  %v8976_v42 = vpop.f32.mrb[81].mxu0  ;;  %v12572_v56 = vpop.f32.mrb[137].mxu1  ;;  %v9031_v30 = vadd.f32 %v16867_v50, %v9015_v18  ;;  %v10741_v18 = vld [vmem:[%s17209_s3 + $0x6] sm:$0x7] }
0x12f7   :  { %v8978_v35 = vpop.f32.mrb[82].mxu0  ;;  %v9018_v22 = vpop.f32.mrb[138].mxu1  ;;  %v12751_v27 = vadd.f32 %v8976_v42, %v4893_v5 }
0x12f8   :  { %v9022_v61 = vmul.f32 0.5, %v12750_v11  ;;  %v8979_v15 = vpop.f32.mrb[83].mxu0  ;;  %v12573_v16 = vpop.f32.mrb[139].mxu1  ;;  %v5412_v11 = vrot.slane %v10741_v18, %v17234_v36 }
0x12f9   :  { %v9027_v17 = vmul.f32 0.5, %v12751_v27 }
0x12fa   :  { %13549 = vtanh.f32 %v9022_v61 }
0x12fb   :  { %13551 = vtanh.f32 %v9027_v17 }
0x1304   :  { %v13550_v43 = vpop.eup %13549 }
0x1305   :  { %v9024_v7 = vmul.f32 0.5, %v13550_v43  ;;  %v13552_v44 = vpop.eup %13551  ;;  %v5416_v43 = vrot.slane %v10741_v18, %v17235_v34 }
0x1306   :  { %v9029_v28 = vmul.f32 0.5, %v13552_v44 }
0x1307   :  { %v9025_v6 = vadd.f32 0.5, %v9024_v7 }
0x1308   :  { %v9030_v3 = vadd.f32 0.5, %v9029_v28 }
0x1309   :  { %v9032_v23 = vmul.f32 %v9031_v30, %v9025_v6  ;;  %v5420_v6 = vrot.slane %v10741_v18, %v17236_v8 }
0x130b   :  { %v9033_v58 = vadd.f32 %v9032_v23, %v5105_v33 }
0x130d   :  { %13553 = vtanh.f32 %v9033_v58  ;;  %v17244_v58 = vld [vmem:[#allocation4_spill] sm:$0xff] }
0x130e   :  { %v5628_v44 = vadd.f32 %v17244_v58, %v5420_v6 }
0x1317   :  { %v13554_v45 = vpop.eup %13553 }
0x1318   :  { %v9035_v0 = vsub.f32 0.0, %v13554_v45 }
0x131a   :  { %v9036_v38 = vmul.f32 %v9035_v0, %v9030_v3 }
0x131c   :  { %v16872_v25 = vadd.f32 %v13554_v45, %v9036_v38 }
0x131e   :  { %v9041_v57 = vpack.c.bf16 %v16872_v25, %v16872_v25 }
0x1320   :  { %9075 = vmatmul.mubr.bf16.vlgmr.msra.gmra.mrb[84].mxu0 %v9041_v57  ;;  %12591 = vmatmul.mubr.bf16.vlgmr.msra.gmra.mrb[140].mxu1 %v9041_v57 }
0x1321   :  { %9145 = vmatpush1.bf16.msra.mxu0 %v16673_v4  ;;  %12595 = vmatpush3.bf16.msra.mxu1 %v16678_v29 }
0x1322   :  { %9146 = vmatprep.subr.bf16.mxu0 %v16683_v62  ;;  %12596 = vmatprep.subr.bf16.mxu1 %v17231_v52 }
0x1323   :  { %9176 = vmatprep.mubr.bf16.mxu0 %v17232_v13  ;;  %12610 = vmatprep.mubr.msk.bf16.mxu1 %vm13633_vm0, %v17231_v52 }
0x1325   :  { %9147 = vmatpush1.bf16.msra.mxu0 %v16689_v51  ;;  %12597 = vmatpush3.bf16.msra.mxu1 %v16695_v26 }
0x1326   :  { %9148 = vmatprep.subr.bf16.mxu0 %v16701_v31  ;;  %12598 = vmatprep.subr.bf16.mxu1 %v17231_v52 }
0x1329   :  { %9149 = vmatpush1.bf16.msra.mxu0 %v16711_v49  ;;  %12599 = vmatpush3.bf16.msra.mxu1 %v16717_v59 }
0x132a   :  { %9150 = vmatprep.subr.bf16.mxu0 %v16723_v54  ;;  %12600 = vmatprep.subr.bf16.mxu1 %v17231_v52 }
0x132d   :  { %9151 = vmatpush1.bf16.msra.mxu0 %v16730_v14  ;;  %12601 = vmatpush3.bf16.msra.mxu1 %v16736_v2 }
0x132e   :  { %9152 = vmatprep.subr.bf16.mxu0 %v16742_v12  ;;  %12602 = vmatprep.subr.bf16.mxu1 %v17231_v52 }
0x1331   :  { %9153 = vmatpush1.bf16.msra.mxu0 %v16749_v37  ;;  %12603 = vmatpush3.bf16.msra.mxu1 %v16755_v55 }
0x1332   :  { %9154 = vmatprep.subr.bf16.mxu0 %v16761_v48  ;;  %12604 = vmatprep.subr.bf16.mxu1 %v17231_v52 }
0x1335   :  { %9155 = vmatpush1.bf16.msra.mxu0 %v16768_v46  ;;  %12605 = vmatpush3.bf16.msra.mxu1 %v16774_v19 }
0x1336   :  { %9156 = vmatprep.subr.bf16.mxu0 %v16780_v20  ;;  %12606 = vmatprep.subr.bf16.mxu1 %v17231_v52 }
0x1339   :  { %9157 = vmatpush1.bf16.msra.mxu0 %v16787_v9  ;;  %12607 = vmatpush3.bf16.msra.mxu1 %v16793_v24 }
0x133a   :  { %9158 = vmatprep.subr.bf16.mxu0 %v16799_v1  ;;  %12608 = vmatprep.subr.bf16.mxu1 %v17231_v52 }
0x133d   :  { %9159 = vmatpush1.bf16.msra.mxu0 %v16806_v63  ;;  %12609 = vmatpush3.bf16.msra.mxu1 %v16812_v32 }
0x133e   :  { %9246 = vmatprep.subr.bf16.mxu0 %v16655_v60  ;;  %12614 = vmatprep.subr.bf16.mxu1 %v17231_v52 }
0x13f3   :  { %v9076_v42 = vpop.f32.mrb[84].mxu0  ;;  %v9117_v56 = vpop.f32.mrb[140].mxu1 }
0x13f4   :  { %v12752_v35 = vadd.f32 %v9076_v42, %v5412_v11  ;;  %v9078_v22 = vpop.f32.mrb[85].mxu0  ;;  %v12592_v61 = vpop.f32.mrb[141].mxu1  ;;  %v9133_v23 = vadd.f32 %v16867_v50, %v9117_v56 }
0x13f5   :  { %v9080_v15 = vpop.f32.mrb[86].mxu0  ;;  %v9120_v16 = vpop.f32.mrb[142].mxu1  ;;  %v12753_v39 = vadd.f32 %v9078_v22, %v5416_v43 }
0x13f6   :  { %v9124_v5 = vmul.f32 0.5, %v12752_v35  ;;  %v9081_v27 = vpop.f32.mrb[87].mxu0  ;;  %v12593_v17 = vpop.f32.mrb[143].mxu1 }
0x13f7   :  { %v9129_v7 = vmul.f32 0.5, %v12753_v39 }
0x13f8   :  { %13555 = vtanh.f32 %v9124_v5 }
0x13f9   :  { %13557 = vtanh.f32 %v9129_v7 }
0x1402   :  { %v13556_v30 = vpop.eup %13555 }
0x1403   :  { %v9126_v40 = vmul.f32 0.5, %v13556_v30  ;;  %v13558_v3 = vpop.eup %13557 }
0x1404   :  { %v9131_v0 = vmul.f32 0.5, %v13558_v3 }
0x1405   :  { %v9127_v33 = vadd.f32 0.5, %v9126_v40 }
0x1406   :  { %v9132_v57 = vadd.f32 0.5, %v9131_v0 }
0x1407   :  { %v9134_v28 = vmul.f32 %v9133_v23, %v9127_v33 }
0x1409   :  { %v9135_v45 = vadd.f32 %v9134_v28, %v5628_v44 }
0x140b   :  { %13559 = vtanh.f32 %v9135_v45  ;;  %v17245_v45 = vld [vmem:[#allocation5_spill] sm:$0xff] }
0x1415   :  { %v13560_v38 = vpop.eup %13559 }
0x1416   :  { %v9137_v11 = vsub.f32 %v16872_v25, %v13560_v38  ;;  %v10854_v25 = vld [vmem:[%s17209_s3 + $0x6] sm:$0x7] }
0x1417   :  { %v5935_v56 = vrot.slane %v10854_v25, %v17234_v36  ;;  %v5939_v30 = vrot.slane %v10854_v25, %v17235_v34  ;;  %v5943_v23 = vrot.slane %v10854_v25, %v17236_v8 }
0x1418   :  { %v9138_v42 = vmul.f32 %v9137_v11, %v9132_v57 }
0x1419   :  { %v6151_v3 = vadd.f32 %v17245_v45, %v5943_v23 }
0x141a   :  { %v16920_v35 = vadd.f32 %v13560_v38, %v9138_v42 }
0x141c   :  { %v9143_v18 = vpack.c.bf16 %v16920_v35, %v16920_v35 }
0x141e   :  { %9177 = vmatmul.mubr.bf16.vlgmr.msra.gmra.mrb[88].mxu0 %v9143_v18  ;;  %12611 = vmatmul.mubr.bf16.vlgmr.msra.gmra.mrb[144].mxu1 %v9143_v18 }
0x141f   :  { %9247 = vmatpush1.bf16.msra.mxu0 %v16673_v4  ;;  %12615 = vmatpush3.bf16.msra.mxu1 %v16678_v29 }
0x1420   :  { %9248 = vmatprep.subr.bf16.mxu0 %v16683_v62  ;;  %12616 = vmatprep.subr.bf16.mxu1 %v17231_v52 }
0x1421   :  { %9278 = vmatprep.mubr.bf16.mxu0 %v17232_v13  ;;  %12630 = vmatprep.mubr.msk.bf16.mxu1 %vm13633_vm0, %v17231_v52 }
0x1423   :  { %9249 = vmatpush1.bf16.msra.mxu0 %v16689_v51  ;;  %12617 = vmatpush3.bf16.msra.mxu1 %v16695_v26 }
0x1424   :  { %9250 = vmatprep.subr.bf16.mxu0 %v16701_v31  ;;  %12618 = vmatprep.subr.bf16.mxu1 %v17231_v52 }
0x1427   :  { %9251 = vmatpush1.bf16.msra.mxu0 %v16711_v49  ;;  %12619 = vmatpush3.bf16.msra.mxu1 %v16717_v59 }
0x1428   :  { %9252 = vmatprep.subr.bf16.mxu0 %v16723_v54  ;;  %12620 = vmatprep.subr.bf16.mxu1 %v17231_v52 }
0x142b   :  { %9253 = vmatpush1.bf16.msra.mxu0 %v16730_v14  ;;  %12621 = vmatpush3.bf16.msra.mxu1 %v16736_v2 }
0x142c   :  { %9254 = vmatprep.subr.bf16.mxu0 %v16742_v12  ;;  %12622 = vmatprep.subr.bf16.mxu1 %v17231_v52 }
0x142f   :  { %9255 = vmatpush1.bf16.msra.mxu0 %v16749_v37  ;;  %12623 = vmatpush3.bf16.msra.mxu1 %v16755_v55 }
0x1430   :  { %9256 = vmatprep.subr.bf16.mxu0 %v16761_v48  ;;  %12624 = vmatprep.subr.bf16.mxu1 %v17231_v52 }
0x1433   :  { %9257 = vmatpush1.bf16.msra.mxu0 %v16768_v46  ;;  %12625 = vmatpush3.bf16.msra.mxu1 %v16774_v19 }
0x1434   :  { %9258 = vmatprep.subr.bf16.mxu0 %v16780_v20  ;;  %12626 = vmatprep.subr.bf16.mxu1 %v17231_v52 }
0x1437   :  { %9259 = vmatpush1.bf16.msra.mxu0 %v16787_v9  ;;  %12627 = vmatpush3.bf16.msra.mxu1 %v16793_v24 }
0x1438   :  { %9260 = vmatprep.subr.bf16.mxu0 %v16799_v1  ;;  %12628 = vmatprep.subr.bf16.mxu1 %v17231_v52 }
0x143b   :  { %9261 = vmatpush1.bf16.msra.mxu0 %v16806_v63  ;;  %12629 = vmatpush3.bf16.msra.mxu1 %v16812_v32 }
0x143c   :  { %9348 = vmatprep.subr.bf16.mxu0 %v16655_v60  ;;  %12634 = vmatprep.subr.bf16.mxu1 %v17231_v52 }
0x14f1   :  { %v9178_v22 = vpop.f32.mrb[88].mxu0  ;;  %v9219_v61 = vpop.f32.mrb[144].mxu1 }
0x14f2   :  { %v12754_v15 = vadd.f32 %v9178_v22, %v5935_v56  ;;  %v9180_v16 = vpop.f32.mrb[89].mxu0  ;;  %v12612_v5 = vpop.f32.mrb[145].mxu1  ;;  %v9235_v28 = vadd.f32 %v16867_v50, %v9219_v61 }
0x14f3   :  { %v9182_v27 = vpop.f32.mrb[90].mxu0  ;;  %v9222_v17 = vpop.f32.mrb[146].mxu1  ;;  %v12755_v6 = vadd.f32 %v9180_v16, %v5939_v30 }
0x14f4   :  { %v9226_v43 = vmul.f32 0.5, %v12754_v15  ;;  %v9183_v39 = vpop.f32.mrb[91].mxu0  ;;  %v12613_v7 = vpop.f32.mrb[147].mxu1 }
0x14f5   :  { %v9231_v40 = vmul.f32 0.5, %v12755_v6 }
0x14f6   :  { %13561 = vtanh.f32 %v9226_v43 }
0x14f7   :  { %13563 = vtanh.f32 %v9231_v40 }
0x1500   :  { %v13562_v33 = vpop.eup %13561 }
0x1501   :  { %v9228_v58 = vmul.f32 0.5, %v13562_v33  ;;  %v13564_v57 = vpop.eup %13563 }
0x1502   :  { %v9233_v11 = vmul.f32 0.5, %v13564_v57 }
0x1503   :  { %v9229_v44 = vadd.f32 0.5, %v9228_v58 }
0x1504   :  { %v9234_v18 = vadd.f32 0.5, %v9233_v11 }
0x1505   :  { %v9236_v0 = vmul.f32 %v9235_v28, %v9229_v44 }
0x1507   :  { %v9237_v38 = vadd.f32 %v9236_v0, %v6151_v3 }
0x1509   :  { %13565 = vtanh.f32 %v9237_v38 }
0x1513   :  { %v13566_v42 = vpop.eup %13565 }
0x1514   :  { %v9239_v56 = vsub.f32 %v16920_v35, %v13566_v42  ;;  %v10967_v35 = vld [vmem:[%s17209_s3 + $0x6] sm:$0x7] }
0x1515   :  { %v6458_v61 = vrot.slane %v10967_v35, %v17234_v36  ;;  %v6462_v33 = vrot.slane %v10967_v35, %v17235_v34  ;;  %v6466_v28 = vrot.slane %v10967_v35, %v17236_v8 }
0x1516   :  { %v9240_v22 = vmul.f32 %v9239_v56, %v9234_v18 }
0x1517   :  { %v6674_v38 = vadd.f32 %v16138_v10, %v6466_v28  ;;  %v11080_v10 = vld [vmem:[%s17209_s3 + $0x6] sm:$0x7] }
0x1518   :  { %v16968_v15 = vadd.f32 %v13566_v42, %v9240_v22 }
0x151a   :  { %v9245_v25 = vpack.c.bf16 %v16968_v15, %v16968_v15 }
0x151c   :  { %9279 = vmatmul.mubr.bf16.vlgmr.msra.gmra.mrb[92].mxu0 %v9245_v25  ;;  %12631 = vmatmul.mubr.bf16.vlgmr.msra.gmra.mrb[148].mxu1 %v9245_v25 }
0x151d   :  { %9349 = vmatpush1.bf16.msra.mxu0 %v16673_v4  ;;  %12635 = vmatpush3.bf16.msra.mxu1 %v16678_v29 }
0x151e   :  { %9350 = vmatprep.subr.bf16.mxu0 %v16683_v62  ;;  %12636 = vmatprep.subr.bf16.mxu1 %v17231_v52 }
0x151f   :  { %9380 = vmatprep.mubr.bf16.mxu0 %v17232_v13  ;;  %12650 = vmatprep.mubr.msk.bf16.mxu1 %vm13633_vm0, %v17231_v52 }
0x1521   :  { %9351 = vmatpush1.bf16.msra.mxu0 %v16689_v51  ;;  %12637 = vmatpush3.bf16.msra.mxu1 %v16695_v26 }
0x1522   :  { %9352 = vmatprep.subr.bf16.mxu0 %v16701_v31  ;;  %12638 = vmatprep.subr.bf16.mxu1 %v17231_v52 }
0x1525   :  { %9353 = vmatpush1.bf16.msra.mxu0 %v16711_v49  ;;  %12639 = vmatpush3.bf16.msra.mxu1 %v16717_v59 }
0x1526   :  { %9354 = vmatprep.subr.bf16.mxu0 %v16723_v54  ;;  %12640 = vmatprep.subr.bf16.mxu1 %v17231_v52 }
0x1529   :  { %9355 = vmatpush1.bf16.msra.mxu0 %v16730_v14  ;;  %12641 = vmatpush3.bf16.msra.mxu1 %v16736_v2 }
0x152a   :  { %9356 = vmatprep.subr.bf16.mxu0 %v16742_v12  ;;  %12642 = vmatprep.subr.bf16.mxu1 %v17231_v52 }
0x152d   :  { %9357 = vmatpush1.bf16.msra.mxu0 %v16749_v37  ;;  %12643 = vmatpush3.bf16.msra.mxu1 %v16755_v55 }
0x152e   :  { %9358 = vmatprep.subr.bf16.mxu0 %v16761_v48  ;;  %12644 = vmatprep.subr.bf16.mxu1 %v17231_v52 }
0x1531   :  { %9359 = vmatpush1.bf16.msra.mxu0 %v16768_v46  ;;  %12645 = vmatpush3.bf16.msra.mxu1 %v16774_v19 }
0x1532   :  { %9360 = vmatprep.subr.bf16.mxu0 %v16780_v20  ;;  %12646 = vmatprep.subr.bf16.mxu1 %v17231_v52 }
0x1535   :  { %9361 = vmatpush1.bf16.msra.mxu0 %v16787_v9  ;;  %12647 = vmatpush3.bf16.msra.mxu1 %v16793_v24 }
0x1536   :  { %9362 = vmatprep.subr.bf16.mxu0 %v16799_v1  ;;  %12648 = vmatprep.subr.bf16.mxu1 %v17231_v52 }
0x1539   :  { %9363 = vmatpush1.bf16.msra.mxu0 %v16806_v63  ;;  %12649 = vmatpush3.bf16.msra.mxu1 %v16812_v32 }
0x153a   :  { %9450 = vmatprep.subr.bf16.mxu0 %v16655_v60  ;;  %12654 = vmatprep.subr.bf16.mxu1 %v17231_v52 }
0x15ef   :  { %v9280_v16 = vpop.f32.mrb[92].mxu0  ;;  %v9321_v5 = vpop.f32.mrb[148].mxu1 }
0x15f0   :  { %v12756_v27 = vadd.f32 %v9280_v16, %v6458_v61  ;;  %v9282_v17 = vpop.f32.mrb[93].mxu0  ;;  %v12632_v43 = vpop.f32.mrb[149].mxu1  ;;  %v9337_v0 = vadd.f32 %v16867_v50, %v9321_v5 }
0x15f1   :  { %v9284_v39 = vpop.f32.mrb[94].mxu0  ;;  %v9324_v7 = vpop.f32.mrb[150].mxu1  ;;  %v12757_v23 = vadd.f32 %v9282_v17, %v6462_v33 }
0x15f2   :  { %v9328_v30 = vmul.f32 0.5, %v12756_v27  ;;  %v9285_v6 = vpop.f32.mrb[95].mxu0  ;;  %v12633_v40 = vpop.f32.mrb[151].mxu1 }
0x15f3   :  { %v9333_v58 = vmul.f32 0.5, %v12757_v23  ;;  %v6985_v23 = vrot.slane %v11080_v10, %v17235_v34 }
0x15f4   :  { %13567 = vtanh.f32 %v9328_v30 }
0x15f5   :  { %13569 = vtanh.f32 %v9333_v58 }
0x15fe   :  { %v13568_v44 = vpop.eup %13567 }
0x15ff   :  { %v9330_v45 = vmul.f32 0.5, %v13568_v44  ;;  %v13570_v42 = vpop.eup %13569 }
0x1600   :  { %v9335_v18 = vmul.f32 0.5, %v13570_v42 }
0x1601   :  { %v9331_v3 = vadd.f32 0.5, %v9330_v45  ;;  %v6989_v45 = vrot.slane %v11080_v10, %v17236_v8 }
0x1602   :  { %v9336_v22 = vadd.f32 0.5, %v9335_v18 }
0x1603   :  { %v9338_v57 = vmul.f32 %v9337_v0, %v9331_v3 }
0x1605   :  { %v9339_v11 = vadd.f32 %v9338_v57, %v6674_v38  ;;  %v7197_v57 = vadd.f32 %v16265_v53, %v6989_v45  ;;  %v11193_v53 = vld [vmem:[%s17209_s3 + $0x6] sm:$0x7] }
0x1607   :  { %13571 = vtanh.f32 %v9339_v11 }
0x1611   :  { %v13572_v56 = vpop.eup %13571 }
0x1612   :  { %v9341_v25 = vsub.f32 %v16968_v15, %v13572_v56  ;;  %v6981_v15 = vrot.slane %v11080_v10, %v17234_v36 }
0x1614   :  { %v9342_v61 = vmul.f32 %v9341_v25, %v9336_v22 }
0x1616   :  { %v17016_v16 = vadd.f32 %v13572_v56, %v9342_v61 }
0x1618   :  { %v9347_v35 = vpack.c.bf16 %v17016_v16, %v17016_v16 }
0x161a   :  { %9381 = vmatmul.mubr.bf16.vlgmr.msra.gmra.mrb[96].mxu0 %v9347_v35  ;;  %12651 = vmatmul.mubr.bf16.vlgmr.msra.gmra.mrb[152].mxu1 %v9347_v35 }
0x161b   :  { %9451 = vmatpush1.bf16.msra.mxu0 %v16673_v4  ;;  %12655 = vmatpush3.bf16.msra.mxu1 %v16678_v29 }
0x161c   :  { %9452 = vmatprep.subr.bf16.mxu0 %v16683_v62  ;;  %12656 = vmatprep.subr.bf16.mxu1 %v17231_v52 }
0x161d   :  { %9482 = vmatprep.mubr.bf16.mxu0 %v17232_v13  ;;  %12670 = vmatprep.mubr.msk.bf16.mxu1 %vm13633_vm0, %v17231_v52 }
0x161f   :  { %9453 = vmatpush1.bf16.msra.mxu0 %v16689_v51  ;;  %12657 = vmatpush3.bf16.msra.mxu1 %v16695_v26 }
0x1620   :  { %9454 = vmatprep.subr.bf16.mxu0 %v16701_v31  ;;  %12658 = vmatprep.subr.bf16.mxu1 %v17231_v52 }
0x1623   :  { %9455 = vmatpush1.bf16.msra.mxu0 %v16711_v49  ;;  %12659 = vmatpush3.bf16.msra.mxu1 %v16717_v59 }
0x1624   :  { %9456 = vmatprep.subr.bf16.mxu0 %v16723_v54  ;;  %12660 = vmatprep.subr.bf16.mxu1 %v17231_v52 }
0x1627   :  { %9457 = vmatpush1.bf16.msra.mxu0 %v16730_v14  ;;  %12661 = vmatpush3.bf16.msra.mxu1 %v16736_v2 }
0x1628   :  { %9458 = vmatprep.subr.bf16.mxu0 %v16742_v12  ;;  %12662 = vmatprep.subr.bf16.mxu1 %v17231_v52 }
0x162b   :  { %9459 = vmatpush1.bf16.msra.mxu0 %v16749_v37  ;;  %12663 = vmatpush3.bf16.msra.mxu1 %v16755_v55 }
0x162c   :  { %9460 = vmatprep.subr.bf16.mxu0 %v16761_v48  ;;  %12664 = vmatprep.subr.bf16.mxu1 %v17231_v52 }
0x162f   :  { %9461 = vmatpush1.bf16.msra.mxu0 %v16768_v46  ;;  %12665 = vmatpush3.bf16.msra.mxu1 %v16774_v19 }
0x1630   :  { %9462 = vmatprep.subr.bf16.mxu0 %v16780_v20  ;;  %12666 = vmatprep.subr.bf16.mxu1 %v17231_v52 }
0x1633   :  { %9463 = vmatpush1.bf16.msra.mxu0 %v16787_v9  ;;  %12667 = vmatpush3.bf16.msra.mxu1 %v16793_v24 }
0x1634   :  { %9464 = vmatprep.subr.bf16.mxu0 %v16799_v1  ;;  %12668 = vmatprep.subr.bf16.mxu1 %v17231_v52 }
0x1637   :  { %9465 = vmatpush1.bf16.msra.mxu0 %v16806_v63  ;;  %12669 = vmatpush3.bf16.msra.mxu1 %v16812_v32 }
0x1638   :  { %9552 = vmatprep.subr.bf16.mxu0 %v16655_v60  ;;  %12674 = vmatprep.subr.bf16.mxu1 %v17231_v52 }
0x16ed   :  { %v9382_v5 = vpop.f32.mrb[96].mxu0  ;;  %v9423_v27 = vpop.f32.mrb[152].mxu1 }
0x16ee   :  { %v12758_v17 = vadd.f32 %v9382_v5, %v6981_v15  ;;  %v9384_v43 = vpop.f32.mrb[97].mxu0  ;;  %v12652_v39 = vpop.f32.mrb[153].mxu1  ;;  %v9439_v38 = vadd.f32 %v16867_v50, %v9423_v27 }
0x16ef   :  { %v9386_v7 = vpop.f32.mrb[98].mxu0  ;;  %v9426_v30 = vpop.f32.mrb[154].mxu1  ;;  %v12759_v58 = vadd.f32 %v9384_v43, %v6985_v23 }
0x16f0   :  { %v9430_v6 = vmul.f32 0.5, %v12758_v17  ;;  %v9387_v40 = vpop.f32.mrb[99].mxu0  ;;  %v12653_v33 = vpop.f32.mrb[155].mxu1 }
0x16f1   :  { %v9435_v44 = vmul.f32 0.5, %v12759_v58 }
0x16f2   :  { %13573 = vtanh.f32 %v9430_v6 }
0x16f3   :  { %13575 = vtanh.f32 %v9435_v44 }
0x16fc   :  { %v13574_v28 = vpop.eup %13573 }
0x16fd   :  { %v9432_v3 = vmul.f32 0.5, %v13574_v28  ;;  %v13576_v18 = vpop.eup %13575  ;;  %v7512_v28 = vrot.slane %v11193_v53, %v17236_v8 }
0x16fe   :  { %v9437_v56 = vmul.f32 0.5, %v13576_v18 }
0x16ff   :  { %v9433_v0 = vadd.f32 0.5, %v9432_v3 }
0x1700   :  { %v9438_v25 = vadd.f32 0.5, %v9437_v56 }
0x1701   :  { %v9440_v11 = vmul.f32 %v9439_v38, %v9433_v0  ;;  %v7720_v38 = vadd.f32 %v16537_v21, %v7512_v28 }
0x1703   :  { %v9441_v42 = vadd.f32 %v9440_v11, %v7197_v57 }
0x1705   :  { %13577 = vtanh.f32 %v9441_v42 }
0x170f   :  { %v13578_v22 = vpop.eup %13577 }
0x1710   :  { %v9443_v61 = vsub.f32 %v17016_v16, %v13578_v22  ;;  %v7504_v16 = vrot.slane %v11193_v53, %v17234_v36 }
0x1712   :  { %v9444_v35 = vmul.f32 %v9443_v61, %v9438_v25 }
0x1714   :  { %v17064_v15 = vadd.f32 %v13578_v22, %v9444_v35 }
0x1716   :  { %v9449_v10 = vpack.c.bf16 %v17064_v15, %v17064_v15 }
0x1718   :  { %9483 = vmatmul.mubr.bf16.vlgmr.msra.gmra.mrb[100].mxu0 %v9449_v10  ;;  %12671 = vmatmul.mubr.bf16.vlgmr.msra.gmra.mrb[156].mxu1 %v9449_v10 }
0x1719   :  { %9553 = vmatpush1.bf16.msra.mxu0 %v16673_v4  ;;  %12675 = vmatpush3.bf16.msra.mxu1 %v16678_v29 }
0x171a   :  { %9554 = vmatprep.subr.bf16.mxu0 %v16683_v62  ;;  %12676 = vmatprep.subr.bf16.mxu1 %v17231_v52 }
0x171b   :  { %9584 = vmatprep.mubr.bf16.mxu0 %v17232_v13  ;;  %12690 = vmatprep.mubr.msk.bf16.mxu1 %vm13633_vm0, %v17231_v52 }
0x171d   :  { %9555 = vmatpush1.bf16.msra.mxu0 %v16689_v51  ;;  %12677 = vmatpush3.bf16.msra.mxu1 %v16695_v26 }
0x171e   :  { %9556 = vmatprep.subr.bf16.mxu0 %v16701_v31  ;;  %12678 = vmatprep.subr.bf16.mxu1 %v17231_v52 }
0x1721   :  { %9557 = vmatpush1.bf16.msra.mxu0 %v16711_v49  ;;  %12679 = vmatpush3.bf16.msra.mxu1 %v16717_v59 }
0x1722   :  { %9558 = vmatprep.subr.bf16.mxu0 %v16723_v54  ;;  %12680 = vmatprep.subr.bf16.mxu1 %v17231_v52 }
0x1725   :  { %9559 = vmatpush1.bf16.msra.mxu0 %v16730_v14  ;;  %12681 = vmatpush3.bf16.msra.mxu1 %v16736_v2 }
0x1726   :  { %9560 = vmatprep.subr.bf16.mxu0 %v16742_v12  ;;  %12682 = vmatprep.subr.bf16.mxu1 %v17231_v52 }
0x1729   :  { %9561 = vmatpush1.bf16.msra.mxu0 %v16749_v37  ;;  %12683 = vmatpush3.bf16.msra.mxu1 %v16755_v55 }
0x172a   :  { %9562 = vmatprep.subr.bf16.mxu0 %v16761_v48  ;;  %12684 = vmatprep.subr.bf16.mxu1 %v17231_v52 }
0x172d   :  { %9563 = vmatpush1.bf16.msra.mxu0 %v16768_v46  ;;  %12685 = vmatpush3.bf16.msra.mxu1 %v16774_v19 }
0x172e   :  { %9564 = vmatprep.subr.bf16.mxu0 %v16780_v20  ;;  %12686 = vmatprep.subr.bf16.mxu1 %v17231_v52 }
0x1731   :  { %9565 = vmatpush1.bf16.msra.mxu0 %v16787_v9  ;;  %12687 = vmatpush3.bf16.msra.mxu1 %v16793_v24 }
0x1732   :  { %9566 = vmatprep.subr.bf16.mxu0 %v16799_v1  ;;  %12688 = vmatprep.subr.bf16.mxu1 %v17231_v52 }
0x1735   :  { %9567 = vmatpush1.bf16.msra.mxu0 %v16806_v63  ;;  %12689 = vmatpush3.bf16.msra.mxu1 %v16812_v32 }
0x1736   :  { %9654 = vmatprep.subr.bf16.mxu0 %v16655_v60  ;;  %12694 = vmatprep.subr.bf16.mxu1 %v17231_v52  ;;  %v7508_v60 = vrot.slane %v11193_v53, %v17235_v34 }
0x17eb   :  { %v9484_v5 = vpop.f32.mrb[100].mxu0  ;;  %v9525_v27 = vpop.f32.mrb[156].mxu1 }
0x17ec   :  { %v12760_v17 = vadd.f32 %v9484_v5, %v7504_v16  ;;  %v9486_v43 = vpop.f32.mrb[101].mxu0  ;;  %v12672_v39 = vpop.f32.mrb[157].mxu1  ;;  %v9541_v0 = vadd.f32 %v16867_v50, %v9525_v27 }
0x17ed   :  { %v9488_v7 = vpop.f32.mrb[102].mxu0  ;;  %v9528_v30 = vpop.f32.mrb[158].mxu1  ;;  %v12761_v23 = vadd.f32 %v9486_v43, %v7508_v60  ;;  %v13446_v43 = vld [vmem:[%s17211_s5 + $0x8] sm:$0xff]   ;;  %v13447_v39 = vld [vmem:[%s17211_s5 + $0x10] sm:$0xff]  }
0x17ee   :  { %v9532_v6 = vmul.f32 0.5, %v12760_v17  ;;  %v9489_v40 = vpop.f32.mrb[103].mxu0  ;;  %v12673_v33 = vpop.f32.mrb[159].mxu1  ;;  %v13448_v7 = vld [vmem:[%s17211_s5 + $0x18] sm:$0xff]   ;;  %v13449_v30 = vld [vmem:[%s17211_s5 + $0x20] sm:$0xff]  }
0x17ef   :  { %v9537_v58 = vmul.f32 0.5, %v12761_v23  ;;  %v13451_v40 = vld [vmem:[%s17211_s5 + $0x30] sm:$0xff]   ;;  %v13452_v33 = vld [vmem:[%s17211_s5 + $0x38] sm:$0xff]   ;;  %v11419_v60 = vld [vmem:[%s17209_s3 + $0x6] sm:$0x7] }
0x17f0   :  { %13579 = vtanh.f32 %v9532_v6  ;;  %v13450_v6 = vld [vmem:[%s17211_s5 + $0x28] sm:$0xff]   ;;  %v8550_v23 = vrot.slane %v11419_v60, %v17234_v36 }
0x17f1   :  { %13581 = vtanh.f32 %v9537_v58 }
0x17fa   :  { %v13580_v44 = vpop.eup %13579 }
0x17fb   :  { %v9534_v45 = vmul.f32 0.5, %v13580_v44  ;;  %v13582_v42 = vpop.eup %13581 }
0x17fc   :  { %v9539_v18 = vmul.f32 0.5, %v13582_v42  ;;  %v8554_v42 = vrot.slane %v11419_v60, %v17235_v34 }
0x17fd   :  { %v9535_v3 = vadd.f32 0.5, %v9534_v45 }
0x17fe   :  { %v9540_v22 = vadd.f32 0.5, %v9539_v18 }
0x17ff   :  { %v9542_v57 = vmul.f32 %v9541_v0, %v9535_v3 }
0x1801   :  { %v9543_v11 = vadd.f32 %v9542_v57, %v7720_v38 }
0x1803   :  { %13583 = vtanh.f32 %v9543_v11 }
0x180d   :  { %v13584_v56 = vpop.eup %13583 }
0x180e   :  { %v9545_v25 = vsub.f32 %v17064_v15, %v13584_v56 }
0x1810   :  { %v9546_v61 = vmul.f32 %v9545_v25, %v9540_v22  ;;  %v8558_v25 = vrot.slane %v11419_v60, %v17236_v8 }
0x1812   :  { %v17112_v35 = vadd.f32 %v13584_v56, %v9546_v61 }
0x1814   :  { %v9551_v10 = vpack.c.bf16 %v17112_v35, %v17112_v35 }
0x1816   :  { %9585 = vmatmul.mubr.bf16.vlgmr.msra.gmra.mrb[104].mxu0 %v9551_v10  ;;  %12691 = vmatmul.mubr.bf16.vlgmr.msra.gmra.mrb[160].mxu1 %v9551_v10  ;;  %v8766_v10 = vadd.f32 %v16857_v41, %v8558_v25 }
0x1817   :  { %9655 = vmatpush1.bf16.msra.mxu0 %v16673_v4  ;;  %12695 = vmatpush3.bf16.msra.mxu1 %v16678_v29 }
0x1818   :  { %9656 = vmatprep.subr.bf16.mxu0 %v16683_v62  ;;  %12696 = vmatprep.subr.bf16.mxu1 %v17231_v52 }
0x1819   :  { %9686 = vmatprep.mubr.bf16.mxu0 %v17232_v13  ;;  %12710 = vmatprep.mubr.msk.bf16.mxu1 %vm13633_vm0, %v17231_v52  ;;  %v11306_v13 = vld [vmem:[%s17209_s3 + $0x6] sm:$0x7] }
0x181a   :  { %v8027_v21 = vrot.slane %v11306_v13, %v17234_v36 }
0x181b   :  { %9657 = vmatpush1.bf16.msra.mxu0 %v16689_v51  ;;  %12697 = vmatpush3.bf16.msra.mxu1 %v16695_v26 }
0x181c   :  { %9658 = vmatprep.subr.bf16.mxu0 %v16701_v31  ;;  %12698 = vmatprep.subr.bf16.mxu1 %v17231_v52 }
0x181f   :  { %9659 = vmatpush1.bf16.msra.mxu0 %v16711_v49  ;;  %12699 = vmatpush3.bf16.msra.mxu1 %v16717_v59 }
0x1820   :  { %9660 = vmatprep.subr.bf16.mxu0 %v16723_v54  ;;  %12700 = vmatprep.subr.bf16.mxu1 %v17231_v52 }
0x1823   :  { %9661 = vmatpush1.bf16.msra.mxu0 %v16730_v14  ;;  %12701 = vmatpush3.bf16.msra.mxu1 %v16736_v2  ;;  %v8031_v2 = vrot.slane %v11306_v13, %v17235_v34 }
0x1824   :  { %9662 = vmatprep.subr.bf16.mxu0 %v16742_v12  ;;  %12702 = vmatprep.subr.bf16.mxu1 %v17231_v52 }
0x1827   :  { %9663 = vmatpush1.bf16.msra.mxu0 %v16749_v37  ;;  %12703 = vmatpush3.bf16.msra.mxu1 %v16755_v55 }
0x1828   :  { %9664 = vmatprep.subr.bf16.mxu0 %v16761_v48  ;;  %12704 = vmatprep.subr.bf16.mxu1 %v17231_v52  ;;  %v8035_v48 = vrot.slane %v11306_v13, %v17236_v8  ;;  %v9769_v8 = vld [vmem:[%s17212_s6] sm:$0xff] }
0x182b   :  { %9665 = vmatpush1.bf16.msra.mxu0 %v16768_v46  ;;  %12705 = vmatpush3.bf16.msra.mxu1 %v16774_v19 }
0x182c   :  { %9666 = vmatprep.subr.bf16.mxu0 %v16780_v20  ;;  %12706 = vmatprep.subr.bf16.mxu1 %v17231_v52 }
0x182f   :  { %9667 = vmatpush1.bf16.msra.mxu0 %v16787_v9  ;;  %12707 = vmatpush3.bf16.msra.mxu1 %v16793_v24  ;;  %v8243_v9 = vadd.f32 %v16659_v47, %v8035_v48  ;;  %v13445_v47 = vld [vmem:[%s17211_s5] sm:$0xff]  }
0x1830   :  { %9668 = vmatprep.subr.bf16.mxu0 %v16799_v1  ;;  %12708 = vmatprep.subr.bf16.mxu1 %v17231_v52 }
0x1833   :  { %9669 = vmatpush1.bf16.msra.mxu0 %v16806_v63  ;;  %12709 = vmatpush3.bf16.msra.mxu1 %v16812_v32 }
0x1834   :  { %12714 = vmatprep.subr.bf16.mxu0 %v17231_v52 }
0x18e9   :  { %v9586_v4 = vpop.f32.mrb[104].mxu0  ;;  %v9627_v29 = vpop.f32.mrb[160].mxu1 }
0x18ea   :  { %v12762_v62 = vadd.f32 %v9586_v4, %v8027_v21  ;;  %v9588_v51 = vpop.f32.mrb[105].mxu0  ;;  %v12692_v26 = vpop.f32.mrb[161].mxu1  ;;  %v9643_v20 = vadd.f32 %v16867_v50, %v9627_v29 }
0x18eb   :  { %v9590_v31 = vpop.f32.mrb[106].mxu0  ;;  %v9630_v49 = vpop.f32.mrb[162].mxu1  ;;  %v12763_v12 = vadd.f32 %v9588_v51, %v8031_v2 }
0x18ec   :  { %v9634_v59 = vmul.f32 0.5, %v12762_v62  ;;  %v9591_v54 = vpop.f32.mrb[107].mxu0  ;;  %v12693_v14 = vpop.f32.mrb[163].mxu1 }
0x18ed   :  { %v9639_v37 = vmul.f32 0.5, %v12763_v12 }
0x18ee   :  { %13585 = vtanh.f32 %v9634_v59 }
0x18ef   :  { %13587 = vtanh.f32 %v9639_v37 }
0x18f8   :  { %v13586_v55 = vpop.eup %13585 }
0x18f9   :  { %v9636_v46 = vmul.f32 0.5, %v13586_v55  ;;  %v13588_v63 = vpop.eup %13587 }
0x18fa   :  { %v9641_v32 = vmul.f32 0.5, %v13588_v63 }
0x18fb   :  { %v9637_v19 = vadd.f32 0.5, %v9636_v46 }
0x18fc   :  { %v9642_v53 = vadd.f32 0.5, %v9641_v32 }
0x18fd   :  { %v9644_v24 = vmul.f32 %v9643_v20, %v9637_v19 }
0x18ff   :  { %v9645_v1 = vadd.f32 %v9644_v24, %v8243_v9 }
0x1901   :  { %13589 = vtanh.f32 %v9645_v1 }
0x190b   :  { %v13590_v15 = vpop.eup %13589 }
0x190c   :  { %v9647_v16 = vsub.f32 %v17112_v35, %v13590_v15 }
0x190e   :  { %v9648_v5 = vmul.f32 %v9647_v16, %v9642_v53 }
0x1910   :  { %v9649_v27 = vadd.f32 %v13590_v15, %v9648_v5 }
0x1912   :  { %v9653_v17 = vpack.c.bf16 %v9649_v27, %v9649_v27 }
0x1914   :  { %9687 = vmatmul.mubr.bf16.vlgmr.msra.gmra.mrb[108].mxu0 %v9653_v17  ;;  %12711 = vmatmul.mubr.bf16.vlgmr.msra.gmra.mrb[164].mxu1 %v9653_v17 }
0x1915   :  { %12730 = vmatprep.mubr.msk.bf16.mxu0 %vm13633_vm0, %v17231_v52  ;;  %12715 = vmatpush3.bf16.msra.mxu0 %v13445_v47 }
0x1916   :  { %12716 = vmatprep.subr.bf16.mxu0 %v17231_v52 }
0x1919   :  { %12717 = vmatpush3.bf16.msra.mxu0 %v13446_v43 }
0x191a   :  { %12718 = vmatprep.subr.bf16.mxu0 %v17231_v52 }
0x191d   :  { %12719 = vmatpush3.bf16.msra.mxu0 %v13447_v39 }
0x191e   :  { %12720 = vmatprep.subr.bf16.mxu0 %v17231_v52 }
0x1921   :  { %12721 = vmatpush3.bf16.msra.mxu0 %v13448_v7 }
0x1922   :  { %12722 = vmatprep.subr.bf16.mxu0 %v17231_v52 }
0x1925   :  { %12723 = vmatpush3.bf16.msra.mxu0 %v13449_v30 }
0x1926   :  { %12724 = vmatprep.subr.bf16.mxu0 %v17231_v52 }
0x1929   :  { %12725 = vmatpush3.bf16.msra.mxu0 %v13450_v6 }
0x192a   :  { %12726 = vmatprep.subr.bf16.mxu0 %v17231_v52 }
0x192d   :  { %12727 = vmatpush3.bf16.msra.mxu0 %v13451_v40 }
0x192e   :  { %12728 = vmatprep.subr.bf16.mxu0 %v17231_v52 }
0x1931   :  { %12729 = vmatpush3.bf16.msra.mxu0 %v13452_v33 }
0x19e7   :  { %v9688_v58 = vpop.f32.mrb[108].mxu0  ;;  %v9729_v44 = vpop.f32.mrb[164].mxu1 }
0x19e8   :  { %v12764_v28 = vadd.f32 %v9688_v58, %v8550_v23  ;;  %v9690_v45 = vpop.f32.mrb[109].mxu0  ;;  %v12712_v3 = vpop.f32.mrb[165].mxu1  ;;  %v9745_v35 = vadd.f32 %v16867_v50, %v9729_v44 }
0x19e9   :  { %v9692_v0 = vpop.f32.mrb[110].mxu0  ;;  %v9732_v38 = vpop.f32.mrb[166].mxu1  ;;  %v12765_v18 = vadd.f32 %v9690_v45, %v8554_v42 }
0x19ea   :  { %v9736_v57 = vmul.f32 0.5, %v12764_v28  ;;  %v9693_v52 = vpop.f32.mrb[111].mxu0  ;;  %v12713_v11 = vpop.f32.mrb[167].mxu1 }
0x19eb   :  { %v9741_v56 = vmul.f32 0.5, %v12765_v18 }
0x19ec   :  { %13591 = vtanh.f32 %v9736_v57 }
0x19ed   :  { %13593 = vtanh.f32 %v9741_v56 }
0x19f6   :  { %v13592_v22 = vpop.eup %13591 }
0x19f7   :  { %v9738_v61 = vmul.f32 0.5, %v13592_v22  ;;  %v13594_v4 = vpop.eup %13593 }
0x19f8   :  { %v9743_v29 = vmul.f32 0.5, %v13594_v4 }
0x19f9   :  { %v9739_v36 = vadd.f32 0.5, %v9738_v61 }
0x19fa   :  { %v9744_v51 = vadd.f32 0.5, %v9743_v29 }
0x19fb   :  { %v9746_v13 = vmul.f32 %v9745_v35, %v9739_v36 }
0x19fd   :  { %v9747_v21 = vadd.f32 %v9746_v13, %v8766_v10 }
0x19ff   :  { %13595 = vtanh.f32 %v9747_v21 }
0x1a09   :  { %v13596_v62 = vpop.eup %13595 }
0x1a0a   :  { %v9749_v34 = vsub.f32 %v9649_v27, %v13596_v62 }
0x1a0c   :  { %v9750_v26 = vmul.f32 %v9749_v34, %v9744_v51 }
0x1a0e   :  { %v9751_v31 = vadd.f32 %v13596_v62, %v9750_v26 }
0x1a10   :  { %v9752_v49 = vpack.c.bf16 %v9751_v31, %v9751_v31 }
0x1a12   :  { %12731 = vmatmul.mubr.bf16.vlgmr.msra.gmra.mrb[112].mxu0 %v9752_v49 }
0x1ae5   :  { %v9852_v50 = vpop.f32.mrb[112].mxu0 }
0x1ae6   :  { %v9853_v59 = vadd.f32 %v9852_v50, %v9769_v8  ;;  %v12732_v54 = vpop.f32.mrb[113].mxu0 }
0x1ae7   :  { %v9855_v41 = vpop.f32.mrb[114].mxu0 }
0x1ae8   :  { %9858 = vst [vmem:[%s17213_s7] sm:$0xff] %v9853_v59  ;;  %v12733_v14 = vpop.f32.mrb[115].mxu0 }

</bundles_post_ra>
